<compile_context>
chip_gen: v7x
topology: tpu7x:2x2x1
jax: 0.10.0
libtpu: 0.0.40
codegen_flags: <defaults>
</compile_context>

<pallas_src>
import functools

import numpy as np
import jax
import jax.numpy as jnp
from jax import lax
from jax.experimental import pallas as pl
from jax.experimental.pallas import tpu as pltpu

NUM_CLASSES = 7          # len(EmovoDataset.LABEL_DICT) - EMOVO has 7 emotion labels
EPS = 1e-5               # BatchNorm eps (PyTorch default)
POOL_K, POOL_S = 3, 2    # MaxPool1d(kernel_size=3, stride=2)

CONV_CFGS = [
    dict(Cin=2,   Cout=16,  K=11, stride=5),
    dict(Cin=16,  Cout=32,  K=7,  stride=3),
    dict(Cin=32,  Cout=64,  K=3,  stride=2),
    dict(Cin=64,  Cout=128, K=3,  stride=2),
    dict(Cin=128, Cout=256, K=3,  stride=2),
]


def out_size(L, k, s):
    return (L - k) // s + 1


def build_plan(waveform_size):
    """Static per-stage sizes (all plain Python ints)."""
    plan = []
    Lin = waveform_size
    for cfg in CONV_CFGS:
        K, s = cfg["K"], cfg["stride"]
        Lconv = out_size(Lin, K, s)
        Lp = out_size(Lconv, POOL_K, POOL_S)
        assert Lconv >= POOL_K and Lp >= 1, "waveform too short for EmovoCNN"
        s2 = 2 * s
        d_e = (K - 1) // s2
        d_o = (s + K - 1) // s2
        Q = max(d_e + Lp + 1, d_o + Lp)     # columns needed per residue slab
        # Guard: every tap read stays inside the valid part of the previous
        # activation, so zero padding / empty selection columns are never used.
        assert s2 * Lp + (K - 1) <= Lin - 1
        assert s2 * (Lp - 1) + s + (K - 1) <= Lin - 1
        plan.append(dict(K=K, s=s, Cin=cfg["Cin"], Cout=cfg["Cout"],
                         Lconv=Lconv, Lp=Lp, Q=Q, Lin=Lin))
        Lin = Lp
    return plan


def _selection_matrix(Lp_prev, s_next, Q_next):
    """S[t, r*Q + q] = 1 iff t == q*(2*s_next) + r.

    Right-multiplying a pooled activation (C, Lp_prev) by S re-factors it into
    2*s_next contiguous residue slabs of width Q_next (still length-on-lanes)."""
    s2 = 2 * s_next
    S = np.zeros((Lp_prev, s2 * Q_next), np.float32)
    for r in range(s2):
        for q in range(Q_next):
            t = q * s2 + r
            if t < Lp_prev:
                S[t, r * Q_next + q] = 1.0
    return S


# ---------------------------------------------------------------------------
# The single fused Pallas kernel
# ---------------------------------------------------------------------------
def _emovo_fused_kernel(*refs, plan):
    n_st = len(plan)
    x_ref = refs[0]                                   # (1, Cin1, 2*s1*Q1) factored input
    w_refs = refs[1:1 + 2 * n_st:2]                   # (K, Cout, Cin) per stage (BN folded)
    b_refs = refs[2:2 + 2 * n_st:2]                   # (Cout, 1) per stage (BN folded)
    s_refs = refs[1 + 2 * n_st:n_st + 2 * n_st]       # n_st - 1 selection matrices
    wh1_ref, bh1_ref, wh2_ref, bh2_ref = refs[3 * n_st:3 * n_st + 4]
    out_ref = refs[-1]                                # (1, NUM_CLASSES, 1)

    def stage(getcols, w_ref, b_ref, st):
        """Conv1d(K, s) + folded BN + ReLU + MaxPool1d(3, 2) in (Cout, L) layout.

        getcols(r, d, n) returns the (Cin, n) slab whose column j holds the previous
        activation at position (d + j) * 2s + r  (parity-factored input)."""
        K, s, Lp, Cout = st["K"], st["s"], st["Lp"], st["Cout"]
        s2 = 2 * s
        n_e, n_o = Lp + 1, Lp
        acc_e = jnp.zeros((Cout, n_e), jnp.float32)   # conv outputs at even positions
        acc_o = jnp.zeros((Cout, n_o), jnp.float32)   # conv outputs at odd positions
        for k in range(K):                            # static unroll over taps
            wk = w_ref[k]                             # (Cout, Cin)
            acc_e = acc_e + jnp.dot(wk, getcols(k % s2, k // s2, n_e),
                                    preferred_element_type=jnp.float32)
            acc_o = acc_o + jnp.dot(wk, getcols((s + k) % s2, (s + k) // s2, n_o),
                                    preferred_element_type=jnp.float32)
        b = b_ref[...]                                # (Cout, 1), broadcast over lanes
        y_e = jnp.maximum(acc_e + b, 0.0)             # BN folded + ReLU
        y_o = jnp.maximum(acc_o + b, 0.0)
        # MaxPool1d(3, 2): p[:, j] = max(y[2j], y[2j+1], y[2j+2])
        return jnp.maximum(jnp.maximum(y_e[:, :Lp], y_o), y_e[:, 1:Lp + 1])

    # ---- stage 1: read the parity-factored input ref directly (length on lanes)
    st0 = plan[0]
    Q0 = st0["Q"]
    p = stage(lambda r, d, n: x_ref[0, :, r * Q0 + d:r * Q0 + d + n],
              w_refs[0], b_refs[0], st0)

    # ---- stages 2..5: one 0/1 selection matmul re-factors the pooled activation
    # into the residue slabs of the next stride; everything stays in VMEM/vregs.
    for i in range(1, n_st):
        st = plan[i]
        fcat = jnp.dot(p, s_refs[i - 1][...], preferred_element_type=jnp.float32)
        Q = st["Q"]
        p = stage(lambda r, d, n, fcat=fcat, Q=Q: fcat[:, r * Q + d:r * Q + d + n],
                  w_refs[i], b_refs[i], st)           # p: (Cout_i, Lp_i)

    # ---- classifier head: Linear + folded BN + ReLU + Linear + Softmax(dim=1),
    # computed in column-vector form so no transposes are needed.
    h = bh1_ref[...]                                  # (128, 1)
    for l in range(plan[-1]["Lp"]):                   # static (== 1 for waveform 8000)
        h = h + jnp.dot(wh1_ref[l], p[:, l:l + 1],
                        preferred_element_type=jnp.float32)
    h = jnp.maximum(h, 0.0)
    z = jnp.dot(wh2_ref[...], h, preferred_element_type=jnp.float32) + bh2_ref[...]
    z = z - jnp.max(z, axis=0, keepdims=True)
    e = jnp.exp(z)
    out_ref[0] = e / jnp.sum(e, axis=0, keepdims=True)    # (NUM_CLASSES, 1)


# ---------------------------------------------------------------------------
# Wrapper: parameter folding + one pallas_call
# ---------------------------------------------------------------------------
def emovo_cnn_forward(x_ncl, params):
    """x_ncl: (B, 2, waveform_size) -> (B, NUM_CLASSES) softmax probabilities."""
    B, Cin, L = x_ncl.shape
    plan = build_plan(L)
    Lp_final = plan[-1]["Lp"]
    C5 = CONV_CFGS[-1]["Cout"]

    # Parity-factored, lane-dense kernel input:  xcat[b, c, r*Q0 + q] = x[b, c, q*2*s1 + r]
    st0 = plan[0]
    s2_0, Q0 = 2 * st0["s"], st0["Q"]
    tgt = s2_0 * Q0
    x = x_ncl.astype(jnp.float32)
    if tgt > L:
        x = jnp.pad(x, ((0, 0), (0, 0), (0, tgt - L)))     # padded tail is never read
    xcat = (x[:, :, :tgt].reshape(B, Cin, Q0, s2_0)
            .transpose(0, 1, 3, 2).reshape(B, Cin, tgt))

    # Fold inference-mode BatchNorm into conv weights / biases.
    conv_w, conv_b = [], []
    for p in params["conv"]:
        scale = p["gamma"] / jnp.sqrt(p["var"] + EPS)
        shift = p["beta"] - p["mean"] * scale
        conv_w.append(jnp.transpose(p["w"], (2, 0, 1)) * scale[None, :, None])  # (K,Cout,Cin)
        conv_b.append((p["b"] * scale + shift)[:, None])                        # (Cout,1)

    sels = [jnp.asarray(_selection_matrix(plan[i - 1]["Lp"], plan[i]["s"], plan[i]["Q"]))
            for i in range(1, len(plan))]

    # Classifier: fold BN1; permute W1's input dim from PyTorch's channel-major flatten
    # order (c*Lp_final + l) into per-position (l, 128, C5) slabs used by the kernel.
    scale1 = params["bn1_gamma"] / jnp.sqrt(params["bn1_var"] + EPS)
    shift1 = params["bn1_beta"] - params["bn1_mean"] * scale1
    w1 = (params["w1"] * scale1[:, None]).reshape(-1, C5, Lp_final)
    w1 = jnp.transpose(w1, (2, 0, 1))                      # (Lp_final, 128, C5)
    b1 = (params["b1"] * scale1 + shift1)[:, None]         # (128, 1)
    w2 = params["w2"]                                      # (NUM_CLASSES, 128)
    b2 = params["b2"][:, None]                             # (NUM_CLASSES, 1)

    def const_spec(arr):
        nd = arr.ndim
        return pl.BlockSpec(arr.shape, lambda b, nd=nd: (0,) * nd)

    operands = [xcat]
    in_specs = [pl.BlockSpec((1, Cin, tgt), lambda b: (b, 0, 0))]
    for w, bia in zip(conv_w, conv_b):
        operands += [w, bia]
        in_specs += [const_spec(w), const_spec(bia)]
    for S in sels:
        operands.append(S)
        in_specs.append(const_spec(S))
    for arr in (w1, b1, w2, b2):
        operands.append(arr)
        in_specs.append(const_spec(arr))

    out = pl.pallas_call(
        functools.partial(_emovo_fused_kernel, plan=plan),
        out_shape=jax.ShapeDtypeStruct((B, NUM_CLASSES, 1), jnp.float32),
        grid=(B,),
        in_specs=in_specs,
        out_specs=pl.BlockSpec((1, NUM_CLASSES, 1), lambda b: (b, 0, 0)),
        compiler_params=pltpu.CompilerParams(
            dimension_semantics=("parallel",),             # megacore: split batch over TCs
            vmem_limit_bytes=32 * 1024 * 1024),
    )(*operands)
    return out[:, :, 0]


# ---------------------------------------------------------------------------
# Deterministic parameter init + pure-JAX reference (sanity check)
# ---------------------------------------------------------------------------
def init_params(key, waveform_size):
    params = {"conv": []}
    L = waveform_size
    for cfg in CONV_CFGS:
        key, kw, kb, kg, kbe, km, kv = jax.random.split(key, 7)
        fan_in = cfg["Cin"] * cfg["K"]
        params["conv"].append(dict(
            w=jax.random.normal(kw, (cfg["Cout"], cfg["Cin"], cfg["K"]), jnp.float32)
              / np.sqrt(fan_in),
            b=0.05 * jax.random.normal(kb, (cfg["Cout"],), jnp.float32),
            gamma=1.0 + 0.1 * jax.random.normal(kg, (cfg["Cout"],), jnp.float32),
            beta=0.1 * jax.random.normal(kbe, (cfg["Cout"],), jnp.float32),
            mean=0.05 * jax.random.normal(km, (cfg["Cout"],), jnp.float32),
            var=jax.random.uniform(kv, (cfg["Cout"],), jnp.float32, 0.5, 1.5),
        ))
        L = out_size(L, cfg["K"], cfg["stride"])
        L = out_size(L, POOL_K, POOL_S)
    feat_dim = CONV_CFGS[-1]["Cout"] * L
    key, kw1, kb1, kg1, kbe1, km1, kv1, kw2, kb2 = jax.random.split(key, 9)
    params.update(
        w1=jax.random.normal(kw1, (128, feat_dim), jnp.float32) / np.sqrt(feat_dim),
        b1=0.05 * jax.random.normal(kb1, (128,), jnp.float32),
        bn1_gamma=1.0 + 0.1 * jax.random.normal(kg1, (128,), jnp.float32),
        bn1_beta=0.1 * jax.random.normal(kbe1, (128,), jnp.float32),
        bn1_mean=0.05 * jax.random.normal(km1, (128,), jnp.float32),
        bn1_var=jax.random.uniform(kv1, (128,), jnp.float32, 0.5, 1.5),
        w2=jax.random.normal(kw2, (NUM_CLASSES, 128), jnp.float32) / np.sqrt(128),
        b2=0.05 * jax.random.normal(kb2, (NUM_CLASSES,), jnp.float32),
    )
    return params, feat_dim, L


def reference_forward(x_ncl, params):
    h = x_ncl.astype(jnp.float32)
    for cfg, p in zip(CONV_CFGS, params["conv"]):
        h = lax.conv_general_dilated(h, p["w"], (cfg["stride"],), "VALID",
                                     dimension_numbers=("NCH", "OIH", "NCH"))
        h = h + p["b"][None, :, None]
        scale = p["gamma"] / jnp.sqrt(p["var"] + EPS)
        shift = p["beta"] - p["mean"] * scale
        h = jnp.maximum(h * scale[None, :, None] + shift[None, :, None], 0.0)
        h = lax.reduce_window(h, -jnp.inf, lax.max,
                              (1, 1, POOL_K), (1, 1, POOL_S), "VALID")
    feat = h.reshape(h.shape[0], -1)
    z = feat @ params["w1"].T + params["b1"]
    scale1 = params["bn1_gamma"] / jnp.sqrt(params["bn1_var"] + EPS)
    shift1 = params["bn1_beta"] - params["bn1_mean"] * scale1
    z = jnp.maximum(z * scale1 + shift1, 0.0)
    z = z @ params["w2"].T + params["b2"]
    return jax.nn.softmax(z, axis=1)


# ---------------------------------------------------------------------------
if __name__ == "__main__":
    WAVEFORM_SIZE = 8000   # small waveform length that survives all 5 conv+pool stages
    BATCH = 2

    key = jax.random.PRNGKey(0)
    kx, kp = jax.random.split(key)
    x = jax.random.normal(kx, (BATCH, 2, WAVEFORM_SIZE), jnp.float32)  # PyTorch NCL input
    params, feat_dim, L_final = init_params(kp, WAVEFORM_SIZE)

    fwd = jax.jit(emovo_cnn_forward)
    out = jax.block_until_ready(fwd(x, params))
    assert out.shape == (BATCH, NUM_CLASSES), out.shape
    assert bool(jnp.all(jnp.isfinite(out)))
    assert bool(jnp.allclose(jnp.sum(out, axis=1), 1.0, atol=1e-4))  # softmax rows sum to 1

    # Jitted pure-JAX reference (single XLA compile instead of op-by-op dispatch).
    ref = jax.block_until_ready(jax.jit(reference_forward)(x, params))
    np.testing.assert_allclose(np.asarray(out), np.asarray(ref), rtol=5e-2, atol=5e-3)

    print("KERNEL_OK")
</pallas_src>

<mosaic_0001>
module attributes {stable_mosaic.version = 11 : i64} {
  func.func @_emovo_fused_kernel(%arg0: i32, %arg1: memref<1x2x8000xf32, #tpu.memory_space<vmem>>, %arg2: memref<11x16x2xf32, #tpu.memory_space<vmem>>, %arg3: memref<16x1xf32, #tpu.memory_space<vmem>>, %arg4: memref<7x32x16xf32, #tpu.memory_space<vmem>>, %arg5: memref<32x1xf32, #tpu.memory_space<vmem>>, %arg6: memref<3x64x32xf32, #tpu.memory_space<vmem>>, %arg7: memref<64x1xf32, #tpu.memory_space<vmem>>, %arg8: memref<3x128x64xf32, #tpu.memory_space<vmem>>, %arg9: memref<128x1xf32, #tpu.memory_space<vmem>>, %arg10: memref<3x256x128xf32, #tpu.memory_space<vmem>>, %arg11: memref<256x1xf32, #tpu.memory_space<vmem>>, %arg12: memref<798x798xf32, #tpu.memory_space<vmem>>, %arg13: memref<131x132xf32, #tpu.memory_space<vmem>>, %arg14: memref<32x32xf32, #tpu.memory_space<vmem>>, %arg15: memref<7x8xf32, #tpu.memory_space<vmem>>, %arg16: memref<1x128x256xf32, #tpu.memory_space<vmem>>, %arg17: memref<128x1xf32, #tpu.memory_space<vmem>>, %arg18: memref<7x128xf32, #tpu.memory_space<vmem>>, %arg19: memref<7x1xf32, #tpu.memory_space<vmem>>, %arg20: memref<1x7x1xf32, #tpu.memory_space<vmem>>) attributes {dimension_semantics = [#tpu.dimension_semantics<parallel>], iteration_bounds = array<i64: 2>, scalar_prefetch = 0 : i64, scratch_operands = 0 : i64, tpu.core_type = #tpu.core_type<tc>, window_params = [{transform_indices = @transform_0, window_bounds = array<i64: 1, 2, 8000>}, {pipeline_mode = #tpu.pipeline_mode<synchronous>, transform_indices = @transform_1, window_bounds = array<i64: 11, 16, 2>}, {pipeline_mode = #tpu.pipeline_mode<synchronous>, transform_indices = @transform_2, window_bounds = array<i64: 16, 1>}, {pipeline_mode = #tpu.pipeline_mode<synchronous>, transform_indices = @transform_3, window_bounds = array<i64: 7, 32, 16>}, {pipeline_mode = #tpu.pipeline_mode<synchronous>, transform_indices = @transform_4, window_bounds = array<i64: 32, 1>}, {pipeline_mode = #tpu.pipeline_mode<synchronous>, transform_indices = @transform_5, window_bounds = array<i64: 3, 64, 32>}, {pipeline_mode = #tpu.pipeline_mode<synchronous>, transform_indices = @transform_6, window_bounds = array<i64: 64, 1>}, {pipeline_mode = #tpu.pipeline_mode<synchronous>, transform_indices = @transform_7, window_bounds = array<i64: 3, 128, 64>}, {pipeline_mode = #tpu.pipeline_mode<synchronous>, transform_indices = @transform_8, window_bounds = array<i64: 128, 1>}, {pipeline_mode = #tpu.pipeline_mode<synchronous>, transform_indices = @transform_9, window_bounds = array<i64: 3, 256, 128>}, {pipeline_mode = #tpu.pipeline_mode<synchronous>, transform_indices = @transform_10, window_bounds = array<i64: 256, 1>}, {pipeline_mode = #tpu.pipeline_mode<synchronous>, transform_indices = @transform_11, window_bounds = array<i64: 798, 798>}, {pipeline_mode = #tpu.pipeline_mode<synchronous>, transform_indices = @transform_12, window_bounds = array<i64: 131, 132>}, {pipeline_mode = #tpu.pipeline_mode<synchronous>, transform_indices = @transform_13, window_bounds = array<i64: 32, 32>}, {pipeline_mode = #tpu.pipeline_mode<synchronous>, transform_indices = @transform_14, window_bounds = array<i64: 7, 8>}, {pipeline_mode = #tpu.pipeline_mode<synchronous>, transform_indices = @transform_15, window_bounds = array<i64: 1, 128, 256>}, {pipeline_mode = #tpu.pipeline_mode<synchronous>, transform_indices = @transform_16, window_bounds = array<i64: 128, 1>}, {pipeline_mode = #tpu.pipeline_mode<synchronous>, transform_indices = @transform_17, window_bounds = array<i64: 7, 128>}, {pipeline_mode = #tpu.pipeline_mode<synchronous>, transform_indices = @transform_18, window_bounds = array<i64: 7, 1>}, {transform_indices = @transform_19, window_bounds = array<i64: 1, 7, 1>}]} {
    %cst = arith.constant 0.000000e+00 : f32
    %0 = vector.broadcast %cst : f32 to vector<16x799xf32>
    %cst_0 = arith.constant 0.000000e+00 : f32
    %1 = vector.broadcast %cst_0 : f32 to vector<16x798xf32>
    %c0 = arith.constant 0 : index
    %c0_1 = arith.constant 0 : index
    %c0_2 = arith.constant 0 : index
    %2 = vector.load %arg2[%c0, %c0_1, %c0_2] : memref<11x16x2xf32, #tpu.memory_space<vmem>>, vector<1x16x2xf32>
    %3 = vector.shape_cast %2 : vector<1x16x2xf32> to vector<16x2xf32>
    %c0_3 = arith.constant 0 : index
    %c0_4 = arith.constant 0 : index
    %c0_5 = arith.constant 0 : index
    %4 = vector.load %arg1[%c0_3, %c0_4, %c0_5] : memref<1x2x8000xf32, #tpu.memory_space<vmem>>, vector<1x2x799xf32>
    %5 = vector.shape_cast %4 : vector<1x2x799xf32> to vector<2x799xf32>
    %cst_6 = arith.constant dense<0.000000e+00> : vector<16x799xf32>
    %6 = tpu.matmul %3, %5, %cst_6 {dimension_numbers = #tpu.dot_dimension_numbers<[1], [0], [0], [1], [0, 0, 1, 1], [], []>} : vector<16x2xf32>, vector<2x799xf32>, vector<16x799xf32> -> vector<16x799xf32>
    %7 = arith.addf %0, %6 : vector<16x799xf32>
    %c0_7 = arith.constant 0 : index
    %c0_8 = arith.constant 0 : index
    %c4000 = arith.constant 4000 : index
    %8 = vector.load %arg1[%c0_7, %c0_8, %c4000] : memref<1x2x8000xf32, #tpu.memory_space<vmem>>, vector<1x2x798xf32>
    %9 = vector.shape_cast %8 : vector<1x2x798xf32> to vector<2x798xf32>
    %cst_9 = arith.constant dense<0.000000e+00> : vector<16x798xf32>
    %10 = tpu.matmul %3, %9, %cst_9 {dimension_numbers = #tpu.dot_dimension_numbers<[1], [0], [0], [1], [0, 0, 1, 1], [], []>} : vector<16x2xf32>, vector<2x798xf32>, vector<16x798xf32> -> vector<16x798xf32>
    %11 = arith.addf %1, %10 : vector<16x798xf32>
    %c1 = arith.constant 1 : index
    %c0_10 = arith.constant 0 : index
    %c0_11 = arith.constant 0 : index
    %12 = vector.load %arg2[%c1, %c0_10, %c0_11] : memref<11x16x2xf32, #tpu.memory_space<vmem>>, vector<1x16x2xf32>
    %13 = vector.shape_cast %12 : vector<1x16x2xf32> to vector<16x2xf32>
    %c0_12 = arith.constant 0 : index
    %c0_13 = arith.constant 0 : index
    %c800 = arith.constant 800 : index
    %14 = vector.load %arg1[%c0_12, %c0_13, %c800] : memref<1x2x8000xf32, #tpu.memory_space<vmem>>, vector<1x2x799xf32>
    %15 = vector.shape_cast %14 : vector<1x2x799xf32> to vector<2x799xf32>
    %cst_14 = arith.constant dense<0.000000e+00> : vector<16x799xf32>
    %16 = tpu.matmul %13, %15, %cst_14 {dimension_numbers = #tpu.dot_dimension_numbers<[1], [0], [0], [1], [0, 0, 1, 1], [], []>} : vector<16x2xf32>, vector<2x799xf32>, vector<16x799xf32> -> vector<16x799xf32>
    %17 = arith.addf %7, %16 : vector<16x799xf32>
    %c0_15 = arith.constant 0 : index
    %c0_16 = arith.constant 0 : index
    %c4800 = arith.constant 4800 : index
    %18 = vector.load %arg1[%c0_15, %c0_16, %c4800] : memref<1x2x8000xf32, #tpu.memory_space<vmem>>, vector<1x2x798xf32>
    %19 = vector.shape_cast %18 : vector<1x2x798xf32> to vector<2x798xf32>
    %cst_17 = arith.constant dense<0.000000e+00> : vector<16x798xf32>
    %20 = tpu.matmul %13, %19, %cst_17 {dimension_numbers = #tpu.dot_dimension_numbers<[1], [0], [0], [1], [0, 0, 1, 1], [], []>} : vector<16x2xf32>, vector<2x798xf32>, vector<16x798xf32> -> vector<16x798xf32>
    %21 = arith.addf %11, %20 : vector<16x798xf32>
    %c2 = arith.constant 2 : index
    %c0_18 = arith.constant 0 : index
    %c0_19 = arith.constant 0 : index
    %22 = vector.load %arg2[%c2, %c0_18, %c0_19] : memref<11x16x2xf32, #tpu.memory_space<vmem>>, vector<1x16x2xf32>
    %23 = vector.shape_cast %22 : vector<1x16x2xf32> to vector<16x2xf32>
    %c0_20 = arith.constant 0 : index
    %c0_21 = arith.constant 0 : index
    %c1600 = arith.constant 1600 : index
    %24 = vector.load %arg1[%c0_20, %c0_21, %c1600] : memref<1x2x8000xf32, #tpu.memory_space<vmem>>, vector<1x2x799xf32>
    %25 = vector.shape_cast %24 : vector<1x2x799xf32> to vector<2x799xf32>
    %cst_22 = arith.constant dense<0.000000e+00> : vector<16x799xf32>
    %26 = tpu.matmul %23, %25, %cst_22 {dimension_numbers = #tpu.dot_dimension_numbers<[1], [0], [0], [1], [0, 0, 1, 1], [], []>} : vector<16x2xf32>, vector<2x799xf32>, vector<16x799xf32> -> vector<16x799xf32>
    %27 = arith.addf %17, %26 : vector<16x799xf32>
    %c0_23 = arith.constant 0 : index
    %c0_24 = arith.constant 0 : index
    %c5600 = arith.constant 5600 : index
    %28 = vector.load %arg1[%c0_23, %c0_24, %c5600] : memref<1x2x8000xf32, #tpu.memory_space<vmem>>, vector<1x2x798xf32>
    %29 = vector.shape_cast %28 : vector<1x2x798xf32> to vector<2x798xf32>
    %cst_25 = arith.constant dense<0.000000e+00> : vector<16x798xf32>
    %30 = tpu.matmul %23, %29, %cst_25 {dimension_numbers = #tpu.dot_dimension_numbers<[1], [0], [0], [1], [0, 0, 1, 1], [], []>} : vector<16x2xf32>, vector<2x798xf32>, vector<16x798xf32> -> vector<16x798xf32>
    %31 = arith.addf %21, %30 : vector<16x798xf32>
    %c3 = arith.constant 3 : index
    %c0_26 = arith.constant 0 : index
    %c0_27 = arith.constant 0 : index
    %32 = vector.load %arg2[%c3, %c0_26, %c0_27] : memref<11x16x2xf32, #tpu.memory_space<vmem>>, vector<1x16x2xf32>
    %33 = vector.shape_cast %32 : vector<1x16x2xf32> to vector<16x2xf32>
    %c0_28 = arith.constant 0 : index
    %c0_29 = arith.constant 0 : index
    %c2400 = arith.constant 2400 : index
    %34 = vector.load %arg1[%c0_28, %c0_29, %c2400] : memref<1x2x8000xf32, #tpu.memory_space<vmem>>, vector<1x2x799xf32>
    %35 = vector.shape_cast %34 : vector<1x2x799xf32> to vector<2x799xf32>
    %cst_30 = arith.constant dense<0.000000e+00> : vector<16x799xf32>
    %36 = tpu.matmul %33, %35, %cst_30 {dimension_numbers = #tpu.dot_dimension_numbers<[1], [0], [0], [1], [0, 0, 1, 1], [], []>} : vector<16x2xf32>, vector<2x799xf32>, vector<16x799xf32> -> vector<16x799xf32>
    %37 = arith.addf %27, %36 : vector<16x799xf32>
    %c0_31 = arith.constant 0 : index
    %c0_32 = arith.constant 0 : index
    %c6400 = arith.constant 6400 : index
    %38 = vector.load %arg1[%c0_31, %c0_32, %c6400] : memref<1x2x8000xf32, #tpu.memory_space<vmem>>, vector<1x2x798xf32>
    %39 = vector.shape_cast %38 : vector<1x2x798xf32> to vector<2x798xf32>
    %cst_33 = arith.constant dense<0.000000e+00> : vector<16x798xf32>
    %40 = tpu.matmul %33, %39, %cst_33 {dimension_numbers = #tpu.dot_dimension_numbers<[1], [0], [0], [1], [0, 0, 1, 1], [], []>} : vector<16x2xf32>, vector<2x798xf32>, vector<16x798xf32> -> vector<16x798xf32>
    %41 = arith.addf %31, %40 : vector<16x798xf32>
    %c4 = arith.constant 4 : index
    %c0_34 = arith.constant 0 : index
    %c0_35 = arith.constant 0 : index
    %42 = vector.load %arg2[%c4, %c0_34, %c0_35] : memref<11x16x2xf32, #tpu.memory_space<vmem>>, vector<1x16x2xf32>
    %43 = vector.shape_cast %42 : vector<1x16x2xf32> to vector<16x2xf32>
    %c0_36 = arith.constant 0 : index
    %c0_37 = arith.constant 0 : index
    %c3200 = arith.constant 3200 : index
    %44 = vector.load %arg1[%c0_36, %c0_37, %c3200] : memref<1x2x8000xf32, #tpu.memory_space<vmem>>, vector<1x2x799xf32>
    %45 = vector.shape_cast %44 : vector<1x2x799xf32> to vector<2x799xf32>
    %cst_38 = arith.constant dense<0.000000e+00> : vector<16x799xf32>
    %46 = tpu.matmul %43, %45, %cst_38 {dimension_numbers = #tpu.dot_dimension_numbers<[1], [0], [0], [1], [0, 0, 1, 1], [], []>} : vector<16x2xf32>, vector<2x799xf32>, vector<16x799xf32> -> vector<16x799xf32>
    %47 = arith.addf %37, %46 : vector<16x799xf32>
    %c0_39 = arith.constant 0 : index
    %c0_40 = arith.constant 0 : index
    %c7200 = arith.constant 7200 : index
    %48 = vector.load %arg1[%c0_39, %c0_40, %c7200] : memref<1x2x8000xf32, #tpu.memory_space<vmem>>, vector<1x2x798xf32>
    %49 = vector.shape_cast %48 : vector<1x2x798xf32> to vector<2x798xf32>
    %cst_41 = arith.constant dense<0.000000e+00> : vector<16x798xf32>
    %50 = tpu.matmul %43, %49, %cst_41 {dimension_numbers = #tpu.dot_dimension_numbers<[1], [0], [0], [1], [0, 0, 1, 1], [], []>} : vector<16x2xf32>, vector<2x798xf32>, vector<16x798xf32> -> vector<16x798xf32>
    %51 = arith.addf %41, %50 : vector<16x798xf32>
    %c5 = arith.constant 5 : index
    %c0_42 = arith.constant 0 : index
    %c0_43 = arith.constant 0 : index
    %52 = vector.load %arg2[%c5, %c0_42, %c0_43] : memref<11x16x2xf32, #tpu.memory_space<vmem>>, vector<1x16x2xf32>
    %53 = vector.shape_cast %52 : vector<1x16x2xf32> to vector<16x2xf32>
    %c0_44 = arith.constant 0 : index
    %c0_45 = arith.constant 0 : index
    %c4000_46 = arith.constant 4000 : index
    %54 = vector.load %arg1[%c0_44, %c0_45, %c4000_46] : memref<1x2x8000xf32, #tpu.memory_space<vmem>>, vector<1x2x799xf32>
    %55 = vector.shape_cast %54 : vector<1x2x799xf32> to vector<2x799xf32>
    %cst_47 = arith.constant dense<0.000000e+00> : vector<16x799xf32>
    %56 = tpu.matmul %53, %55, %cst_47 {dimension_numbers = #tpu.dot_dimension_numbers<[1], [0], [0], [1], [0, 0, 1, 1], [], []>} : vector<16x2xf32>, vector<2x799xf32>, vector<16x799xf32> -> vector<16x799xf32>
    %57 = arith.addf %47, %56 : vector<16x799xf32>
    %c0_48 = arith.constant 0 : index
    %c0_49 = arith.constant 0 : index
    %c1_50 = arith.constant 1 : index
    %58 = vector.load %arg1[%c0_48, %c0_49, %c1_50] : memref<1x2x8000xf32, #tpu.memory_space<vmem>>, vector<1x2x798xf32>
    %59 = vector.shape_cast %58 : vector<1x2x798xf32> to vector<2x798xf32>
    %cst_51 = arith.constant dense<0.000000e+00> : vector<16x798xf32>
    %60 = tpu.matmul %53, %59, %cst_51 {dimension_numbers = #tpu.dot_dimension_numbers<[1], [0], [0], [1], [0, 0, 1, 1], [], []>} : vector<16x2xf32>, vector<2x798xf32>, vector<16x798xf32> -> vector<16x798xf32>
    %61 = arith.addf %51, %60 : vector<16x798xf32>
    %c6 = arith.constant 6 : index
    %c0_52 = arith.constant 0 : index
    %c0_53 = arith.constant 0 : index
    %62 = vector.load %arg2[%c6, %c0_52, %c0_53] : memref<11x16x2xf32, #tpu.memory_space<vmem>>, vector<1x16x2xf32>
    %63 = vector.shape_cast %62 : vector<1x16x2xf32> to vector<16x2xf32>
    %c0_54 = arith.constant 0 : index
    %c0_55 = arith.constant 0 : index
    %c4800_56 = arith.constant 4800 : index
    %64 = vector.load %arg1[%c0_54, %c0_55, %c4800_56] : memref<1x2x8000xf32, #tpu.memory_space<vmem>>, vector<1x2x799xf32>
    %65 = vector.shape_cast %64 : vector<1x2x799xf32> to vector<2x799xf32>
    %cst_57 = arith.constant dense<0.000000e+00> : vector<16x799xf32>
    %66 = tpu.matmul %63, %65, %cst_57 {dimension_numbers = #tpu.dot_dimension_numbers<[1], [0], [0], [1], [0, 0, 1, 1], [], []>} : vector<16x2xf32>, vector<2x799xf32>, vector<16x799xf32> -> vector<16x799xf32>
    %67 = arith.addf %57, %66 : vector<16x799xf32>
    %c0_58 = arith.constant 0 : index
    %c0_59 = arith.constant 0 : index
    %c801 = arith.constant 801 : index
    %68 = vector.load %arg1[%c0_58, %c0_59, %c801] : memref<1x2x8000xf32, #tpu.memory_space<vmem>>, vector<1x2x798xf32>
    %69 = vector.shape_cast %68 : vector<1x2x798xf32> to vector<2x798xf32>
    %cst_60 = arith.constant dense<0.000000e+00> : vector<16x798xf32>
    %70 = tpu.matmul %63, %69, %cst_60 {dimension_numbers = #tpu.dot_dimension_numbers<[1], [0], [0], [1], [0, 0, 1, 1], [], []>} : vector<16x2xf32>, vector<2x798xf32>, vector<16x798xf32> -> vector<16x798xf32>
    %71 = arith.addf %61, %70 : vector<16x798xf32>
    %c7 = arith.constant 7 : index
    %c0_61 = arith.constant 0 : index
    %c0_62 = arith.constant 0 : index
    %72 = vector.load %arg2[%c7, %c0_61, %c0_62] : memref<11x16x2xf32, #tpu.memory_space<vmem>>, vector<1x16x2xf32>
    %73 = vector.shape_cast %72 : vector<1x16x2xf32> to vector<16x2xf32>
    %c0_63 = arith.constant 0 : index
    %c0_64 = arith.constant 0 : index
    %c5600_65 = arith.constant 5600 : index
    %74 = vector.load %arg1[%c0_63, %c0_64, %c5600_65] : memref<1x2x8000xf32, #tpu.memory_space<vmem>>, vector<1x2x799xf32>
    %75 = vector.shape_cast %74 : vector<1x2x799xf32> to vector<2x799xf32>
    %cst_66 = arith.constant dense<0.000000e+00> : vector<16x799xf32>
    %76 = tpu.matmul %73, %75, %cst_66 {dimension_numbers = #tpu.dot_dimension_numbers<[1], [0], [0], [1], [0, 0, 1, 1], [], []>} : vector<16x2xf32>, vector<2x799xf32>, vector<16x799xf32> -> vector<16x799xf32>
    %77 = arith.addf %67, %76 : vector<16x799xf32>
    %c0_67 = arith.constant 0 : index
    %c0_68 = arith.constant 0 : index
    %c1601 = arith.constant 1601 : index
    %78 = vector.load %arg1[%c0_67, %c0_68, %c1601] : memref<1x2x8000xf32, #tpu.memory_space<vmem>>, vector<1x2x798xf32>
    %79 = vector.shape_cast %78 : vector<1x2x798xf32> to vector<2x798xf32>
    %cst_69 = arith.constant dense<0.000000e+00> : vector<16x798xf32>
    %80 = tpu.matmul %73, %79, %cst_69 {dimension_numbers = #tpu.dot_dimension_numbers<[1], [0], [0], [1], [0, 0, 1, 1], [], []>} : vector<16x2xf32>, vector<2x798xf32>, vector<16x798xf32> -> vector<16x798xf32>
    %81 = arith.addf %71, %80 : vector<16x798xf32>
    %c8 = arith.constant 8 : index
    %c0_70 = arith.constant 0 : index
    %c0_71 = arith.constant 0 : index
    %82 = vector.load %arg2[%c8, %c0_70, %c0_71] : memref<11x16x2xf32, #tpu.memory_space<vmem>>, vector<1x16x2xf32>
    %83 = vector.shape_cast %82 : vector<1x16x2xf32> to vector<16x2xf32>
    %c0_72 = arith.constant 0 : index
    %c0_73 = arith.constant 0 : index
    %c6400_74 = arith.constant 6400 : index
    %84 = vector.load %arg1[%c0_72, %c0_73, %c6400_74] : memref<1x2x8000xf32, #tpu.memory_space<vmem>>, vector<1x2x799xf32>
    %85 = vector.shape_cast %84 : vector<1x2x799xf32> to vector<2x799xf32>
    %cst_75 = arith.constant dense<0.000000e+00> : vector<16x799xf32>
    %86 = tpu.matmul %83, %85, %cst_75 {dimension_numbers = #tpu.dot_dimension_numbers<[1], [0], [0], [1], [0, 0, 1, 1], [], []>} : vector<16x2xf32>, vector<2x799xf32>, vector<16x799xf32> -> vector<16x799xf32>
    %87 = arith.addf %77, %86 : vector<16x799xf32>
    %c0_76 = arith.constant 0 : index
    %c0_77 = arith.constant 0 : index
    %c2401 = arith.constant 2401 : index
    %88 = vector.load %arg1[%c0_76, %c0_77, %c2401] : memref<1x2x8000xf32, #tpu.memory_space<vmem>>, vector<1x2x798xf32>
    %89 = vector.shape_cast %88 : vector<1x2x798xf32> to vector<2x798xf32>
    %cst_78 = arith.constant dense<0.000000e+00> : vector<16x798xf32>
    %90 = tpu.matmul %83, %89, %cst_78 {dimension_numbers = #tpu.dot_dimension_numbers<[1], [0], [0], [1], [0, 0, 1, 1], [], []>} : vector<16x2xf32>, vector<2x798xf32>, vector<16x798xf32> -> vector<16x798xf32>
    %91 = arith.addf %81, %90 : vector<16x798xf32>
    %c9 = arith.constant 9 : index
    %c0_79 = arith.constant 0 : index
    %c0_80 = arith.constant 0 : index
    %92 = vector.load %arg2[%c9, %c0_79, %c0_80] : memref<11x16x2xf32, #tpu.memory_space<vmem>>, vector<1x16x2xf32>
    %93 = vector.shape_cast %92 : vector<1x16x2xf32> to vector<16x2xf32>
    %c0_81 = arith.constant 0 : index
    %c0_82 = arith.constant 0 : index
    %c7200_83 = arith.constant 7200 : index
    %94 = vector.load %arg1[%c0_81, %c0_82, %c7200_83] : memref<1x2x8000xf32, #tpu.memory_space<vmem>>, vector<1x2x799xf32>
    %95 = vector.shape_cast %94 : vector<1x2x799xf32> to vector<2x799xf32>
    %cst_84 = arith.constant dense<0.000000e+00> : vector<16x799xf32>
    %96 = tpu.matmul %93, %95, %cst_84 {dimension_numbers = #tpu.dot_dimension_numbers<[1], [0], [0], [1], [0, 0, 1, 1], [], []>} : vector<16x2xf32>, vector<2x799xf32>, vector<16x799xf32> -> vector<16x799xf32>
    %97 = arith.addf %87, %96 : vector<16x799xf32>
    %c0_85 = arith.constant 0 : index
    %c0_86 = arith.constant 0 : index
    %c3201 = arith.constant 3201 : index
    %98 = vector.load %arg1[%c0_85, %c0_86, %c3201] : memref<1x2x8000xf32, #tpu.memory_space<vmem>>, vector<1x2x798xf32>
    %99 = vector.shape_cast %98 : vector<1x2x798xf32> to vector<2x798xf32>
    %cst_87 = arith.constant dense<0.000000e+00> : vector<16x798xf32>
    %100 = tpu.matmul %93, %99, %cst_87 {dimension_numbers = #tpu.dot_dimension_numbers<[1], [0], [0], [1], [0, 0, 1, 1], [], []>} : vector<16x2xf32>, vector<2x798xf32>, vector<16x798xf32> -> vector<16x798xf32>
    %101 = arith.addf %91, %100 : vector<16x798xf32>
    %c10 = arith.constant 10 : index
    %c0_88 = arith.constant 0 : index
    %c0_89 = arith.constant 0 : index
    %102 = vector.load %arg2[%c10, %c0_88, %c0_89] : memref<11x16x2xf32, #tpu.memory_space<vmem>>, vector<1x16x2xf32>
    %103 = vector.shape_cast %102 : vector<1x16x2xf32> to vector<16x2xf32>
    %c0_90 = arith.constant 0 : index
    %c0_91 = arith.constant 0 : index
    %c1_92 = arith.constant 1 : index
    %104 = vector.load %arg1[%c0_90, %c0_91, %c1_92] : memref<1x2x8000xf32, #tpu.memory_space<vmem>>, vector<1x2x799xf32>
    %105 = vector.shape_cast %104 : vector<1x2x799xf32> to vector<2x799xf32>
    %cst_93 = arith.constant dense<0.000000e+00> : vector<16x799xf32>
    %106 = tpu.matmul %103, %105, %cst_93 {dimension_numbers = #tpu.dot_dimension_numbers<[1], [0], [0], [1], [0, 0, 1, 1], [], []>} : vector<16x2xf32>, vector<2x799xf32>, vector<16x799xf32> -> vector<16x799xf32>
    %107 = arith.addf %97, %106 : vector<16x799xf32>
    %c0_94 = arith.constant 0 : index
    %c0_95 = arith.constant 0 : index
    %c4001 = arith.constant 4001 : index
    %108 = vector.load %arg1[%c0_94, %c0_95, %c4001] : memref<1x2x8000xf32, #tpu.memory_space<vmem>>, vector<1x2x798xf32>
    %109 = vector.shape_cast %108 : vector<1x2x798xf32> to vector<2x798xf32>
    %cst_96 = arith.constant dense<0.000000e+00> : vector<16x798xf32>
    %110 = tpu.matmul %103, %109, %cst_96 {dimension_numbers = #tpu.dot_dimension_numbers<[1], [0], [0], [1], [0, 0, 1, 1], [], []>} : vector<16x2xf32>, vector<2x798xf32>, vector<16x798xf32> -> vector<16x798xf32>
    %111 = arith.addf %101, %110 : vector<16x798xf32>
    %c0_97 = arith.constant 0 : index
    %c0_98 = arith.constant 0 : index
    %112 = vector.load %arg3[%c0_97, %c0_98] : memref<16x1xf32, #tpu.memory_space<vmem>>, vector<16x1xf32>
    %113 = vector.broadcast %112 : vector<16x1xf32> to vector<16x799xf32>
    %114 = arith.addf %107, %113 : vector<16x799xf32>
    %cst_99 = arith.constant 0.000000e+00 : f32
    %115 = vector.broadcast %cst_99 : f32 to vector<16x799xf32>
    %116 = arith.maximumf %114, %115 : vector<16x799xf32>
    %117 = vector.broadcast %112 : vector<16x1xf32> to vector<16x798xf32>
    %118 = arith.addf %111, %117 : vector<16x798xf32>
    %cst_100 = arith.constant 0.000000e+00 : f32
    %119 = vector.broadcast %cst_100 : f32 to vector<16x798xf32>
    %120 = arith.maximumf %118, %119 : vector<16x798xf32>
    %121 = vector.extract_strided_slice %116 {offsets = [0, 0], sizes = [16, 798], strides = [1, 1]} : vector<16x799xf32> to vector<16x798xf32>
    %122 = arith.maximumf %121, %120 : vector<16x798xf32>
    %123 = vector.extract_strided_slice %116 {offsets = [0, 1], sizes = [16, 798], strides = [1, 1]} : vector<16x799xf32> to vector<16x798xf32>
    %124 = arith.maximumf %122, %123 : vector<16x798xf32>
    %c0_101 = arith.constant 0 : index
    %c0_102 = arith.constant 0 : index
    %125 = vector.load %arg12[%c0_101, %c0_102] : memref<798x798xf32, #tpu.memory_space<vmem>>, vector<798x798xf32>
    %cst_103 = arith.constant dense<0.000000e+00> : vector<16x798xf32>
    %126 = tpu.matmul %124, %125, %cst_103 {dimension_numbers = #tpu.dot_dimension_numbers<[1], [0], [0], [1], [0, 0, 1, 1], [], []>} : vector<16x798xf32>, vector<798x798xf32>, vector<16x798xf32> -> vector<16x798xf32>
    %cst_104 = arith.constant 0.000000e+00 : f32
    %127 = vector.broadcast %cst_104 : f32 to vector<32x132xf32>
    %cst_105 = arith.constant 0.000000e+00 : f32
    %128 = vector.broadcast %cst_105 : f32 to vector<32x131xf32>
    %c0_106 = arith.constant 0 : index
    %c0_107 = arith.constant 0 : index
    %c0_108 = arith.constant 0 : index
    %129 = vector.load %arg4[%c0_106, %c0_107, %c0_108] : memref<7x32x16xf32, #tpu.memory_space<vmem>>, vector<1x32x16xf32>
    %130 = vector.shape_cast %129 : vector<1x32x16xf32> to vector<32x16xf32>
    %131 = vector.extract_strided_slice %126 {offsets = [0, 0], sizes = [16, 132], strides = [1, 1]} : vector<16x798xf32> to vector<16x132xf32>
    %cst_109 = arith.constant dense<0.000000e+00> : vector<32x132xf32>
    %132 = tpu.matmul %130, %131, %cst_109 {dimension_numbers = #tpu.dot_dimension_numbers<[1], [0], [0], [1], [0, 0, 1, 1], [], []>} : vector<32x16xf32>, vector<16x132xf32>, vector<32x132xf32> -> vector<32x132xf32>
    %133 = arith.addf %127, %132 : vector<32x132xf32>
    %134 = vector.extract_strided_slice %126 {offsets = [0, 399], sizes = [16, 131], strides = [1, 1]} : vector<16x798xf32> to vector<16x131xf32>
    %cst_110 = arith.constant dense<0.000000e+00> : vector<32x131xf32>
    %135 = tpu.matmul %130, %134, %cst_110 {dimension_numbers = #tpu.dot_dimension_numbers<[1], [0], [0], [1], [0, 0, 1, 1], [], []>} : vector<32x16xf32>, vector<16x131xf32>, vector<32x131xf32> -> vector<32x131xf32>
    %136 = arith.addf %128, %135 : vector<32x131xf32>
    %c1_111 = arith.constant 1 : index
    %c0_112 = arith.constant 0 : index
    %c0_113 = arith.constant 0 : index
    %137 = vector.load %arg4[%c1_111, %c0_112, %c0_113] : memref<7x32x16xf32, #tpu.memory_space<vmem>>, vector<1x32x16xf32>
    %138 = vector.shape_cast %137 : vector<1x32x16xf32> to vector<32x16xf32>
    %139 = vector.extract_strided_slice %126 {offsets = [0, 133], sizes = [16, 132], strides = [1, 1]} : vector<16x798xf32> to vector<16x132xf32>
    %cst_114 = arith.constant dense<0.000000e+00> : vector<32x132xf32>
    %140 = tpu.matmul %138, %139, %cst_114 {dimension_numbers = #tpu.dot_dimension_numbers<[1], [0], [0], [1], [0, 0, 1, 1], [], []>} : vector<32x16xf32>, vector<16x132xf32>, vector<32x132xf32> -> vector<32x132xf32>
    %141 = arith.addf %133, %140 : vector<32x132xf32>
    %142 = vector.extract_strided_slice %126 {offsets = [0, 532], sizes = [16, 131], strides = [1, 1]} : vector<16x798xf32> to vector<16x131xf32>
    %cst_115 = arith.constant dense<0.000000e+00> : vector<32x131xf32>
    %143 = tpu.matmul %138, %142, %cst_115 {dimension_numbers = #tpu.dot_dimension_numbers<[1], [0], [0], [1], [0, 0, 1, 1], [], []>} : vector<32x16xf32>, vector<16x131xf32>, vector<32x131xf32> -> vector<32x131xf32>
    %144 = arith.addf %136, %143 : vector<32x131xf32>
    %c2_116 = arith.constant 2 : index
    %c0_117 = arith.constant 0 : index
    %c0_118 = arith.constant 0 : index
    %145 = vector.load %arg4[%c2_116, %c0_117, %c0_118] : memref<7x32x16xf32, #tpu.memory_space<vmem>>, vector<1x32x16xf32>
    %146 = vector.shape_cast %145 : vector<1x32x16xf32> to vector<32x16xf32>
    %147 = vector.extract_strided_slice %126 {offsets = [0, 266], sizes = [16, 132], strides = [1, 1]} : vector<16x798xf32> to vector<16x132xf32>
    %cst_119 = arith.constant dense<0.000000e+00> : vector<32x132xf32>
    %148 = tpu.matmul %146, %147, %cst_119 {dimension_numbers = #tpu.dot_dimension_numbers<[1], [0], [0], [1], [0, 0, 1, 1], [], []>} : vector<32x16xf32>, vector<16x132xf32>, vector<32x132xf32> -> vector<32x132xf32>
    %149 = arith.addf %141, %148 : vector<32x132xf32>
    %150 = vector.extract_strided_slice %126 {offsets = [0, 665], sizes = [16, 131], strides = [1, 1]} : vector<16x798xf32> to vector<16x131xf32>
    %cst_120 = arith.constant dense<0.000000e+00> : vector<32x131xf32>
    %151 = tpu.matmul %146, %150, %cst_120 {dimension_numbers = #tpu.dot_dimension_numbers<[1], [0], [0], [1], [0, 0, 1, 1], [], []>} : vector<32x16xf32>, vector<16x131xf32>, vector<32x131xf32> -> vector<32x131xf32>
    %152 = arith.addf %144, %151 : vector<32x131xf32>
    %c3_121 = arith.constant 3 : index
    %c0_122 = arith.constant 0 : index
    %c0_123 = arith.constant 0 : index
    %153 = vector.load %arg4[%c3_121, %c0_122, %c0_123] : memref<7x32x16xf32, #tpu.memory_space<vmem>>, vector<1x32x16xf32>
    %154 = vector.shape_cast %153 : vector<1x32x16xf32> to vector<32x16xf32>
    %155 = vector.extract_strided_slice %126 {offsets = [0, 399], sizes = [16, 132], strides = [1, 1]} : vector<16x798xf32> to vector<16x132xf32>
    %cst_124 = arith.constant dense<0.000000e+00> : vector<32x132xf32>
    %156 = tpu.matmul %154, %155, %cst_124 {dimension_numbers = #tpu.dot_dimension_numbers<[1], [0], [0], [1], [0, 0, 1, 1], [], []>} : vector<32x16xf32>, vector<16x132xf32>, vector<32x132xf32> -> vector<32x132xf32>
    %157 = arith.addf %149, %156 : vector<32x132xf32>
    %158 = vector.extract_strided_slice %126 {offsets = [0, 1], sizes = [16, 131], strides = [1, 1]} : vector<16x798xf32> to vector<16x131xf32>
    %cst_125 = arith.constant dense<0.000000e+00> : vector<32x131xf32>
    %159 = tpu.matmul %154, %158, %cst_125 {dimension_numbers = #tpu.dot_dimension_numbers<[1], [0], [0], [1], [0, 0, 1, 1], [], []>} : vector<32x16xf32>, vector<16x131xf32>, vector<32x131xf32> -> vector<32x131xf32>
    %160 = arith.addf %152, %159 : vector<32x131xf32>
    %c4_126 = arith.constant 4 : index
    %c0_127 = arith.constant 0 : index
    %c0_128 = arith.constant 0 : index
    %161 = vector.load %arg4[%c4_126, %c0_127, %c0_128] : memref<7x32x16xf32, #tpu.memory_space<vmem>>, vector<1x32x16xf32>
    %162 = vector.shape_cast %161 : vector<1x32x16xf32> to vector<32x16xf32>
    %163 = vector.extract_strided_slice %126 {offsets = [0, 532], sizes = [16, 132], strides = [1, 1]} : vector<16x798xf32> to vector<16x132xf32>
    %cst_129 = arith.constant dense<0.000000e+00> : vector<32x132xf32>
    %164 = tpu.matmul %162, %163, %cst_129 {dimension_numbers = #tpu.dot_dimension_numbers<[1], [0], [0], [1], [0, 0, 1, 1], [], []>} : vector<32x16xf32>, vector<16x132xf32>, vector<32x132xf32> -> vector<32x132xf32>
    %165 = arith.addf %157, %164 : vector<32x132xf32>
    %166 = vector.extract_strided_slice %126 {offsets = [0, 134], sizes = [16, 131], strides = [1, 1]} : vector<16x798xf32> to vector<16x131xf32>
    %cst_130 = arith.constant dense<0.000000e+00> : vector<32x131xf32>
    %167 = tpu.matmul %162, %166, %cst_130 {dimension_numbers = #tpu.dot_dimension_numbers<[1], [0], [0], [1], [0, 0, 1, 1], [], []>} : vector<32x16xf32>, vector<16x131xf32>, vector<32x131xf32> -> vector<32x131xf32>
    %168 = arith.addf %160, %167 : vector<32x131xf32>
    %c5_131 = arith.constant 5 : index
    %c0_132 = arith.constant 0 : index
    %c0_133 = arith.constant 0 : index
    %169 = vector.load %arg4[%c5_131, %c0_132, %c0_133] : memref<7x32x16xf32, #tpu.memory_space<vmem>>, vector<1x32x16xf32>
    %170 = vector.shape_cast %169 : vector<1x32x16xf32> to vector<32x16xf32>
    %171 = vector.extract_strided_slice %126 {offsets = [0, 665], sizes = [16, 132], strides = [1, 1]} : vector<16x798xf32> to vector<16x132xf32>
    %cst_134 = arith.constant dense<0.000000e+00> : vector<32x132xf32>
    %172 = tpu.matmul %170, %171, %cst_134 {dimension_numbers = #tpu.dot_dimension_numbers<[1], [0], [0], [1], [0, 0, 1, 1], [], []>} : vector<32x16xf32>, vector<16x132xf32>, vector<32x132xf32> -> vector<32x132xf32>
    %173 = arith.addf %165, %172 : vector<32x132xf32>
    %174 = vector.extract_strided_slice %126 {offsets = [0, 267], sizes = [16, 131], strides = [1, 1]} : vector<16x798xf32> to vector<16x131xf32>
    %cst_135 = arith.constant dense<0.000000e+00> : vector<32x131xf32>
    %175 = tpu.matmul %170, %174, %cst_135 {dimension_numbers = #tpu.dot_dimension_numbers<[1], [0], [0], [1], [0, 0, 1, 1], [], []>} : vector<32x16xf32>, vector<16x131xf32>, vector<32x131xf32> -> vector<32x131xf32>
    %176 = arith.addf %168, %175 : vector<32x131xf32>
    %c6_136 = arith.constant 6 : index
    %c0_137 = arith.constant 0 : index
    %c0_138 = arith.constant 0 : index
    %177 = vector.load %arg4[%c6_136, %c0_137, %c0_138] : memref<7x32x16xf32, #tpu.memory_space<vmem>>, vector<1x32x16xf32>
    %178 = vector.shape_cast %177 : vector<1x32x16xf32> to vector<32x16xf32>
    %179 = vector.extract_strided_slice %126 {offsets = [0, 1], sizes = [16, 132], strides = [1, 1]} : vector<16x798xf32> to vector<16x132xf32>
    %cst_139 = arith.constant dense<0.000000e+00> : vector<32x132xf32>
    %180 = tpu.matmul %178, %179, %cst_139 {dimension_numbers = #tpu.dot_dimension_numbers<[1], [0], [0], [1], [0, 0, 1, 1], [], []>} : vector<32x16xf32>, vector<16x132xf32>, vector<32x132xf32> -> vector<32x132xf32>
    %181 = arith.addf %173, %180 : vector<32x132xf32>
    %182 = vector.extract_strided_slice %126 {offsets = [0, 400], sizes = [16, 131], strides = [1, 1]} : vector<16x798xf32> to vector<16x131xf32>
    %cst_140 = arith.constant dense<0.000000e+00> : vector<32x131xf32>
    %183 = tpu.matmul %178, %182, %cst_140 {dimension_numbers = #tpu.dot_dimension_numbers<[1], [0], [0], [1], [0, 0, 1, 1], [], []>} : vector<32x16xf32>, vector<16x131xf32>, vector<32x131xf32> -> vector<32x131xf32>
    %184 = arith.addf %176, %183 : vector<32x131xf32>
    %c0_141 = arith.constant 0 : index
    %c0_142 = arith.constant 0 : index
    %185 = vector.load %arg5[%c0_141, %c0_142] : memref<32x1xf32, #tpu.memory_space<vmem>>, vector<32x1xf32>
    %186 = vector.broadcast %185 : vector<32x1xf32> to vector<32x132xf32>
    %187 = arith.addf %181, %186 : vector<32x132xf32>
    %cst_143 = arith.constant 0.000000e+00 : f32
    %188 = vector.broadcast %cst_143 : f32 to vector<32x132xf32>
    %189 = arith.maximumf %187, %188 : vector<32x132xf32>
    %190 = vector.broadcast %185 : vector<32x1xf32> to vector<32x131xf32>
    %191 = arith.addf %184, %190 : vector<32x131xf32>
    %cst_144 = arith.constant 0.000000e+00 : f32
    %192 = vector.broadcast %cst_144 : f32 to vector<32x131xf32>
    %193 = arith.maximumf %191, %192 : vector<32x131xf32>
    %194 = vector.extract_strided_slice %189 {offsets = [0, 0], sizes = [32, 131], strides = [1, 1]} : vector<32x132xf32> to vector<32x131xf32>
    %195 = arith.maximumf %194, %193 : vector<32x131xf32>
    %196 = vector.extract_strided_slice %189 {offsets = [0, 1], sizes = [32, 131], strides = [1, 1]} : vector<32x132xf32> to vector<32x131xf32>
    %197 = arith.maximumf %195, %196 : vector<32x131xf32>
    %c0_145 = arith.constant 0 : index
    %c0_146 = arith.constant 0 : index
    %198 = vector.load %arg13[%c0_145, %c0_146] : memref<131x132xf32, #tpu.memory_space<vmem>>, vector<131x132xf32>
    %cst_147 = arith.constant dense<0.000000e+00> : vector<32x132xf32>
    %199 = tpu.matmul %197, %198, %cst_147 {dimension_numbers = #tpu.dot_dimension_numbers<[1], [0], [0], [1], [0, 0, 1, 1], [], []>} : vector<32x131xf32>, vector<131x132xf32>, vector<32x132xf32> -> vector<32x132xf32>
    %cst_148 = arith.constant 0.000000e+00 : f32
    %200 = vector.broadcast %cst_148 : f32 to vector<64x33xf32>
    %cst_149 = arith.constant 0.000000e+00 : f32
    %201 = vector.broadcast %cst_149 : f32 to vector<64x32xf32>
    %c0_150 = arith.constant 0 : index
    %c0_151 = arith.constant 0 : index
    %c0_152 = arith.constant 0 : index
    %202 = vector.load %arg6[%c0_150, %c0_151, %c0_152] : memref<3x64x32xf32, #tpu.memory_space<vmem>>, vector<1x64x32xf32>
    %203 = vector.shape_cast %202 : vector<1x64x32xf32> to vector<64x32xf32>
    %204 = vector.extract_strided_slice %199 {offsets = [0, 0], sizes = [32, 33], strides = [1, 1]} : vector<32x132xf32> to vector<32x33xf32>
    %cst_153 = arith.constant dense<0.000000e+00> : vector<64x33xf32>
    %205 = tpu.matmul %203, %204, %cst_153 {dimension_numbers = #tpu.dot_dimension_numbers<[1], [0], [0], [1], [0, 0, 1, 1], [], []>} : vector<64x32xf32>, vector<32x33xf32>, vector<64x33xf32> -> vector<64x33xf32>
    %206 = arith.addf %200, %205 : vector<64x33xf32>
    %207 = vector.extract_strided_slice %199 {offsets = [0, 66], sizes = [32, 32], strides = [1, 1]} : vector<32x132xf32> to vector<32x32xf32>
    %cst_154 = arith.constant dense<0.000000e+00> : vector<64x32xf32>
    %208 = tpu.matmul %203, %207, %cst_154 {dimension_numbers = #tpu.dot_dimension_numbers<[1], [0], [0], [1], [0, 0, 1, 1], [], []>} : vector<64x32xf32>, vector<32x32xf32>, vector<64x32xf32> -> vector<64x32xf32>
    %209 = arith.addf %201, %208 : vector<64x32xf32>
    %c1_155 = arith.constant 1 : index
    %c0_156 = arith.constant 0 : index
    %c0_157 = arith.constant 0 : index
    %210 = vector.load %arg6[%c1_155, %c0_156, %c0_157] : memref<3x64x32xf32, #tpu.memory_space<vmem>>, vector<1x64x32xf32>
    %211 = vector.shape_cast %210 : vector<1x64x32xf32> to vector<64x32xf32>
    %212 = vector.extract_strided_slice %199 {offsets = [0, 33], sizes = [32, 33], strides = [1, 1]} : vector<32x132xf32> to vector<32x33xf32>
    %cst_158 = arith.constant dense<0.000000e+00> : vector<64x33xf32>
    %213 = tpu.matmul %211, %212, %cst_158 {dimension_numbers = #tpu.dot_dimension_numbers<[1], [0], [0], [1], [0, 0, 1, 1], [], []>} : vector<64x32xf32>, vector<32x33xf32>, vector<64x33xf32> -> vector<64x33xf32>
    %214 = arith.addf %206, %213 : vector<64x33xf32>
    %215 = vector.extract_strided_slice %199 {offsets = [0, 99], sizes = [32, 32], strides = [1, 1]} : vector<32x132xf32> to vector<32x32xf32>
    %cst_159 = arith.constant dense<0.000000e+00> : vector<64x32xf32>
    %216 = tpu.matmul %211, %215, %cst_159 {dimension_numbers = #tpu.dot_dimension_numbers<[1], [0], [0], [1], [0, 0, 1, 1], [], []>} : vector<64x32xf32>, vector<32x32xf32>, vector<64x32xf32> -> vector<64x32xf32>
    %217 = arith.addf %209, %216 : vector<64x32xf32>
    %c2_160 = arith.constant 2 : index
    %c0_161 = arith.constant 0 : index
    %c0_162 = arith.constant 0 : index
    %218 = vector.load %arg6[%c2_160, %c0_161, %c0_162] : memref<3x64x32xf32, #tpu.memory_space<vmem>>, vector<1x64x32xf32>
    %219 = vector.shape_cast %218 : vector<1x64x32xf32> to vector<64x32xf32>
    %220 = vector.extract_strided_slice %199 {offsets = [0, 66], sizes = [32, 33], strides = [1, 1]} : vector<32x132xf32> to vector<32x33xf32>
    %cst_163 = arith.constant dense<0.000000e+00> : vector<64x33xf32>
    %221 = tpu.matmul %219, %220, %cst_163 {dimension_numbers = #tpu.dot_dimension_numbers<[1], [0], [0], [1], [0, 0, 1, 1], [], []>} : vector<64x32xf32>, vector<32x33xf32>, vector<64x33xf32> -> vector<64x33xf32>
    %222 = arith.addf %214, %221 : vector<64x33xf32>
    %223 = vector.extract_strided_slice %199 {offsets = [0, 1], sizes = [32, 32], strides = [1, 1]} : vector<32x132xf32> to vector<32x32xf32>
    %cst_164 = arith.constant dense<0.000000e+00> : vector<64x32xf32>
    %224 = tpu.matmul %219, %223, %cst_164 {dimension_numbers = #tpu.dot_dimension_numbers<[1], [0], [0], [1], [0, 0, 1, 1], [], []>} : vector<64x32xf32>, vector<32x32xf32>, vector<64x32xf32> -> vector<64x32xf32>
    %225 = arith.addf %217, %224 : vector<64x32xf32>
    %c0_165 = arith.constant 0 : index
    %c0_166 = arith.constant 0 : index
    %226 = vector.load %arg7[%c0_165, %c0_166] : memref<64x1xf32, #tpu.memory_space<vmem>>, vector<64x1xf32>
    %227 = vector.broadcast %226 : vector<64x1xf32> to vector<64x33xf32>
    %228 = arith.addf %222, %227 : vector<64x33xf32>
    %cst_167 = arith.constant 0.000000e+00 : f32
    %229 = vector.broadcast %cst_167 : f32 to vector<64x33xf32>
    %230 = arith.maximumf %228, %229 : vector<64x33xf32>
    %231 = vector.broadcast %226 : vector<64x1xf32> to vector<64x32xf32>
    %232 = arith.addf %225, %231 : vector<64x32xf32>
    %cst_168 = arith.constant 0.000000e+00 : f32
    %233 = vector.broadcast %cst_168 : f32 to vector<64x32xf32>
    %234 = arith.maximumf %232, %233 : vector<64x32xf32>
    %235 = vector.extract_strided_slice %230 {offsets = [0, 0], sizes = [64, 32], strides = [1, 1]} : vector<64x33xf32> to vector<64x32xf32>
    %236 = arith.maximumf %235, %234 : vector<64x32xf32>
    %237 = vector.extract_strided_slice %230 {offsets = [0, 1], sizes = [64, 32], strides = [1, 1]} : vector<64x33xf32> to vector<64x32xf32>
    %238 = arith.maximumf %236, %237 : vector<64x32xf32>
    %c0_169 = arith.constant 0 : index
    %c0_170 = arith.constant 0 : index
    %239 = vector.load %arg14[%c0_169, %c0_170] : memref<32x32xf32, #tpu.memory_space<vmem>>, vector<32x32xf32>
    %cst_171 = arith.constant dense<0.000000e+00> : vector<64x32xf32>
    %240 = tpu.matmul %238, %239, %cst_171 {dimension_numbers = #tpu.dot_dimension_numbers<[1], [0], [0], [1], [0, 0, 1, 1], [], []>} : vector<64x32xf32>, vector<32x32xf32>, vector<64x32xf32> -> vector<64x32xf32>
    %cst_172 = arith.constant 0.000000e+00 : f32
    %241 = vector.broadcast %cst_172 : f32 to vector<128x8xf32>
    %cst_173 = arith.constant 0.000000e+00 : f32
    %242 = vector.broadcast %cst_173 : f32 to vector<128x7xf32>
    %c0_174 = arith.constant 0 : index
    %c0_175 = arith.constant 0 : index
    %c0_176 = arith.constant 0 : index
    %243 = vector.load %arg8[%c0_174, %c0_175, %c0_176] : memref<3x128x64xf32, #tpu.memory_space<vmem>>, vector<1x128x64xf32>
    %244 = vector.shape_cast %243 : vector<1x128x64xf32> to vector<128x64xf32>
    %245 = vector.extract_strided_slice %240 {offsets = [0, 0], sizes = [64, 8], strides = [1, 1]} : vector<64x32xf32> to vector<64x8xf32>
    %cst_177 = arith.constant dense<0.000000e+00> : vector<128x8xf32>
    %246 = tpu.matmul %244, %245, %cst_177 {dimension_numbers = #tpu.dot_dimension_numbers<[1], [0], [0], [1], [0, 0, 1, 1], [], []>} : vector<128x64xf32>, vector<64x8xf32>, vector<128x8xf32> -> vector<128x8xf32>
    %247 = arith.addf %241, %246 : vector<128x8xf32>
    %248 = vector.extract_strided_slice %240 {offsets = [0, 16], sizes = [64, 7], strides = [1, 1]} : vector<64x32xf32> to vector<64x7xf32>
    %cst_178 = arith.constant dense<0.000000e+00> : vector<128x7xf32>
    %249 = tpu.matmul %244, %248, %cst_178 {dimension_numbers = #tpu.dot_dimension_numbers<[1], [0], [0], [1], [0, 0, 1, 1], [], []>} : vector<128x64xf32>, vector<64x7xf32>, vector<128x7xf32> -> vector<128x7xf32>
    %250 = arith.addf %242, %249 : vector<128x7xf32>
    %c1_179 = arith.constant 1 : index
    %c0_180 = arith.constant 0 : index
    %c0_181 = arith.constant 0 : index
    %251 = vector.load %arg8[%c1_179, %c0_180, %c0_181] : memref<3x128x64xf32, #tpu.memory_space<vmem>>, vector<1x128x64xf32>
    %252 = vector.shape_cast %251 : vector<1x128x64xf32> to vector<128x64xf32>
    %253 = vector.extract_strided_slice %240 {offsets = [0, 8], sizes = [64, 8], strides = [1, 1]} : vector<64x32xf32> to vector<64x8xf32>
    %cst_182 = arith.constant dense<0.000000e+00> : vector<128x8xf32>
    %254 = tpu.matmul %252, %253, %cst_182 {dimension_numbers = #tpu.dot_dimension_numbers<[1], [0], [0], [1], [0, 0, 1, 1], [], []>} : vector<128x64xf32>, vector<64x8xf32>, vector<128x8xf32> -> vector<128x8xf32>
    %255 = arith.addf %247, %254 : vector<128x8xf32>
    %256 = vector.extract_strided_slice %240 {offsets = [0, 24], sizes = [64, 7], strides = [1, 1]} : vector<64x32xf32> to vector<64x7xf32>
    %cst_183 = arith.constant dense<0.000000e+00> : vector<128x7xf32>
    %257 = tpu.matmul %252, %256, %cst_183 {dimension_numbers = #tpu.dot_dimension_numbers<[1], [0], [0], [1], [0, 0, 1, 1], [], []>} : vector<128x64xf32>, vector<64x7xf32>, vector<128x7xf32> -> vector<128x7xf32>
    %258 = arith.addf %250, %257 : vector<128x7xf32>
    %c2_184 = arith.constant 2 : index
    %c0_185 = arith.constant 0 : index
    %c0_186 = arith.constant 0 : index
    %259 = vector.load %arg8[%c2_184, %c0_185, %c0_186] : memref<3x128x64xf32, #tpu.memory_space<vmem>>, vector<1x128x64xf32>
    %260 = vector.shape_cast %259 : vector<1x128x64xf32> to vector<128x64xf32>
    %261 = vector.extract_strided_slice %240 {offsets = [0, 16], sizes = [64, 8], strides = [1, 1]} : vector<64x32xf32> to vector<64x8xf32>
    %cst_187 = arith.constant dense<0.000000e+00> : vector<128x8xf32>
    %262 = tpu.matmul %260, %261, %cst_187 {dimension_numbers = #tpu.dot_dimension_numbers<[1], [0], [0], [1], [0, 0, 1, 1], [], []>} : vector<128x64xf32>, vector<64x8xf32>, vector<128x8xf32> -> vector<128x8xf32>
    %263 = arith.addf %255, %262 : vector<128x8xf32>
    %264 = vector.extract_strided_slice %240 {offsets = [0, 1], sizes = [64, 7], strides = [1, 1]} : vector<64x32xf32> to vector<64x7xf32>
    %cst_188 = arith.constant dense<0.000000e+00> : vector<128x7xf32>
    %265 = tpu.matmul %260, %264, %cst_188 {dimension_numbers = #tpu.dot_dimension_numbers<[1], [0], [0], [1], [0, 0, 1, 1], [], []>} : vector<128x64xf32>, vector<64x7xf32>, vector<128x7xf32> -> vector<128x7xf32>
    %266 = arith.addf %258, %265 : vector<128x7xf32>
    %c0_189 = arith.constant 0 : index
    %c0_190 = arith.constant 0 : index
    %267 = vector.load %arg9[%c0_189, %c0_190] : memref<128x1xf32, #tpu.memory_space<vmem>>, vector<128x1xf32>
    %268 = vector.broadcast %267 : vector<128x1xf32> to vector<128x8xf32>
    %269 = arith.addf %263, %268 : vector<128x8xf32>
    %cst_191 = arith.constant 0.000000e+00 : f32
    %270 = vector.broadcast %cst_191 : f32 to vector<128x8xf32>
    %271 = arith.maximumf %269, %270 : vector<128x8xf32>
    %272 = vector.broadcast %267 : vector<128x1xf32> to vector<128x7xf32>
    %273 = arith.addf %266, %272 : vector<128x7xf32>
    %cst_192 = arith.constant 0.000000e+00 : f32
    %274 = vector.broadcast %cst_192 : f32 to vector<128x7xf32>
    %275 = arith.maximumf %273, %274 : vector<128x7xf32>
    %276 = vector.extract_strided_slice %271 {offsets = [0, 0], sizes = [128, 7], strides = [1, 1]} : vector<128x8xf32> to vector<128x7xf32>
    %277 = arith.maximumf %276, %275 : vector<128x7xf32>
    %278 = vector.extract_strided_slice %271 {offsets = [0, 1], sizes = [128, 7], strides = [1, 1]} : vector<128x8xf32> to vector<128x7xf32>
    %279 = arith.maximumf %277, %278 : vector<128x7xf32>
    %c0_193 = arith.constant 0 : index
    %c0_194 = arith.constant 0 : index
    %280 = vector.load %arg15[%c0_193, %c0_194] : memref<7x8xf32, #tpu.memory_space<vmem>>, vector<7x8xf32>
    %cst_195 = arith.constant dense<0.000000e+00> : vector<128x8xf32>
    %281 = tpu.matmul %279, %280, %cst_195 {dimension_numbers = #tpu.dot_dimension_numbers<[1], [0], [0], [1], [0, 0, 1, 1], [], []>} : vector<128x7xf32>, vector<7x8xf32>, vector<128x8xf32> -> vector<128x8xf32>
    %cst_196 = arith.constant 0.000000e+00 : f32
    %282 = vector.broadcast %cst_196 : f32 to vector<256x2xf32>
    %cst_197 = arith.constant 0.000000e+00 : f32
    %283 = vector.broadcast %cst_197 : f32 to vector<256x1xf32>
    %c0_198 = arith.constant 0 : index
    %c0_199 = arith.constant 0 : index
    %c0_200 = arith.constant 0 : index
    %284 = vector.load %arg10[%c0_198, %c0_199, %c0_200] : memref<3x256x128xf32, #tpu.memory_space<vmem>>, vector<1x256x128xf32>
    %285 = vector.shape_cast %284 : vector<1x256x128xf32> to vector<256x128xf32>
    %286 = vector.extract_strided_slice %281 {offsets = [0, 0], sizes = [128, 2], strides = [1, 1]} : vector<128x8xf32> to vector<128x2xf32>
    %cst_201 = arith.constant dense<0.000000e+00> : vector<256x2xf32>
    %287 = tpu.matmul %285, %286, %cst_201 {dimension_numbers = #tpu.dot_dimension_numbers<[1], [0], [0], [1], [0, 0, 1, 1], [], []>} : vector<256x128xf32>, vector<128x2xf32>, vector<256x2xf32> -> vector<256x2xf32>
    %288 = arith.addf %282, %287 : vector<256x2xf32>
    %289 = vector.extract_strided_slice %281 {offsets = [0, 4], sizes = [128, 1], strides = [1, 1]} : vector<128x8xf32> to vector<128x1xf32>
    %cst_202 = arith.constant dense<0.000000e+00> : vector<256x1xf32>
    %290 = tpu.matmul %285, %289, %cst_202 {dimension_numbers = #tpu.dot_dimension_numbers<[1], [0], [0], [1], [0, 0, 1, 1], [], []>} : vector<256x128xf32>, vector<128x1xf32>, vector<256x1xf32> -> vector<256x1xf32>
    %291 = arith.addf %283, %290 : vector<256x1xf32>
    %c1_203 = arith.constant 1 : index
    %c0_204 = arith.constant 0 : index
    %c0_205 = arith.constant 0 : index
    %292 = vector.load %arg10[%c1_203, %c0_204, %c0_205] : memref<3x256x128xf32, #tpu.memory_space<vmem>>, vector<1x256x128xf32>
    %293 = vector.shape_cast %292 : vector<1x256x128xf32> to vector<256x128xf32>
    %294 = vector.extract_strided_slice %281 {offsets = [0, 2], sizes = [128, 2], strides = [1, 1]} : vector<128x8xf32> to vector<128x2xf32>
    %cst_206 = arith.constant dense<0.000000e+00> : vector<256x2xf32>
    %295 = tpu.matmul %293, %294, %cst_206 {dimension_numbers = #tpu.dot_dimension_numbers<[1], [0], [0], [1], [0, 0, 1, 1], [], []>} : vector<256x128xf32>, vector<128x2xf32>, vector<256x2xf32> -> vector<256x2xf32>
    %296 = arith.addf %288, %295 : vector<256x2xf32>
    %297 = vector.extract_strided_slice %281 {offsets = [0, 6], sizes = [128, 1], strides = [1, 1]} : vector<128x8xf32> to vector<128x1xf32>
    %cst_207 = arith.constant dense<0.000000e+00> : vector<256x1xf32>
    %298 = tpu.matmul %293, %297, %cst_207 {dimension_numbers = #tpu.dot_dimension_numbers<[1], [0], [0], [1], [0, 0, 1, 1], [], []>} : vector<256x128xf32>, vector<128x1xf32>, vector<256x1xf32> -> vector<256x1xf32>
    %299 = arith.addf %291, %298 : vector<256x1xf32>
    %c2_208 = arith.constant 2 : index
    %c0_209 = arith.constant 0 : index
    %c0_210 = arith.constant 0 : index
    %300 = vector.load %arg10[%c2_208, %c0_209, %c0_210] : memref<3x256x128xf32, #tpu.memory_space<vmem>>, vector<1x256x128xf32>
    %301 = vector.shape_cast %300 : vector<1x256x128xf32> to vector<256x128xf32>
    %302 = vector.extract_strided_slice %281 {offsets = [0, 4], sizes = [128, 2], strides = [1, 1]} : vector<128x8xf32> to vector<128x2xf32>
    %cst_211 = arith.constant dense<0.000000e+00> : vector<256x2xf32>
    %303 = tpu.matmul %301, %302, %cst_211 {dimension_numbers = #tpu.dot_dimension_numbers<[1], [0], [0], [1], [0, 0, 1, 1], [], []>} : vector<256x128xf32>, vector<128x2xf32>, vector<256x2xf32> -> vector<256x2xf32>
    %304 = arith.addf %296, %303 : vector<256x2xf32>
    %305 = vector.extract_strided_slice %281 {offsets = [0, 1], sizes = [128, 1], strides = [1, 1]} : vector<128x8xf32> to vector<128x1xf32>
    %cst_212 = arith.constant dense<0.000000e+00> : vector<256x1xf32>
    %306 = tpu.matmul %301, %305, %cst_212 {dimension_numbers = #tpu.dot_dimension_numbers<[1], [0], [0], [1], [0, 0, 1, 1], [], []>} : vector<256x128xf32>, vector<128x1xf32>, vector<256x1xf32> -> vector<256x1xf32>
    %307 = arith.addf %299, %306 : vector<256x1xf32>
    %c0_213 = arith.constant 0 : index
    %c0_214 = arith.constant 0 : index
    %308 = vector.load %arg11[%c0_213, %c0_214] : memref<256x1xf32, #tpu.memory_space<vmem>>, vector<256x1xf32>
    %309 = vector.broadcast %308 : vector<256x1xf32> to vector<256x2xf32>
    %310 = arith.addf %304, %309 : vector<256x2xf32>
    %cst_215 = arith.constant 0.000000e+00 : f32
    %311 = vector.broadcast %cst_215 : f32 to vector<256x2xf32>
    %312 = arith.maximumf %310, %311 : vector<256x2xf32>
    %313 = arith.addf %307, %308 : vector<256x1xf32>
    %cst_216 = arith.constant 0.000000e+00 : f32
    %314 = vector.broadcast %cst_216 : f32 to vector<256x1xf32>
    %315 = arith.maximumf %313, %314 : vector<256x1xf32>
    %316 = vector.extract_strided_slice %312 {offsets = [0, 0], sizes = [256, 1], strides = [1, 1]} : vector<256x2xf32> to vector<256x1xf32>
    %317 = arith.maximumf %316, %315 : vector<256x1xf32>
    %318 = vector.extract_strided_slice %312 {offsets = [0, 1], sizes = [256, 1], strides = [1, 1]} : vector<256x2xf32> to vector<256x1xf32>
    %319 = arith.maximumf %317, %318 : vector<256x1xf32>
    %c0_217 = arith.constant 0 : index
    %c0_218 = arith.constant 0 : index
    %320 = vector.load %arg17[%c0_217, %c0_218] : memref<128x1xf32, #tpu.memory_space<vmem>>, vector<128x1xf32>
    %c0_219 = arith.constant 0 : index
    %c0_220 = arith.constant 0 : index
    %c0_221 = arith.constant 0 : index
    %321 = vector.load %arg16[%c0_219, %c0_220, %c0_221] : memref<1x128x256xf32, #tpu.memory_space<vmem>>, vector<1x128x256xf32>
    %322 = vector.shape_cast %321 : vector<1x128x256xf32> to vector<128x256xf32>
    %cst_222 = arith.constant dense<0.000000e+00> : vector<128x1xf32>
    %323 = tpu.matmul %322, %319, %cst_222 {dimension_numbers = #tpu.dot_dimension_numbers<[1], [0], [0], [1], [0, 0, 1, 1], [], []>} : vector<128x256xf32>, vector<256x1xf32>, vector<128x1xf32> -> vector<128x1xf32>
    %324 = arith.addf %320, %323 : vector<128x1xf32>
    %cst_223 = arith.constant 0.000000e+00 : f32
    %325 = vector.broadcast %cst_223 : f32 to vector<128x1xf32>
    %326 = arith.maximumf %324, %325 : vector<128x1xf32>
    %c0_224 = arith.constant 0 : index
    %c0_225 = arith.constant 0 : index
    %327 = vector.load %arg18[%c0_224, %c0_225] : memref<7x128xf32, #tpu.memory_space<vmem>>, vector<7x128xf32>
    %cst_226 = arith.constant dense<0.000000e+00> : vector<7x1xf32>
    %328 = tpu.matmul %327, %326, %cst_226 {dimension_numbers = #tpu.dot_dimension_numbers<[1], [0], [0], [1], [0, 0, 1, 1], [], []>} : vector<7x128xf32>, vector<128x1xf32>, vector<7x1xf32> -> vector<7x1xf32>
    %c0_227 = arith.constant 0 : index
    %c0_228 = arith.constant 0 : index
    %329 = vector.load %arg19[%c0_227, %c0_228] : memref<7x1xf32, #tpu.memory_space<vmem>>, vector<7x1xf32>
    %330 = arith.addf %328, %329 : vector<7x1xf32>
    %cst_229 = arith.constant dense<0xFF800000> : vector<1xf32>
    %331 = vector.multi_reduction <maximumf>, %330, %cst_229 [0] : vector<7x1xf32> to vector<1xf32>
    %332 = vector.shape_cast %331 : vector<1xf32> to vector<1x1xf32>
    %333 = vector.broadcast %332 : vector<1x1xf32> to vector<7x1xf32>
    %334 = arith.subf %330, %333 : vector<7x1xf32>
    %335 = math.exp %334 : vector<7x1xf32>
    %cst_230 = arith.constant dense<0.000000e+00> : vector<1xf32>
    %336 = vector.multi_reduction <add>, %335, %cst_230 [0] : vector<7x1xf32> to vector<1xf32>
    %337 = vector.shape_cast %336 : vector<1xf32> to vector<1x1xf32>
    %338 = vector.broadcast %337 : vector<1x1xf32> to vector<7x1xf32>
    %339 = arith.divf %335, %338 : vector<7x1xf32>
    %c0_231 = arith.constant 0 : index
    %c0_232 = arith.constant 0 : index
    %c0_233 = arith.constant 0 : index
    %340 = vector.load %arg20[%c0_231, %c0_232, %c0_233] : memref<1x7x1xf32, #tpu.memory_space<vmem>>, vector<1x7x1xf32>
    %341 = vector.shape_cast %340 : vector<1x7x1xf32> to vector<7x1xf32>
    %342 = vector.shape_cast %339 : vector<7x1xf32> to vector<1x7x1xf32>
    tpu.vector_store %arg20[%c0_231, %c0_232, %c0_233], %342 {strides = array<i32>} : memref<1x7x1xf32, #tpu.memory_space<vmem>>, vector<1x7x1xf32>,
    return
  }
  func.func @transform_0(%arg0: i32) -> (i32, i32, i32) {
    %c0_i32 = arith.constant 0 : i32
    %c0_i32_0 = arith.constant 0 : i32
    %c0_i32_1 = arith.constant 0 : i32
    return %arg0, %c0_i32, %c0_i32_0 : i32, i32, i32
  }
  func.func @transform_1(%arg0: i32) -> (i32, i32, i32) {
    %c0_i32 = arith.constant 0 : i32
    %c0_i32_0 = arith.constant 0 : i32
    %c0_i32_1 = arith.constant 0 : i32
    %c0_i32_2 = arith.constant 0 : i32
    return %c0_i32, %c0_i32_0, %c0_i32_1 : i32, i32, i32
  }
  func.func @transform_2(%arg0: i32) -> (i32, i32) {
    %c0_i32 = arith.constant 0 : i32
    %c0_i32_0 = arith.constant 0 : i32
    %c0_i32_1 = arith.constant 0 : i32
    return %c0_i32, %c0_i32_0 : i32, i32
  }
  func.func @transform_3(%arg0: i32) -> (i32, i32, i32) {
    %c0_i32 = arith.constant 0 : i32
    %c0_i32_0 = arith.constant 0 : i32
    %c0_i32_1 = arith.constant 0 : i32
    %c0_i32_2 = arith.constant 0 : i32
    return %c0_i32, %c0_i32_0, %c0_i32_1 : i32, i32, i32
  }
  func.func @transform_4(%arg0: i32) -> (i32, i32) {
    %c0_i32 = arith.constant 0 : i32
    %c0_i32_0 = arith.constant 0 : i32
    %c0_i32_1 = arith.constant 0 : i32
    return %c0_i32, %c0_i32_0 : i32, i32
  }
  func.func @transform_5(%arg0: i32) -> (i32, i32, i32) {
    %c0_i32 = arith.constant 0 : i32
    %c0_i32_0 = arith.constant 0 : i32
    %c0_i32_1 = arith.constant 0 : i32
    %c0_i32_2 = arith.constant 0 : i32
    return %c0_i32, %c0_i32_0, %c0_i32_1 : i32, i32, i32
  }
  func.func @transform_6(%arg0: i32) -> (i32, i32) {
    %c0_i32 = arith.constant 0 : i32
    %c0_i32_0 = arith.constant 0 : i32
    %c0_i32_1 = arith.constant 0 : i32
    return %c0_i32, %c0_i32_0 : i32, i32
  }
  func.func @transform_7(%arg0: i32) -> (i32, i32, i32) {
    %c0_i32 = arith.constant 0 : i32
    %c0_i32_0 = arith.constant 0 : i32
    %c0_i32_1 = arith.constant 0 : i32
    %c0_i32_2 = arith.constant 0 : i32
    return %c0_i32, %c0_i32_0, %c0_i32_1 : i32, i32, i32
  }
  func.func @transform_8(%arg0: i32) -> (i32, i32) {
    %c0_i32 = arith.constant 0 : i32
    %c0_i32_0 = arith.constant 0 : i32
    %c0_i32_1 = arith.constant 0 : i32
    return %c0_i32, %c0_i32_0 : i32, i32
  }
  func.func @transform_9(%arg0: i32) -> (i32, i32, i32) {
    %c0_i32 = arith.constant 0 : i32
    %c0_i32_0 = arith.constant 0 : i32
    %c0_i32_1 = arith.constant 0 : i32
    %c0_i32_2 = arith.constant 0 : i32
    return %c0_i32, %c0_i32_0, %c0_i32_1 : i32, i32, i32
  }
  func.func @transform_10(%arg0: i32) -> (i32, i32) {
    %c0_i32 = arith.constant 0 : i32
    %c0_i32_0 = arith.constant 0 : i32
    %c0_i32_1 = arith.constant 0 : i32
    return %c0_i32, %c0_i32_0 : i32, i32
  }
  func.func @transform_11(%arg0: i32) -> (i32, i32) {
    %c0_i32 = arith.constant 0 : i32
    %c0_i32_0 = arith.constant 0 : i32
    %c0_i32_1 = arith.constant 0 : i32
    return %c0_i32, %c0_i32_0 : i32, i32
  }
  func.func @transform_12(%arg0: i32) -> (i32, i32) {
    %c0_i32 = arith.constant 0 : i32
    %c0_i32_0 = arith.constant 0 : i32
    %c0_i32_1 = arith.constant 0 : i32
    return %c0_i32, %c0_i32_0 : i32, i32
  }
  func.func @transform_13(%arg0: i32) -> (i32, i32) {
    %c0_i32 = arith.constant 0 : i32
    %c0_i32_0 = arith.constant 0 : i32
    %c0_i32_1 = arith.constant 0 : i32
    return %c0_i32, %c0_i32_0 : i32, i32
  }
  func.func @transform_14(%arg0: i32) -> (i32, i32) {
    %c0_i32 = arith.constant 0 : i32
    %c0_i32_0 = arith.constant 0 : i32
    %c0_i32_1 = arith.constant 0 : i32
    return %c0_i32, %c0_i32_0 : i32, i32
  }
  func.func @transform_15(%arg0: i32) -> (i32, i32, i32) {
    %c0_i32 = arith.constant 0 : i32
    %c0_i32_0 = arith.constant 0 : i32
    %c0_i32_1 = arith.constant 0 : i32
    %c0_i32_2 = arith.constant 0 : i32
    return %c0_i32, %c0_i32_0, %c0_i32_1 : i32, i32, i32
  }
  func.func @transform_16(%arg0: i32) -> (i32, i32) {
    %c0_i32 = arith.constant 0 : i32
    %c0_i32_0 = arith.constant 0 : i32
    %c0_i32_1 = arith.constant 0 : i32
    return %c0_i32, %c0_i32_0 : i32, i32
  }
  func.func @transform_17(%arg0: i32) -> (i32, i32) {
    %c0_i32 = arith.constant 0 : i32
    %c0_i32_0 = arith.constant 0 : i32
    %c0_i32_1 = arith.constant 0 : i32
    return %c0_i32, %c0_i32_0 : i32, i32
  }
  func.func @transform_18(%arg0: i32) -> (i32, i32) {
    %c0_i32 = arith.constant 0 : i32
    %c0_i32_0 = arith.constant 0 : i32
    %c0_i32_1 = arith.constant 0 : i32
    return %c0_i32, %c0_i32_0 : i32, i32
  }
  func.func @transform_19(%arg0: i32) -> (i32, i32, i32) {
    %c0_i32 = arith.constant 0 : i32
    %c0_i32_0 = arith.constant 0 : i32
    %c0_i32_1 = arith.constant 0 : i32
    return %arg0, %c0_i32, %c0_i32_0 : i32, i32, i32
  }
}

</mosaic_0001>

<bundles_post_ra>
// kernel: emovo_cnn_forward.1
= control target key start
LH: loop header
LB: loop body
LE: loop exit
PB: predicated region body
PF: predicated region fallthrough
CT: control target
= control target key end

     0   :  { %s29974_s0 = inlined_call_operand.vmem [shape: f32[2,2,8000], index: 0, kind: input, shape index: {}]   ;;  %s29975_s1 = inlined_call_operand.vmem [shape: f32[11,16,2], index: 1, kind: input, shape index: {}]   ;;  %s29976_s2 = inlined_call_operand.vmem [shape: f32[16,1], index: 2, kind: input, shape index: {}]   ;;  %s29977_s3 = inlined_call_operand.vmem [shape: f32[7,32,16], index: 3, kind: input, shape index: {}]   ;;  %s29978_s4 = inlined_call_operand.vmem [shape: f32[32,1], index: 4, kind: input, shape index: {}]   ;;  %s29979_s5 = inlined_call_operand.vmem [shape: f32[3,64,32], index: 5, kind: input, shape index: {}]   ;;  %s29980_s6 = inlined_call_operand.vmem [shape: f32[64,1], index: 6, kind: input, shape index: {}]   ;;  %s29981_s7 = inlined_call_operand.vmem [shape: f32[3,128,64], index: 7, kind: input, shape index: {}]   ;;  %s29982_s8 = inlined_call_operand.vmem [shape: f32[128,1], index: 8, kind: input, shape index: {}]   ;;  %s29983_s9 = inlined_call_operand.vmem [shape: f32[3,256,128], index: 9, kind: input, shape index: {}]   ;;  %s29984_s10 = inlined_call_operand.vmem [shape: f32[256,1], index: 10, kind: input, shape index: {}]   ;;  %s29985_s11 = inlined_call_operand.vmem [shape: f32[798,798], index: 11, kind: input, shape index: {}]   ;;  %s29986_s12 = inlined_call_operand.vmem [shape: f32[131,132], index: 12, kind: input, shape index: {}]   ;;  %s29987_s13 = inlined_call_operand.vmem [shape: f32[32,32], index: 13, kind: input, shape index: {}]   ;;  %s29988_s14 = inlined_call_operand.vmem [shape: f32[7,8], index: 14, kind: input, shape index: {}]   ;;  %s29989_s15 = inlined_call_operand.vmem [shape: f32[1,128,256], index: 15, kind: input, shape index: {}]   ;;  %s29990_s16 = inlined_call_operand.vmem [shape: f32[128,1], index: 16, kind: input, shape index: {}]   ;;  %s29991_s17 = inlined_call_operand.vmem [shape: f32[7,128], index: 17, kind: input, shape index: {}]   ;;  %s29992_s18 = inlined_call_operand.vmem [shape: f32[7,1], index: 18, kind: input, shape index: {}]   ;;  %s29993_s19 = inlined_call_operand.vmem [shape: f32[2,7,1], index: 19, kind: output, shape index: {}]  }
   0x1   :  { %30007 = sst [smem:[#allocation2_spill]] %s29974_s0  ;;  %s23627_s0 = smov 0  }
   0x2   :  { %30008 = sst [smem:[#allocation3_spill]] %s29975_s1 }
   0x3   :  { %30009 = sst [smem:[#allocation4_spill]] %s29976_s2 }
   0x4   :  { %30010 = sst [smem:[#allocation5_spill]] %s29977_s3 }
   0x5 LB: > { %s18467_s30 = sadd.s32 4294967295, %s23498_s0   ;;  %p18471_p0 = scmp.ge.s32.totalorder %s23498_s0, 1  ;;  %s23498_s0 = sphi %s23627_s0, %s29_s0  }
   0x6   : > { %p537_p1 = scmp.lt.s32.totalorder %s23498_s0, 3 }
   0x8   : > { %p538_p2 = pnand %p18471_p0, %p537_p1 }
   0x9   : > { %p592_p3 = scmp.lt.s32.totalorder (!%p538_p2), %s18467_s30, 1  ;;  %v618_v0 = vlaneseq (!%p538_p2)  ;;  %v23500_v1 = vmov (!%p538_p2), 1983009808   ;;  %v23501_v6 = vmov (!%p538_p2), 0.0   ;;  %s30011_s22 = sld [smem:[#allocation2_spill]] (!%p538_p2)  ;;  %vm661_vm0 = vcmask (!%p538_p2), 785408  }
   0xa   : > { %541 = sbr.rel (%p538_p2) target bundleno = 4896 (0x1320), region = 96  ;;  %v616_v2 = vunpack.c.l.s4 (!%p538_p2), %v23500_v1  ;;  %760 = vmatprep.mubr.f32.mxu1 (!%p538_p2), %v23501_v6  ;;  %754 = vmatprep.mubr.f32.mxu0 (!%p538_p2), %v23501_v6  ;;  %s23502_s23 = smov (!%p538_p2), 96   ;;  %vm675_vm1 = vcmask (!%p538_p2), 1041408   ;;  %vm668_vm2 = vcmask (!%p538_p2), 15360   ;;  %vm1408_vm3 = vcmask (!%p538_p2), 523264  }
   0xb   : > { %v619_v3 = vshrl.u32 (!%p538_p2), %v618_v0, 7  ;;  %s23503_s24 = smov (!%p538_p2), 64   ;;  %s23504_s25 = smov (!%p538_p2), 32   ;;  %vm2561_vm4 = vcmask (!%p538_p2), 261120   ;;  %vm4895_vm5 = vcmask (!%p538_p2), 1039360   ;;  %vm5687_vm6 = vcmask (!%p538_p2), 777216  }
   0xc   : > { %v617_v4 = vunpack.c.0.s8 (!%p538_p2), %v616_v2  ;;  %s29999_s3 = smov (!%p538_p2), 127   ;;  %s30012_s28 = sld [smem:[#allocation3_spill]] (!%p538_p2)  ;;  %vm6479_vm7 = vcmask (!%p538_p2), 515072   ;;  %vm7251_vm8 = vcmask (!%p538_p2), 252928   ;;  %vm10045_vm9 = vcmask (!%p538_p2), 1045504  }
   0xd   : > { %s23508_s29 = smov (!%p538_p2), 31   ;;  %vm23510_vm10 = vmmov (!%p538_p2), 1   ;;  %vm10038_vm12 = vcmask (!%p538_p2), 244736   ;;  %vm11319_vm13 = vcmask (!%p538_p2), 130048   ;;  %s23513_s1 = smov (!%p538_p2), 118   ;;  %vm11534_vm14 = vcmask (!%p538_p2), 883712  }
   0xe   : > { %v23638_v5 = vsub.s32 (!%p538_p2), %v617_v4, %v619_v3  ;;  %vm26511_vm11 = vmpackc.low (!%p538_p2), %vm10045_vm9, %vm23510_vm10  ;;  %s23516_s26 = smov (!%p538_p2), 117   ;;  %s23517_s27 = smov (!%p538_p2), 123   ;;  %vm11640_vm15 = vcmask (!%p538_p2), 924672   ;;  %vm13039_vm9 = vcmask (!%p538_p2), 1042432   ;;  %vm13026_vm10 = vcmask (!%p538_p2), 23552  }
  0x11   : > { %s30022_s30 = smov (!%p592_p3, %s18467_s30), 1 }
  0x12   : > { %s22904_s20 = smul.u32 126, %s30022_s30 }
  0x14   : > { %s23645_s2 = scalar_lea.vmem %s30011_s22, %s22904_s20  ;;  %s30013_s22 = sld [smem:[#allocation4_spill]] }
  0x15   : > { %v610_v7 = vld [vmem:[%s23645_s2 + $0xc] sm:$0xff]  ;;  %v611_v8 = vld [vmem:[%s23645_s2 + $0x14] sm:$0x3f]  ;;  %v605_v27 = vld [vmem:[%s23645_s2 + $0x3e] sm:$0xff] }
  0x16   : > { %v23650_v9 = vrot.slane %v610_v7, %v23638_v5  ;;  %v614_v10 = vcombine.high %v610_v7, %v610_v7  ;;  %v638_v13 = vrot.slane %v611_v8, %v23638_v5  ;;  %v1357_v14 = vld [vmem:[%s23645_s2 + $0x4a] sm:$0xff]  ;;  %v631_v18 = vcombine.high %v611_v8, %v611_v8  ;;  %v1358_v22 = vld [vmem:[%s23645_s2 + $0x52] sm:$0x3f]  ;;  %v2113_v37 = vld [vmem:[%s23645_s2 + $0x18] sm:$0xff] }
  0x17   : > { %v23672_v17 = vrot.slane %v1357_v14, %v23638_v5  ;;  %v1361_v21 = vcombine.high %v1357_v14, %v1357_v14  ;;  %v1385_v24 = vrot.slane %v1358_v22, %v23638_v5  ;;  %v1378_v25 = vcombine.high %v1358_v22, %v1358_v22  ;;  %v606_v33 = vld [vmem:[%s23645_s2 + $0x46] sm:$0x3f]  ;;  %v2114_v44 = vld [vmem:[%s23645_s2 + $0x20] sm:$0x3f]  ;;  %v2510_v49 = vld [vmem:[%s23645_s2 + $0x56] sm:$0xff] }
  0x18   : > { %647 = vrot.lane.b32.xlu1 %v23650_v9, %s23502_s23  ;;  %v23656_v11 = vcombine.high %v23650_v9, %v23650_v9  ;;  %v23659_v12 = vrot.slane %v614_v10, %v23638_v5  ;;  %v646_v16 = vcombine.high %v638_v13, %v638_v13  ;;  %v645_v20 = vrot.slane %v631_v18, %v23638_v5  ;;  %v2511_v56 = vld [vmem:[%s23645_s2 + $0x5e] sm:$0x3f]  ;;  %v2905_v58 = vld [vmem:[%s23645_s2 + $0x24] sm:$0xff]  ;;  %v2906_v2 = vld [vmem:[%s23645_s2 + $0x2c] sm:$0x3f] }
  0x19   : > { %v23679_v19 = vcombine.high %v23672_v17, %v23672_v17  ;;  %v23688_v23 = vrot.slane %v1361_v21, %v23638_v5  ;;  %v1392_v28 = vrot.slane %v1378_v25, %v23638_v5  ;;  %v1737_v29 = vcombine.high %v605_v27, %v605_v27  ;;  %v4053_v10 = vld [vmem:[%s23645_s2 + $0x70] sm:$0xff]  ;;  %v4054_v21 = vld [vmem:[%s23645_s2 + $0x78] sm:$0x3f] }
  0x1a   : > { %649 = vrot.lane.b32.xlu0 %v23656_v11, %s23502_s23  ;;  %v23667_v15 = vcombine.high %v23659_v12, %v23659_v12  ;;  %v1393_v30 = vcombine.high %v1385_v24, %v1385_v24  ;;  %v23705_v31 = vrot.slane %v605_v27, %v23638_v5  ;;  %v1761_v36 = vrot.slane %v606_v33, %v23638_v5 }
  0x1b   : > { %v23697_v26 = vcombine.high %v23688_v23, %v23688_v23  ;;  %v23709_v32 = vrot.slane %v1737_v29, %v23638_v5  ;;  %v23730_v39 = vrot.slane %v2113_v37, %v23638_v5  ;;  %v1754_v40 = vcombine.high %v606_v33, %v606_v33 }
  0x1c   : > { %653 = vrot.lane.b32.xlu1 %v23667_v15, %s23502_s23  ;;  %v23715_v34 = vcombine.high %v23705_v31, %v23705_v31  ;;  %v1769_v38 = vcombine.high %v1761_v36, %v1761_v36  ;;  %v2117_v43 = vcombine.high %v2113_v37, %v2113_v37  ;;  %v2141_v46 = vrot.slane %v2114_v44, %v23638_v5  ;;  %v603_v37 = vld [vmem:[%s23645_s2] sm:$0xff] }
  0x1d   : > { %v23721_v35 = vcombine.high %v23709_v32, %v23709_v32  ;;  %v23737_v41 = vcombine.high %v23730_v39, %v23730_v39  ;;  %v1768_v42 = vrot.slane %v1754_v40, %v23638_v5  ;;  %v2134_v47 = vcombine.high %v2114_v44, %v2114_v44 }
  0x1e   : > { %651 = vrot.lane.b32.xlu0 %v23659_v12, %s23502_s23  ;;  %v23746_v45 = vrot.slane %v2117_v43, %v23638_v5  ;;  %v2514_v51 = vcombine.high %v2510_v49, %v2510_v49  ;;  %v2149_v52 = vcombine.high %v2141_v46, %v2141_v46  ;;  %v23763_v53 = vrot.slane %v2510_v49, %v23638_v5 }
  0x1f   : > { %v2148_v50 = vrot.slane %v2134_v47, %v23638_v5  ;;  %v2538_v59 = vrot.slane %v2511_v56, %v23638_v5  ;;  %v23788_v61 = vrot.slane %v2905_v58, %v23638_v5  ;;  %v2531_v62 = vcombine.high %v2511_v56, %v2511_v56  ;;  %v23888_v56 = vld [vmem:[%s30012_s28 + $0x18] sm:$0xff] }
  0x20   : > { %657 = vrot.lane.b32.xlu1 %v646_v16, %s23502_s23  ;;  %v23755_v48 = vcombine.high %v23746_v45, %v23746_v45  ;;  %v23767_v54 = vrot.slane %v2514_v51, %v23638_v5  ;;  %v23772_v55 = vcombine.high %v23763_v53, %v23763_v53  ;;  %v2909_v1 = vcombine.high %v2905_v58, %v2905_v58  ;;  %v23893_v58 = vld [vmem:[%s30012_s28 + $0x10] sm:$0xff] }
  0x21   : > { %v2546_v60 = vcombine.high %v2538_v59, %v2538_v59  ;;  %v23795_v63 = vcombine.high %v23788_v61, %v23788_v61  ;;  %v2545_v0 = vrot.slane %v2531_v62, %v23638_v5  ;;  %v2933_v4 = vrot.slane %v2906_v2, %v23638_v5 }
  0x22   : > { %655 = vrot.lane.b32.xlu0 %v638_v13, %s23502_s23  ;;  %v23779_v57 = vcombine.high %v23767_v54, %v23767_v54  ;;  %v23804_v3 = vrot.slane %v2909_v1, %v23638_v5  ;;  %v2926_v7 = vcombine.high %v2906_v2, %v2906_v2  ;;  %v4057_v14 = vcombine.high %v4053_v10, %v4053_v10 }
  0x23   : > { %v2941_v16 = vcombine.high %v2933_v4, %v2933_v4  ;;  %v23821_v18 = vrot.slane %v4053_v10, %v23638_v5  ;;  %v4081_v25 = vrot.slane %v4054_v21, %v23638_v5  ;;  %v998_v40 = vcombine.high %v603_v37, %v603_v37 }
  0x24   : > { %1396 = vrot.lane.b32.xlu1 %v23679_v19, %s23503_s24  ;;  %v23813_v8 = vcombine.high %v23804_v3, %v23804_v3  ;;  %v2940_v13 = vrot.slane %v2926_v7, %v23638_v5  ;;  %v604_v7 = vld [vmem:[%s23645_s2 + $0x8] sm:$0x3f] }
  0x25   : > { %v23831_v22 = vcombine.high %v23821_v18, %v23821_v18  ;;  %v4089_v27 = vcombine.high %v4081_v25, %v4081_v25  ;;  %v23869_v43 = vrot.slane %v998_v40, %v23638_v5 }
  0x26   : > { %659 = vrot.lane.b32.xlu0 %v645_v20, %s23502_s23  ;;  %v23825_v20 = vrot.slane %v4057_v14, %v23638_v5 }
  0x28   : > { %1394 = vrot.lane.b32.xlu1 %v23672_v17, %s23503_s24 }
  0x2a   : > { %1398 = vrot.lane.b32.xlu0 %v23688_v23, %s23503_s24 }
  0x2c   : > { %1402 = vrot.lane.b32.xlu1 %v1385_v24, %s23503_s24  ;;  %v23837_v24 = vcombine.high %v23825_v20, %v23825_v20 }
  0x2e   : > { %1400 = vrot.lane.b32.xlu0 %v23697_v26, %s23503_s24 }
  0x30   : > { %1406 = vrot.lane.b32.xlu1 %v1392_v28, %s23503_s24  ;;  %v4074_v28 = vcombine.high %v4054_v21, %v4054_v21  ;;  %v1015_v21 = vcombine.high %v604_v7, %v604_v7 }
  0x32   : > { %1404 = vrot.lane.b32.xlu0 %v1393_v30, %s23503_s24  ;;  %v4088_v29 = vrot.slane %v4074_v28, %v23638_v5  ;;  %v4448_v30 = vld [vmem:[%s23645_s2 + $0x46] sm:$0x3f]  ;;  %v1029_v28 = vrot.slane %v1015_v21, %v23638_v5 }
  0x33   : > { %v4475_v33 = vrot.slane %v4448_v30, %v23638_v5 }
  0x34   : > { %1774 = vrot.lane.b32.xlu1 %v23709_v32, %s23502_s23 }
  0x36   : > { %1772 = vrot.lane.b32.xlu0 %v23715_v34, %s23502_s23 }
  0x38   : > { %1776 = vrot.lane.b32.xlu1 %v23721_v35, %s23502_s23 }
  0x3a   : > { %1770 = vrot.lane.b32.xlu0 %v23705_v31, %s23502_s23 }
  0x3c   : > { %1780 = vrot.lane.b32.xlu1 %v1769_v38, %s23502_s23 }
  0x3e   : > { %1778 = vrot.lane.b32.xlu0 %v1761_v36, %s23502_s23  ;;  %v4468_v36 = vcombine.high %v4448_v30, %v4448_v30 }
  0x40   : > { %2152 = vrot.lane.b32.xlu1 %v23737_v41, %s23503_s24  ;;  %v4482_v38 = vrot.slane %v4468_v36, %v23638_v5  ;;  %v23952_v36 = vld [vmem:[%s30012_s28] sm:$0xff] }
  0x42   : > { %1782 = vrot.lane.b32.xlu0 %v1768_v42, %s23502_s23  ;;  %v23864_v42 = vrot.slane %v603_v37, %v23638_v5  ;;  %v5240_v37 = vld [vmem:[%s23645_s2 + $0x52] sm:$0x3f] }
  0x44   : > { %2150 = vrot.lane.b32.xlu1 %v23730_v39, %s23503_s24 }
  0x46   : > { %2154 = vrot.lane.b32.xlu0 %v23746_v45, %s23503_s24 }
  0x48   : > { %2158 = vrot.lane.b32.xlu1 %v2141_v46, %s23503_s24  ;;  %v1014_v46 = vcombine.high %v23869_v43, %v23869_v43 }
  0x4a   : > { %2156 = vrot.lane.b32.xlu0 %v23755_v48, %s23503_s24 }
  0x4c   : > { %2162 = vrot.lane.b32.xlu1 %v2148_v50, %s23503_s24 }
  0x4e   : > { %2160 = vrot.lane.b32.xlu0 %v2149_v52, %s23503_s24 }
  0x50   : > { %2551 = vrot.lane.b32.xlu1 %v23767_v54, %s23504_s25 }
  0x52   : > { %2549 = vrot.lane.b32.xlu0 %v23772_v55, %s23504_s25 }
  0x54   : > { %2553 = vrot.lane.b32.xlu1 %v23779_v57, %s23504_s25 }
  0x56   : > { %2547 = vrot.lane.b32.xlu0 %v23763_v53, %s23504_s25 }
  0x58   : > { %2557 = vrot.lane.b32.xlu1 %v2546_v60, %s23504_s25 }
  0x5a   : > { %2555 = vrot.lane.b32.xlu0 %v2538_v59, %s23504_s25 }
  0x5c   : > { %2944 = vrot.lane.b32.xlu1 %v23795_v63, %s23504_s25 }
  0x5e   : > { %2559 = vrot.lane.b32.xlu0 %v2545_v0, %s23504_s25 }
  0x60   : > { %2942 = vrot.lane.b32.xlu1 %v23788_v61, %s23504_s25 }
  0x62   : > { %2946 = vrot.lane.b32.xlu0 %v23804_v3, %s23504_s25 }
  0x64   : > { %2950 = vrot.lane.b32.xlu1 %v2933_v4, %s23504_s25 }
  0x66   : > { %2948 = vrot.lane.b32.xlu0 %v23813_v8, %s23504_s25 }
  0x68   : > { %2954 = vrot.lane.b32.xlu1 %v2940_v13, %s23504_s25 }
  0x6a   : > { %2952 = vrot.lane.b32.xlu0 %v2941_v16, %s23504_s25 }
  0x6c   : > { %4094 = vrot.lane.b32.xlu1 %v23825_v20, %s23502_s23 }
  0x6e   : > { %4092 = vrot.lane.b32.xlu0 %v23831_v22, %s23502_s23 }
  0x70   : > { %4096 = vrot.lane.b32.xlu1 %v23837_v24, %s23502_s23 }
  0x72   : > { %4090 = vrot.lane.b32.xlu0 %v23821_v18, %s23502_s23 }
  0x74   : > { %4100 = vrot.lane.b32.xlu1 %v4089_v27, %s23502_s23 }
  0x76   : > { %4098 = vrot.lane.b32.xlu0 %v4081_v25, %s23502_s23  ;;  %v1022_v25 = vrot.slane %v604_v7, %v23638_v5 }
  0x78   : > { %4486 = vrot.lane.b32.xlu1 %v23715_v34, %s23502_s23  ;;  %v4483_v34 = vcombine.high %v4475_v33, %v4475_v33  ;;  %v1030_v30 = vcombine.high %v1022_v25, %v1022_v25 }
  0x7a   : > { %4102 = vrot.lane.b32.xlu0 %v4088_v29, %s23502_s23 }
  0x7c   : > { %4484 = vrot.lane.b32.xlu1 %v23705_v31, %s23502_s23  ;;  %v4845_v31 = vld [vmem:[%s23645_s2 + $0x8] sm:$0x3f] }
  0x7d   : > { %v4865_v4 = vcombine.high %v4845_v31, %v4845_v31 }
  0x7e   : > { %4488 = vrot.lane.b32.xlu0 %v23709_v32, %s23502_s23  ;;  %v1013_v32 = vcombine.high %v23864_v42, %v23864_v42 }
  0x80   : > { %4492 = vrot.lane.b32.xlu1 %v4475_v33, %s23502_s23 }
  0x82   : > { %4490 = vrot.lane.b32.xlu0 %v23721_v35, %s23502_s23  ;;  %v4872_v35 = vrot.slane %v4845_v31, %v23638_v5  ;;  %v5267_v31 = vrot.slane %v5240_v37, %v23638_v5 }
  0x84   : > { %4496 = vrot.lane.b32.xlu1 %v4482_v38, %s23502_s23  ;;  %v4880_v49 = vcombine.high %v4872_v35, %v4872_v35 }
  0x86   : > { %4494 = vrot.lane.b32.xlu0 %v4483_v34, %s23502_s23 }
  0x88   : > { %4885 = vrot.lane.b32.xlu1 %v23869_v43, %s29999_s3 }
  0x8a   : > { %v648_v44 = vpop.permute.xlu1 %647  ;;  %4883 = vrot.lane.b32.xlu0 %v1013_v32, %s29999_s3 }
  0x8c   : > { %v650_v47 = vpop.permute.xlu0 %649  ;;  %4887 = vrot.lane.b32.xlu1 %v1014_v46, %s29999_s3 }
  0x8d   : > { %v662_v59 = vsel %vm661_vm0, %v648_v44, %v650_v47  ;;  %v5260_v44 = vcombine.high %v5240_v37, %v5240_v37 }
  0x8e   : > { %v654_v50 = vpop.permute.xlu1 %653  ;;  %4881 = vrot.lane.b32.xlu0 %v23864_v42, %s29999_s3 }
  0x90   : > { %v652_v51 = vpop.permute.xlu0 %651  ;;  %4891 = vrot.lane.b32.xlu1 %v4880_v49, %s29999_s3 }
  0x91   : > { %v663_v52 = vsel %vm661_vm0, %v650_v47, %v652_v51  ;;  %v664_v1 = vsel %vm661_vm0, %v652_v51, %v654_v50 }
  0x92   : > { %18476 = vmatprep.subr.msk.mxu0 %vm675_vm1, %v663_v52  ;;  %22266 = vmatprep.subr.msk.mxu1 %vm675_vm1, %v663_v52  ;;  %v658_v60 = vpop.permute.xlu1 %657  ;;  %v5275_v52 = vcombine.high %v5267_v31, %v5267_v31 }
  0x93   : > { %18477 = vmatpush1.msk.msra.mxu0 %vm675_vm1, %v662_v59  ;;  %22267 = vmatpush1.msk.msra.mxu1 %vm675_vm1, %v662_v59  ;;  %v5274_v59 = vrot.slane %v5260_v44, %v23638_v5 }
  0x94   : > { %18479 = vmatmul.mubr.msk.f32.vlgmr.msra.gmra.mrb[0].mxu1 %vm668_vm2, %v23888_v56  ;;  %v656_v62 = vpop.permute.xlu0 %655  ;;  %18478 = vmatmul.mubr.msk.f32.vlgmr.msra.gmra.mrb[0].mxu0 %vm668_vm2, %v23893_v58 }
  0x95   : > { %v665_v0 = vsel %vm661_vm0, %v654_v50, %v656_v62  ;;  %831 = vmatprep.mubr.f32.mxu1 %v23501_v6  ;;  %908 = vmatprep.mubr.f32.mxu0 %v23501_v6  ;;  %v666_v14 = vsel %vm661_vm0, %v656_v62, %v658_v60 }
  0x96   : > { %18480 = vmatprep.subr.msk.mxu1 %vm675_vm1, %v665_v0  ;;  %v23909_v2 = vpop.permute.xlu1 %1396  ;;  %4889 = vrot.lane.b32.xlu0 %v4872_v35, %s29999_s3 }
  0x97   : > { %18481 = vmatpush1.msk.msra.mxu1 %vm675_vm1, %v664_v1  ;;  %5278 = vrot.lane.b32.xlu1 %v23679_v19, %s23503_s24  ;;  %v4879_v19 = vrot.slane %v4865_v4, %v23638_v5 }
  0x98   : > { %v660_v10 = vpop.permute.xlu0 %659  ;;  %18482 = vmatmul.mubr.msk.f32.vlgmr.msra.gmra.mrb[2].mxu1 %vm668_vm2, %v23893_v58 }
  0x99   : > { %v667_v13 = vsel %vm661_vm0, %v658_v60, %v660_v10  ;;  %837 = vmatprep.mubr.f32.mxu1 %v23501_v6  ;;  %20024 = vmatprep.subr.msk.mxu1 %vm675_vm1, %v660_v10 }
  0x9a   : > { %18484 = vmatprep.subr.msk.mxu0 %vm675_vm1, %v667_v13  ;;  %20025 = vmatpush3.msk.msra.mxu1 %vm675_vm1, %v660_v10  ;;  %v1395_v16 = vpop.permute.xlu1 %1394 }
  0x9b   : > { %18485 = vmatpush1.msk.msra.mxu0 %vm675_vm1, %v666_v14  ;;  %18495 = vmatprep.subr.msk.mxu1 %vm675_vm1, %v1014_v46  ;;  %v1409_v46 = vsel %vm1408_vm3, %v1395_v16, %v23909_v2 }
  0x9c   : > { %18483 = vmatmul.mubr.msk.f32.gmra.mrb[4].mxu1 %vm668_vm2, %v23888_v56  ;;  %18486 = vmatmul.mubr.msk.f32.vlgmr.msra.gmra.mrb[2].mxu0 %vm668_vm2, %v23893_v58  ;;  %v1399_v27 = vpop.permute.xlu0 %1398 }
  0x9d   : > { %914 = vmatprep.mubr.f32.mxu0 %v23501_v6  ;;  %20026 = vmatprep.mubr.msk.f32.mxu1 %vm668_vm2, %v23893_v58  ;;  %v1410_v38 = vsel %vm1408_vm3, %v23909_v2, %v1399_v27  ;;  %v5637_v2 = vld [vmem:[%s23645_s2 + $0x14] sm:$0x3f] }
  0x9e   : > { %18491 = vmatprep.subr.msk.mxu0 %vm675_vm1, %v1013_v32  ;;  %v1403_v29 = vpop.permute.xlu1 %1402  ;;  %4893 = vrot.lane.b32.xlu0 %v4879_v19, %s29999_s3  ;;  %v5664_v13 = vrot.slane %v5637_v2, %v23638_v5  ;;  %v5657_v21 = vcombine.high %v5637_v2, %v5637_v2  ;;  %v3302_v2 = vld [vmem:[%s23645_s2 + $0x64] sm:$0xff] }
  0x9f   : > { %18492 = vmatpush1.msk.msra.mxu0 %vm675_vm1, %v23864_v42  ;;  %5276 = vrot.lane.b32.xlu1 %v23672_v17, %s23503_s24 }
  0xa0   : > { %18487 = vmatmul.mubr.msk.f32.gmra.mrb[4].mxu0 %vm668_vm2, %v23888_v56  ;;  %20027 = vmatmul.mubr.msk.f32.vlgmr.msra.gmra.mrb[6].mxu1 %vm668_vm2, %v23888_v56  ;;  %v1401_v33 = vpop.permute.xlu0 %1400 }
  0xa1   : > { %1115 = vmatprep.mubr.f32.mxu0 %v23501_v6  ;;  %18496 = vmatpush1.msk.msra.mxu1 %vm675_vm1, %v23869_v43  ;;  %v1412_v34 = vsel %vm1408_vm3, %v1401_v33, %v1403_v29  ;;  %v1411_v32 = vsel %vm1408_vm3, %v1399_v27, %v1401_v33 }
  0xa2   : > { %1192 = vmatprep.mubr.f32.mxu1 %v23501_v6  ;;  %20029 = vmatprep.subr.msk.mxu1 %vm675_vm1, %v1029_v28  ;;  %v1407_v17 = vpop.permute.xlu1 %1406 }
  0xa3   : > { %18499 = vmatprep.subr.msk.mxu0 %vm675_vm1, %v1030_v30  ;;  %5280 = vrot.lane.b32.xlu0 %v23688_v23, %s23503_s24  ;;  %v23972_v23 = vld [vmem:[%s30012_s28 + $0x8] sm:$0xff] }
  0xa4   : > { %18493 = vmatmul.mubr.msk.f32.vlgmr.msra.gmra.mrb[0].mxu0 %vm668_vm2, %v23952_v36  ;;  %18497 = vmatmul.mubr.msk.f32.vlgmr.msra.gmra.mrb[2].mxu1 %vm668_vm2, %v23952_v36  ;;  %v1405_v40 = vpop.permute.xlu0 %1404 }
  0xa5   : > { %1121 = vmatprep.mubr.f32.mxu0 %v23501_v6  ;;  %1198 = vmatprep.mubr.f32.mxu1 %v23501_v6  ;;  %v1414_v47 = vsel %vm1408_vm3, %v1405_v40, %v1407_v17 }
  0xa6   : > { %20030 = vmatpush3.msk.msra.mxu1 %vm675_vm1, %v1029_v28  ;;  %18500 = vmatpush1.msk.msra.mxu0 %vm675_vm1, %v1022_v25  ;;  %v23976_v42 = vpop.permute.xlu1 %1774  ;;  %v5671_v28 = vrot.slane %v5657_v21, %v23638_v5 }
  0xa7   : > { %18506 = vmatprep.subr.msk.mxu1 %vm675_vm1, %v1410_v38  ;;  %18510 = vmatprep.subr.msk.mxu0 %vm675_vm1, %v1412_v34 }
  0xa8   : > { %18494 = vmatmul.mubr.msk.f32.gmra.mrb[6].mxu0 %vm668_vm2, %v23972_v23  ;;  %18498 = vmatmul.mubr.msk.f32.gmra.mrb[4].mxu1 %vm668_vm2, %v23972_v23  ;;  %v1773_v43 = vpop.permute.xlu0 %1772 }
  0xa9   : > { %1269 = vmatprep.mubr.f32.mxu0 %v23501_v6  ;;  %20031 = vmatprep.mubr.msk.f32.mxu1 %vm668_vm2, %v23952_v36  ;;  %v1785_v51 = vsel %vm661_vm0, %v1773_v43, %v23976_v42 }
  0xaa   : > { %v1777_v35 = vpop.permute.xlu1 %1776  ;;  %5282 = vrot.lane.b32.xlu0 %v23697_v26, %s23503_s24  ;;  %5284 = vrot.lane.b32.xlu1 %v5267_v31, %s23503_s24  ;;  %v1413_v26 = vsel %vm1408_vm3, %v1403_v29, %v1405_v40  ;;  %v24120_v31 = vld [vmem:[%s30012_s28 + $0x28] sm:$0xff] }
  0xab   : > { %v1786_v16 = vsel %vm661_vm0, %v23976_v42, %v1777_v35  ;;  %v6032_v42 = vld [vmem:[%s23645_s2 + $0x5e] sm:$0x3f] }
  0xac   : > { %18501 = vmatmul.mubr.msk.f32.vlgmr.msra.gmra.mrb[2].mxu0 %vm668_vm2, %v23952_v36  ;;  %20032 = vmatmul.mubr.msk.f32.vlgmr.msra.gmra.mrb[6].mxu1 %vm668_vm2, %v23972_v23  ;;  %v1771_v49 = vpop.permute.xlu0 %1770  ;;  %v6052_v44 = vcombine.high %v6032_v42, %v6032_v42 }
  0xad   : > { %18507 = vmatpush1.msk.msra.mxu1 %vm675_vm1, %v1409_v46  ;;  %18511 = vmatpush1.msk.msra.mxu0 %vm675_vm1, %v1411_v32  ;;  %v1784_v4 = vsel %vm661_vm0, %v1771_v49, %v1773_v43 }
  0xae   : > { %1275 = vmatprep.mubr.f32.mxu0 %v23501_v6  ;;  %1493 = vmatprep.mubr.f32.mxu1 %v23501_v6  ;;  %v1781_v50 = vpop.permute.xlu1 %1780  ;;  %v6066_v49 = vrot.slane %v6052_v44, %v23638_v5 }
  0xaf   : > { %18514 = vmatprep.subr.msk.mxu1 %vm675_vm1, %v1414_v47  ;;  %20034 = vmatprep.subr.msk.mxu0 %vm675_vm1, %v1407_v17 }
  0xb0   : > { %18502 = vmatmul.mubr.msk.f32.gmra.mrb[4].mxu0 %vm668_vm2, %v23972_v23  ;;  %18508 = vmatmul.mubr.msk.f32.vlgmr.msra.gmra.mrb[8].mxu1 %vm668_vm2, %v23893_v58  ;;  %v1779_v60 = vpop.permute.xlu0 %1778 }
  0xb1   : > { %18515 = vmatpush1.msk.msra.mxu1 %vm675_vm1, %v1413_v26  ;;  %1499 = vmatprep.mubr.f32.mxu1 %v23501_v6  ;;  %v1787_v0 = vsel %vm661_vm0, %v1777_v35, %v1779_v60  ;;  %v6059_v35 = vrot.slane %v6032_v42, %v23638_v5  ;;  %v7201_v42 = vld [vmem:[%s23645_s2 + $0x2c] sm:$0x3f] }
  0xb2   : > { %1570 = vmatprep.mubr.f32.mxu0 %v23501_v6  ;;  %18521 = vmatprep.subr.msk.mxu1 %vm675_vm1, %v1785_v51  ;;  %v24017_v62 = vpop.permute.xlu1 %2152 }
  0xb3   : > { %5286 = vrot.lane.b32.xlu0 %v5275_v52, %s23503_s24  ;;  %5288 = vrot.lane.b32.xlu1 %v5274_v59, %s23503_s24  ;;  %s29997_s24 = smov 95  }
  0xb4   : > { %18509 = vmatmul.mubr.msk.f32.gmra.mrb[10].mxu1 %vm668_vm2, %v23888_v56  ;;  %18512 = vmatmul.mubr.msk.f32.vlgmr.msra.gmra.mrb[8].mxu0 %vm668_vm2, %v23893_v58  ;;  %v1783_v1 = vpop.permute.xlu0 %1782 }
  0xb5   : > { %20035 = vmatpush3.msk.msra.mxu0 %vm675_vm1, %v1407_v17  ;;  %1576 = vmatprep.mubr.f32.mxu0 %v23501_v6  ;;  %v1789_v10 = vsel %vm661_vm0, %v1781_v50, %v1783_v1 }
  0xb6   : > { %1647 = vmatprep.mubr.f32.mxu1 %v23501_v6  ;;  %18525 = vmatprep.subr.msk.mxu0 %vm675_vm1, %v1787_v0  ;;  %v2151_v7 = vpop.permute.xlu1 %2150 }
  0xb7   : > { %5675 = vrot.lane.b32.xlu0 %v23656_v11, %s29997_s24  ;;  %5677 = vrot.lane.b32.xlu1 %v23659_v12, %s29997_s24  ;;  %v5672_v12 = vcombine.high %v5664_v13, %v5664_v13  ;;  %v2164_v17 = vsel %vm1408_vm3, %v2151_v7, %v24017_v62 }
  0xb8   : > { %18513 = vmatmul.mubr.msk.f32.gmra.mrb[10].mxu0 %vm668_vm2, %v23888_v56  ;;  %18516 = vmatmul.mubr.msk.f32.vlgmr.msra.gmra.mrb[12].mxu1 %vm668_vm2, %v23893_v58  ;;  %v2155_v14 = vpop.permute.xlu0 %2154 }
  0xb9   : > { %18522 = vmatpush1.msk.msra.mxu1 %vm675_vm1, %v1784_v4  ;;  %1653 = vmatprep.mubr.f32.mxu1 %v23501_v6 }
  0xba   : > { %20036 = vmatprep.mubr.msk.f32.mxu0 %vm668_vm2, %v23893_v58  ;;  %18529 = vmatprep.subr.msk.mxu1 %vm675_vm1, %v1789_v10  ;;  %v2159_v11 = vpop.permute.xlu1 %2158  ;;  %v6429_v10 = vld [vmem:[%s23645_s2 + $0x20] sm:$0x3f] }
  0xbb   : > { %5673 = vrot.lane.b32.xlu0 %v23650_v9, %s29997_s24  ;;  %5679 = vrot.lane.b32.xlu1 %v23667_v15, %s29997_s24  ;;  %v1788_v9 = vsel %vm661_vm0, %v1779_v60, %v1781_v50 }
  0xbc   : > { %18517 = vmatmul.mubr.msk.f32.gmra.mrb[14].mxu1 %vm668_vm2, %v23888_v56  ;;  %20037 = vmatmul.mubr.msk.f32.vlgmr.msra.gmra.mrb[12].mxu0 %vm668_vm2, %v23888_v56  ;;  %v2157_v58 = vpop.permute.xlu0 %2156  ;;  %v2165_v56 = vsel %vm1408_vm3, %v24017_v62, %v2155_v14 }
  0xbd   : > { %18526 = vmatpush1.msk.msra.mxu0 %vm675_vm1, %v1786_v16  ;;  %1868 = vmatprep.mubr.f32.mxu1 %v23501_v6  ;;  %v2167_v25 = vsel %vm1408_vm3, %v2157_v58, %v2159_v11  ;;  %v2166_v30 = vsel %vm1408_vm3, %v2155_v14, %v2157_v58  ;;  %v6456_v16 = vrot.slane %v6429_v10, %v23638_v5 }
  0xbe   : > { %1945 = vmatprep.mubr.f32.mxu0 %v23501_v6  ;;  %20039 = vmatprep.subr.msk.mxu0 %vm675_vm1, %v1783_v1  ;;  %v2163_v15 = vpop.permute.xlu1 %2162 }
  0xbf   : > { %5681 = vrot.lane.b32.xlu0 %v5664_v13, %s29997_s24  ;;  %5683 = vrot.lane.b32.xlu1 %v5672_v12, %s29997_s24  ;;  %v6464_v21 = vcombine.high %v6456_v16, %v6456_v16 }
  0xc0   : > { %18523 = vmatmul.mubr.msk.f32.vlgmr.msra.gmra.mrb[8].mxu1 %vm668_vm2, %v23952_v36  ;;  %18527 = vmatmul.mubr.msk.f32.vlgmr.msra.gmra.mrb[8].mxu0 %vm668_vm2, %v23952_v36  ;;  %v2161_v19 = vpop.permute.xlu0 %2160 }
  0xc1   : > { %18530 = vmatpush1.msk.msra.mxu1 %vm675_vm1, %v1788_v9  ;;  %1874 = vmatprep.mubr.f32.mxu1 %v23501_v6  ;;  %v2169_v37 = vsel %vm1408_vm3, %v2161_v19, %v2163_v15  ;;  %v2168_v40 = vsel %vm1408_vm3, %v2159_v11, %v2161_v19  ;;  %v6449_v9 = vcombine.high %v6429_v10, %v6429_v10 }
  0xc2   : > { %1951 = vmatprep.mubr.f32.mxu0 %v23501_v6  ;;  %20040 = vmatpush3.msk.msra.mxu0 %vm675_vm1, %v1783_v1  ;;  %v2552_v27 = vpop.permute.xlu1 %2551 }
  0xc3   : > { %18538 = vmatprep.subr.msk.mxu0 %vm675_vm1, %v2165_v56  ;;  %18542 = vmatprep.subr.msk.mxu1 %vm675_vm1, %v2167_v25  ;;  %v24239_v56 = vrot.slane %v3302_v2, %v23638_v5  ;;  %v3303_v25 = vld [vmem:[%s23645_s2 + $0x6c] sm:$0x3f] }
  0xc4   : > { %18524 = vmatmul.mubr.msk.f32.gmra.mrb[10].mxu1 %vm668_vm2, %v23972_v23  ;;  %18528 = vmatmul.mubr.msk.f32.gmra.mrb[10].mxu0 %vm668_vm2, %v23972_v23  ;;  %v24082_v29 = vpop.permute.xlu0 %2549 }
  0xc5   : > { %2022 = vmatprep.mubr.f32.mxu1 %v23501_v6  ;;  %20041 = vmatprep.mubr.msk.f32.mxu0 %vm668_vm2, %v23952_v36  ;;  %v2563_v32 = vsel %vm2561_vm4, %v24082_v29, %v2552_v27 }
  0xc6   : > { %v2554_v33 = vpop.permute.xlu1 %2553  ;;  %5685 = vrot.lane.b32.xlu0 %v5671_v28, %s29997_s24  ;;  %6070 = vrot.lane.b32.xlu1 %v23772_v55, %s23504_s25  ;;  %v24103_v55 = vld [vmem:[%s30012_s28 + $0x20] sm:$0xff]  ;;  %v24257_v28 = vld [vmem:[%s30012_s28 + $0x38] sm:$0xff] }
  0xc7   : > { %v2564_v47 = vsel %vm2561_vm4, %v2552_v27, %v2554_v33 }
  0xc8   : > { %18531 = vmatmul.mubr.msk.f32.vlgmr.msra.gmra.mrb[12].mxu1 %vm668_vm2, %v23952_v36  ;;  %20042 = vmatmul.mubr.msk.f32.vlgmr.msra.gmra.mrb[12].mxu0 %vm668_vm2, %v23972_v23  ;;  %v2548_v38 = vpop.permute.xlu0 %2547 }
  0xc9   : > { %18539 = vmatpush1.msk.msra.mxu0 %vm675_vm1, %v2164_v17  ;;  %18543 = vmatpush1.msk.msra.mxu1 %vm675_vm1, %v2166_v30  ;;  %v2562_v51 = vsel %vm2561_vm4, %v2548_v38, %v24082_v29  ;;  %v6463_v29 = vrot.slane %v6449_v9, %v23638_v5  ;;  %v3323_v17 = vcombine.high %v3303_v25, %v3303_v25  ;;  %v7993_v9 = vld [vmem:[%s23645_s2 + $0x3a] sm:$0x3f] }
  0xca   : > { %2028 = vmatprep.mubr.f32.mxu1 %v23501_v6  ;;  %2254 = vmatprep.mubr.f32.mxu0 %v23501_v6  ;;  %v2558_v36 = vpop.permute.xlu1 %2557  ;;  %v3330_v38 = vrot.slane %v3303_v25, %v23638_v5 }
  0xcb   : > { %18546 = vmatprep.subr.msk.mxu0 %vm675_vm1, %v2169_v37  ;;  %20044 = vmatprep.subr.msk.mxu1 %vm675_vm1, %v2163_v15 }
  0xcc   : > { %18532 = vmatmul.mubr.msk.f32.gmra.mrb[14].mxu1 %vm668_vm2, %v23972_v23  ;;  %18540 = vmatmul.mubr.msk.f32.vlgmr.msra.gmra.mrb[0].mxu0 %vm668_vm2, %v24103_v55  ;;  %v2556_v34 = vpop.permute.xlu0 %2555 }
  0xcd   : > { %18547 = vmatpush1.msk.msra.mxu0 %vm675_vm1, %v2168_v40  ;;  %2260 = vmatprep.mubr.f32.mxu0 %v23501_v6  ;;  %v2565_v43 = vsel %vm2561_vm4, %v2554_v33, %v2556_v34  ;;  %v2566_v59 = vsel %vm2561_vm4, %v2556_v34, %v2558_v36  ;;  %v24267_v33 = vcombine.high %v24239_v56, %v24239_v56 }
  0xce   : > { %2331 = vmatprep.mubr.f32.mxu1 %v23501_v6  ;;  %18557 = vmatprep.subr.msk.mxu0 %vm675_vm1, %v2565_v43  ;;  %v24125_v23 = vpop.permute.xlu1 %2944  ;;  %v3337_v40 = vrot.slane %v3323_v17, %v23638_v5 }
  0xcf   : > { %6072 = vrot.lane.b32.xlu0 %v23767_v54, %s23504_s25  ;;  %6068 = vrot.lane.b32.xlu1 %v23763_v53, %s23504_s25  ;;  %v6067_v54 = vcombine.high %v6059_v35, %v6059_v35 }
  0xd0   : > { %18541 = vmatmul.mubr.msk.f32.gmra.mrb[6].mxu0 %vm668_vm2, %v24120_v31  ;;  %18544 = vmatmul.mubr.msk.f32.vlgmr.msra.gmra.mrb[2].mxu1 %vm668_vm2, %v24103_v55  ;;  %v2560_v46 = vpop.permute.xlu0 %2559 }
  0xd1   : > { %20045 = vmatpush3.msk.msra.mxu1 %vm675_vm1, %v2163_v15  ;;  %2337 = vmatprep.mubr.f32.mxu1 %v23501_v6  ;;  %v2567_v50 = vsel %vm2561_vm4, %v2558_v36, %v2560_v46 }
  0xd2   : > { %2408 = vmatprep.mubr.f32.mxu0 %v23501_v6  ;;  %18553 = vmatprep.subr.msk.mxu1 %vm675_vm1, %v2563_v32  ;;  %v2943_v53 = vpop.permute.xlu1 %2942 }
  0xd3   : > { %6074 = vrot.lane.b32.xlu0 %v23779_v57, %s23504_s25  ;;  %6076 = vrot.lane.b32.xlu1 %v6059_v35, %s23504_s25  ;;  %v2956_v11 = vsel %vm2561_vm4, %v2943_v53, %v24125_v23  ;;  %v7221_v35 = vcombine.high %v7201_v42, %v7201_v42 }
  0xd4   : > { %18545 = vmatmul.mubr.msk.f32.gmra.mrb[4].mxu1 %vm668_vm2, %v24120_v31  ;;  %18548 = vmatmul.mubr.msk.f32.vlgmr.msra.gmra.mrb[2].mxu0 %vm668_vm2, %v24103_v55  ;;  %v2947_v26 = vpop.permute.xlu0 %2946 }
  0xd5   : > { %18558 = vmatpush1.msk.msra.mxu0 %vm675_vm1, %v2564_v47  ;;  %2414 = vmatprep.mubr.f32.mxu0 %v23501_v6  ;;  %v2957_v62 = vsel %vm2561_vm4, %v24125_v23, %v2947_v26  ;;  %v7228_v23 = vrot.slane %v7201_v42, %v23638_v5  ;;  %v3677_v47 = vld [vmem:[%s23645_s2 + $0x3a] sm:$0x3f]  ;;  %v7235_v53 = vrot.slane %v7221_v35, %v23638_v5 }
  0xd6   : > { %20046 = vmatprep.mubr.msk.f32.mxu1 %vm668_vm2, %v24103_v55  ;;  %20049 = vmatprep.subr.msk.mxu0 %vm675_vm1, %v2560_v46  ;;  %v2951_v57 = vpop.permute.xlu1 %2950  ;;  %v24550_v42 = vld [vmem:[%s30012_s28 + $0x58] sm:$0xff] }
  0xd7   : > { %6078 = vrot.lane.b32.xlu0 %v6067_v54, %s23504_s25  ;;  %6080 = vrot.lane.b32.xlu1 %v6066_v49, %s23504_s25  ;;  %s23507_s25 = smov 63   ;;  %v7236_v54 = vcombine.high %v7228_v23, %v7228_v23  ;;  %v3697_v49 = vcombine.high %v3677_v47, %v3677_v47 }
  0xd8   : > { %18549 = vmatmul.mubr.msk.f32.gmra.mrb[4].mxu0 %vm668_vm2, %v24120_v31  ;;  %20047 = vmatmul.mubr.msk.f32.vlgmr.msra.gmra.mrb[6].mxu1 %vm668_vm2, %v24120_v31  ;;  %v2949_v52 = vpop.permute.xlu0 %2948 }
  0xd9   : > { %18554 = vmatpush1.msk.msra.mxu1 %vm675_vm1, %v2562_v51  ;;  %2646 = vmatprep.mubr.f32.mxu1 %v23501_v6  ;;  %v2959_v0 = vsel %vm2561_vm4, %v2949_v52, %v2951_v57  ;;  %v2958_v7 = vsel %vm2561_vm4, %v2947_v26, %v2949_v52  ;;  %v3711_v51 = vrot.slane %v3697_v49, %v23638_v5  ;;  %v24378_v52 = vld [vmem:[%s30012_s28 + $0x40] sm:$0xff] }
  0xda   : > { %2723 = vmatprep.mubr.f32.mxu0 %v23501_v6  ;;  %18561 = vmatprep.subr.msk.mxu1 %vm675_vm1, %v2567_v50  ;;  %v24170_v60 = vpop.permute.xlu1 %2954 }
  0xdb   : > { %6467 = vrot.lane.b32.xlu0 %v23737_v41, %s23507_s25  ;;  %6469 = vrot.lane.b32.xlu1 %v23746_v45, %s23507_s25  ;;  %v3306_v45 = vcombine.high %v3302_v2, %v3302_v2 }
  0xdc   : > { %18555 = vmatmul.mubr.msk.f32.vlgmr.msra.gmra.mrb[8].mxu1 %vm668_vm2, %v24103_v55  ;;  %18559 = vmatmul.mubr.msk.f32.vlgmr.msra.gmra.mrb[8].mxu0 %vm668_vm2, %v24103_v55  ;;  %v2953_v1 = vpop.permute.xlu0 %2952 }
  0xdd   : > { %18562 = vmatpush1.msk.msra.mxu1 %vm675_vm1, %v2566_v59  ;;  %2652 = vmatprep.mubr.f32.mxu1 %v23501_v6  ;;  %v24210_v14 = vrot.slane %v3306_v45, %v23638_v5  ;;  %v2960_v58 = vsel %vm2561_vm4, %v2951_v57, %v2953_v1 }
  0xde   : > { %2729 = vmatprep.mubr.f32.mxu0 %v23501_v6  ;;  %20050 = vmatpush3.msk.msra.mxu0 %vm675_vm1, %v2560_v46  ;;  %v24188_v41 = vpop.permute.xlu1 %4094 }
  0xdf   : > { %18570 = vmatprep.subr.msk.mxu0 %vm675_vm1, %v2957_v62  ;;  %18574 = vmatprep.subr.msk.mxu1 %vm675_vm1, %v2959_v0  ;;  %v24243_v19 = vcombine.high %v24210_v14, %v24210_v14  ;;  %v7596_v62 = vld [vmem:[%s23645_s2 + $0x78] sm:$0x3f] }
  0xe0   : > { %18556 = vmatmul.mubr.msk.f32.gmra.mrb[10].mxu1 %vm668_vm2, %v24120_v31  ;;  %18560 = vmatmul.mubr.msk.f32.gmra.mrb[10].mxu0 %vm668_vm2, %v24120_v31  ;;  %v24196_v4 = vpop.permute.xlu0 %4092  ;;  %v7623_v2 = vrot.slane %v7596_v62, %v23638_v5 }
  0xe1   : > { %2800 = vmatprep.mubr.f32.mxu1 %v23501_v6  ;;  %20051 = vmatprep.mubr.msk.f32.mxu0 %vm668_vm2, %v24103_v55 }
  0xe2   : > { %6465 = vrot.lane.b32.xlu0 %v23730_v39, %s23507_s25  ;;  %6471 = vrot.lane.b32.xlu1 %v23755_v48, %s23507_s25  ;;  %v24207_v13 = vpop.permute.xlu1 %4096  ;;  %v2961_v39 = vsel %vm2561_vm4, %v2953_v1, %v24170_v60  ;;  %v24227_v48 = vld [vmem:[%s30012_s28 + $0x30] sm:$0xff]  ;;  %v24402_v1 = vld [vmem:[%s30012_s28 + $0x48] sm:$0xff]  ;;  %v7631_v10 = vcombine.high %v7623_v2, %v7623_v2 }
  0xe4   : > { %18563 = vmatmul.mubr.msk.f32.vlgmr.msra.gmra.mrb[12].mxu1 %vm668_vm2, %v24103_v55  ;;  %20052 = vmatmul.mubr.msk.f32.vlgmr.msra.gmra.mrb[12].mxu0 %vm668_vm2, %v24120_v31  ;;  %v24220_v12 = vpop.permute.xlu0 %4090  ;;  %v3676_v55 = vld [vmem:[%s23645_s2 + $0x32] sm:$0xff] }
  0xe5   : > { %18571 = vmatpush1.msk.msra.mxu0 %vm675_vm1, %v2956_v11  ;;  %18575 = vmatpush1.msk.msra.mxu1 %vm675_vm1, %v2958_v7  ;;  %v3680_v36 = vcombine.high %v3676_v55, %v3676_v55  ;;  %v24309_v43 = vrot.slane %v3676_v55, %v23638_v5  ;;  %v7616_v11 = vcombine.high %v7596_v62, %v7596_v62 }
  0xe6   : > { %2806 = vmatprep.mubr.f32.mxu1 %v23501_v6  ;;  %3046 = vmatprep.mubr.f32.mxu0 %v23501_v6  ;;  %v24233_v15 = vpop.permute.xlu1 %4100 }
  0xe7   : > { %18578 = vmatprep.subr.msk.mxu0 %vm675_vm1, %v2961_v39  ;;  %20054 = vmatprep.subr.msk.mxu1 %vm675_vm1, %v24170_v60  ;;  %v24313_v32 = vrot.slane %v3680_v36, %v23638_v5  ;;  %v24330_v44 = vcombine.high %v24309_v43, %v24309_v43  ;;  %v4104_v39 = vsel %vm661_vm0, %v24220_v12, %v24196_v4 }
  0xe8   : > { %18564 = vmatmul.mubr.msk.f32.gmra.mrb[14].mxu1 %vm668_vm2, %v24120_v31  ;;  %18572 = vmatmul.mubr.msk.f32.vlgmr.msra.gmra.mrb[0].mxu0 %vm668_vm2, %v24227_v48  ;;  %v24250_v27 = vpop.permute.xlu0 %4098 }
  0xe9   : > { %18579 = vmatpush1.msk.msra.mxu0 %vm675_vm1, %v2960_v58  ;;  %3052 = vmatprep.mubr.f32.mxu0 %v23501_v6  ;;  %v24335_v46 = vcombine.high %v24313_v32, %v24313_v32  ;;  %v4107_v0 = vsel %vm661_vm0, %v24207_v13, %v24250_v27 }
  0xea   : > { %3123 = vmatprep.mubr.f32.mxu1 %v23501_v6  ;;  %6473 = vrot.lane.b32.xlu0 %v6456_v16, %s23507_s25  ;;  %v24262_v30 = vpop.permute.xlu1 %4486 }
  0xeb   : > { %6475 = vrot.lane.b32.xlu1 %v6464_v21, %s23507_s25  ;;  %18589 = vmatprep.subr.msk.mxu0 %vm675_vm1, %v24243_v19 }
  0xec   : > { %18573 = vmatmul.mubr.msk.f32.gmra.mrb[6].mxu0 %vm668_vm2, %v24257_v28  ;;  %18576 = vmatmul.mubr.msk.f32.vlgmr.msra.gmra.mrb[2].mxu1 %vm668_vm2, %v24227_v48  ;;  %v24275_v37 = vpop.permute.xlu0 %4102 }
  0xed   : > { %3129 = vmatprep.mubr.f32.mxu1 %v23501_v6  ;;  %3200 = vmatprep.mubr.f32.mxu0 %v23501_v6 }
  0xee   : > { %20055 = vmatpush3.msk.msra.mxu1 %vm675_vm1, %v24170_v60  ;;  %6477 = vrot.lane.b32.xlu0 %v6463_v29, %s23507_s25  ;;  %v24289_v34 = vpop.permute.xlu1 %4484  ;;  %s30014_s25 = smov 127  }
  0xef   : > { %18585 = vmatprep.subr.msk.mxu1 %vm675_vm1, %v24267_v33  ;;  %7239 = vrot.lane.b32.xlu1 %v23795_v63, %s23508_s29  ;;  %v3338_v63 = vcombine.high %v3330_v38, %v3330_v38  ;;  %v4498_v29 = vsel %vm661_vm0, %v24289_v34, %v24262_v30 }
  0xf0   : > { %18577 = vmatmul.mubr.msk.f32.gmra.mrb[4].mxu1 %vm668_vm2, %v24257_v28  ;;  %18580 = vmatmul.mubr.msk.f32.vlgmr.msra.gmra.mrb[2].mxu0 %vm668_vm2, %v24227_v48  ;;  %v24296_v31 = vpop.permute.xlu0 %4488 }
  0xf1   : > { %3206 = vmatprep.mubr.f32.mxu0 %v23501_v6  ;;  %20056 = vmatprep.mubr.msk.f32.mxu1 %vm668_vm2, %v24227_v48  ;;  %v4499_v16 = vsel %vm661_vm0, %v24262_v30, %v24296_v31 }
  0xf2   : > { %18590 = vmatpush1.msk.msra.mxu0 %vm675_vm1, %v24210_v14  ;;  %7241 = vrot.lane.b32.xlu0 %v23804_v3, %s23508_s29  ;;  %v24324_v3 = vpop.permute.xlu1 %4492 }
  0xf3   : > { %20059 = vmatprep.subr.msk.mxu0 %vm675_vm1, %v3337_v40  ;;  %7237 = vrot.lane.b32.xlu1 %v23788_v61, %s23508_s29 }
  0xf4   : > { %18581 = vmatmul.mubr.msk.f32.gmra.mrb[4].mxu0 %vm668_vm2, %v24257_v28  ;;  %20057 = vmatmul.mubr.msk.f32.vlgmr.msra.gmra.mrb[6].mxu1 %vm668_vm2, %v24257_v28  ;;  %v24322_v61 = vpop.permute.xlu0 %4490 }
  0xf5   : > { %18586 = vmatpush1.msk.msra.mxu1 %vm675_vm1, %v24239_v56  ;;  %3417 = vmatprep.mubr.f32.mxu1 %v23501_v6  ;;  %v4501_v58 = vsel %vm661_vm0, %v24322_v61, %v24324_v3  ;;  %v4500_v25 = vsel %vm661_vm0, %v24296_v31, %v24322_v61 }
  0xf6   : > { %3494 = vmatprep.mubr.f32.mxu0 %v23501_v6  ;;  %18593 = vmatprep.subr.msk.mxu1 %vm675_vm1, %v3338_v63  ;;  %v24356_v57 = vpop.permute.xlu1 %4496 }
  0xf7   : > { %7245 = vrot.lane.b32.xlu1 %v7228_v23, %s23508_s29  ;;  %7243 = vrot.lane.b32.xlu0 %v23813_v8, %s23508_s29  ;;  %v3704_v8 = vrot.slane %v3677_v47, %v23638_v5 }
  0xf8   : > { %18587 = vmatmul.mubr.msk.f32.vlgmr.msra.gmra.mrb[8].mxu1 %vm668_vm2, %v24227_v48  ;;  %18591 = vmatmul.mubr.msk.f32.vlgmr.msra.gmra.mrb[8].mxu0 %vm668_vm2, %v24227_v48  ;;  %v24354_v26 = vpop.permute.xlu0 %4494 }
  0xf9   : > { %3423 = vmatprep.mubr.f32.mxu1 %v23501_v6  ;;  %3500 = vmatprep.mubr.f32.mxu0 %v23501_v6  ;;  %v3712_v50 = vcombine.high %v3704_v8, %v3704_v8  ;;  %v4503_v17 = vsel %vm661_vm0, %v24354_v26, %v24356_v57  ;;  %v4502_v30 = vsel %vm661_vm0, %v24324_v3, %v24354_v26 }
  0xfa   : > { %18594 = vmatpush1.msk.msra.mxu1 %vm675_vm1, %v3330_v38  ;;  %20060 = vmatpush3.msk.msra.mxu0 %vm675_vm1, %v3337_v40  ;;  %v24382_v60 = vpop.permute.xlu1 %4885  ;;  %v24527_v38 = vld [vmem:[%s30012_s28 + $0x50] sm:$0xff] }
  0xfb   : > { %18602 = vmatprep.subr.msk.mxu0 %vm675_vm1, %v24330_v44  ;;  %18606 = vmatprep.subr.msk.mxu1 %vm675_vm1, %v24335_v46 }
  0xfc   : > { %18588 = vmatmul.mubr.msk.f32.gmra.mrb[10].mxu1 %vm668_vm2, %v24257_v28  ;;  %18592 = vmatmul.mubr.msk.f32.gmra.mrb[10].mxu0 %vm668_vm2, %v24257_v28  ;;  %v24380_v59 = vpop.permute.xlu0 %4883 }
  0xfd   : > { %3571 = vmatprep.mubr.f32.mxu1 %v23501_v6  ;;  %20061 = vmatprep.mubr.msk.f32.mxu0 %vm668_vm2, %v24227_v48  ;;  %v4897_v23 = vsel %vm4895_vm5, %v24380_v59, %v24382_v60 }
  0xfe   : > { %7249 = vrot.lane.b32.xlu1 %v7235_v53, %s23508_s29  ;;  %7247 = vrot.lane.b32.xlu0 %v7236_v54, %s23508_s29  ;;  %v24413_v7 = vpop.permute.xlu1 %4887  ;;  %s30005_s29 = smov 112  }
 0x100   : > { %18595 = vmatmul.mubr.msk.f32.vlgmr.msra.gmra.mrb[12].mxu1 %vm668_vm2, %v24227_v48  ;;  %20062 = vmatmul.mubr.msk.f32.vlgmr.msra.gmra.mrb[12].mxu0 %vm668_vm2, %v24257_v28  ;;  %v24411_v45 = vpop.permute.xlu0 %4881  ;;  %v4108_v48 = vsel %vm661_vm0, %v24250_v27, %v24233_v15  ;;  %v8020_v27 = vrot.slane %v7993_v9, %v23638_v5 }
 0x101   : > { %3577 = vmatprep.mubr.f32.mxu1 %v23501_v6  ;;  %18603 = vmatpush1.msk.msra.mxu0 %vm675_vm1, %v24309_v43 }
 0x102   : > { %3797 = vmatprep.mubr.f32.mxu0 %v23501_v6  ;;  %18607 = vmatpush1.msk.msra.mxu1 %vm675_vm1, %v24313_v32  ;;  %v8028_v63 = vcombine.high %v8020_v27, %v8020_v27 }
 0x103   : > { %18610 = vmatprep.subr.msk.mxu0 %vm675_vm1, %v3712_v50  ;;  %20064 = vmatprep.subr.msk.mxu1 %vm675_vm1, %v3711_v51  ;;  %v4896_v50 = vsel %vm4895_vm5, %v24411_v45, %v24380_v59 }
 0x104   : > { %18596 = vmatmul.mubr.msk.f32.gmra.mrb[14].mxu1 %vm668_vm2, %v24257_v28  ;;  %18604 = vmatmul.mubr.msk.f32.vlgmr.msra.gmra.mrb[0].mxu0 %vm668_vm2, %v24378_v52  ;;  %v8013_v28 = vcombine.high %v7993_v9, %v7993_v9 }
 0x105   : > { %3803 = vmatprep.mubr.f32.mxu0 %v23501_v6  ;;  %3874 = vmatprep.mubr.f32.mxu1 %v23501_v6 }
 0x106   : > { %18611 = vmatpush1.msk.msra.mxu0 %vm675_vm1, %v3704_v8  ;;  %7636 = vrot.lane.b32.xlu1 %v23825_v20, %s23502_s23  ;;  %v4105_v20 = vsel %vm661_vm0, %v24196_v4, %v24188_v41  ;;  %v8027_v55 = vrot.slane %v8013_v28, %v23638_v5  ;;  %v8783_v8 = vld [vmem:[%s23645_s2 + $0x3e] sm:$0xff] }
 0x107   : > { %18621 = vmatprep.subr.msk.mxu0 %vm675_vm1, %v4107_v0  ;;  %7634 = vrot.lane.b32.xlu0 %v23831_v22, %s23502_s23  ;;  %v4106_v22 = vsel %vm661_vm0, %v24188_v41, %v24207_v13  ;;  %v7630_v13 = vrot.slane %v7616_v11, %v23638_v5 }
 0x108   : > { %18605 = vmatmul.mubr.msk.f32.gmra.mrb[6].mxu0 %vm668_vm2, %v24402_v1  ;;  %18608 = vmatmul.mubr.msk.f32.vlgmr.msra.gmra.mrb[2].mxu1 %vm668_vm2, %v24378_v52  ;;  %v24439_v41 = vpop.permute.xlu0 %4889 }
 0x109   : > { %3880 = vmatprep.mubr.f32.mxu1 %v23501_v6  ;;  %3951 = vmatprep.mubr.f32.mxu0 %v23501_v6  ;;  %v4899_v35 = vsel %vm4895_vm5, %v24413_v7, %v24439_v41 }
 0x10a   : > { %20065 = vmatpush3.msk.msra.mxu1 %vm675_vm1, %v3711_v51  ;;  %7638 = vrot.lane.b32.xlu1 %v23837_v24, %s23502_s23  ;;  %v24441_v24 = vpop.permute.xlu1 %4891  ;;  %v8787_v51 = vcombine.high %v8783_v8, %v8783_v8 }
 0x10b   : > { %18617 = vmatprep.subr.msk.mxu1 %vm675_vm1, %v4105_v20  ;;  %7632 = vrot.lane.b32.xlu0 %v23821_v18, %s23502_s23  ;;  %v4109_v18 = vsel %vm661_vm0, %v24233_v15, %v24275_v37 }
 0x10c   : > { %18609 = vmatmul.mubr.msk.f32.gmra.mrb[4].mxu1 %vm668_vm2, %v24402_v1  ;;  %18612 = vmatmul.mubr.msk.f32.vlgmr.msra.gmra.mrb[2].mxu0 %vm668_vm2, %v24378_v52  ;;  %v8801_v0 = vrot.slane %v8787_v51, %v23638_v5 }
 0x10d   : > { %18622 = vmatpush1.msk.msra.mxu0 %vm675_vm1, %v4106_v22  ;;  %3957 = vmatprep.mubr.f32.mxu0 %v23501_v6 }
 0x10e   : > { %20066 = vmatprep.mubr.msk.f32.mxu1 %vm668_vm2, %v24378_v52  ;;  %7642 = vrot.lane.b32.xlu1 %v7631_v10, %s23502_s23  ;;  %v24472_v12 = vpop.permute.xlu1 %5278 }
 0x10f   : > { %20069 = vmatprep.subr.msk.mxu0 %vm675_vm1, %v24275_v37  ;;  %7640 = vrot.lane.b32.xlu0 %v7623_v2, %s23502_s23 }
 0x110   : > { %18613 = vmatmul.mubr.msk.f32.gmra.mrb[4].mxu0 %vm668_vm2, %v24402_v1  ;;  %20067 = vmatmul.mubr.msk.f32.vlgmr.msra.gmra.mrb[6].mxu1 %vm668_vm2, %v24402_v1  ;;  %v24470_v4 = vpop.permute.xlu0 %4893 }
 0x111   : > { %18618 = vmatpush1.msk.msra.mxu1 %vm675_vm1, %v4104_v39  ;;  %4188 = vmatprep.mubr.f32.mxu1 %v23501_v6  ;;  %v4901_v49 = vsel %vm4895_vm5, %v24441_v24, %v24470_v4 }
 0x112   : > { %4265 = vmatprep.mubr.f32.mxu0 %v23501_v6  ;;  %18625 = vmatprep.subr.msk.mxu1 %vm675_vm1, %v4109_v18  ;;  %v24501_v21 = vpop.permute.xlu1 %5276  ;;  %v24677_v18 = vld [vmem:[%s30012_s28 + $0x60] sm:$0xff] }
 0x113   : > { %8031 = vrot.lane.b32.xlu1 %v24330_v44, %s29999_s3  ;;  %7644 = vrot.lane.b32.xlu0 %v7630_v13, %s23502_s23  ;;  %s30003_s23 = smov 122  }
 0x114   : > { %18619 = vmatmul.mubr.msk.f32.vlgmr.msra.gmra.mrb[8].mxu1 %vm668_vm2, %v24378_v52  ;;  %18623 = vmatmul.mubr.msk.f32.vlgmr.msra.gmra.mrb[8].mxu0 %vm668_vm2, %v24378_v52 }
 0x115   : > { %18626 = vmatpush1.msk.msra.mxu1 %vm675_vm1, %v4108_v48  ;;  %4194 = vmatprep.mubr.f32.mxu1 %v23501_v6  ;;  %v24499_v15 = vpop.permute.xlu0 %5280 }
 0x116   : > { %4271 = vmatprep.mubr.f32.mxu0 %v23501_v6  ;;  %20070 = vmatpush3.msk.msra.mxu0 %vm675_vm1, %v24275_v37  ;;  %v8386_v37 = vld [vmem:[%s23645_s2] sm:$0xff]  ;;  %v5291_v2 = vsel %vm1408_vm3, %v24472_v12, %v24499_v15 }
 0x117   : > { %18634 = vmatprep.subr.msk.mxu0 %vm675_vm1, %v4499_v16  ;;  %18638 = vmatprep.subr.msk.mxu1 %vm675_vm1, %v4501_v58  ;;  %v8390_v40 = vcombine.high %v8386_v37, %v8386_v37  ;;  %v8397_v31 = vrot.slane %v8386_v37, %v23638_v5  ;;  %v24700_v16 = vld [vmem:[%s30012_s28 + $0x68] sm:$0xff]  ;;  %v8803_v58 = vcombine.high %v8801_v0, %v8801_v0 }
 0x118   : > { %18620 = vmatmul.mubr.msk.f32.gmra.mrb[10].mxu1 %vm668_vm2, %v24402_v1  ;;  %18624 = vmatmul.mubr.msk.f32.gmra.mrb[10].mxu0 %vm668_vm2, %v24402_v1 }
 0x119   : > { %4342 = vmatprep.mubr.f32.mxu1 %v23501_v6  ;;  %20071 = vmatprep.mubr.msk.f32.mxu0 %vm668_vm2, %v24378_v52  ;;  %v8405_v44 = vcombine.high %v8397_v31, %v8397_v31 }
 0x11a   : > { %8029 = vrot.lane.b32.xlu1 %v24309_v43, %s29999_s3  ;;  %8033 = vrot.lane.b32.xlu0 %v24313_v32, %s29999_s3  ;;  %v8404_v43 = vrot.slane %v8390_v40, %v23638_v5  ;;  %v8387_v32 = vld [vmem:[%s23645_s2 + $0x8] sm:$0x3f] }
 0x11b   : > { %v8407_v53 = vcombine.high %v8387_v32, %v8387_v32  ;;  %v8414_v59 = vrot.slane %v8387_v32, %v23638_v5 }
 0x11c   : > { %18627 = vmatmul.mubr.msk.f32.vlgmr.msra.gmra.mrb[12].mxu1 %vm668_vm2, %v24378_v52  ;;  %20072 = vmatmul.mubr.msk.f32.vlgmr.msra.gmra.mrb[12].mxu0 %vm668_vm2, %v24402_v1  ;;  %v24537_v36 = vpop.permute.xlu0 %5282  ;;  %v24539_v34 = vpop.permute.xlu1 %5284  ;;  %v8406_v47 = vcombine.high %v8404_v43, %v8404_v43  ;;  %v4900_v52 = vsel %vm4895_vm5, %v24439_v41, %v24441_v24  ;;  %v5290_v41 = vsel %vm1408_vm3, %v24501_v21, %v24472_v12  ;;  %v8784_v12 = vld [vmem:[%s23645_s2 + $0x46] sm:$0x3f] }
 0x11d   : > { %18635 = vmatpush1.msk.msra.mxu0 %vm675_vm1, %v4498_v29  ;;  %18639 = vmatpush1.msk.msra.mxu1 %vm675_vm1, %v4500_v25  ;;  %v8421_v26 = vrot.slane %v8407_v53, %v23638_v5  ;;  %v8422_v20 = vcombine.high %v8414_v59, %v8414_v59  ;;  %v5292_v10 = vsel %vm1408_vm3, %v24499_v15, %v24537_v36 }
 0x11e   : > { %4348 = vmatprep.mubr.f32.mxu1 %v23501_v6  ;;  %4588 = vmatprep.mubr.f32.mxu0 %v23501_v6  ;;  %v8811_v15 = vrot.slane %v8784_v12, %v23638_v5  ;;  %v8804_v21 = vcombine.high %v8784_v12, %v8784_v12 }
 0x11f   : > { %8037 = vrot.lane.b32.xlu1 %v8020_v27, %s29999_s3  ;;  %18642 = vmatprep.subr.msk.mxu0 %vm675_vm1, %v4503_v17 }
 0x120   : > { %18628 = vmatmul.mubr.msk.f32.gmra.mrb[14].mxu1 %vm668_vm2, %v24402_v1  ;;  %18636 = vmatmul.mubr.msk.f32.vlgmr.msra.gmra.mrb[0].mxu0 %vm668_vm2, %v24527_v38  ;;  %v8819_v29 = vcombine.high %v8811_v15, %v8811_v15  ;;  %v8818_v17 = vrot.slane %v8804_v21, %v23638_v5 }
 0x121   : > { %18643 = vmatpush1.msk.msra.mxu0 %vm675_vm1, %v4502_v30  ;;  %4594 = vmatprep.mubr.f32.mxu0 %v23501_v6 }
 0x122   : > { %4665 = vmatprep.mubr.f32.mxu1 %v23501_v6  ;;  %20074 = vmatprep.subr.msk.mxu1 %vm675_vm1, %v24356_v57 }
 0x123   : > { %8035 = vrot.lane.b32.xlu0 %v24335_v46, %s29999_s3  ;;  %8041 = vrot.lane.b32.xlu1 %v8027_v55, %s29999_s3  ;;  %v4898_v46 = vsel %vm4895_vm5, %v24382_v60, %v24413_v7  ;;  %v8794_v60 = vrot.slane %v8783_v8, %v23638_v5  ;;  %v5293_v7 = vsel %vm1408_vm3, %v24537_v36, %v24539_v34  ;;  %v24807_v8 = vld [vmem:[%s30012_s28 + $0x78] sm:$0xff] }
 0x124   : > { %18637 = vmatmul.mubr.msk.f32.gmra.mrb[6].mxu0 %vm668_vm2, %v24550_v42  ;;  %18640 = vmatmul.mubr.msk.f32.vlgmr.msra.gmra.mrb[2].mxu1 %vm668_vm2, %v24527_v38 }
 0x125   : > { %20075 = vmatpush3.msk.msra.mxu1 %vm675_vm1, %v24356_v57  ;;  %4671 = vmatprep.mubr.f32.mxu1 %v23501_v6  ;;  %v24571_v61 = vpop.permute.xlu0 %5286  ;;  %v24573_v3 = vpop.permute.xlu1 %5288  ;;  %v8802_v45 = vcombine.high %v8794_v60, %v8794_v60 }
 0x126   : > { %4742 = vmatprep.mubr.f32.mxu0 %v23501_v6  ;;  %18649 = vmatprep.subr.msk.mxu1 %vm675_vm1, %v4897_v23  ;;  %v5295_v24 = vsel %vm1408_vm3, %v24571_v61, %v24573_v3  ;;  %v5294_v13 = vsel %vm1408_vm3, %v24539_v34, %v24571_v61  ;;  %v23509_v34 = vmov 0   ;;  %v9175_v23 = vld [vmem:[%s30013_s22 + $0x8] sm:$0xff] }
 0x127   : > { %8039 = vrot.lane.b32.xlu0 %v8028_v63, %s29999_s3  ;;  %8427 = vrot.lane.b32.xlu1 %v8404_v43, %s29999_s3  ;;  %v9174_v43 = vld [vmem:[%s30013_s22] sm:$0xff]  ;;  %s30017_s22 = sld [smem:[#allocation5_spill]] }
 0x128   : > { %18641 = vmatmul.mubr.msk.f32.gmra.mrb[4].mxu1 %vm668_vm2, %v24550_v42  ;;  %18644 = vmatmul.mubr.msk.f32.vlgmr.msra.gmra.mrb[2].mxu0 %vm668_vm2, %v24527_v38 }
 0x129   : > { %18653 = vmatprep.subr.msk.mxu0 %vm675_vm1, %v4899_v35  ;;  %4748 = vmatprep.mubr.f32.mxu0 %v23501_v6  ;;  %v24591_v54 = vpop.permute.xlu1 %5677  ;;  %v24603_v57 = vpop.permute.xlu0 %5675 }
 0x12a   : > { %18654 = vmatpush1.msk.msra.mxu0 %vm675_vm1, %v4898_v46  ;;  %20076 = vmatprep.mubr.msk.f32.mxu1 %vm668_vm2, %v24527_v38  ;;  %v5689_v9 = vsel %vm5687_vm6, %v24603_v57, %v24591_v54  ;;  %v24791_v46 = vld [vmem:[%s30012_s28 + $0x70] sm:$0xff] }
 0x12b   : > { %8425 = vrot.lane.b32.xlu0 %v8405_v44, %s29999_s3  ;;  %8429 = vrot.lane.b32.xlu1 %v8406_v47, %s29999_s3 }
 0x12c   : > { %18645 = vmatmul.mubr.msk.f32.gmra.mrb[4].mxu0 %vm668_vm2, %v24550_v42  ;;  %20077 = vmatmul.mubr.msk.f32.vlgmr.msra.gmra.mrb[6].mxu1 %vm668_vm2, %v24550_v42 }
 0x12d   : > { %18650 = vmatpush1.msk.msra.mxu1 %vm675_vm1, %v4896_v50  ;;  %4980 = vmatprep.mubr.f32.mxu1 %v23501_v6  ;;  %v24623_v62 = vpop.permute.xlu1 %5679  ;;  %v24632_v1 = vpop.permute.xlu0 %5673 }
 0x12e   : > { %5057 = vmatprep.mubr.f32.mxu0 %v23501_v6  ;;  %18657 = vmatprep.subr.msk.mxu1 %vm675_vm1, %v4901_v49  ;;  %v5690_v28 = vsel %vm5687_vm6, %v24591_v54, %v24623_v62  ;;  %v5688_v55 = vsel %vm5687_vm6, %v24632_v1, %v24603_v57 }
 0x12f   : > { %8423 = vrot.lane.b32.xlu0 %v8397_v31, %s29999_s3  ;;  %8435 = vrot.lane.b32.xlu1 %v8421_v26, %s29999_s3 }
 0x130   : > { %18651 = vmatmul.mubr.msk.f32.vlgmr.msra.gmra.mrb[8].mxu1 %vm668_vm2, %v24527_v38  ;;  %18655 = vmatmul.mubr.msk.f32.vlgmr.msra.gmra.mrb[8].mxu0 %vm668_vm2, %v24527_v38 }
 0x131   : > { %18658 = vmatpush1.msk.msra.mxu1 %vm675_vm1, %v4900_v52  ;;  %4986 = vmatprep.mubr.f32.mxu1 %v23501_v6  ;;  %v24652_v22 = vpop.permute.xlu1 %5683  ;;  %v5682_v11 = vpop.permute.xlu0 %5681 }
 0x132   : > { %5063 = vmatprep.mubr.f32.mxu0 %v23501_v6  ;;  %20079 = vmatprep.subr.msk.mxu0 %vm675_vm1, %v24470_v4  ;;  %v5692_v40 = vsel %vm5687_vm6, %v5682_v11, %v24652_v22 }
 0x133   : > { %20080 = vmatpush3.msk.msra.mxu0 %vm675_vm1, %v24470_v4  ;;  %8431 = vrot.lane.b32.xlu0 %v8414_v59, %s29999_s3  ;;  %v5691_v4 = vsel %vm5687_vm6, %v24623_v62, %v5682_v11 }
 0x134   : > { %18652 = vmatmul.mubr.msk.f32.gmra.mrb[10].mxu1 %vm668_vm2, %v24550_v42  ;;  %18656 = vmatmul.mubr.msk.f32.gmra.mrb[10].mxu0 %vm668_vm2, %v24550_v42 }
 0x135   : > { %8824 = vrot.lane.b32.xlu1 %v8801_v0, %s29997_s24  ;;  %18666 = vmatprep.subr.msk.mxu0 %vm675_vm1, %v5291_v2 }
 0x136   : > { %5134 = vmatprep.mubr.f32.mxu1 %v23501_v6  ;;  %20081 = vmatprep.mubr.msk.f32.mxu0 %vm668_vm2, %v24527_v38 }
 0x137   : > { %18670 = vmatprep.subr.msk.mxu1 %vm675_vm1, %v5293_v7  ;;  %8822 = vrot.lane.b32.xlu0 %v8802_v45, %s29997_s24 }
 0x138   : > { %18659 = vmatmul.mubr.msk.f32.vlgmr.msra.gmra.mrb[12].mxu1 %vm668_vm2, %v24527_v38  ;;  %20082 = vmatmul.mubr.msk.f32.vlgmr.msra.gmra.mrb[12].mxu0 %vm668_vm2, %v24550_v42  ;;  %v5686_v39 = vpop.permute.xlu0 %5685  ;;  %v24686_v48 = vpop.permute.xlu1 %6070 }
 0x139   : > { %18667 = vmatpush1.msk.msra.mxu0 %vm675_vm1, %v5290_v41  ;;  %8433 = vrot.lane.b32.xlu1 %v8422_v20, %s29999_s3  ;;  %v5693_v38 = vsel %vm5687_vm6, %v24652_v22, %v5686_v39  ;;  %v6824_v20 = vld [vmem:[%s23645_s2 + $0x6c] sm:$0x3f]  ;;  %s23514_s3 = smov 103   ;;  %s23521_s2 = smov 120  }
 0x13a   : > { %18671 = vmatpush1.msk.msra.mxu1 %vm675_vm1, %v5292_v10  ;;  %5140 = vmatprep.mubr.f32.mxu1 %v23501_v6  ;;  %v6851_v22 = vrot.slane %v6824_v20, %v23638_v5  ;;  %v6844_v10 = vcombine.high %v6824_v20, %v6824_v20  ;;  %v18793_v20 = vld [vmem:[%s30012_s28 + $0xa8] sm:$0xff] }
 0x13b   : > { %5380 = vmatprep.mubr.f32.mxu0 %v23501_v6  ;;  %18674 = vmatprep.subr.msk.mxu0 %vm675_vm1, %v5295_v24 }
 0x13c   : > { %18660 = vmatmul.mubr.msk.f32.gmra.mrb[14].mxu1 %vm668_vm2, %v24550_v42  ;;  %18668 = vmatmul.mubr.msk.f32.vlgmr.msra.gmra.mrb[0].mxu0 %vm668_vm2, %v24677_v18  ;;  %v6858_v24 = vrot.slane %v6844_v10, %v23638_v5 }
 0x13d   : > { %18675 = vmatpush1.msk.msra.mxu0 %vm675_vm1, %v5294_v13  ;;  %5386 = vmatprep.mubr.f32.mxu0 %v23501_v6 }
 0x13e   : > { %5457 = vmatprep.mubr.f32.mxu1 %v23501_v6  ;;  %20084 = vmatprep.subr.msk.mxu1 %vm675_vm1, %v24573_v3 }
 0x13f   : > { %8820 = vrot.lane.b32.xlu0 %v8794_v60, %s29997_s24  ;;  %18685 = vmatprep.subr.msk.mxu0 %vm675_vm1, %v5691_v4 }
 0x140   : > { %18669 = vmatmul.mubr.msk.f32.gmra.mrb[6].mxu0 %vm668_vm2, %v24700_v16  ;;  %18672 = vmatmul.mubr.msk.f32.vlgmr.msra.gmra.mrb[2].mxu1 %vm668_vm2, %v24677_v18 }
 0x141   : > { %20085 = vmatpush3.msk.msra.mxu1 %vm675_vm1, %v24573_v3  ;;  %5463 = vmatprep.mubr.f32.mxu1 %v23501_v6  ;;  %v6073_v25 = vpop.permute.xlu0 %6072  ;;  %v6069_v27 = vpop.permute.xlu1 %6068 }
 0x142   : > { %5534 = vmatprep.mubr.f32.mxu0 %v23501_v6  ;;  %18681 = vmatprep.subr.msk.mxu1 %vm675_vm1, %v5689_v9  ;;  %v6083_v42 = vsel %vm2561_vm4, %v24686_v48, %v6073_v25  ;;  %v6082_v35 = vsel %vm2561_vm4, %v6069_v27, %v24686_v48 }
 0x143   : > { %8826 = vrot.lane.b32.xlu0 %v8803_v58, %s29997_s24  ;;  %8828 = vrot.lane.b32.xlu1 %v8811_v15, %s29997_s24 }
 0x144   : > { %18673 = vmatmul.mubr.msk.f32.gmra.mrb[4].mxu1 %vm668_vm2, %v24700_v16  ;;  %18676 = vmatmul.mubr.msk.f32.vlgmr.msra.gmra.mrb[2].mxu0 %vm668_vm2, %v24677_v18 }
 0x145   : > { %18686 = vmatpush1.msk.msra.mxu0 %vm675_vm1, %v5690_v28  ;;  %5540 = vmatprep.mubr.f32.mxu0 %v23501_v6  ;;  %v6075_v37 = vpop.permute.xlu0 %6074  ;;  %v6077_v30 = vpop.permute.xlu1 %6076 }
 0x146   : > { %20086 = vmatprep.mubr.msk.f32.mxu1 %vm668_vm2, %v24677_v18  ;;  %20089 = vmatprep.subr.msk.mxu0 %vm675_vm1, %v5686_v39  ;;  %v6085_v31 = vsel %vm2561_vm4, %v6075_v37, %v6077_v30  ;;  %v6084_v3 = vsel %vm2561_vm4, %v6073_v25, %v6075_v37 }
 0x147   : > { %8830 = vrot.lane.b32.xlu0 %v8819_v29, %s29997_s24  ;;  %8832 = vrot.lane.b32.xlu1 %v8818_v17, %s29997_s24  ;;  %s23511_s24 = smov 108  }
 0x148   : > { %18677 = vmatmul.mubr.msk.f32.gmra.mrb[4].mxu0 %vm668_vm2, %v24700_v16  ;;  %20087 = vmatmul.mubr.msk.f32.vlgmr.msra.gmra.mrb[6].mxu1 %vm668_vm2, %v24700_v16 }
 0x149   : > { %18682 = vmatpush1.msk.msra.mxu1 %vm675_vm1, %v5688_v55  ;;  %5772 = vmatprep.mubr.f32.mxu1 %v23501_v6  ;;  %v6079_v36 = vpop.permute.xlu0 %6078  ;;  %v6081_v63 = vpop.permute.xlu1 %6080 }
 0x14a   : > { %5849 = vmatprep.mubr.f32.mxu0 %v23501_v6  ;;  %18689 = vmatprep.subr.msk.mxu1 %vm675_vm1, %v5693_v38  ;;  %v6087_v44 = vsel %vm2561_vm4, %v6079_v36, %v6081_v63  ;;  %v6086_v47 = vsel %vm2561_vm4, %v6077_v30, %v6079_v36 }
 0x14b   : > { %22940 = vset.pattern.permute.xlu0 %v23509_v34  ;;  %22941 = vset.pattern.permute.xlu1 %v23509_v34 }
 0x14c   : > { %18683 = vmatmul.mubr.msk.f32.vlgmr.msra.gmra.mrb[8].mxu1 %vm668_vm2, %v24677_v18  ;;  %18687 = vmatmul.mubr.msk.f32.vlgmr.msra.gmra.mrb[8].mxu0 %vm668_vm2, %v24677_v18 }
 0x14d   : > { %18690 = vmatpush1.msk.msra.mxu1 %vm675_vm1, %v5692_v40  ;;  %5778 = vmatprep.mubr.f32.mxu1 %v23501_v6  ;;  %v6468_v32 = vpop.permute.xlu0 %6467  ;;  %v6470_v61 = vpop.permute.xlu1 %6469  ;;  %v24967_v40 = vld [vmem:[%s30012_s28 + $0x90] sm:$0xff] }
 0x14e   : > { %5855 = vmatprep.mubr.f32.mxu0 %v23501_v6  ;;  %20090 = vmatpush3.msk.msra.mxu0 %vm675_vm1, %v5686_v39  ;;  %v6481_v49 = vsel %vm6479_vm7, %v6468_v32, %v6470_v61 }
 0x14f   : > { %18698 = vmatprep.subr.msk.mxu0 %vm675_vm1, %v6083_v42  ;;  %18702 = vmatprep.subr.msk.mxu1 %vm675_vm1, %v6085_v31  ;;  %v24983_v31 = vld [vmem:[%s30012_s28 + $0x98] sm:$0xff] }
 0x150   : > { %18684 = vmatmul.mubr.msk.f32.gmra.mrb[10].mxu1 %vm668_vm2, %v24700_v16  ;;  %18688 = vmatmul.mubr.msk.f32.gmra.mrb[10].mxu0 %vm668_vm2, %v24700_v16 }
 0x151   : > { %5926 = vmatprep.mubr.f32.mxu1 %v23501_v6  ;;  %20091 = vmatprep.mubr.msk.f32.mxu0 %vm668_vm2, %v24677_v18 }
 0x152   : > { %9178 = vperm.xlu0 %22940, %v9174_v43   ;;  %9183 = vperm.xlu1 %22941, %v9175_v23  }
 0x154   : > { %18691 = vmatmul.mubr.msk.f32.vlgmr.msra.gmra.mrb[12].mxu1 %vm668_vm2, %v24677_v18  ;;  %20092 = vmatmul.mubr.msk.f32.vlgmr.msra.gmra.mrb[12].mxu0 %vm668_vm2, %v24700_v16  ;;  %v6466_v53 = vpop.permute.xlu0 %6465  ;;  %v6472_v54 = vpop.permute.xlu1 %6471 }
 0x155   : > { %18699 = vmatpush1.msk.msra.mxu0 %vm675_vm1, %v6082_v35  ;;  %18703 = vmatpush1.msk.msra.mxu1 %vm675_vm1, %v6084_v3  ;;  %v6482_v51 = vsel %vm6479_vm7, %v6470_v61, %v6472_v54  ;;  %v6480_v62 = vsel %vm6479_vm7, %v6466_v53, %v6468_v32 }
 0x156   : > { %5932 = vmatprep.mubr.f32.mxu1 %v23501_v6  ;;  %6172 = vmatprep.mubr.f32.mxu0 %v23501_v6 }
 0x157   : > { %18706 = vmatprep.subr.msk.mxu0 %vm675_vm1, %v6087_v44  ;;  %20094 = vmatprep.subr.msk.mxu1 %vm675_vm1, %v6081_v63 }
 0x158   : > { %18692 = vmatmul.mubr.msk.f32.gmra.mrb[14].mxu1 %vm668_vm2, %v24700_v16  ;;  %18700 = vmatmul.mubr.msk.f32.vlgmr.msra.gmra.mrb[0].mxu0 %vm668_vm2, %v24791_v46 }
 0x159   : > { %18707 = vmatpush1.msk.msra.mxu0 %vm675_vm1, %v6086_v47  ;;  %6178 = vmatprep.mubr.f32.mxu0 %v23501_v6 }
 0x15a   : > { %6249 = vmatprep.mubr.f32.mxu1 %v23501_v6 }
 0x15c   : > { %18701 = vmatmul.mubr.msk.f32.gmra.mrb[6].mxu0 %vm668_vm2, %v24807_v8  ;;  %18704 = vmatmul.mubr.msk.f32.vlgmr.msra.gmra.mrb[2].mxu1 %vm668_vm2, %v24791_v46  ;;  %v6474_v26 = vpop.permute.xlu0 %6473 }
 0x15d   : > { %6255 = vmatprep.mubr.f32.mxu1 %v23501_v6  ;;  %6326 = vmatprep.mubr.f32.mxu0 %v23501_v6  ;;  %v6483_v57 = vsel %vm6479_vm7, %v6472_v54, %v6474_v26  ;;  %v6476_v50 = vpop.permute.xlu1 %6475 }
 0x15e   : > { %20095 = vmatpush3.msk.msra.mxu1 %vm675_vm1, %v6081_v63  ;;  %18717 = vmatprep.subr.msk.mxu0 %vm675_vm1, %v6483_v57  ;;  %v6484_v0 = vsel %vm6479_vm7, %v6474_v26, %v6476_v50 }
 0x15f   : > { %18713 = vmatprep.subr.msk.mxu1 %vm675_vm1, %v6481_v49 }
 0x160   : > { %18705 = vmatmul.mubr.msk.f32.gmra.mrb[4].mxu1 %vm668_vm2, %v24807_v8  ;;  %18708 = vmatmul.mubr.msk.f32.vlgmr.msra.gmra.mrb[2].mxu0 %vm668_vm2, %v24791_v46  ;;  %v6478_v52 = vpop.permute.xlu0 %6477 }
 0x161   : > { %6332 = vmatprep.mubr.f32.mxu0 %v23501_v6  ;;  %20096 = vmatprep.mubr.msk.f32.mxu1 %vm668_vm2, %v24791_v46  ;;  %v24829_v59 = vpop.permute.xlu1 %7239  ;;  %v6485_v60 = vsel %vm6479_vm7, %v6476_v50, %v6478_v52  ;;  %vm12554_vm7 = vcmask 957440  }
 0x162   : > { %18718 = vmatpush1.msk.msra.mxu0 %vm675_vm1, %v6482_v51 }
 0x163   : > { %20099 = vmatprep.subr.msk.mxu0 %vm675_vm1, %v6478_v52 }
 0x164   : > { %18709 = vmatmul.mubr.msk.f32.gmra.mrb[4].mxu0 %vm668_vm2, %v24807_v8  ;;  %20097 = vmatmul.mubr.msk.f32.vlgmr.msra.gmra.mrb[6].mxu1 %vm668_vm2, %v24807_v8  ;;  %v7242_v45 = vpop.permute.xlu0 %7241 }
 0x165   : > { %18714 = vmatpush1.msk.msra.mxu1 %vm675_vm1, %v6480_v62  ;;  %6564 = vmatprep.mubr.f32.mxu1 %v23501_v6  ;;  %v24844_v1 = vpop.permute.xlu1 %7237  ;;  %v7253_v13 = vsel %vm7251_vm8, %v24829_v59, %v7242_v45 }
 0x166   : > { %6641 = vmatprep.mubr.f32.mxu0 %v23501_v6  ;;  %18721 = vmatprep.subr.msk.mxu1 %vm675_vm1, %v6485_v60  ;;  %v7252_v9 = vsel %vm7251_vm8, %v24844_v1, %v24829_v59  ;;  %v18792_v60 = vld [vmem:[%s30012_s28 + $0xa0] sm:$0xff] }
 0x167   : > { %v24846_v2 = vpop.f32.mrb[0].mxu1 }
 0x168   : > { %v24848_v7 = vpop.f32.mrb[1].mxu1  ;;  %18715 = vmatmul.mubr.msk.f32.vlgmr.msra.gmra.mrb[8].mxu1 %vm668_vm2, %v24791_v46  ;;  %18719 = vmatmul.mubr.msk.f32.vlgmr.msra.gmra.mrb[8].mxu0 %vm668_vm2, %v24791_v46 }
 0x169   : > { %18722 = vmatpush1.msk.msra.mxu1 %vm675_vm1, %v6484_v0  ;;  %6570 = vmatprep.mubr.f32.mxu1 %v23501_v6  ;;  %v7246_v11 = vpop.permute.xlu1 %7245  ;;  %v7244_v41 = vpop.permute.xlu0 %7243 }
 0x16a   : > { %6647 = vmatprep.mubr.f32.mxu0 %v23501_v6  ;;  %20100 = vmatpush3.msk.msra.mxu0 %vm675_vm1, %v6478_v52  ;;  %v7254_v4 = vsel %vm7251_vm8, %v7242_v45, %v7244_v41 }
 0x16b   : > { %18730 = vmatprep.subr.msk.mxu0 %vm675_vm1, %v24267_v33  ;;  %18734 = vmatprep.subr.msk.mxu1 %vm675_vm1, %v24243_v19  ;;  %v6859_v33 = vcombine.high %v6851_v22, %v6851_v22  ;;  %v24882_v19 = vld [vmem:[%s30012_s28 + $0x80] sm:$0xff] }
 0x16c   : > { %18716 = vmatmul.mubr.msk.f32.gmra.mrb[10].mxu1 %vm668_vm2, %v24807_v8  ;;  %18720 = vmatmul.mubr.msk.f32.gmra.mrb[10].mxu0 %vm668_vm2, %v24807_v8 }
 0x16d   : > { %6718 = vmatprep.mubr.f32.mxu1 %v23501_v6  ;;  %20101 = vmatprep.mubr.msk.f32.mxu0 %vm668_vm2, %v24791_v46 }
 0x170   : > { %18723 = vmatmul.mubr.msk.f32.vlgmr.msra.gmra.mrb[12].mxu1 %vm668_vm2, %v24791_v46  ;;  %20102 = vmatmul.mubr.msk.f32.vlgmr.msra.gmra.mrb[12].mxu0 %vm668_vm2, %v24807_v8  ;;  %v7250_v5 = vpop.permute.xlu1 %7249  ;;  %v7248_v18 = vpop.permute.xlu0 %7247 }
 0x171   : > { %6724 = vmatprep.mubr.f32.mxu1 %v23501_v6  ;;  %18731 = vmatpush1.msk.msra.mxu0 %vm675_vm1, %v24239_v56  ;;  %v7255_v56 = vsel %vm7251_vm8, %v7244_v41, %v7246_v11  ;;  %v7257_v58 = vsel %vm7251_vm8, %v7248_v18, %v7250_v5  ;;  %v7256_v25 = vsel %vm7251_vm8, %v7246_v11, %v7248_v18  ;;  %vm12780_vm8 = vcmask 916480  }
 0x172   : > { %6944 = vmatprep.mubr.f32.mxu0 %v23501_v6  ;;  %18735 = vmatpush1.msk.msra.mxu1 %vm675_vm1, %v24210_v14  ;;  %v24899_v14 = vld [vmem:[%s30012_s28 + $0x88] sm:$0xff]  ;;  %s23512_s28 = smov 113  }
 0x173   : > { %18738 = vmatprep.subr.msk.mxu0 %vm675_vm1, %v6859_v33  ;;  %20104 = vmatprep.subr.msk.mxu1 %vm675_vm1, %v6858_v24 }
 0x174   : > { %18724 = vmatmul.mubr.msk.f32.gmra.mrb[14].mxu1 %vm668_vm2, %v24807_v8  ;;  %18732 = vmatmul.mubr.msk.f32.vlgmr.msra.gmra.mrb[0].mxu0 %vm668_vm2, %v24882_v19 }
 0x175   : > { %6950 = vmatprep.mubr.f32.mxu0 %v23501_v6  ;;  %7021 = vmatprep.mubr.f32.mxu1 %v23501_v6 }
 0x176   : > { %18739 = vmatpush1.msk.msra.mxu0 %vm675_vm1, %v6851_v22 }
 0x177   : > { %18749 = vmatprep.subr.msk.mxu0 %vm675_vm1, %v7255_v56 }
 0x178   : > { %18733 = vmatmul.mubr.msk.f32.gmra.mrb[6].mxu0 %vm668_vm2, %v24899_v14  ;;  %18736 = vmatmul.mubr.msk.f32.vlgmr.msra.gmra.mrb[2].mxu1 %vm668_vm2, %v24882_v19  ;;  %v7637_v39 = vpop.permute.xlu1 %7636 }
 0x179   : > { %7027 = vmatprep.mubr.f32.mxu1 %v23501_v6  ;;  %7098 = vmatprep.mubr.f32.mxu0 %v23501_v6  ;;  %v7635_v48 = vpop.permute.xlu0 %7634 }
 0x17a   : > { %20105 = vmatpush3.msk.msra.mxu1 %vm675_vm1, %v6858_v24  ;;  %v7647_v27 = vsel %vm661_vm0, %v7635_v48, %v7637_v39 }
 0x17b   : > { %18745 = vmatprep.subr.msk.mxu1 %vm675_vm1, %v7253_v13  ;;  %v9339_v13 = vld [vmem:[%s29985_s11 + $0x8] sm:$0xff] }
 0x17c   : > { %18737 = vmatmul.mubr.msk.f32.gmra.mrb[4].mxu1 %vm668_vm2, %v24899_v14  ;;  %18740 = vmatmul.mubr.msk.f32.vlgmr.msra.gmra.mrb[2].mxu0 %vm668_vm2, %v24882_v19  ;;  %v7639_v12 = vpop.permute.xlu1 %7638 }
 0x17d   : > { %18750 = vmatpush1.msk.msra.mxu0 %vm675_vm1, %v7254_v4  ;;  %7104 = vmatprep.mubr.f32.mxu0 %v23501_v6  ;;  %v7633_v16 = vpop.permute.xlu0 %7632  ;;  %v7648_v37 = vsel %vm661_vm0, %v7637_v39, %v7639_v12  ;;  %v9346_v39 = vld [vmem:[%s29985_s11 + $0x40] sm:$0xff] }
 0x17e   : > { %20106 = vmatprep.mubr.msk.f32.mxu1 %vm668_vm2, %v24882_v19  ;;  %20109 = vmatprep.subr.msk.mxu0 %vm675_vm1, %v7250_v5  ;;  %v7646_v38 = vsel %vm661_vm0, %v7633_v16, %v7635_v48  ;;  %v9341_v48 = vld [vmem:[%s29985_s11 + $0x18] sm:$0xff]  ;;  %v21066_v4 = vpack.c.bf16 %v9346_v39, %v9339_v13  ;;  %v9338_v16 = vld [vmem:[%s29985_s11] sm:$0xff] }
 0x17f   : > { %v9418_v13 = vld [vmem:[%s29985_s11 + $0x280] sm:$0xff] }
 0x180   : > { %18741 = vmatmul.mubr.msk.f32.gmra.mrb[4].mxu0 %vm668_vm2, %v24899_v14  ;;  %20107 = vmatmul.mubr.msk.f32.vlgmr.msra.gmra.mrb[6].mxu1 %vm668_vm2, %v24899_v14  ;;  %v7643_v15 = vpop.permute.xlu1 %7642 }
 0x181   : > { %18746 = vmatpush1.msk.msra.mxu1 %vm675_vm1, %v7252_v9  ;;  %7336 = vmatprep.mubr.f32.mxu1 %v23501_v6  ;;  %v7641_v21 = vpop.permute.xlu0 %7640 }
 0x182   : > { %7413 = vmatprep.mubr.f32.mxu0 %v23501_v6  ;;  %18753 = vmatprep.subr.msk.mxu1 %vm675_vm1, %v7257_v58  ;;  %v7649_v28 = vsel %vm661_vm0, %v7639_v12, %v7641_v21  ;;  %v7650_v36 = vsel %vm661_vm0, %v7641_v21, %v7643_v15  ;;  %v9348_v12 = vld [vmem:[%s29985_s11 + $0x50] sm:$0xff]  ;;  %v9345_v58 = vld [vmem:[%s29985_s11 + $0x38] sm:$0xff] }
 0x183   : > { %v21268_v9 = vpack.c.bf16 %v9348_v12, %v9341_v48  ;;  %v9340_v21 = vld [vmem:[%s29985_s11 + $0x10] sm:$0xff] }
 0x184   : > { %18747 = vmatmul.mubr.msk.f32.vlgmr.msra.gmra.mrb[8].mxu1 %vm668_vm2, %v24882_v19  ;;  %18751 = vmatmul.mubr.msk.f32.vlgmr.msra.gmra.mrb[8].mxu0 %vm668_vm2, %v24882_v19  ;;  %v9408_v12 = vld [vmem:[%s29985_s11 + $0x230] sm:$0xff] }
 0x185   : > { %18754 = vmatpush1.msk.msra.mxu1 %vm675_vm1, %v7256_v25  ;;  %7342 = vmatprep.mubr.f32.mxu1 %v23501_v6  ;;  %v8032_v29 = vpop.permute.xlu1 %8031  ;;  %v7645_v17 = vpop.permute.xlu0 %7644  ;;  %v9347_v25 = vld [vmem:[%s29985_s11 + $0x48] sm:$0xff] }
 0x186   : > { %7419 = vmatprep.mubr.f32.mxu0 %v23501_v6  ;;  %20110 = vmatpush3.msk.msra.mxu0 %vm675_vm1, %v7250_v5  ;;  %v7651_v55 = vsel %vm661_vm0, %v7643_v15, %v7645_v17  ;;  %v21068_v15 = vpack.c.bf16 %v9345_v58, %v9338_v16  ;;  %v9415_v16 = vld [vmem:[%s29985_s11 + $0x268] sm:$0xff]  ;;  %v9410_v58 = vld [vmem:[%s29985_s11 + $0x240] sm:$0xff]  ;;  %vm11749_vm0 = vcmask 965632  }
 0x187   : > { %18762 = vmatprep.subr.msk.mxu0 %vm675_vm1, %v7647_v27  ;;  %18766 = vmatprep.subr.msk.mxu1 %vm675_vm1, %v7649_v28  ;;  %v9353_v27 = vld [vmem:[%s29985_s11 + $0x78] sm:$0xff]  ;;  %v21270_v28 = vpack.c.bf16 %v9347_v25, %v9340_v21  ;;  %v9423_v21 = vld [vmem:[%s29985_s11 + $0x2a8] sm:$0xff]  ;;  %v9430_v25 = vld [vmem:[%s29985_s11 + $0x2e0] sm:$0xff] }
 0x188   : > { %18748 = vmatmul.mubr.msk.f32.gmra.mrb[10].mxu1 %vm668_vm2, %v24899_v14  ;;  %18752 = vmatmul.mubr.msk.f32.gmra.mrb[10].mxu0 %vm668_vm2, %v24899_v14 }
 0x189   : > { %7490 = vmatprep.mubr.f32.mxu1 %v23501_v6  ;;  %20111 = vmatprep.mubr.msk.f32.mxu0 %vm668_vm2, %v24882_v19 }
 0x18c   : > { %18755 = vmatmul.mubr.msk.f32.vlgmr.msra.gmra.mrb[12].mxu1 %vm668_vm2, %v24882_v19  ;;  %20112 = vmatmul.mubr.msk.f32.vlgmr.msra.gmra.mrb[12].mxu0 %vm668_vm2, %v24899_v14  ;;  %v8030_v30 = vpop.permute.xlu1 %8029  ;;  %v8034_v34 = vpop.permute.xlu0 %8033 }
 0x18d   : > { %18763 = vmatpush1.msk.msra.mxu0 %vm675_vm1, %v7646_v38  ;;  %18767 = vmatpush1.msk.msra.mxu1 %vm675_vm1, %v7648_v37  ;;  %v8044_v63 = vsel %vm4895_vm5, %v8032_v29, %v8034_v34  ;;  %v8043_v46 = vsel %vm4895_vm5, %v8030_v30, %v8032_v29  ;;  %v9360_v29 = vld [vmem:[%s29985_s11 + $0xb0] sm:$0xff]  ;;  %v9362_v37 = vld [vmem:[%s29985_s11 + $0xc0] sm:$0xff] }
 0x18e   : > { %7496 = vmatprep.mubr.f32.mxu1 %v23501_v6  ;;  %7736 = vmatprep.mubr.f32.mxu0 %v23501_v6  ;;  %v21070_v38 = vpack.c.bf16 %v9360_v29, %v9353_v27  ;;  %v9425_v27 = vld [vmem:[%s29985_s11 + $0x2b8] sm:$0xff]  ;;  %v21088_v29 = vpack.c.bf16 %v9415_v16, %v9408_v12  ;;  %v9480_v16 = vld [vmem:[%s29985_s11 + $0x470] sm:$0xff] }
 0x18f   : > { %18770 = vmatprep.subr.msk.mxu0 %vm675_vm1, %v7651_v55  ;;  %20114 = vmatprep.subr.msk.mxu1 %vm675_vm1, %v7645_v17  ;;  %v9352_v55 = vld [vmem:[%s29985_s11 + $0x70] sm:$0xff]  ;;  %v9485_v12 = vld [vmem:[%s29985_s11 + $0x498] sm:$0xff] }
 0x190   : > { %18756 = vmatmul.mubr.msk.f32.gmra.mrb[14].mxu1 %vm668_vm2, %v24899_v14  ;;  %18764 = vmatmul.mubr.msk.f32.vlgmr.msra.gmra.mrb[0].mxu0 %vm668_vm2, %v24967_v40 }
 0x191   : > { %18771 = vmatpush1.msk.msra.mxu0 %vm675_vm1, %v7650_v36  ;;  %v8038_v42 = vpop.permute.xlu1 %8037  ;;  %7742 = vmatprep.mubr.f32.mxu0 %v23501_v6  ;;  %v9354_v36 = vld [vmem:[%s29985_s11 + $0x80] sm:$0xff] }
 0x192   : > { %7813 = vmatprep.mubr.f32.mxu1 %v23501_v6 }
 0x194   : > { %18765 = vmatmul.mubr.msk.f32.gmra.mrb[6].mxu0 %vm668_vm2, %v24983_v31  ;;  %18768 = vmatmul.mubr.msk.f32.vlgmr.msra.gmra.mrb[2].mxu1 %vm668_vm2, %v24967_v40 }
 0x195   : > { %20115 = vmatpush3.msk.msra.mxu1 %vm675_vm1, %v7645_v17  ;;  %v8036_v43 = vpop.permute.xlu0 %8035  ;;  %v8042_v23 = vpop.permute.xlu1 %8041  ;;  %7819 = vmatprep.mubr.f32.mxu1 %v23501_v6  ;;  %v9355_v17 = vld [vmem:[%s29985_s11 + $0x88] sm:$0xff] }
 0x196   : > { %v8045_v32 = vsel %vm4895_vm5, %v8034_v34, %v8036_v43  ;;  %7890 = vmatprep.mubr.f32.mxu0 %v23501_v6  ;;  %18777 = vmatprep.subr.msk.mxu1 %vm675_vm1, %v8044_v63  ;;  %v8046_v61 = vsel %vm4895_vm5, %v8036_v43, %v8038_v42  ;;  %v21272_v30 = vpack.c.bf16 %v9362_v37, %v9355_v17  ;;  %v9374_v63 = vld [vmem:[%s29985_s11 + $0x120] sm:$0xff] }
 0x197   : > { %18781 = vmatprep.subr.msk.mxu0 %vm675_vm1, %v8046_v61  ;;  %v9376_v61 = vld [vmem:[%s29985_s11 + $0x130] sm:$0xff]  ;;  %v21090_v37 = vpack.c.bf16 %v9430_v25, %v9423_v21  ;;  %v9495_v25 = vld [vmem:[%s29985_s11 + $0x4e8] sm:$0xff] }
 0x198   : > { %18769 = vmatmul.mubr.msk.f32.gmra.mrb[4].mxu1 %vm668_vm2, %v24983_v31  ;;  %18772 = vmatmul.mubr.msk.f32.vlgmr.msra.gmra.mrb[2].mxu0 %vm668_vm2, %v24967_v40  ;;  %v9500_v21 = vld [vmem:[%s29985_s11 + $0x510] sm:$0xff] }
 0x199   : > { %18782 = vmatpush1.msk.msra.mxu0 %vm675_vm1, %v8045_v32  ;;  %v8040_v3 = vpop.permute.xlu0 %8039  ;;  %v8428_v35 = vpop.permute.xlu1 %8427  ;;  %7896 = vmatprep.mubr.f32.mxu0 %v23501_v6  ;;  %v9369_v32 = vld [vmem:[%s29985_s11 + $0xf8] sm:$0xff] }
 0x19a   : > { %20116 = vmatprep.mubr.msk.f32.mxu1 %vm668_vm2, %v24967_v40  ;;  %20119 = vmatprep.subr.msk.mxu0 %vm675_vm1, %v8042_v23  ;;  %v8048_v44 = vsel %vm4895_vm5, %v8040_v3, %v8042_v23  ;;  %v8047_v54 = vsel %vm4895_vm5, %v8038_v42, %v8040_v3  ;;  %v9361_v42 = vld [vmem:[%s29985_s11 + $0xb8] sm:$0xff]  ;;  %v9366_v3 = vld [vmem:[%s29985_s11 + $0xe0] sm:$0xff] }
 0x19b   : > { %v21274_v43 = vpack.c.bf16 %v9361_v42, %v9354_v36  ;;  %v9431_v36 = vld [vmem:[%s29985_s11 + $0x2e8] sm:$0xff]  ;;  %v9444_v42 = vld [vmem:[%s29985_s11 + $0x350] sm:$0xff] }
 0x19c   : > { %18773 = vmatmul.mubr.msk.f32.gmra.mrb[4].mxu0 %vm668_vm2, %v24983_v31  ;;  %20117 = vmatmul.mubr.msk.f32.vlgmr.msra.gmra.mrb[6].mxu1 %vm668_vm2, %v24983_v31 }
 0x19d   : > { %18778 = vmatpush1.msk.msra.mxu1 %vm675_vm1, %v8043_v46  ;;  %v8426_v47 = vpop.permute.xlu0 %8425  ;;  %v8430_v53 = vpop.permute.xlu1 %8429  ;;  %8127 = vmatprep.mubr.f32.mxu1 %v23501_v6  ;;  %v9368_v46 = vld [vmem:[%s29985_s11 + $0xf0] sm:$0xff] }
 0x19e   : > { %8204 = vmatprep.mubr.f32.mxu0 %v23501_v6  ;;  %18785 = vmatprep.subr.msk.mxu1 %vm675_vm1, %v8048_v44  ;;  %v8438_v8 = vsel %vm4895_vm5, %v8426_v47, %v8428_v35  ;;  %v8439_v50 = vsel %vm4895_vm5, %v8428_v35, %v8430_v53  ;;  %v21276_v35 = vpack.c.bf16 %v9376_v61, %v9369_v32  ;;  %v9373_v44 = vld [vmem:[%s29985_s11 + $0x118] sm:$0xff]  ;;  %v9436_v61 = vld [vmem:[%s29985_s11 + $0x310] sm:$0xff] }
 0x1a0   : > { %18779 = vmatmul.mubr.msk.f32.vlgmr.msra.gmra.mrb[8].mxu1 %vm668_vm2, %v24967_v40  ;;  %18783 = vmatmul.mubr.msk.f32.vlgmr.msra.gmra.mrb[8].mxu0 %vm668_vm2, %v24967_v40 }
 0x1a1   : > { %18786 = vmatpush1.msk.msra.mxu1 %vm675_vm1, %v8047_v54  ;;  %v8424_v49 = vpop.permute.xlu0 %8423  ;;  %v8436_v26 = vpop.permute.xlu1 %8435  ;;  %8133 = vmatprep.mubr.f32.mxu1 %v23501_v6  ;;  %v9381_v54 = vld [vmem:[%s29985_s11 + $0x158] sm:$0xff] }
 0x1a2   : > { %8210 = vmatprep.mubr.f32.mxu0 %v23501_v6  ;;  %20120 = vmatpush3.msk.msra.mxu0 %vm675_vm1, %v8042_v23  ;;  %v8437_v59 = vsel %vm4895_vm5, %v8424_v49, %v8426_v47  ;;  %v9375_v47 = vld [vmem:[%s29985_s11 + $0x128] sm:$0xff] }
 0x1a3   : > { %18794 = vmatprep.subr.msk.mxu0 %vm675_vm1, %v8438_v8  ;;  %v9388_v8 = vld [vmem:[%s29985_s11 + $0x190] sm:$0xff]  ;;  %v9383_v49 = vld [vmem:[%s29985_s11 + $0x168] sm:$0xff] }
 0x1a4   : > { %18780 = vmatmul.mubr.msk.f32.gmra.mrb[10].mxu1 %vm668_vm2, %v24983_v31  ;;  %18784 = vmatmul.mubr.msk.f32.gmra.mrb[10].mxu0 %vm668_vm2, %v24983_v31 }
 0x1a5   : > { %v8432_v57 = vpop.permute.xlu0 %8431  ;;  %8281 = vmatprep.mubr.f32.mxu1 %v23501_v6  ;;  %20121 = vmatprep.mubr.msk.f32.mxu0 %vm668_vm2, %v24967_v40 }
 0x1a6   : > { %v8440_v51 = vsel %vm4895_vm5, %v8430_v53, %v8432_v57  ;;  %v21076_v53 = vpack.c.bf16 %v9373_v44, %v9366_v3  ;;  %v9443_v3 = vld [vmem:[%s29985_s11 + $0x348] sm:$0xff] }
 0x1a7   : > { %v8825_v52 = vpop.permute.xlu1 %8824  ;;  %18798 = vmatprep.subr.msk.mxu1 %vm675_vm1, %v8440_v51  ;;  %v9380_v51 = vld [vmem:[%s29985_s11 + $0x150] sm:$0xff] }
 0x1a8   : > { %18787 = vmatmul.mubr.msk.f32.vlgmr.msra.gmra.mrb[12].mxu1 %vm668_vm2, %v24967_v40  ;;  %20122 = vmatmul.mubr.msk.f32.vlgmr.msra.gmra.mrb[12].mxu0 %vm668_vm2, %v24983_v31  ;;  %v9359_v40 = vld [vmem:[%s29985_s11 + $0xa8] sm:$0xff] }
 0x1a9   : > { %18795 = vmatpush1.msk.msra.mxu0 %vm675_vm1, %v8437_v59  ;;  %18799 = vmatpush1.msk.msra.mxu1 %vm675_vm1, %v8439_v50  ;;  %v8823_v0 = vpop.permute.xlu0 %8822  ;;  %v21072_v34 = vpack.c.bf16 %v9359_v40, %v9352_v55  ;;  %v9390_v50 = vld [vmem:[%s29985_s11 + $0x1a0] sm:$0xff]  ;;  %v9424_v55 = vld [vmem:[%s29985_s11 + $0x2b0] sm:$0xff] }
 0x1aa   : > { %8287 = vmatprep.mubr.f32.mxu1 %v23501_v6  ;;  %8527 = vmatprep.mubr.f32.mxu0 %v23501_v6  ;;  %v8835_v22 = vsel %vm5687_vm6, %v8823_v0, %v8825_v52  ;;  %v21280_v59 = vpack.c.bf16 %v9390_v50, %v9383_v49  ;;  %v21096_v49 = vpack.c.bf16 %v9443_v3, %v9436_v61  ;;  %v9450_v50 = vld [vmem:[%s29985_s11 + $0x380] sm:$0xff]  ;;  %v9513_v61 = vld [vmem:[%s29985_s11 + $0x578] sm:$0xff] }
 0x1ab   : > { %v8434_v62 = vpop.permute.xlu1 %8433  ;;  %20124 = vmatprep.subr.msk.mxu1 %vm675_vm1, %v8436_v26 }
 0x1ac   : > { %v8441_v1 = vsel %vm4895_vm5, %v8432_v57, %v8434_v62  ;;  %18788 = vmatmul.mubr.msk.f32.gmra.mrb[14].mxu1 %vm668_vm2, %v24983_v31  ;;  %18796 = vmatmul.mubr.msk.f32.vlgmr.msra.gmra.mrb[0].mxu0 %vm668_vm2, %v18792_v60  ;;  %v8442_v45 = vsel %vm4895_vm5, %v8434_v62, %v8436_v26  ;;  %v9367_v31 = vld [vmem:[%s29985_s11 + $0xe8] sm:$0xff]  ;;  %v21078_v57 = vpack.c.bf16 %v9388_v8, %v9381_v54  ;;  %v9389_v62 = vld [vmem:[%s29985_s11 + $0x198] sm:$0xff]  ;;  %v9460_v8 = vld [vmem:[%s29985_s11 + $0x3d0] sm:$0xff] }
 0x1ad   : > { %18802 = vmatprep.subr.msk.mxu0 %vm675_vm1, %v8442_v45  ;;  %8533 = vmatprep.mubr.f32.mxu0 %v23501_v6  ;;  %v21074_v23 = vpack.c.bf16 %v9374_v63, %v9367_v31  ;;  %v9397_v45 = vld [vmem:[%s29985_s11 + $0x1d8] sm:$0xff]  ;;  %v9439_v31 = vld [vmem:[%s29985_s11 + $0x328] sm:$0xff]  ;;  %v9446_v63 = vld [vmem:[%s29985_s11 + $0x360] sm:$0xff] }
 0x1ae   : > { %18803 = vmatpush1.msk.msra.mxu0 %vm675_vm1, %v8441_v1  ;;  %8604 = vmatprep.mubr.f32.mxu1 %v23501_v6  ;;  %v9402_v1 = vld [vmem:[%s29985_s11 + $0x200] sm:$0xff]  ;;  %v21296_v44 = vpack.c.bf16 %v9446_v63, %v9439_v31  ;;  %v9453_v54 = vld [vmem:[%s29985_s11 + $0x398] sm:$0xff]  ;;  %v9516_v31 = vld [vmem:[%s29985_s11 + $0x590] sm:$0xff] }
 0x1b0   : > { %18797 = vmatmul.mubr.msk.f32.gmra.mrb[6].mxu0 %vm668_vm2, %v18793_v20  ;;  %18800 = vmatmul.mubr.msk.f32.vlgmr.msra.gmra.mrb[2].mxu1 %vm668_vm2, %v18792_v60 }
 0x1b1   : > { %8610 = vmatprep.mubr.f32.mxu1 %v23501_v6  ;;  %8681 = vmatprep.mubr.f32.mxu0 %v23501_v6  ;;  %v8821_v10 = vpop.permute.xlu0 %8820 }
 0x1b2   : > { %20125 = vmatpush3.msk.msra.mxu1 %vm675_vm1, %v8436_v26  ;;  %v8834_v33 = vsel %vm5687_vm6, %v8821_v10, %v8823_v0  ;;  %v21278_v26 = vpack.c.bf16 %v9375_v47, %v9368_v46  ;;  %v9395_v0 = vld [vmem:[%s29985_s11 + $0x1c8] sm:$0xff]  ;;  %v9445_v46 = vld [vmem:[%s29985_s11 + $0x358] sm:$0xff] }
 0x1b3   : > { %18809 = vmatprep.subr.msk.mxu1 %vm675_vm1, %v8835_v22  ;;  %v9451_v47 = vld [vmem:[%s29985_s11 + $0x388] sm:$0xff] }
 0x1b4   : > { %18801 = vmatmul.mubr.msk.f32.gmra.mrb[4].mxu1 %vm668_vm2, %v18793_v20  ;;  %18804 = vmatmul.mubr.msk.f32.vlgmr.msra.gmra.mrb[2].mxu0 %vm668_vm2, %v18792_v60 }
 0x1b5   : > { %8687 = vmatprep.mubr.f32.mxu0 %v23501_v6  ;;  %20126 = vmatprep.mubr.msk.f32.mxu1 %vm668_vm2, %v18792_v60  ;;  %v8827_v11 = vpop.permute.xlu0 %8826  ;;  %v8829_v41 = vpop.permute.xlu1 %8828 }
 0x1b6   : > { %v8837_v24 = vsel %vm5687_vm6, %v8827_v11, %v8829_v41  ;;  %v8836_v19 = vsel %vm5687_vm6, %v8825_v52, %v8827_v11  ;;  %v9387_v52 = vld [vmem:[%s29985_s11 + $0x188] sm:$0xff]  ;;  %v21082_v11 = vpack.c.bf16 %v9402_v1, %v9395_v0  ;;  %v9472_v0 = vld [vmem:[%s29985_s11 + $0x430] sm:$0xff] }
 0x1b7   : > { %18813 = vmatprep.subr.msk.mxu0 %vm675_vm1, %v8837_v24  ;;  %v21080_v22 = vpack.c.bf16 %v9387_v52, %v9380_v51  ;;  %v9396_v24 = vld [vmem:[%s29985_s11 + $0x1d0] sm:$0xff]  ;;  %v9457_v51 = vld [vmem:[%s29985_s11 + $0x3b8] sm:$0xff]  ;;  %v9467_v1 = vld [vmem:[%s29985_s11 + $0x408] sm:$0xff] }
 0x1b8   : > { %18805 = vmatmul.mubr.msk.f32.gmra.mrb[4].mxu0 %vm668_vm2, %v18793_v20  ;;  %20127 = vmatmul.mubr.msk.f32.vlgmr.msra.gmra.mrb[6].mxu1 %vm668_vm2, %v18793_v20  ;;  %v9452_v52 = vld [vmem:[%s29985_s11 + $0x390] sm:$0xff] }
 0x1b9   : > { %18810 = vmatpush1.msk.msra.mxu1 %vm675_vm1, %v8834_v33  ;;  %8918 = vmatprep.mubr.f32.mxu1 %v23501_v6  ;;  %v8831_v5 = vpop.permute.xlu0 %8830  ;;  %v8833_v18 = vpop.permute.xlu1 %8832  ;;  %v9401_v33 = vld [vmem:[%s29985_s11 + $0x1f8] sm:$0xff] }
 0x1ba   : > { %18814 = vmatpush1.msk.msra.mxu0 %vm675_vm1, %v8836_v19  ;;  %8995 = vmatprep.mubr.f32.mxu0 %v23501_v6  ;;  %v8839_v56 = vsel %vm5687_vm6, %v8831_v5, %v8833_v18  ;;  %v8838_v14 = vsel %vm5687_vm6, %v8829_v41, %v8831_v5  ;;  %v9394_v41 = vld [vmem:[%s29985_s11 + $0x1c0] sm:$0xff]  ;;  %v9403_v5 = vld [vmem:[%s29985_s11 + $0x208] sm:$0xff]  ;;  %vm12328_vm6 = vcmask 998400  }
 0x1bb   : > { %18817 = vmatprep.subr.msk.mxu1 %vm675_vm1, %v8839_v56  ;;  %20129 = vmatprep.subr.msk.mxu0 %vm675_vm1, %v8833_v18  ;;  %v9416_v56 = vld [vmem:[%s29985_s11 + $0x270] sm:$0xff]  ;;  %v21084_v39 = vpack.c.bf16 %v9401_v33, %v9394_v41  ;;  %v21286_v48 = vpack.c.bf16 %v9403_v5, %v9396_v24  ;;  %v9471_v41 = vld [vmem:[%s29985_s11 + $0x428] sm:$0xff]  ;;  %v9466_v33 = vld [vmem:[%s29985_s11 + $0x400] sm:$0xff] }
 0x1bc   : > { %18811 = vmatmul.mubr.msk.f32.vlgmr.msra.gmra.mrb[8].mxu1 %vm668_vm2, %v18792_v60  ;;  %18815 = vmatmul.mubr.msk.f32.vlgmr.msra.gmra.mrb[8].mxu0 %vm668_vm2, %v18792_v60  ;;  %v9479_v5 = vld [vmem:[%s29985_s11 + $0x468] sm:$0xff] }
 0x1bd   : > { %8924 = vmatprep.mubr.f32.mxu1 %v23501_v6  ;;  %9001 = vmatprep.mubr.f32.mxu0 %v23501_v6 }
 0x1be   : > { %18818 = vmatpush1.msk.msra.mxu1 %vm675_vm1, %v8838_v14  ;;  %20130 = vmatpush3.msk.msra.mxu0 %vm675_vm1, %v8833_v18  ;;  %v9409_v18 = vld [vmem:[%s29985_s11 + $0x238] sm:$0xff]  ;;  %v9411_v14 = vld [vmem:[%s29985_s11 + $0x248] sm:$0xff]  ;;  %vm11312_vm1 = vcmask 1006592  }
 0x1bf   : > { %21067 = vmatprep.subr.bf16.mxu1 %v21066_v4  ;;  %21269 = vmatprep.subr.bf16.mxu0 %v21268_v9  ;;  %v21086_v4 = vpack.c.bf16 %v9416_v56, %v9409_v18  ;;  %v21288_v9 = vpack.c.bf16 %v9418_v13, %v9411_v14  ;;  %v9486_v18 = vld [vmem:[%s29985_s11 + $0x4a0] sm:$0xff]  ;;  %v9481_v56 = vld [vmem:[%s29985_s11 + $0x478] sm:$0xff]  ;;  %v9488_v14 = vld [vmem:[%s29985_s11 + $0x4b0] sm:$0xff] }
 0x1c0   : > { %18812 = vmatmul.mubr.msk.f32.gmra.mrb[10].mxu1 %vm668_vm2, %v18793_v20  ;;  %18816 = vmatmul.mubr.msk.f32.gmra.mrb[10].mxu0 %vm668_vm2, %v18793_v20 }
 0x1c1   : > { %9072 = vmatprep.mubr.f32.mxu1 %v23501_v6  ;;  %20131 = vmatprep.mubr.msk.f32.mxu0 %vm668_vm2, %v18792_v60 }
 0x1c4   : > { %18819 = vmatmul.mubr.msk.f32.vlgmr.msra.gmra.mrb[12].mxu1 %vm668_vm2, %v18792_v60  ;;  %20132 = vmatmul.mubr.msk.f32.vlgmr.msra.gmra.mrb[12].mxu0 %vm668_vm2, %v18793_v20  ;;  %v9382_v60 = vld [vmem:[%s29985_s11 + $0x160] sm:$0xff] }
 0x1c5   : > { %9078 = vmatprep.mubr.f32.mxu1 %v23501_v6  ;;  %21069 = vmatpush1.bf16.msra.mxu1 %v21068_v15  ;;  %v21282_v10 = vpack.c.bf16 %v9389_v62, %v9382_v60  ;;  %v9417_v15 = vld [vmem:[%s29985_s11 + $0x278] sm:$0xff]  ;;  %v9459_v60 = vld [vmem:[%s29985_s11 + $0x3c8] sm:$0xff] }
 0x1c6   : > { %21271 = vmatpush1.bf16.msra.mxu0 %v21270_v28  ;;  %21071 = vmatprep.subr.bf16.mxu1 %v21070_v38  ;;  %v9432_v28 = vld [vmem:[%s29985_s11 + $0x2f0] sm:$0xff]  ;;  %v21290_v17 = vpack.c.bf16 %v9417_v15, %v9410_v58  ;;  %v9422_v38 = vld [vmem:[%s29985_s11 + $0x2a0] sm:$0xff]  ;;  %v9465_v62 = vld [vmem:[%s29985_s11 + $0x3f8] sm:$0xff]  ;;  %v21308_v58 = vpack.c.bf16 %v9488_v14, %v9481_v56 }
 0x1c7   : > { %21273 = vmatprep.subr.bf16.mxu0 %v21272_v30  ;;  %v9429_v30 = vld [vmem:[%s29985_s11 + $0x2d8] sm:$0xff]  ;;  %v21292_v40 = vpack.c.bf16 %v9432_v28, %v9425_v27  ;;  %v9502_v27 = vld [vmem:[%s29985_s11 + $0x520] sm:$0xff]  ;;  %v9556_v56 = vld [vmem:[%s29985_s11 + $0x6d0] sm:$0xff] }
 0x1c8   : > { %18820 = vmatmul.mubr.msk.f32.gmra.mrb[14].mxu1 %vm668_vm2, %v18793_v20  ;;  %v9404_v20 = vld [vmem:[%s29985_s11 + $0x210] sm:$0xff]  ;;  %v9493_v15 = vld [vmem:[%s29985_s11 + $0x4d8] sm:$0xff]  ;;  %v9551_v14 = vld [vmem:[%s29985_s11 + $0x6a8] sm:$0xff]  ;;  %vm11875_vm2 = vcmask 842752  }
 0x1c9   : > { %21073 = vmatpush1.bf16.msra.mxu1 %v21072_v34  ;;  %v21284_v19 = vpack.c.bf16 %v9404_v20, %v9397_v45  ;;  %v9437_v34 = vld [vmem:[%s29985_s11 + $0x318] sm:$0xff]  ;;  %v9474_v45 = vld [vmem:[%s29985_s11 + $0x440] sm:$0xff]  ;;  %v21100_v20 = vpack.c.bf16 %v9457_v51, %v9450_v50  ;;  %v9520_v50 = vld [vmem:[%s29985_s11 + $0x5b0] sm:$0xff] }
 0x1ca   : > { %21275 = vmatpush1.bf16.msra.mxu0 %v21274_v43  ;;  %21075 = vmatprep.subr.bf16.mxu1 %v21074_v23  ;;  %v21092_v43 = vpack.c.bf16 %v9429_v30, %v9422_v38  ;;  %v21294_v23 = vpack.c.bf16 %v9431_v36, %v9424_v55  ;;  %v21094_v32 = vpack.c.bf16 %v9444_v42, %v9437_v34  ;;  %v9499_v38 = vld [vmem:[%s29985_s11 + $0x508] sm:$0xff]  ;;  %v9494_v30 = vld [vmem:[%s29985_s11 + $0x4e0] sm:$0xff]  ;;  %v9509_v42 = vld [vmem:[%s29985_s11 + $0x558] sm:$0xff] }
 0x1cb   : > { %21277 = vmatprep.subr.bf16.mxu0 %v21276_v35  ;;  %v9438_v35 = vld [vmem:[%s29985_s11 + $0x320] sm:$0xff]  ;;  %v21304_v24 = vpack.c.bf16 %v9474_v45, %v9467_v1  ;;  %v21312_v55 = vpack.c.bf16 %v9502_v27, %v9495_v25  ;;  %v9507_v36 = vld [vmem:[%s29985_s11 + $0x548] sm:$0xff]  ;;  %v21316_v3 = vpack.c.bf16 %v9516_v31, %v9509_v42 }
 0x1cc   : > { %v9514_v34 = vld [vmem:[%s29985_s11 + $0x580] sm:$0xff]  ;;  %v9527_v51 = vld [vmem:[%s29985_s11 + $0x5e8] sm:$0xff] }
 0x1cd   : > { %21077 = vmatpush1.bf16.msra.mxu1 %v21076_v53  ;;  %v9458_v53 = vld [vmem:[%s29985_s11 + $0x3c0] sm:$0xff] }
 0x1ce   : > { %21279 = vmatpush1.bf16.msra.mxu0 %v21278_v26  ;;  %21079 = vmatprep.subr.bf16.mxu1 %v21078_v57  ;;  %v21298_v26 = vpack.c.bf16 %v9445_v46, %v9438_v35  ;;  %v21098_v57 = vpack.c.bf16 %v9458_v53, %v9451_v47  ;;  %v9508_v35 = vld [vmem:[%s29985_s11 + $0x550] sm:$0xff]  ;;  %v9523_v46 = vld [vmem:[%s29985_s11 + $0x5c8] sm:$0xff]  ;;  %v9530_v47 = vld [vmem:[%s29985_s11 + $0x600] sm:$0xff] }
 0x1cf   : > { %21281 = vmatprep.subr.bf16.mxu0 %v21280_v59  ;;  %v21300_v59 = vpack.c.bf16 %v9460_v8, %v9453_v54  ;;  %v21320_v8 = vpack.c.bf16 %v9530_v47, %v9523_v46 }
 0x1d1   : > { %21081 = vmatpush1.bf16.msra.mxu1 %v21080_v22  ;;  %v21302_v22 = vpack.c.bf16 %v9459_v60, %v9452_v52  ;;  %v9522_v52 = vld [vmem:[%s29985_s11 + $0x5c0] sm:$0xff]  ;;  %v9529_v60 = vld [vmem:[%s29985_s11 + $0x5f8] sm:$0xff] }
 0x1d2   : > { %21283 = vmatpush1.bf16.msra.mxu0 %v21282_v10  ;;  %21083 = vmatprep.subr.bf16.mxu1 %v21082_v11  ;;  %v21102_v10 = vpack.c.bf16 %v9472_v0, %v9465_v62  ;;  %v9464_v11 = vld [vmem:[%s29985_s11 + $0x3f0] sm:$0xff]  ;;  %v9535_v62 = vld [vmem:[%s29985_s11 + $0x628] sm:$0xff]  ;;  %v9542_v0 = vld [vmem:[%s29985_s11 + $0x660] sm:$0xff]  ;;  %v21322_v1 = vpack.c.bf16 %v9529_v60, %v9522_v52 }
 0x1d3   : > { %21285 = vmatprep.subr.bf16.mxu0 %v21284_v19  ;;  %v9473_v19 = vld [vmem:[%s29985_s11 + $0x438] sm:$0xff]  ;;  %v21104_v13 = vpack.c.bf16 %v9471_v41, %v9464_v11  ;;  %v21122_v45 = vpack.c.bf16 %v9542_v0, %v9535_v62 }
 0x1d4   : > { %v9541_v41 = vld [vmem:[%s29985_s11 + $0x658] sm:$0xff] }
 0x1d5   : > { %21085 = vmatpush1.bf16.msra.mxu1 %v21084_v39  ;;  %v21306_v39 = vpack.c.bf16 %v9473_v19, %v9466_v33  ;;  %v9536_v33 = vld [vmem:[%s29985_s11 + $0x630] sm:$0xff] }
 0x1d6   : > { %21287 = vmatpush1.bf16.msra.mxu0 %v21286_v48  ;;  %21087 = vmatprep.subr.bf16.mxu1 %v21086_v4  ;;  %v21106_v48 = vpack.c.bf16 %v9486_v18, %v9479_v5  ;;  %v9478_v4 = vld [vmem:[%s29985_s11 + $0x460] sm:$0xff]  ;;  %v9549_v18 = vld [vmem:[%s29985_s11 + $0x698] sm:$0xff] }
 0x1d7   : > { %21289 = vmatprep.subr.bf16.mxu0 %v21288_v9  ;;  %v9487_v9 = vld [vmem:[%s29985_s11 + $0x4a8] sm:$0xff]  ;;  %v21108_v28 = vpack.c.bf16 %v9485_v12, %v9478_v4  ;;  %v9548_v4 = vld [vmem:[%s29985_s11 + $0x690] sm:$0xff] }
 0x1d8   : > { %v9555_v12 = vld [vmem:[%s29985_s11 + $0x6c8] sm:$0xff] }
 0x1d9   : > { %21089 = vmatpush1.bf16.msra.mxu1 %v21088_v29  ;;  %v21310_v29 = vpack.c.bf16 %v9487_v9, %v9480_v16  ;;  %v9550_v9 = vld [vmem:[%s29985_s11 + $0x6a0] sm:$0xff] }
 0x1da   : > { %21291 = vmatpush1.bf16.msra.mxu0 %v21290_v17  ;;  %21091 = vmatprep.subr.bf16.mxu1 %v21090_v37  ;;  %v21110_v17 = vpack.c.bf16 %v9500_v21, %v9493_v15  ;;  %v9492_v37 = vld [vmem:[%s29985_s11 + $0x4d0] sm:$0xff]  ;;  %v9557_v15 = vld [vmem:[%s29985_s11 + $0x6d8] sm:$0xff] }
 0x1db   : > { %21293 = vmatprep.subr.bf16.mxu0 %v21292_v40  ;;  %v9501_v40 = vld [vmem:[%s29985_s11 + $0x518] sm:$0xff]  ;;  %v21112_v63 = vpack.c.bf16 %v9499_v38, %v9492_v37  ;;  %v21330_v25 = vpack.c.bf16 %v9557_v15, %v9550_v9 }
 0x1dc   : > { %v9565_v37 = vld [vmem:[%s29985_s11 + $0x718] sm:$0xff] }
 0x1dd   : > { %21093 = vmatpush1.bf16.msra.mxu1 %v21092_v43  ;;  %v21314_v43 = vpack.c.bf16 %v9501_v40, %v9494_v30  ;;  %v9572_v30 = vld [vmem:[%s29985_s11 + $0x750] sm:$0xff] }
 0x1de   : > { %21295 = vmatpush1.bf16.msra.mxu0 %v21294_v23  ;;  %21095 = vmatprep.subr.bf16.mxu1 %v21094_v32  ;;  %v21114_v23 = vpack.c.bf16 %v9514_v34, %v9507_v36  ;;  %v9506_v32 = vld [vmem:[%s29985_s11 + $0x540] sm:$0xff]  ;;  %v25507_v36 = vpop.permute.xlu1 %9183  ;;  %v21332_v34 = vpack.c.bf16 %v9572_v30, %v9565_v37 }
 0x1df   : > { %21297 = vmatprep.subr.bf16.mxu0 %v21296_v44  ;;  %v9515_v44 = vld [vmem:[%s29985_s11 + $0x588] sm:$0xff]  ;;  %v21116_v53 = vpack.c.bf16 %v9513_v61, %v9506_v32 }
 0x1e0   : > { %v21318_v54 = vpack.c.bf16 %v9515_v44, %v9508_v35 }
 0x1e1   : > { %21097 = vmatpush1.bf16.msra.mxu1 %v21096_v49  ;;  %v9521_v49 = vld [vmem:[%s29985_s11 + $0x5b8] sm:$0xff] }
 0x1e2   : > { %21299 = vmatpush1.bf16.msra.mxu0 %v21298_v26  ;;  %21099 = vmatprep.subr.bf16.mxu1 %v21098_v57  ;;  %v9528_v26 = vld [vmem:[%s29985_s11 + $0x5f0] sm:$0xff] }
 0x1e3   : > { %21301 = vmatprep.subr.bf16.mxu0 %v21300_v59  ;;  %v21118_v57 = vpack.c.bf16 %v9528_v26, %v9521_v49  ;;  %v21120_v59 = vpack.c.bf16 %v9527_v51, %v9520_v50 }
 0x1e5   : > { %21101 = vmatpush1.bf16.msra.mxu1 %v21100_v20  ;;  %v9537_v20 = vld [vmem:[%s29985_s11 + $0x638] sm:$0xff] }
 0x1e6   : > { %21303 = vmatpush1.bf16.msra.mxu0 %v21302_v22  ;;  %21103 = vmatprep.subr.bf16.mxu1 %v21102_v10  ;;  %v9544_v22 = vld [vmem:[%s29985_s11 + $0x670] sm:$0xff]  ;;  %v9534_v10 = vld [vmem:[%s29985_s11 + $0x620] sm:$0xff] }
 0x1e7   : > { %21305 = vmatprep.subr.bf16.mxu0 %v21304_v24  ;;  %v21324_v11 = vpack.c.bf16 %v9544_v22, %v9537_v20  ;;  %v9543_v24 = vld [vmem:[%s29985_s11 + $0x668] sm:$0xff]  ;;  %v21124_v19 = vpack.c.bf16 %v9541_v41, %v9534_v10 }
 0x1e8   : > { %v21326_v5 = vpack.c.bf16 %v9543_v24, %v9536_v33 }
 0x1e9   : > { %21105 = vmatpush1.bf16.msra.mxu1 %v21104_v13  ;;  %v25471_v13 = vpop.permute.xlu0 %9178 }
 0x1ea   : > { %21307 = vmatpush1.bf16.msra.mxu0 %v21306_v39  ;;  %21107 = vmatprep.subr.bf16.mxu1 %v21106_v48  ;;  %v21126_v39 = vpack.c.bf16 %v9556_v56, %v9549_v18  ;;  %v9558_v48 = vld [vmem:[%s29985_s11 + $0x6e0] sm:$0xff] }
 0x1eb   : > { %21309 = vmatprep.subr.bf16.mxu0 %v21308_v58  ;;  %v21328_v16 = vpack.c.bf16 %v9558_v48, %v9551_v14  ;;  %v21128_v58 = vpack.c.bf16 %v9555_v12, %v9548_v4 }
 0x1ed   : > { %21109 = vmatpush1.bf16.msra.mxu1 %v21108_v28 }
 0x1ee   : > { %21311 = vmatpush1.bf16.msra.mxu0 %v21310_v29  ;;  %21111 = vmatprep.subr.bf16.mxu1 %v21110_v17  ;;  %v9563_v29 = vld [vmem:[%s29985_s11 + $0x708] sm:$0xff]  ;;  %v9570_v17 = vld [vmem:[%s29985_s11 + $0x740] sm:$0xff] }
 0x1ef   : > { %21313 = vmatprep.subr.bf16.mxu0 %v21312_v55  ;;  %v21130_v38 = vpack.c.bf16 %v9570_v17, %v9563_v29 }
 0x1f1   : > { %21113 = vmatpush1.bf16.msra.mxu1 %v21112_v63 }
 0x1f2   : > { %21315 = vmatpush1.bf16.msra.mxu0 %v21314_v43  ;;  %21115 = vmatprep.subr.bf16.mxu1 %v21114_v23 }
 0x1f3   : > { %21317 = vmatprep.subr.bf16.mxu0 %v21316_v3 }
 0x1f5   : > { %21117 = vmatpush1.bf16.msra.mxu1 %v21116_v53 }
 0x1f6   : > { %21319 = vmatpush1.bf16.msra.mxu0 %v21318_v54  ;;  %21119 = vmatprep.subr.bf16.mxu1 %v21118_v57 }
 0x1f7   : > { %21321 = vmatprep.subr.bf16.mxu0 %v21320_v8 }
 0x1f9   : > { %21121 = vmatpush1.bf16.msra.mxu1 %v21120_v59 }
 0x1fa   : > { %21323 = vmatpush1.bf16.msra.mxu0 %v21322_v1  ;;  %21123 = vmatprep.subr.bf16.mxu1 %v21122_v45 }
 0x1fb   : > { %21325 = vmatprep.subr.bf16.mxu0 %v21324_v11 }
 0x1fd   : > { %21125 = vmatpush1.bf16.msra.mxu1 %v21124_v19 }
 0x1fe   : > { %21327 = vmatpush1.bf16.msra.mxu0 %v21326_v5  ;;  %21127 = vmatprep.subr.bf16.mxu1 %v21126_v39 }
 0x1ff   : > { %21329 = vmatprep.subr.bf16.mxu0 %v21328_v16 }
 0x201   : > { %21129 = vmatpush1.bf16.msra.mxu1 %v21128_v58 }
 0x202   : > { %21331 = vmatpush1.bf16.msra.mxu0 %v21330_v25  ;;  %21131 = vmatprep.subr.bf16.mxu1 %v21130_v38 }
 0x203   : > { %21333 = vmatprep.subr.bf16.mxu0 %v21332_v34 }
 0x27f   : > { %v8529_v21 = vpop.f32.mrb[0].mxu0 }
 0x280   : > { %v25489_v27 = vadd.f32 %v25471_v13, %v8529_v21  ;;  %v8531_v28 = vpop.f32.mrb[1].mxu0 }
 0x281   : > { %v25505_v40 = vadd.f32 %v25471_v13, %v8531_v28 }
 0x282   : > { %v9200_v55 = vmax.f32 %v25489_v27, 0.0 }
 0x283   : > { %v8535_v42 = vpop.f32.mrb[6].mxu0  ;;  %v8606_v31 = vpop.f32.mrb[2].mxu1  ;;  %v9201_v35 = vmax.f32 %v25505_v40, 0.0 }
 0x284   : > { %v22268_v63 = vadd.f32 %v8535_v42, %v24846_v2  ;;  %v9188_v43 = vadd.f32 %v25471_v13, %v8606_v31  ;;  %9270 = vrot.lane.b32.xlu0 %v9200_v55, %s30014_s25  ;;  %v8537_v23 = vpop.f32.mrb[7].mxu0  ;;  %v8608_v32 = vpop.f32.mrb[3].mxu1 }
 0x285   : > { %v22269_v61 = vadd.f32 %v8537_v23, %v24848_v7  ;;  %v9189_v3 = vadd.f32 %v25471_v13, %v8608_v32 }
 0x286   : > { %v9202_v44 = vmax.f32 %v9188_v43, 0.0  ;;  %v25518_v46 = vadd.f32 %v22268_v63, %v25507_v36 }
 0x287   : > { %v9203_v2 = vmax.f32 %v9189_v3, 0.0  ;;  %v8612_v47 = vpop.f32.mrb[4].mxu1  ;;  %v25521_v53 = vadd.f32 %v22269_v61, %v25507_v36  ;;  %v8683_v54 = vpop.f32.mrb[2].mxu0 }
 0x288   : > { %v22942_v8 = vpack.i.bf16 %v9202_v44, %v9201_v35  ;;  %v25524_v49 = vadd.f32 %v25507_v36, %v8612_v47  ;;  %v8614_v26 = vpop.f32.mrb[5].mxu1  ;;  %v8685_v7 = vpop.f32.mrb[3].mxu0  ;;  %v9207_v57 = vmax.f32 %v25518_v46, 0.0  ;;  %v25536_v1 = vadd.f32 %v25471_v13, %v8683_v54 }
 0x289   : > { %v9208_v50 = vmax.f32 %v25521_v53, 0.0  ;;  %v25530_v52 = vadd.f32 %v25507_v36, %v8614_v26  ;;  %v25544_v11 = vadd.f32 %v25471_v13, %v8685_v7 }
 0x28a   : > { %v9209_v51 = vmax.f32 %v25524_v49, 0.0  ;;  %22943 = vrot.lane.b32.xlu1 %v22942_v8, %s30014_s25  ;;  %v22947_v59 = vpack.i.bf16 %v9203_v2, %v9207_v57  ;;  %v9204_v5 = vmax.f32 %v25536_v1, 0.0 }
 0x28b   : > { %v8689_v60 = vpop.f32.mrb[4].mxu0  ;;  %v20128_v62 = vpop.f32.mrb[6].mxu1  ;;  %v9210_v10 = vmax.f32 %v25530_v52, 0.0  ;;  %v9205_v16 = vmax.f32 %v25544_v11, 0.0 }
 0x28c   : > { %v22952_v0 = vpack.i.bf16 %v9209_v51, %v9208_v50  ;;  %v25539_v45 = vadd.f32 %v25507_v36, %v8689_v60  ;;  %v8691_v20 = vpop.f32.mrb[5].mxu0  ;;  %22948 = vrot.lane.b32.xlu0 %v22947_v59, %s30014_s25  ;;  %v8760_v22 = vpop.f32.mrb[7].mxu1  ;;  %v9199_v58 = vadd.f32 %v20128_v62, %v25507_v36 }
 0x28d   : > { %v25549_v33 = vadd.f32 %v25471_v13, %v8760_v22  ;;  %v9198_v21 = vadd.f32 %v25507_v36, %v8691_v20 }
 0x28e   : > { %v9211_v41 = vmax.f32 %v25539_v45, 0.0  ;;  %22953 = vrot.lane.b32.xlu1 %v22952_v0, %s30014_s25  ;;  %v9213_v27 = vmax.f32 %v9199_v58, 0.0  ;;  %v9571_v45 = vld [vmem:[%s29985_s11 + $0x748] sm:$0xff] }
 0x28f   : > { %v8920_v24 = vpop.f32.mrb[8].mxu1  ;;  %v8997_v19 = vpop.f32.mrb[8].mxu0  ;;  %v9206_v25 = vmax.f32 %v25549_v33, 0.0  ;;  %v9579_v58 = vld [vmem:[%s29985_s11 + $0x788] sm:$0xff] }
 0x290   : > { %v22957_v18 = vpack.i.bf16 %v9211_v41, %v9210_v10  ;;  %v9214_v56 = vadd.f32 %v25471_v13, %v8920_v24  ;;  %v9216_v14 = vadd.f32 %v25471_v13, %v8997_v19  ;;  %v8922_v39 = vpop.f32.mrb[9].mxu1  ;;  %v8999_v48 = vpop.f32.mrb[9].mxu0 }
 0x291   : > { %v9215_v4 = vadd.f32 %v25471_v13, %v8922_v39  ;;  %v9217_v12 = vadd.f32 %v25471_v13, %v8999_v48  ;;  %v9569_v39 = vld [vmem:[%s29985_s11 + $0x738] sm:$0xff] }
 0x292   : > { %v9228_v9 = vmax.f32 %v9214_v56, 0.0  ;;  %v9230_v15 = vmax.f32 %v9216_v14, 0.0  ;;  %9278 = vrot.lane.b32.xlu1 %v9204_v5, %s30014_s25  ;;  %22958 = vrot.lane.b32.xlu0 %v22957_v18, %s30014_s25  ;;  %v9562_v14 = vld [vmem:[%s29985_s11 + $0x700] sm:$0xff] }
 0x293   : > { %v9229_v28 = vmax.f32 %v9215_v4, 0.0  ;;  %v9231_v29 = vmax.f32 %v9217_v12, 0.0  ;;  %v8926_v17 = vpop.f32.mrb[10].mxu1  ;;  %v9003_v37 = vpop.f32.mrb[10].mxu0 }
 0x294   : > { %v25566_v38 = vmax.f32 %v9200_v55, %v9228_v9  ;;  %v25568_v30 = vmax.f32 %v9202_v44, %v9230_v15  ;;  %v9221_v40 = vadd.f32 %v25507_v36, %v8926_v17  ;;  %v9223_v34 = vadd.f32 %v25507_v36, %v9003_v37  ;;  %v8928_v42 = vpop.f32.mrb[11].mxu1  ;;  %v9005_v31 = vpop.f32.mrb[11].mxu0  ;;  %v9586_v9 = vld [vmem:[%s29985_s11 + $0x7c0] sm:$0xff] }
 0x295   : > { %v9243_v63 = vmax.f32 %v9201_v35, %v9229_v28  ;;  %v25572_v43 = vmax.f32 %v9203_v2, %v9231_v29  ;;  %v9222_v23 = vadd.f32 %v25507_v36, %v8928_v42  ;;  %v9224_v32 = vadd.f32 %v25507_v36, %v9005_v31 }
 0x296   : > { %v9235_v61 = vmax.f32 %v9221_v40, 0.0  ;;  %v9237_v3 = vmax.f32 %v9223_v34, 0.0  ;;  %9280 = vrot.lane.b32.xlu1 %v9205_v16, %s30014_s25  ;;  %9282 = vrot.lane.b32.xlu0 %v9206_v25, %s30014_s25  ;;  %v9212_v55 = vmax.f32 %v9198_v21, 0.0  ;;  %v21132_v21 = vpack.c.bf16 %v9569_v39, %v9562_v14  ;;  %v9607_v14 = vld [vmem:[%s29985_s11 + $0x868] sm:$0xff]  ;;  %v9614_v39 = vld [vmem:[%s29985_s11 + $0x8a0] sm:$0xff] }
 0x297   : > { %v9236_v44 = vmax.f32 %v9222_v23, 0.0  ;;  %v9238_v46 = vmax.f32 %v9224_v32, 0.0  ;;  %v9074_v47 = vpop.f32.mrb[12].mxu1  ;;  %v20133_v54 = vpop.f32.mrb[12].mxu0  ;;  %v21336_v31 = vpack.c.bf16 %v9586_v9, %v9579_v58  ;;  %v9576_v23 = vld [vmem:[%s29985_s11 + $0x770] sm:$0xff]  ;;  %v9583_v32 = vld [vmem:[%s29985_s11 + $0x7a8] sm:$0xff]  ;;  %v21344_v58 = vpack.c.bf16 %v9614_v39, %v9607_v14 }
 0x298   : > { %v25578_v8 = vmax.f32 %v9207_v57, %v9235_v61  ;;  %v25580_v35 = vmax.f32 %v9209_v51, %v9237_v3  ;;  %v9218_v2 = vadd.f32 %v25471_v13, %v9074_v47  ;;  %v9227_v49 = vadd.f32 %v20133_v54, %v25507_v36  ;;  %v9076_v26 = vpop.f32.mrb[13].mxu1  ;;  %v9151_v7 = vpop.f32.mrb[13].mxu0  ;;  %v9606_v9 = vld [vmem:[%s29985_s11 + $0x860] sm:$0xff]  ;;  %v9653_v14 = vld [vmem:[%s29985_s11 + $0x9d8] sm:$0xff] }
 0x299   : > { %v25586_v52 = vmax.f32 %v9208_v50, %v9236_v44  ;;  %v25588_v59 = vmax.f32 %v9210_v10, %v9238_v46  ;;  %v9219_v60 = vadd.f32 %v25471_v13, %v9076_v26  ;;  %v9220_v62 = vadd.f32 %v25471_v13, %v9151_v7  ;;  %v9591_v46 = vld [vmem:[%s29985_s11 + $0x7e8] sm:$0xff]  ;;  %v9600_v26 = vld [vmem:[%s29985_s11 + $0x830] sm:$0xff] }
 0x29a   : > { %v9232_v57 = vmax.f32 %v9218_v2, 0.0  ;;  %v9241_v0 = vmax.f32 %v9227_v49, 0.0  ;;  %9294 = vrot.lane.b32.xlu1 %v9212_v55, %s30014_s25  ;;  %9296 = vrot.lane.b32.xlu0 %v9213_v27, %s30014_s25  ;;  %v21136_v2 = vpack.c.bf16 %v9583_v32, %v9576_v23  ;;  %v9593_v49 = vld [vmem:[%s29985_s11 + $0x7f8] sm:$0xff] }
 0x29b   : > { %v9233_v51 = vmax.f32 %v9219_v60, 0.0  ;;  %v9234_v1 = vmax.f32 %v9220_v62, 0.0  ;;  %v9080_v20 = vpop.f32.mrb[14].mxu1  ;;  %v9625_v23 = vld [vmem:[%s29985_s11 + $0x8f8] sm:$0xff] }
 0x29c   : > { %v25594_v22 = vmax.f32 %v9204_v5, %v9232_v57  ;;  %v25596_v53 = vmax.f32 %v9213_v27, %v9241_v0  ;;  %v9225_v50 = vadd.f32 %v25507_v36, %v9080_v20  ;;  %v9082_v10 = vpop.f32.mrb[15].mxu1 }
 0x29d   : > { %v25599_v11 = vmax.f32 %v9205_v16, %v9233_v51  ;;  %v25601_v33 = vmax.f32 %v9206_v25, %v9234_v1  ;;  %v9226_v13 = vadd.f32 %v25507_v36, %v9082_v10  ;;  %v9564_v36 = vld [vmem:[%s29985_s11 + $0x710] sm:$0xff]  ;;  %v9590_v51 = vld [vmem:[%s29985_s11 + $0x7e0] sm:$0xff]  ;;  %v9597_v1 = vld [vmem:[%s29985_s11 + $0x818] sm:$0xff] }
 0x29e   : > { %v9239_v24 = vmax.f32 %v9225_v50, 0.0  ;;  %v9584_v16 = vld [vmem:[%s29985_s11 + $0x7b0] sm:$0xff]  ;;  %v21334_v17 = vpack.c.bf16 %v9571_v45, %v9564_v36  ;;  %v9605_v10 = vld [vmem:[%s29985_s11 + $0x858] sm:$0xff]  ;;  %v21140_v36 = vpack.c.bf16 %v9597_v1, %v9590_v51  ;;  %v9634_v51 = vld [vmem:[%s29985_s11 + $0x940] sm:$0xff] }
 0x29f   : > { %v9240_v19 = vmax.f32 %v9226_v13, 0.0  ;;  %v9641_v1 = vld [vmem:[%s29985_s11 + $0x978] sm:$0xff] }
 0x2a0   : > { %v25606_v18 = vmax.f32 %v9211_v41, %v9239_v24  ;;  %v9577_v41 = vld [vmem:[%s29985_s11 + $0x778] sm:$0xff] }
 0x2a1   : > { %v25608_v56 = vmax.f32 %v9212_v55, %v9240_v19  ;;  %v21134_v42 = vpack.c.bf16 %v9584_v16, %v9577_v41  ;;  %v21340_v19 = vpack.c.bf16 %v9600_v26, %v9593_v49  ;;  %v9604_v41 = vld [vmem:[%s29985_s11 + $0x850] sm:$0xff]  ;;  %v9639_v49 = vld [vmem:[%s29985_s11 + $0x968] sm:$0xff] }
 0x2f6   : > { %v9271_v5 = vpop.permute.xlu0 %9270 }
 0x2fc   : > { %v22944_v48 = vpop.permute.xlu1 %22943 }
 0x2fd   : > { %v22946_v4 = vunpack.i.h.bf16 %v22944_v48  ;;  %v22945_v12 = vunpack.i.l.bf16 %v22944_v48 }
 0x2fe   : > { %v22949_v15 = vpop.permute.xlu0 %22948 }
 0x2ff   : > { %v9298_v25 = vsel %vm4895_vm5, %v9271_v5, %v22945_v12  ;;  %v9299_v28 = vsel %vm4895_vm5, %v22945_v12, %v22946_v4  ;;  %v22951_v29 = vunpack.i.h.bf16 %v22949_v15  ;;  %v22950_v3 = vunpack.i.l.bf16 %v22949_v15  ;;  %v9612_v5 = vld [vmem:[%s29985_s11 + $0x890] sm:$0xff]  ;;  %v9613_v15 = vld [vmem:[%s29985_s11 + $0x898] sm:$0xff] }
 0x300   : > { %v25637_v37 = vmax.f32 %v25566_v38, %v9298_v25  ;;  %v22954_v40 = vpop.permute.xlu1 %22953  ;;  %v25639_v34 = vmax.f32 %v9243_v63, %v9299_v28  ;;  %v9578_v38 = vld [vmem:[%s29985_s11 + $0x780] sm:$0xff]  ;;  %v9585_v63 = vld [vmem:[%s29985_s11 + $0x7b8] sm:$0xff]  ;;  %v21142_v16 = vpack.c.bf16 %v9612_v5, %v9605_v10  ;;  %v9628_v28 = vld [vmem:[%s29985_s11 + $0x910] sm:$0xff] }
 0x301   : > { %v9300_v61 = vsel %vm4895_vm5, %v22946_v4, %v22951_v29  ;;  %v22956_v27 = vunpack.i.h.bf16 %v22954_v40  ;;  %v22955_v55 = vunpack.i.l.bf16 %v22954_v40  ;;  %v21338_v0 = vpack.c.bf16 %v9585_v63, %v9578_v38  ;;  %v9611_v4 = vld [vmem:[%s29985_s11 + $0x888] sm:$0xff]  ;;  %v9621_v25 = vld [vmem:[%s29985_s11 + $0x8d8] sm:$0xff]  ;;  %v9656_v10 = vld [vmem:[%s29985_s11 + $0x9f0] sm:$0xff] }
 0x302   : > { %v25655_v44 = vmax.f32 %v25568_v30, %v9300_v61  ;;  %10131 = vmatprep.mubr.f32.mxu1 %v25639_v34  ;;  %10439 = vmatprep.mubr.f32.mxu0 %v25639_v34  ;;  %v9598_v30 = vld [vmem:[%s29985_s11 + $0x820] sm:$0xff]  ;;  %v21144_v40 = vpack.c.bf16 %v9611_v4, %v9604_v41  ;;  %v9633_v38 = vld [vmem:[%s29985_s11 + $0x938] sm:$0xff]  ;;  %v9668_v4 = vld [vmem:[%s29985_s11 + $0xa50] sm:$0xff] }
 0x303   : > { %v9304_v47 = vsel %vm4895_vm5, %v22950_v3, %v22955_v55  ;;  %v9305_v54 = vsel %vm4895_vm5, %v22955_v55, %v22956_v27  ;;  %10132 = vmatmul.mubr.f32.vlgmr.msra.gmra.mrb[16].mxu1 %v25637_v37  ;;  %10440 = vmatmul.mubr.f32.vlgmr.msra.gmra.mrb[14].mxu0 %v25637_v37  ;;  %v21138_v24 = vpack.c.bf16 %v9598_v30, %v9591_v46  ;;  %v9627_v55 = vld [vmem:[%s29985_s11 + $0x908] sm:$0xff]  ;;  %v9640_v46 = vld [vmem:[%s29985_s11 + $0x970] sm:$0xff]  ;;  %v9646_v5 = vld [vmem:[%s29985_s11 + $0x9a0] sm:$0xff] }
 0x304   : > { %21133 = vmatpush1.bf16.msra.mxu1 %v21132_v21  ;;  %21335 = vmatpush1.bf16.msra.mxu0 %v21334_v17  ;;  %v25675_v7 = vpop.permute.xlu1 %9278  ;;  %v25677_v60 = vpop.permute.xlu0 %22958  ;;  %v25680_v62 = vmax.f32 %v25586_v52, %v9305_v54  ;;  %v25683_v57 = vmax.f32 %v25578_v8, %v9304_v47  ;;  %v9592_v8 = vld [vmem:[%s29985_s11 + $0x7f0] sm:$0xff]  ;;  %v9599_v52 = vld [vmem:[%s29985_s11 + $0x828] sm:$0xff]  ;;  %v21348_v3 = vpack.c.bf16 %v9628_v28, %v9621_v25  ;;  %v9642_v54 = vld [vmem:[%s29985_s11 + $0x980] sm:$0xff] }
 0x305   : > { %v9301_v20 = vsel %vm4895_vm5, %v22951_v29, %v25675_v7  ;;  %v22960_v50 = vunpack.i.l.bf16 %v25677_v60  ;;  %21135 = vmatprep.subr.bf16.mxu1 %v21134_v42  ;;  %21337 = vmatprep.subr.bf16.mxu0 %v21336_v31  ;;  %v21342_v45 = vpack.c.bf16 %v9599_v52, %v9592_v8  ;;  %v9619_v21 = vld [vmem:[%s29985_s11 + $0x8c8] sm:$0xff]  ;;  %v22961_v29 = vunpack.i.h.bf16 %v25677_v60  ;;  %v9618_v31 = vld [vmem:[%s29985_s11 + $0x8c0] sm:$0xff]  ;;  %v9649_v52 = vld [vmem:[%s29985_s11 + $0x9b8] sm:$0xff] }
 0x306   : > { %v25704_v13 = vmax.f32 %v25572_v43, %v9301_v20  ;;  %10137 = vmatprep.mubr.f32.mxu1 %v25680_v62  ;;  %10445 = vmatprep.mubr.f32.mxu0 %v25680_v62  ;;  %v21346_v42 = vpack.c.bf16 %v9613_v15, %v9606_v9  ;;  %v9635_v47 = vld [vmem:[%s29985_s11 + $0x948] sm:$0xff]  ;;  %v21150_v26 = vpack.c.bf16 %v9640_v46, %v9633_v38  ;;  %v9654_v8 = vld [vmem:[%s29985_s11 + $0x9e0] sm:$0xff]  ;;  %v9661_v41 = vld [vmem:[%s29985_s11 + $0xa18] sm:$0xff] }
 0x307   : > { %v9306_v43 = vsel %vm4895_vm5, %v22956_v27, %v22960_v50  ;;  %10138 = vmatmul.mubr.f32.gmra.mrb[18].mxu1 %v25683_v57  ;;  %10446 = vmatmul.mubr.f32.gmra.mrb[16].mxu0 %v25683_v57  ;;  %v9620_v27 = vld [vmem:[%s29985_s11 + $0x8d0] sm:$0xff]  ;;  %v9647_v20 = vld [vmem:[%s29985_s11 + $0x9a8] sm:$0xff]  ;;  %v21156_v9 = vpack.c.bf16 %v9653_v14, %v9646_v5  ;;  %v21158_v25 = vpack.c.bf16 %v9668_v4, %v9661_v41  ;;  %v9681_v38 = vld [vmem:[%s29985_s11 + $0xab8] sm:$0xff] }
 0x308   : > { %21137 = vmatpush1.bf16.msra.mxu1 %v21136_v2  ;;  %21339 = vmatpush1.bf16.msra.mxu0 %v21338_v0  ;;  %v25722_v48 = vpop.permute.xlu1 %9280  ;;  %v25731_v12 = vmax.f32 %v25580_v35, %v9306_v43  ;;  %v9626_v35 = vld [vmem:[%s29985_s11 + $0x900] sm:$0xff]  ;;  %v21148_v2 = vpack.c.bf16 %v9625_v23, %v9618_v31  ;;  %v21350_v30 = vpack.c.bf16 %v9627_v55, %v9620_v27  ;;  %v9675_v31 = vld [vmem:[%s29985_s11 + $0xa88] sm:$0xff]  ;;  %v9705_v14 = vld [vmem:[%s29985_s11 + $0xb78] sm:$0xff] }
 0x309   : > { %10208 = vmatprep.mubr.f32.mxu1 %v25704_v13  ;;  %10516 = vmatprep.mubr.f32.mxu0 %v25704_v13  ;;  %v21146_v61 = vpack.c.bf16 %v9626_v35, %v9619_v21  ;;  %v21352_v0 = vpack.c.bf16 %v9642_v54, %v9635_v47  ;;  %v21154_v39 = vpack.c.bf16 %v9654_v8, %v9647_v20  ;;  %v9660_v21 = vld [vmem:[%s29985_s11 + $0xa10] sm:$0xff]  ;;  %v9667_v35 = vld [vmem:[%s29985_s11 + $0xa48] sm:$0xff]  ;;  %v9682_v23 = vld [vmem:[%s29985_s11 + $0xac0] sm:$0xff] }
 0x30a   : > { %21139 = vmatprep.subr.bf16.mxu1 %v21138_v24  ;;  %21341 = vmatprep.subr.bf16.mxu0 %v21340_v19  ;;  %v21354_v19 = vpack.c.bf16 %v9641_v1, %v9634_v51  ;;  %v21356_v43 = vpack.c.bf16 %v9656_v10, %v9649_v52  ;;  %v9674_v55 = vld [vmem:[%s29985_s11 + $0xa80] sm:$0xff]  ;;  %v21162_v46 = vpack.c.bf16 %v9682_v23, %v9675_v31  ;;  %v9676_v54 = vld [vmem:[%s29985_s11 + $0xa90] sm:$0xff]  ;;  %v9695_v20 = vld [vmem:[%s29985_s11 + $0xb28] sm:$0xff] }
 0x30b   : > { %v9688_v1 = vld [vmem:[%s29985_s11 + $0xaf0] sm:$0xff]  ;;  %v9690_v10 = vld [vmem:[%s29985_s11 + $0xb00] sm:$0xff]  ;;  %v9709_v41 = vld [vmem:[%s29985_s11 + $0xb98] sm:$0xff] }
 0x30c   : > { %21141 = vmatpush1.bf16.msra.mxu1 %v21140_v36  ;;  %21343 = vmatpush1.bf16.msra.mxu0 %v21342_v45  ;;  %v25754_v17 = vpop.permute.xlu1 %9294  ;;  %v9648_v36 = vld [vmem:[%s29985_s11 + $0x9b0] sm:$0xff]  ;;  %v9655_v45 = vld [vmem:[%s29985_s11 + $0x9e8] sm:$0xff]  ;;  %v9710_v5 = vld [vmem:[%s29985_s11 + $0xba0] sm:$0xff] }
 0x30d   : > { %v9308_v32 = vsel %vm4895_vm5, %v22961_v29, %v25754_v17  ;;  %21143 = vmatprep.subr.bf16.mxu1 %v21142_v16  ;;  %21345 = vmatprep.subr.bf16.mxu0 %v21344_v58  ;;  %v9663_v16 = vld [vmem:[%s29985_s11 + $0xa28] sm:$0xff]  ;;  %v9670_v58 = vld [vmem:[%s29985_s11 + $0xa60] sm:$0xff]  ;;  %v21358_v15 = vpack.c.bf16 %v9655_v45, %v9648_v36 }
 0x30e   : > { %v25776_v63 = vmax.f32 %v25606_v18, %v9308_v32  ;;  %v9632_v18 = vld [vmem:[%s29985_s11 + $0x930] sm:$0xff]  ;;  %v21360_v28 = vpack.c.bf16 %v9670_v58, %v9663_v16  ;;  %v9677_v32 = vld [vmem:[%s29985_s11 + $0xa98] sm:$0xff]  ;;  %v9702_v45 = vld [vmem:[%s29985_s11 + $0xb60] sm:$0xff] }
 0x30f   : > { %v21152_v24 = vpack.c.bf16 %v9639_v49, %v9632_v18  ;;  %v9696_v18 = vld [vmem:[%s29985_s11 + $0xb30] sm:$0xff]  ;;  %v9691_v49 = vld [vmem:[%s29985_s11 + $0xb08] sm:$0xff] }
 0x310   : > { %21145 = vmatpush1.bf16.msra.mxu1 %v21144_v40  ;;  %21347 = vmatpush1.bf16.msra.mxu0 %v21346_v42  ;;  %v9662_v40 = vld [vmem:[%s29985_s11 + $0xa20] sm:$0xff]  ;;  %v9669_v42 = vld [vmem:[%s29985_s11 + $0xa58] sm:$0xff]  ;;  %v9704_v58 = vld [vmem:[%s29985_s11 + $0xb70] sm:$0xff] }
 0x311   : > { %21147 = vmatprep.subr.bf16.mxu1 %v21146_v61  ;;  %21349 = vmatprep.subr.bf16.mxu0 %v21348_v3  ;;  %v9684_v61 = vld [vmem:[%s29985_s11 + $0xad0] sm:$0xff]  ;;  %v21160_v3 = vpack.c.bf16 %v9667_v35, %v9660_v21  ;;  %v21362_v27 = vpack.c.bf16 %v9669_v42, %v9662_v40  ;;  %v9719_v35 = vld [vmem:[%s29985_s11 + $0xbe8] sm:$0xff] }
 0x312   : > { %v21364_v47 = vpack.c.bf16 %v9684_v61, %v9677_v32  ;;  %v9724_v21 = vld [vmem:[%s29985_s11 + $0xc10] sm:$0xff]  ;;  %v9723_v31 = vld [vmem:[%s29985_s11 + $0xc08] sm:$0xff]  ;;  %v9718_v61 = vld [vmem:[%s29985_s11 + $0xbe0] sm:$0xff] }
 0x313   : > { %v9716_v42 = vld [vmem:[%s29985_s11 + $0xbd0] sm:$0xff] }
 0x314   : > { %21149 = vmatpush1.bf16.msra.mxu1 %v21148_v2  ;;  %21351 = vmatpush1.bf16.msra.mxu0 %v21350_v30  ;;  %v9683_v2 = vld [vmem:[%s29985_s11 + $0xac8] sm:$0xff]  ;;  %v9689_v30 = vld [vmem:[%s29985_s11 + $0xaf8] sm:$0xff] }
 0x315   : > { %21151 = vmatprep.subr.bf16.mxu1 %v21150_v26  ;;  %21353 = vmatprep.subr.bf16.mxu0 %v21352_v0  ;;  %v9698_v26 = vld [vmem:[%s29985_s11 + $0xb40] sm:$0xff]  ;;  %v21164_v0 = vpack.c.bf16 %v9681_v38, %v9674_v55  ;;  %v21366_v51 = vpack.c.bf16 %v9683_v2, %v9676_v54  ;;  %v21166_v8 = vpack.c.bf16 %v9696_v18, %v9689_v30  ;;  %v9733_v38 = vld [vmem:[%s29985_s11 + $0xc58] sm:$0xff] }
 0x316   : > { %v21368_v52 = vpack.c.bf16 %v9698_v26, %v9691_v49  ;;  %v9738_v55 = vld [vmem:[%s29985_s11 + $0xc80] sm:$0xff]  ;;  %v9737_v30 = vld [vmem:[%s29985_s11 + $0xc78] sm:$0xff]  ;;  %v9732_v26 = vld [vmem:[%s29985_s11 + $0xc50] sm:$0xff] }
 0x317   : > { %v9730_v2 = vld [vmem:[%s29985_s11 + $0xc40] sm:$0xff] }
 0x318   : > { %21153 = vmatpush1.bf16.msra.mxu1 %v21152_v24  ;;  %21355 = vmatpush1.bf16.msra.mxu0 %v21354_v19  ;;  %v9697_v24 = vld [vmem:[%s29985_s11 + $0xb38] sm:$0xff]  ;;  %v9703_v19 = vld [vmem:[%s29985_s11 + $0xb68] sm:$0xff] }
 0x319   : > { %21155 = vmatprep.subr.bf16.mxu1 %v21154_v39  ;;  %21357 = vmatprep.subr.bf16.mxu0 %v21356_v43  ;;  %v9712_v39 = vld [vmem:[%s29985_s11 + $0xbb0] sm:$0xff]  ;;  %v21168_v43 = vpack.c.bf16 %v9695_v20, %v9688_v1  ;;  %v21370_v36 = vpack.c.bf16 %v9697_v24, %v9690_v10  ;;  %v21170_v4 = vpack.c.bf16 %v9710_v5, %v9703_v19  ;;  %v9747_v20 = vld [vmem:[%s29985_s11 + $0xcc8] sm:$0xff] }
 0x31a   : > { %v21372_v16 = vpack.c.bf16 %v9712_v39, %v9705_v14  ;;  %v9752_v1 = vld [vmem:[%s29985_s11 + $0xcf0] sm:$0xff]  ;;  %v9751_v19 = vld [vmem:[%s29985_s11 + $0xce8] sm:$0xff]  ;;  %v9746_v39 = vld [vmem:[%s29985_s11 + $0xcc0] sm:$0xff] }
 0x31b   : > { %v9744_v24 = vld [vmem:[%s29985_s11 + $0xcb0] sm:$0xff] }
 0x31c   : > { %21157 = vmatpush1.bf16.msra.mxu1 %v21156_v9  ;;  %21359 = vmatpush1.bf16.msra.mxu0 %v21358_v15  ;;  %v9711_v9 = vld [vmem:[%s29985_s11 + $0xba8] sm:$0xff]  ;;  %v9717_v15 = vld [vmem:[%s29985_s11 + $0xbd8] sm:$0xff] }
 0x31d   : > { %21159 = vmatprep.subr.bf16.mxu1 %v21158_v25  ;;  %21361 = vmatprep.subr.bf16.mxu0 %v21360_v28  ;;  %v9726_v25 = vld [vmem:[%s29985_s11 + $0xc20] sm:$0xff]  ;;  %v21172_v28 = vpack.c.bf16 %v9709_v41, %v9702_v45  ;;  %v21374_v40 = vpack.c.bf16 %v9711_v9, %v9704_v58  ;;  %v21174_v23 = vpack.c.bf16 %v9724_v21, %v9717_v15  ;;  %v9761_v41 = vld [vmem:[%s29985_s11 + $0xd38] sm:$0xff] }
 0x31e   : > { %v21376_v32 = vpack.c.bf16 %v9726_v25, %v9719_v35  ;;  %v9766_v45 = vld [vmem:[%s29985_s11 + $0xd60] sm:$0xff]  ;;  %v9765_v15 = vld [vmem:[%s29985_s11 + $0xd58] sm:$0xff]  ;;  %v9760_v25 = vld [vmem:[%s29985_s11 + $0xd30] sm:$0xff] }
 0x31f   : > { %v9758_v9 = vld [vmem:[%s29985_s11 + $0xd20] sm:$0xff] }
 0x320   : > { %21161 = vmatpush1.bf16.msra.mxu1 %v21160_v3  ;;  %21363 = vmatpush1.bf16.msra.mxu0 %v21362_v27  ;;  %v9725_v3 = vld [vmem:[%s29985_s11 + $0xc18] sm:$0xff]  ;;  %v9731_v27 = vld [vmem:[%s29985_s11 + $0xc48] sm:$0xff] }
 0x321   : > { %21163 = vmatprep.subr.bf16.mxu1 %v21162_v46  ;;  %21365 = vmatprep.subr.bf16.mxu0 %v21364_v47  ;;  %v9740_v46 = vld [vmem:[%s29985_s11 + $0xc90] sm:$0xff]  ;;  %v21176_v47 = vpack.c.bf16 %v9723_v31, %v9716_v42  ;;  %v21378_v54 = vpack.c.bf16 %v9725_v3, %v9718_v61  ;;  %v21178_v18 = vpack.c.bf16 %v9738_v55, %v9731_v27  ;;  %v9775_v31 = vld [vmem:[%s29985_s11 + $0xda8] sm:$0xff] }
 0x322   : > { %v21380_v49 = vpack.c.bf16 %v9740_v46, %v9733_v38  ;;  %v9780_v42 = vld [vmem:[%s29985_s11 + $0xdd0] sm:$0xff]  ;;  %v9779_v27 = vld [vmem:[%s29985_s11 + $0xdc8] sm:$0xff]  ;;  %v9774_v46 = vld [vmem:[%s29985_s11 + $0xda0] sm:$0xff] }
 0x323   : > { %v9772_v3 = vld [vmem:[%s29985_s11 + $0xd90] sm:$0xff] }
 0x324   : > { %21165 = vmatpush1.bf16.msra.mxu1 %v21164_v0  ;;  %21367 = vmatpush1.bf16.msra.mxu0 %v21366_v51  ;;  %v9739_v0 = vld [vmem:[%s29985_s11 + $0xc88] sm:$0xff]  ;;  %v9745_v51 = vld [vmem:[%s29985_s11 + $0xcb8] sm:$0xff] }
 0x325   : > { %21167 = vmatprep.subr.bf16.mxu1 %v21166_v8  ;;  %21369 = vmatprep.subr.bf16.mxu0 %v21368_v52  ;;  %v9754_v8 = vld [vmem:[%s29985_s11 + $0xd00] sm:$0xff]  ;;  %v21180_v52 = vpack.c.bf16 %v9737_v30, %v9730_v2  ;;  %v21382_v10 = vpack.c.bf16 %v9739_v0, %v9732_v26  ;;  %v21182_v5 = vpack.c.bf16 %v9752_v1, %v9745_v51  ;;  %v9789_v30 = vld [vmem:[%s29985_s11 + $0xe18] sm:$0xff] }
 0x326   : > { %v21384_v14 = vpack.c.bf16 %v9754_v8, %v9747_v20  ;;  %v9794_v2 = vld [vmem:[%s29985_s11 + $0xe40] sm:$0xff]  ;;  %v9793_v20 = vld [vmem:[%s29985_s11 + $0xe38] sm:$0xff]  ;;  %v9788_v8 = vld [vmem:[%s29985_s11 + $0xe10] sm:$0xff] }
 0x327   : > { %v9786_v1 = vld [vmem:[%s29985_s11 + $0xe00] sm:$0xff] }
 0x328   : > { %21169 = vmatpush1.bf16.msra.mxu1 %v21168_v43  ;;  %21371 = vmatpush1.bf16.msra.mxu0 %v21370_v36  ;;  %v9753_v43 = vld [vmem:[%s29985_s11 + $0xcf8] sm:$0xff]  ;;  %v9759_v36 = vld [vmem:[%s29985_s11 + $0xd28] sm:$0xff] }
 0x329   : > { %21171 = vmatprep.subr.bf16.mxu1 %v21170_v4  ;;  %21373 = vmatprep.subr.bf16.mxu0 %v21372_v16  ;;  %v9768_v4 = vld [vmem:[%s29985_s11 + $0xd70] sm:$0xff]  ;;  %v21184_v16 = vpack.c.bf16 %v9751_v19, %v9744_v24  ;;  %v21386_v58 = vpack.c.bf16 %v9753_v43, %v9746_v39  ;;  %v21186_v21 = vpack.c.bf16 %v9766_v45, %v9759_v36  ;;  %v26080_v39 = vpop.permute.xlu0 %9282 }
 0x32a   : > { %v21388_v35 = vpack.c.bf16 %v9768_v4, %v9761_v41  ;;  %v9307_v24 = vsel %vm4895_vm5, %v22960_v50, %v22961_v29  ;;  %v9808_v19 = vld [vmem:[%s29985_s11 + $0xeb0] sm:$0xff]  ;;  %v21196_v43 = vpack.c.bf16 %v9793_v20, %v9786_v1  ;;  %v9807_v29 = vld [vmem:[%s29985_s11 + $0xea8] sm:$0xff]  ;;  %v9802_v4 = vld [vmem:[%s29985_s11 + $0xe80] sm:$0xff] }
 0x32b   : > { %v9800_v50 = vld [vmem:[%s29985_s11 + $0xe70] sm:$0xff]  ;;  %v26089_v36 = vmax.f32 %v25588_v59, %v9307_v24  ;;  %v9822_v59 = vld [vmem:[%s29985_s11 + $0xf20] sm:$0xff]  ;;  %v9849_v24 = vld [vmem:[%s29985_s11 + $0xff8] sm:$0xff] }
 0x32c   : > { %21173 = vmatpush1.bf16.msra.mxu1 %v21172_v28  ;;  %21375 = vmatpush1.bf16.msra.mxu0 %v21374_v40  ;;  %v9767_v28 = vld [vmem:[%s29985_s11 + $0xd68] sm:$0xff]  ;;  %v9773_v40 = vld [vmem:[%s29985_s11 + $0xd98] sm:$0xff]  ;;  %v9852_v1 = vld [vmem:[%s29985_s11 + $0x1010] sm:$0xff] }
 0x32d   : > { %21175 = vmatprep.subr.bf16.mxu1 %v21174_v23  ;;  %21377 = vmatprep.subr.bf16.mxu0 %v21376_v32  ;;  %v9782_v23 = vld [vmem:[%s29985_s11 + $0xde0] sm:$0xff]  ;;  %v21188_v32 = vpack.c.bf16 %v9765_v15, %v9758_v9  ;;  %v21390_v61 = vpack.c.bf16 %v9767_v28, %v9760_v25  ;;  %v21190_v55 = vpack.c.bf16 %v9780_v42, %v9773_v40  ;;  %v9817_v15 = vld [vmem:[%s29985_s11 + $0xef8] sm:$0xff]  ;;  %v9816_v42 = vld [vmem:[%s29985_s11 + $0xef0] sm:$0xff] }
 0x32e   : > { %v21392_v38 = vpack.c.bf16 %v9782_v23, %v9775_v31  ;;  %v9303_v9 = vsel %vm4895_vm5, %v25722_v48, %v26080_v39  ;;  %v9814_v28 = vld [vmem:[%s29985_s11 + $0xee0] sm:$0xff]  ;;  %v9821_v40 = vld [vmem:[%s29985_s11 + $0xf18] sm:$0xff] }
 0x32f   : > { %v26126_v31 = vmax.f32 %v25599_v11, %v9303_v9  ;;  %v9831_v11 = vld [vmem:[%s29985_s11 + $0xf68] sm:$0xff]  ;;  %v9858_v9 = vld [vmem:[%s29985_s11 + $0x1040] sm:$0xff] }
 0x330   : > { %21177 = vmatpush1.bf16.msra.mxu1 %v21176_v47  ;;  %21379 = vmatpush1.bf16.msra.mxu0 %v21378_v54  ;;  %v9781_v47 = vld [vmem:[%s29985_s11 + $0xdd8] sm:$0xff]  ;;  %v9787_v54 = vld [vmem:[%s29985_s11 + $0xe08] sm:$0xff] }
 0x331   : > { %21179 = vmatprep.subr.bf16.mxu1 %v21178_v18  ;;  %21381 = vmatprep.subr.bf16.mxu0 %v21380_v49  ;;  %v9796_v18 = vld [vmem:[%s29985_s11 + $0xe50] sm:$0xff]  ;;  %v21192_v49 = vpack.c.bf16 %v9779_v27, %v9772_v3  ;;  %v21394_v26 = vpack.c.bf16 %v9781_v47, %v9774_v46  ;;  %v21194_v0 = vpack.c.bf16 %v9794_v2, %v9787_v54  ;;  %v9829_v3 = vld [vmem:[%s29985_s11 + $0xf58] sm:$0xff]  ;;  %v9835_v2 = vld [vmem:[%s29985_s11 + $0xf88] sm:$0xff] }
 0x332   : > { %v21396_v51 = vpack.c.bf16 %v9796_v18, %v9789_v30  ;;  %v9836_v27 = vld [vmem:[%s29985_s11 + $0xf90] sm:$0xff]  ;;  %v9830_v30 = vld [vmem:[%s29985_s11 + $0xf60] sm:$0xff] }
 0x333   : > { %v21206_v47 = vpack.c.bf16 %v9836_v27, %v9829_v3  ;;  %v9828_v54 = vld [vmem:[%s29985_s11 + $0xf50] sm:$0xff] }
 0x334   : > { %21181 = vmatpush1.bf16.msra.mxu1 %v21180_v52  ;;  %21383 = vmatpush1.bf16.msra.mxu0 %v21382_v10  ;;  %v9795_v52 = vld [vmem:[%s29985_s11 + $0xe48] sm:$0xff]  ;;  %v9801_v10 = vld [vmem:[%s29985_s11 + $0xe78] sm:$0xff]  ;;  %v21208_v20 = vpack.c.bf16 %v9835_v2, %v9828_v54  ;;  %v9872_v3 = vld [vmem:[%s29985_s11 + $0x10b0] sm:$0xff] }
 0x335   : > { %21183 = vmatprep.subr.bf16.mxu1 %v21182_v5  ;;  %21385 = vmatprep.subr.bf16.mxu0 %v21384_v14  ;;  %v9803_v5 = vld [vmem:[%s29985_s11 + $0xe88] sm:$0xff]  ;;  %v9810_v14 = vld [vmem:[%s29985_s11 + $0xec0] sm:$0xff]  ;;  %v21398_v60 = vpack.c.bf16 %v9795_v52, %v9788_v8  ;;  %v21198_v45 = vpack.c.bf16 %v9808_v19, %v9801_v10  ;;  %v9844_v19 = vld [vmem:[%s29985_s11 + $0xfd0] sm:$0xff] }
 0x336   : > { %v21400_v41 = vpack.c.bf16 %v9810_v14, %v9803_v5  ;;  %v9842_v10 = vld [vmem:[%s29985_s11 + $0xfc0] sm:$0xff]  ;;  %v9851_v14 = vld [vmem:[%s29985_s11 + $0x1008] sm:$0xff] }
 0x338   : > { %21185 = vmatpush1.bf16.msra.mxu1 %v21184_v16  ;;  %21387 = vmatpush1.bf16.msra.mxu0 %v21386_v58  ;;  %v9809_v16 = vld [vmem:[%s29985_s11 + $0xeb8] sm:$0xff]  ;;  %v9815_v58 = vld [vmem:[%s29985_s11 + $0xee8] sm:$0xff] }
 0x339   : > { %21187 = vmatprep.subr.bf16.mxu1 %v21186_v21  ;;  %21389 = vmatprep.subr.bf16.mxu0 %v21388_v35  ;;  %v9824_v21 = vld [vmem:[%s29985_s11 + $0xf30] sm:$0xff]  ;;  %v21200_v35 = vpack.c.bf16 %v9807_v29, %v9800_v50  ;;  %v21402_v25 = vpack.c.bf16 %v9809_v16, %v9802_v4  ;;  %v21202_v23 = vpack.c.bf16 %v9822_v59, %v9815_v58  ;;  %v9859_v50 = vld [vmem:[%s29985_s11 + $0x1048] sm:$0xff]  ;;  %v9866_v29 = vld [vmem:[%s29985_s11 + $0x1080] sm:$0xff] }
 0x33a   : > { %v9856_v16 = vld [vmem:[%s29985_s11 + $0x1030] sm:$0xff]  ;;  %v9863_v58 = vld [vmem:[%s29985_s11 + $0x1068] sm:$0xff]  ;;  %v21416_v59 = vpack.c.bf16 %v9866_v29, %v9859_v50  ;;  %v9913_v29 = vld [vmem:[%s29985_s11 + $0x11f8] sm:$0xff] }
 0x33b   : > { %v9907_v50 = vld [vmem:[%s29985_s11 + $0x11c8] sm:$0xff] }
 0x33c   : > { %21189 = vmatpush1.bf16.msra.mxu1 %v21188_v32  ;;  %21391 = vmatpush1.bf16.msra.mxu0 %v21390_v61  ;;  %v21404_v32 = vpack.c.bf16 %v9824_v21, %v9817_v15  ;;  %v9823_v61 = vld [vmem:[%s29985_s11 + $0xf28] sm:$0xff]  ;;  %v9865_v15 = vld [vmem:[%s29985_s11 + $0x1078] sm:$0xff] }
 0x33d   : > { %21191 = vmatprep.subr.bf16.mxu1 %v21190_v55  ;;  %21393 = vmatprep.subr.bf16.mxu0 %v21392_v38  ;;  %v9838_v55 = vld [vmem:[%s29985_s11 + $0xfa0] sm:$0xff]  ;;  %v21204_v38 = vpack.c.bf16 %v9821_v40, %v9814_v28  ;;  %v21406_v46 = vpack.c.bf16 %v9823_v61, %v9816_v42  ;;  %v9871_v21 = vld [vmem:[%s29985_s11 + $0x10a8] sm:$0xff]  ;;  %v9880_v28 = vld [vmem:[%s29985_s11 + $0x10f0] sm:$0xff]  ;;  %v21216_v40 = vpack.c.bf16 %v9863_v58, %v9856_v16 }
 0x33e   : > { %v21408_v18 = vpack.c.bf16 %v9838_v55, %v9831_v11  ;;  %v21418_v42 = vpack.c.bf16 %v9865_v15, %v9858_v9  ;;  %v9877_v61 = vld [vmem:[%s29985_s11 + $0x10d8] sm:$0xff]  ;;  %v9879_v11 = vld [vmem:[%s29985_s11 + $0x10e8] sm:$0xff] }
 0x33f   : > { %v9885_v55 = vld [vmem:[%s29985_s11 + $0x1118] sm:$0xff]  ;;  %v21422_v2 = vpack.c.bf16 %v9879_v11, %v9872_v3  ;;  %v9919_v15 = vld [vmem:[%s29985_s11 + $0x1228] sm:$0xff] }
 0x340   : > { %21193 = vmatpush1.bf16.msra.mxu1 %v21192_v49  ;;  %21395 = vmatpush1.bf16.msra.mxu0 %v21394_v26  ;;  %v9837_v49 = vld [vmem:[%s29985_s11 + $0xf98] sm:$0xff]  ;;  %v9843_v26 = vld [vmem:[%s29985_s11 + $0xfc8] sm:$0xff] }
 0x341   : > { %21195 = vmatprep.subr.bf16.mxu1 %v21194_v0  ;;  %21397 = vmatprep.subr.bf16.mxu0 %v21396_v51  ;;  %v9850_v0 = vld [vmem:[%s29985_s11 + $0x1000] sm:$0xff]  ;;  %v9845_v51 = vld [vmem:[%s29985_s11 + $0xfd8] sm:$0xff]  ;;  %v21410_v8 = vpack.c.bf16 %v9837_v49, %v9830_v30  ;;  %v9891_v49 = vld [vmem:[%s29985_s11 + $0x1148] sm:$0xff] }
 0x342   : > { %v21210_v52 = vpack.c.bf16 %v9850_v0, %v9843_v26  ;;  %v21412_v5 = vpack.c.bf16 %v9852_v1, %v9845_v51  ;;  %v9886_v26 = vld [vmem:[%s29985_s11 + $0x1120] sm:$0xff]  ;;  %v9893_v51 = vld [vmem:[%s29985_s11 + $0x1158] sm:$0xff]  ;;  %v9899_v1 = vld [vmem:[%s29985_s11 + $0x1188] sm:$0xff] }
 0x343   : > { %10209 = vmatmul.mubr.f32.vlgmr.msra.gmra.mrb[16].mxu1 %v25655_v44  ;;  %10517 = vmatmul.mubr.f32.vlgmr.msra.gmra.mrb[14].mxu0 %v25655_v44  ;;  %v9933_v11 = vld [vmem:[%s29985_s11 + $0x1298] sm:$0xff] }
 0x344   : > { %10214 = vmatprep.mubr.f32.mxu1 %v26089_v36  ;;  %21197 = vmatpush1.bf16.msra.mxu1 %v21196_v43  ;;  %v9857_v43 = vld [vmem:[%s29985_s11 + $0x1038] sm:$0xff] }
 0x345   : > { %10522 = vmatprep.mubr.f32.mxu0 %v26089_v36  ;;  %21399 = vmatpush1.bf16.msra.mxu0 %v21398_v60  ;;  %v9864_v60 = vld [vmem:[%s29985_s11 + $0x1070] sm:$0xff] }
 0x346   : > { %21199 = vmatprep.subr.bf16.mxu1 %v21198_v45  ;;  %21401 = vmatprep.subr.bf16.mxu0 %v21400_v41  ;;  %v21212_v45 = vpack.c.bf16 %v9849_v24, %v9842_v10  ;;  %v21414_v41 = vpack.c.bf16 %v9851_v14, %v9844_v19  ;;  %v21214_v4 = vpack.c.bf16 %v9864_v60, %v9857_v43  ;;  %v9905_v14 = vld [vmem:[%s29985_s11 + $0x11b8] sm:$0xff]  ;;  %v9900_v43 = vld [vmem:[%s29985_s11 + $0x1190] sm:$0xff] }
 0x347   : > { %10215 = vmatmul.mubr.f32.gmra.mrb[18].mxu1 %v25731_v12  ;;  %10523 = vmatmul.mubr.f32.gmra.mrb[16].mxu0 %v25731_v12  ;;  %v21426_v24 = vpack.c.bf16 %v9893_v51, %v9886_v26  ;;  %v21430_v58 = vpack.c.bf16 %v9907_v50, %v9900_v43  ;;  %v9947_v51 = vld [vmem:[%s29985_s11 + $0x1308] sm:$0xff]  ;;  %v9961_v50 = vld [vmem:[%s29985_s11 + $0x1378] sm:$0xff] }
 0x348   : > { %21201 = vmatpush1.bf16.msra.mxu1 %v21200_v35  ;;  %10285 = vmatprep.mubr.f32.mxu1 %v26126_v31  ;;  %v9878_v35 = vld [vmem:[%s29985_s11 + $0x10e0] sm:$0xff] }
 0x349   : > { %21403 = vmatpush1.bf16.msra.mxu0 %v21402_v25  ;;  %10593 = vmatprep.mubr.f32.mxu0 %v26126_v31  ;;  %v9873_v25 = vld [vmem:[%s29985_s11 + $0x10b8] sm:$0xff] }
 0x34a   : > { %21203 = vmatprep.subr.bf16.mxu1 %v21202_v23  ;;  %21405 = vmatprep.subr.bf16.mxu0 %v21404_v32  ;;  %v21218_v23 = vpack.c.bf16 %v9878_v35, %v9871_v21  ;;  %v9870_v32 = vld [vmem:[%s29985_s11 + $0x10a0] sm:$0xff]  ;;  %v21420_v27 = vpack.c.bf16 %v9880_v28, %v9873_v25  ;;  %v9921_v25 = vld [vmem:[%s29985_s11 + $0x1238] sm:$0xff]  ;;  %v9927_v28 = vld [vmem:[%s29985_s11 + $0x1268] sm:$0xff] }
 0x34b   : > { %v21220_v54 = vpack.c.bf16 %v9877_v61, %v9870_v32  ;;  %v9914_v21 = vld [vmem:[%s29985_s11 + $0x1200] sm:$0xff] }
 0x34c   : > { %21205 = vmatpush1.bf16.msra.mxu1 %v21204_v38  ;;  %v9892_v38 = vld [vmem:[%s29985_s11 + $0x1150] sm:$0xff]  ;;  %v21434_v61 = vpack.c.bf16 %v9921_v25, %v9914_v21  ;;  %v9975_v25 = vld [vmem:[%s29985_s11 + $0x13e8] sm:$0xff] }
 0x34d   : > { %21407 = vmatpush1.bf16.msra.mxu0 %v21406_v46  ;;  %21207 = vmatprep.subr.bf16.mxu1 %v21206_v47  ;;  %v9887_v46 = vld [vmem:[%s29985_s11 + $0x1128] sm:$0xff]  ;;  %v9894_v47 = vld [vmem:[%s29985_s11 + $0x1160] sm:$0xff]  ;;  %v21222_v30 = vpack.c.bf16 %v9892_v38, %v9885_v55  ;;  %v9928_v55 = vld [vmem:[%s29985_s11 + $0x1270] sm:$0xff] }
 0x34e   : > { %21409 = vmatprep.subr.bf16.mxu0 %v21408_v18  ;;  %v9884_v18 = vld [vmem:[%s29985_s11 + $0x1110] sm:$0xff]  ;;  %v21424_v0 = vpack.c.bf16 %v9894_v47, %v9887_v46  ;;  %v9935_v46 = vld [vmem:[%s29985_s11 + $0x12a8] sm:$0xff]  ;;  %v9941_v47 = vld [vmem:[%s29985_s11 + $0x12d8] sm:$0xff] }
 0x34f   : > { %v21224_v10 = vpack.c.bf16 %v9891_v49, %v9884_v18  ;;  %v21438_v49 = vpack.c.bf16 %v9935_v46, %v9928_v55  ;;  %v9989_v46 = vld [vmem:[%s29985_s11 + $0x1458] sm:$0xff] }
 0x350   : > { %21209 = vmatpush1.bf16.msra.mxu1 %v21208_v20  ;;  %v9906_v20 = vld [vmem:[%s29985_s11 + $0x11c0] sm:$0xff] }
 0x351   : > { %21411 = vmatpush1.bf16.msra.mxu0 %v21410_v8  ;;  %21211 = vmatprep.subr.bf16.mxu1 %v21210_v52  ;;  %v9901_v8 = vld [vmem:[%s29985_s11 + $0x1198] sm:$0xff]  ;;  %v9908_v52 = vld [vmem:[%s29985_s11 + $0x11d0] sm:$0xff]  ;;  %v21226_v19 = vpack.c.bf16 %v9906_v20, %v9899_v1  ;;  %v9942_v1 = vld [vmem:[%s29985_s11 + $0x12e0] sm:$0xff] }
 0x352   : > { %21413 = vmatprep.subr.bf16.mxu0 %v21412_v5  ;;  %v9898_v5 = vld [vmem:[%s29985_s11 + $0x1180] sm:$0xff]  ;;  %v21428_v60 = vpack.c.bf16 %v9908_v52, %v9901_v8  ;;  %v9949_v8 = vld [vmem:[%s29985_s11 + $0x1318] sm:$0xff]  ;;  %v9955_v52 = vld [vmem:[%s29985_s11 + $0x1348] sm:$0xff] }
 0x353   : > { %v21228_v16 = vpack.c.bf16 %v9905_v14, %v9898_v5  ;;  %v21442_v14 = vpack.c.bf16 %v9949_v8, %v9942_v1  ;;  %v10003_v8 = vld [vmem:[%s29985_s11 + $0x14c8] sm:$0xff] }
 0x354   : > { %21213 = vmatpush1.bf16.msra.mxu1 %v21212_v45  ;;  %v9920_v45 = vld [vmem:[%s29985_s11 + $0x1230] sm:$0xff] }
 0x355   : > { %21415 = vmatpush1.bf16.msra.mxu0 %v21414_v41  ;;  %21215 = vmatprep.subr.bf16.mxu1 %v21214_v4  ;;  %v9915_v41 = vld [vmem:[%s29985_s11 + $0x1208] sm:$0xff]  ;;  %v9922_v4 = vld [vmem:[%s29985_s11 + $0x1240] sm:$0xff]  ;;  %v21230_v9 = vpack.c.bf16 %v9920_v45, %v9913_v29  ;;  %v9956_v29 = vld [vmem:[%s29985_s11 + $0x1350] sm:$0xff] }
 0x356   : > { %21417 = vmatprep.subr.bf16.mxu0 %v21416_v59  ;;  %v9912_v59 = vld [vmem:[%s29985_s11 + $0x11f0] sm:$0xff]  ;;  %v21432_v35 = vpack.c.bf16 %v9922_v4, %v9915_v41  ;;  %v9963_v41 = vld [vmem:[%s29985_s11 + $0x1388] sm:$0xff]  ;;  %v9969_v4 = vld [vmem:[%s29985_s11 + $0x13b8] sm:$0xff] }
 0x357   : > { %v21232_v32 = vpack.c.bf16 %v9919_v15, %v9912_v59  ;;  %v21446_v15 = vpack.c.bf16 %v9963_v41, %v9956_v29  ;;  %v9302_v41 = vsel %vm4895_vm5, %v25675_v7, %v25722_v48  ;;  %v10019_v7 = vld [vmem:[%s29985_s11 + $0x1548] sm:$0xff]  ;;  %v10025_v48 = vld [vmem:[%s29985_s11 + $0x1578] sm:$0xff] }
 0x358   : > { %21217 = vmatpush1.bf16.msra.mxu1 %v21216_v40  ;;  %v9934_v40 = vld [vmem:[%s29985_s11 + $0x12a0] sm:$0xff] }
 0x359   : > { %21419 = vmatpush1.bf16.msra.mxu0 %v21418_v42  ;;  %21219 = vmatprep.subr.bf16.mxu1 %v21218_v23  ;;  %v9929_v42 = vld [vmem:[%s29985_s11 + $0x1278] sm:$0xff]  ;;  %v9936_v23 = vld [vmem:[%s29985_s11 + $0x12b0] sm:$0xff]  ;;  %v21234_v3 = vpack.c.bf16 %v9934_v40, %v9927_v28  ;;  %v9970_v28 = vld [vmem:[%s29985_s11 + $0x13c0] sm:$0xff] }
 0x35a   : > { %21421 = vmatprep.subr.bf16.mxu0 %v21420_v27  ;;  %v9926_v27 = vld [vmem:[%s29985_s11 + $0x1260] sm:$0xff]  ;;  %v21436_v38 = vpack.c.bf16 %v9936_v23, %v9929_v42  ;;  %v9977_v42 = vld [vmem:[%s29985_s11 + $0x13f8] sm:$0xff]  ;;  %v9983_v23 = vld [vmem:[%s29985_s11 + $0x1428] sm:$0xff] }
 0x35b   : > { %v21236_v18 = vpack.c.bf16 %v9933_v11, %v9926_v27  ;;  %v21450_v11 = vpack.c.bf16 %v9977_v42, %v9970_v28  ;;  %v10024_v28 = vld [vmem:[%s29985_s11 + $0x1570] sm:$0xff] }
 0x35c   : > { %21221 = vmatpush1.bf16.msra.mxu1 %v21220_v54  ;;  %v9948_v54 = vld [vmem:[%s29985_s11 + $0x1310] sm:$0xff] }
 0x35d   : > { %21423 = vmatpush1.bf16.msra.mxu0 %v21422_v2  ;;  %21223 = vmatprep.subr.bf16.mxu1 %v21222_v30  ;;  %v9943_v2 = vld [vmem:[%s29985_s11 + $0x12e8] sm:$0xff]  ;;  %v9950_v30 = vld [vmem:[%s29985_s11 + $0x1320] sm:$0xff]  ;;  %v21238_v26 = vpack.c.bf16 %v9948_v54, %v9941_v47  ;;  %v9984_v47 = vld [vmem:[%s29985_s11 + $0x1430] sm:$0xff] }
 0x35e   : > { %21425 = vmatprep.subr.bf16.mxu0 %v21424_v0  ;;  %v9940_v0 = vld [vmem:[%s29985_s11 + $0x12d0] sm:$0xff]  ;;  %v21440_v20 = vpack.c.bf16 %v9950_v30, %v9943_v2  ;;  %v9991_v2 = vld [vmem:[%s29985_s11 + $0x1468] sm:$0xff]  ;;  %v9997_v30 = vld [vmem:[%s29985_s11 + $0x1498] sm:$0xff] }
 0x35f   : > { %v21240_v5 = vpack.c.bf16 %v9947_v51, %v9940_v0  ;;  %v21454_v51 = vpack.c.bf16 %v9991_v2, %v9984_v47  ;;  %v9342_v2 = vld [vmem:[%s29985_s11 + $0x20] sm:$0xff] }
 0x360   : > { %21225 = vmatpush1.bf16.msra.mxu1 %v21224_v10  ;;  %v9962_v10 = vld [vmem:[%s29985_s11 + $0x1380] sm:$0xff] }
 0x361   : > { %21427 = vmatpush1.bf16.msra.mxu0 %v21426_v24  ;;  %21227 = vmatprep.subr.bf16.mxu1 %v21226_v19  ;;  %v9957_v24 = vld [vmem:[%s29985_s11 + $0x1358] sm:$0xff]  ;;  %v9964_v19 = vld [vmem:[%s29985_s11 + $0x1390] sm:$0xff]  ;;  %v21242_v43 = vpack.c.bf16 %v9962_v10, %v9955_v52  ;;  %v9998_v52 = vld [vmem:[%s29985_s11 + $0x14a0] sm:$0xff] }
 0x362   : > { %21429 = vmatprep.subr.bf16.mxu0 %v21428_v60  ;;  %v9954_v60 = vld [vmem:[%s29985_s11 + $0x1340] sm:$0xff]  ;;  %v21444_v45 = vpack.c.bf16 %v9964_v19, %v9957_v24  ;;  %v10005_v24 = vld [vmem:[%s29985_s11 + $0x14d8] sm:$0xff]  ;;  %v10011_v19 = vld [vmem:[%s29985_s11 + $0x1508] sm:$0xff] }
 0x363   : > { %v21244_v59 = vpack.c.bf16 %v9961_v50, %v9954_v60  ;;  %v26459_v60 = vpop.permute.xlu0 %9296  ;;  %v21458_v29 = vpack.c.bf16 %v10005_v24, %v9998_v52  ;;  %v26566_v52 = vmax.f32 %v25601_v33, %v26080_v39  ;;  %v9356_v24 = vld [vmem:[%s29985_s11 + $0x90] sm:$0xff]  ;;  %v9358_v33 = vld [vmem:[%s29985_s11 + $0xa0] sm:$0xff]  ;;  %v9365_v39 = vld [vmem:[%s29985_s11 + $0xd8] sm:$0xff] }
 0x364   : > { %21229 = vmatpush1.bf16.msra.mxu1 %v21228_v16  ;;  %v9976_v16 = vld [vmem:[%s29985_s11 + $0x13f0] sm:$0xff] }
 0x365   : > { %21431 = vmatpush1.bf16.msra.mxu0 %v21430_v58  ;;  %21231 = vmatprep.subr.bf16.mxu1 %v21230_v9  ;;  %v9971_v58 = vld [vmem:[%s29985_s11 + $0x13c8] sm:$0xff]  ;;  %v9978_v9 = vld [vmem:[%s29985_s11 + $0x1400] sm:$0xff]  ;;  %v21246_v21 = vpack.c.bf16 %v9976_v16, %v9969_v4 }
 0x366   : > { %21433 = vmatprep.subr.bf16.mxu0 %v21432_v35  ;;  %v9968_v35 = vld [vmem:[%s29985_s11 + $0x13b0] sm:$0xff]  ;;  %v21448_v40 = vpack.c.bf16 %v9978_v9, %v9971_v58  ;;  %v10010_v16 = vld [vmem:[%s29985_s11 + $0x1500] sm:$0xff]  ;;  %v10017_v58 = vld [vmem:[%s29985_s11 + $0x1538] sm:$0xff] }
 0x367   : > { %v21248_v27 = vpack.c.bf16 %v9975_v25, %v9968_v35  ;;  %v10012_v9 = vld [vmem:[%s29985_s11 + $0x1510] sm:$0xff]  ;;  %v26492_v35 = vmax.f32 %v25594_v22, %v9302_v41  ;;  %v21260_v25 = vpack.c.bf16 %v10017_v58, %v10010_v16  ;;  %v10026_v22 = vld [vmem:[%s29985_s11 + $0x1580] sm:$0xff]  ;;  %v9491_v41 = vld [vmem:[%s29985_s11 + $0x4c8] sm:$0xff]  ;;  %v21678_v16 = vpack.c.bf16 %v9365_v39, %v9358_v33 }
 0x368   : > { %21233 = vmatpush1.bf16.msra.mxu1 %v21232_v32  ;;  %v9990_v32 = vld [vmem:[%s29985_s11 + $0x1460] sm:$0xff]  ;;  %v21462_v42 = vpack.c.bf16 %v10019_v7, %v10012_v9  ;;  %v9377_v9 = vld [vmem:[%s29985_s11 + $0x138] sm:$0xff] }
 0x369   : > { %21435 = vmatpush1.bf16.msra.mxu0 %v21434_v61  ;;  %21235 = vmatprep.subr.bf16.mxu1 %v21234_v3  ;;  %v9985_v61 = vld [vmem:[%s29985_s11 + $0x1438] sm:$0xff]  ;;  %v9992_v3 = vld [vmem:[%s29985_s11 + $0x1470] sm:$0xff]  ;;  %v21250_v55 = vpack.c.bf16 %v9990_v32, %v9983_v23  ;;  %v10031_v32 = vld [vmem:[%s29985_s11 + $0x15a8] sm:$0x3f] }
 0x36a   : > { %21437 = vmatprep.subr.bf16.mxu0 %v21436_v38  ;;  %v9982_v38 = vld [vmem:[%s29985_s11 + $0x1420] sm:$0xff]  ;;  %v21452_v54 = vpack.c.bf16 %v9992_v3, %v9985_v61  ;;  %v10033_v61 = vld [vmem:[%s29985_s11 + $0x15b8] sm:$0x3f] }
 0x36b   : > { %v21252_v0 = vpack.c.bf16 %v9989_v46, %v9982_v38  ;;  %v9463_v38 = vld [vmem:[%s29985_s11 + $0x3e8] sm:$0xff]  ;;  %v21265_v46 = vpack.c.bf16 %v10031_v32, %v10024_v28  ;;  %v21467_v47 = vpack.c.bf16 %v10033_v61, %v10026_v22  ;;  %v9370_v58 = vld [vmem:[%s29985_s11 + $0x100] sm:$0xff]  ;;  %v9385_v7 = vld [vmem:[%s29985_s11 + $0x178] sm:$0xff] }
 0x36c   : > { %21237 = vmatpush1.bf16.msra.mxu1 %v21236_v18  ;;  %v10004_v18 = vld [vmem:[%s29985_s11 + $0x14d0] sm:$0xff]  ;;  %v9391_v32 = vld [vmem:[%s29985_s11 + $0x1a8] sm:$0xff]  ;;  %v9386_v22 = vld [vmem:[%s29985_s11 + $0x180] sm:$0xff] }
 0x36d   : > { %21439 = vmatpush1.bf16.msra.mxu0 %v21438_v49  ;;  %21239 = vmatprep.subr.bf16.mxu1 %v21238_v26  ;;  %v9999_v49 = vld [vmem:[%s29985_s11 + $0x14a8] sm:$0xff]  ;;  %v10006_v26 = vld [vmem:[%s29985_s11 + $0x14e0] sm:$0xff]  ;;  %v21254_v1 = vpack.c.bf16 %v10004_v18, %v9997_v30  ;;  %v9349_v30 = vld [vmem:[%s29985_s11 + $0x58] sm:$0xff] }
 0x36e   : > { %21441 = vmatprep.subr.bf16.mxu0 %v21440_v20  ;;  %v9996_v20 = vld [vmem:[%s29985_s11 + $0x1490] sm:$0xff]  ;;  %v21456_v10 = vpack.c.bf16 %v10006_v26, %v9999_v49  ;;  %v9351_v26 = vld [vmem:[%s29985_s11 + $0x68] sm:$0xff]  ;;  %v9421_v39 = vld [vmem:[%s29985_s11 + $0x298] sm:$0xff] }
 0x36f   : > { %v21256_v50 = vpack.c.bf16 %v10003_v8, %v9996_v20  ;;  %v9344_v49 = vld [vmem:[%s29985_s11 + $0x30] sm:$0xff]  ;;  %v9470_v20 = vld [vmem:[%s29985_s11 + $0x420] sm:$0xff]  ;;  %v9477_v8 = vld [vmem:[%s29985_s11 + $0x458] sm:$0xff] }
 0x370   : > { %21241 = vmatpush1.bf16.msra.mxu1 %v21240_v5  ;;  %v10018_v5 = vld [vmem:[%s29985_s11 + $0x1540] sm:$0xff] }
 0x371   : > { %21443 = vmatpush1.bf16.msra.mxu0 %v21442_v14  ;;  %21243 = vmatprep.subr.bf16.mxu1 %v21242_v43  ;;  %v10013_v14 = vld [vmem:[%s29985_s11 + $0x1518] sm:$0xff]  ;;  %v10020_v43 = vld [vmem:[%s29985_s11 + $0x1550] sm:$0xff] }
 0x372   : > { %21445 = vmatprep.subr.bf16.mxu0 %v21444_v45  ;;  %v21258_v45 = vpack.c.bf16 %v10018_v5, %v10011_v19  ;;  %v21460_v4 = vpack.c.bf16 %v10020_v43, %v10013_v14  ;;  %v9363_v19 = vld [vmem:[%s29985_s11 + $0xc8] sm:$0xff]  ;;  %v21676_v14 = vpack.c.bf16 %v9477_v8, %v9470_v20 }
 0x373   : > { %v9371_v43 = vld [vmem:[%s29985_s11 + $0x108] sm:$0xff] }
 0x374   : > { %21245 = vmatpush1.bf16.msra.mxu1 %v21244_v59  ;;  %v9309_v59 = vsel %vm4895_vm5, %v25754_v17, %v26459_v60  ;;  %v10034_v17 = vld [vmem:[%s29985_s11 + $0x15c0] sm:$0x3f] }
 0x375   : > { %21447 = vmatpush1.bf16.msra.mxu0 %v21446_v15  ;;  %21247 = vmatprep.subr.bf16.mxu1 %v21246_v21  ;;  %v10032_v15 = vld [vmem:[%s29985_s11 + $0x15b0] sm:$0x3f]  ;;  %v10027_v21 = vld [vmem:[%s29985_s11 + $0x1588] sm:$0xff] }
 0x376   : > { %21449 = vmatprep.subr.bf16.mxu0 %v21448_v40  ;;  %v26498_v40 = vmax.f32 %v25608_v56, %v9309_v59  ;;  %v21262_v23 = vpack.c.bf16 %v10032_v15, %v10025_v48  ;;  %v21464_v3 = vpack.c.bf16 %v10034_v17, %v10027_v21  ;;  %v9372_v59 = vld [vmem:[%s29985_s11 + $0x110] sm:$0xff]  ;;  %v9498_v21 = vld [vmem:[%s29985_s11 + $0x500] sm:$0xff]  ;;  %v9505_v17 = vld [vmem:[%s29985_s11 + $0x538] sm:$0xff] }
 0x377   : > { %v9392_v48 = vld [vmem:[%s29985_s11 + $0x1b0] sm:$0xff]  ;;  %v21684_v61 = vpack.c.bf16 %v9505_v17, %v9498_v21  ;;  %v9561_v21 = vld [vmem:[%s29985_s11 + $0x6f8] sm:$0xff] }
 0x378   : > { %21249 = vmatpush1.bf16.msra.mxu1 %v21248_v27  ;;  %v9343_v27 = vld [vmem:[%s29985_s11 + $0x28] sm:$0xff] }
 0x379   : > { %21451 = vmatpush1.bf16.msra.mxu0 %v21450_v11  ;;  %21251 = vmatprep.subr.bf16.mxu1 %v21250_v55  ;;  %v9350_v11 = vld [vmem:[%s29985_s11 + $0x60] sm:$0xff]  ;;  %v9456_v55 = vld [vmem:[%s29985_s11 + $0x3b0] sm:$0xff] }
 0x37a   : > { %21453 = vmatprep.subr.bf16.mxu0 %v21452_v54  ;;  %v21470_v54 = vpack.c.bf16 %v9350_v11, %v9343_v27  ;;  %v21672_v18 = vpack.c.bf16 %v9463_v38, %v9456_v55  ;;  %v9399_v27 = vld [vmem:[%s29985_s11 + $0x1e8] sm:$0xff]  ;;  %v9406_v11 = vld [vmem:[%s29985_s11 + $0x220] sm:$0xff]  ;;  %v9512_v55 = vld [vmem:[%s29985_s11 + $0x570] sm:$0xff] }
 0x37c   : > { %21253 = vmatpush1.bf16.msra.mxu1 %v21252_v0  ;;  %v9357_v0 = vld [vmem:[%s29985_s11 + $0x98] sm:$0xff] }
 0x37d   : > { %21455 = vmatpush1.bf16.msra.mxu0 %v21454_v51  ;;  %21255 = vmatprep.subr.bf16.mxu1 %v21254_v1  ;;  %v9364_v51 = vld [vmem:[%s29985_s11 + $0xd0] sm:$0xff]  ;;  %v21472_v1 = vpack.c.bf16 %v9349_v30, %v9342_v2  ;;  %v9405_v2 = vld [vmem:[%s29985_s11 + $0x218] sm:$0xff] }
 0x37e   : > { %21457 = vmatprep.subr.bf16.mxu0 %v21456_v10  ;;  %v21674_v10 = vpack.c.bf16 %v9351_v26, %v9344_v49  ;;  %v21474_v5 = vpack.c.bf16 %v9364_v51, %v9357_v0  ;;  %v9400_v30 = vld [vmem:[%s29985_s11 + $0x1f0] sm:$0xff]  ;;  %v9407_v49 = vld [vmem:[%s29985_s11 + $0x228] sm:$0xff]  ;;  %v9413_v26 = vld [vmem:[%s29985_s11 + $0x258] sm:$0xff] }
 0x37f   : > { %v9420_v0 = vld [vmem:[%s29985_s11 + $0x290] sm:$0xff]  ;;  %v9526_v51 = vld [vmem:[%s29985_s11 + $0x5e0] sm:$0xff]  ;;  %v21690_v8 = vpack.c.bf16 %v9407_v49, %v9400_v30  ;;  %v9469_v49 = vld [vmem:[%s29985_s11 + $0x418] sm:$0xff] }
 0x380   : > { %21257 = vmatpush1.bf16.msra.mxu1 %v21256_v50  ;;  %v9378_v50 = vld [vmem:[%s29985_s11 + $0x140] sm:$0xff]  ;;  %v9568_v30 = vld [vmem:[%s29985_s11 + $0x730] sm:$0xff] }
 0x381   : > { %21459 = vmatpush1.bf16.msra.mxu0 %v21458_v29  ;;  %21259 = vmatprep.subr.bf16.mxu1 %v21258_v45  ;;  %v21476_v29 = vpack.c.bf16 %v9363_v19, %v9356_v24  ;;  %v9484_v45 = vld [vmem:[%s29985_s11 + $0x490] sm:$0xff]  ;;  %v9419_v19 = vld [vmem:[%s29985_s11 + $0x288] sm:$0xff] }
 0x382   : > { %21461 = vmatprep.subr.bf16.mxu0 %v21460_v4  ;;  %v26600_v4 = vmax.f32 %v25596_v53, %v26459_v60  ;;  %v21478_v53 = vpack.c.bf16 %v9378_v50, %v9371_v43  ;;  %v9379_v60 = vld [vmem:[%s29985_s11 + $0x148] sm:$0xff]  ;;  %v21680_v15 = vpack.c.bf16 %v9491_v41, %v9484_v45  ;;  %v9412_v24 = vld [vmem:[%s29985_s11 + $0x250] sm:$0xff]  ;;  %v9434_v43 = vld [vmem:[%s29985_s11 + $0x300] sm:$0xff] }
 0x383   : > { %10286 = vmatmul.mubr.f32.vlgmr.msra.gmra.mrb[16].mxu1 %v26492_v35  ;;  %v21682_v28 = vpack.c.bf16 %v9379_v60, %v9372_v59  ;;  %v9540_v50 = vld [vmem:[%s29985_s11 + $0x650] sm:$0xff]  ;;  %v21492_v45 = vpack.c.bf16 %v9419_v19, %v9412_v24  ;;  %v9435_v60 = vld [vmem:[%s29985_s11 + $0x308] sm:$0xff] }
 0x384   : > { %10594 = vmatmul.mubr.f32.vlgmr.msra.gmra.mrb[14].mxu0 %v26492_v35  ;;  %10291 = vmatprep.mubr.f32.mxu1 %v26498_v40  ;;  %v9428_v59 = vld [vmem:[%s29985_s11 + $0x2d0] sm:$0xff] }
 0x385   : > { %21261 = vmatpush1.bf16.msra.mxu1 %v21260_v25  ;;  %10599 = vmatprep.mubr.f32.mxu0 %v26498_v40  ;;  %v21480_v25 = vpack.c.bf16 %v9377_v9, %v9370_v58  ;;  %v9426_v58 = vld [vmem:[%s29985_s11 + $0x2c0] sm:$0xff]  ;;  %v9433_v9 = vld [vmem:[%s29985_s11 + $0x2f8] sm:$0xff] }
 0x386   : > { %21463 = vmatpush1.bf16.msra.mxu0 %v21462_v42  ;;  %21264 = vmatprep.subr.msk.bf16.mxu1 %vm26511_vm11, %v21262_v23  ;;  %v21482_v42 = vpack.c.bf16 %v9392_v48, %v9385_v7  ;;  %v9384_v23 = vld [vmem:[%s29985_s11 + $0x170] sm:$0xff]  ;;  %v9441_v7 = vld [vmem:[%s29985_s11 + $0x338] sm:$0xff]  ;;  %v21496_v17 = vpack.c.bf16 %v9433_v9, %v9426_v58 }
 0x387   : > { %10292 = vmatmul.mubr.f32.gmra.mrb[18].mxu1 %v25776_v63  ;;  %21466 = vmatprep.subr.msk.bf16.mxu0 %vm26511_vm11, %v21464_v3  ;;  %v9393_v3 = vld [vmem:[%s29985_s11 + $0x1b8] sm:$0xff]  ;;  %v21484_v38 = vpack.c.bf16 %v9391_v32, %v9384_v23  ;;  %v9448_v48 = vld [vmem:[%s29985_s11 + $0x370] sm:$0xff]  ;;  %v9447_v23 = vld [vmem:[%s29985_s11 + $0x368] sm:$0xff] }
 0x388   : > { %10600 = vmatmul.mubr.f32.gmra.mrb[16].mxu0 %v25776_v63  ;;  %10362 = vmatprep.mubr.f32.mxu1 %v23501_v6  ;;  %v9442_v32 = vld [vmem:[%s29985_s11 + $0x340] sm:$0xff]  ;;  %v9596_v58 = vld [vmem:[%s29985_s11 + $0x810] sm:$0xff] }
 0x389   : > { %21267 = vmatpush1.bf16.msk.msra.mxu1 %vm26511_vm11, %v21265_v46  ;;  %10670 = vmatprep.mubr.f32.mxu0 %v23501_v6  ;;  %v21686_v46 = vpack.c.bf16 %v9393_v3, %v9386_v22  ;;  %v9455_v3 = vld [vmem:[%s29985_s11 + $0x3a8] sm:$0xff] }
 0x38a   : > { %21469 = vmatpush1.bf16.msk.msra.mxu0 %vm26511_vm11, %v21467_v47  ;;  %21471 = vmatprep.subr.bf16.mxu1 %v21470_v54  ;;  %v21486_v47 = vpack.c.bf16 %v9406_v11, %v9399_v27  ;;  %v9398_v54 = vld [vmem:[%s29985_s11 + $0x1e0] sm:$0xff]  ;;  %v9680_v11 = vld [vmem:[%s29985_s11 + $0xab0] sm:$0xff] }
 0x38b   : > { %21673 = vmatprep.subr.bf16.mxu0 %v21672_v18  ;;  %v21488_v20 = vpack.c.bf16 %v9405_v2, %v9398_v54  ;;  %v9462_v27 = vld [vmem:[%s29985_s11 + $0x3e0] sm:$0xff]  ;;  %v9461_v54 = vld [vmem:[%s29985_s11 + $0x3d8] sm:$0xff] }
 0x38c   : > { %18826 = vmatmul.mubr.msk.f32.vlgmr.msra.gmra.mrb[16].mxu1 %vm10038_vm12, %v26566_v52 }
 0x38d   : > { %18830 = vmatmul.mubr.msk.f32.vlgmr.msra.gmra.mrb[14].mxu0 %vm10038_vm12, %v26566_v52  ;;  %21473 = vmatpush1.bf16.msra.mxu1 %v21472_v1  ;;  %v9533_v1 = vld [vmem:[%s29985_s11 + $0x618] sm:$0xff] }
 0x38e   : > { %21675 = vmatpush3.bf16.msra.mxu0 %v21674_v10  ;;  %10368 = vmatprep.mubr.f32.mxu1 %v23501_v6  ;;  %v21490_v10 = vpack.c.bf16 %v9420_v0, %v9413_v26  ;;  %v21692_v33 = vpack.c.bf16 %v9533_v1, %v9526_v51  ;;  %v9476_v26 = vld [vmem:[%s29985_s11 + $0x450] sm:$0xff]  ;;  %v9694_v0 = vld [vmem:[%s29985_s11 + $0xb20] sm:$0xff]  ;;  %v9701_v51 = vld [vmem:[%s29985_s11 + $0xb58] sm:$0xff] }
 0x38f   : > { %10676 = vmatprep.mubr.f32.mxu0 %v23501_v6  ;;  %21475 = vmatprep.subr.bf16.mxu1 %v21474_v5  ;;  %v9414_v5 = vld [vmem:[%s29985_s11 + $0x260] sm:$0xff]  ;;  %v21506_v24 = vpack.c.bf16 %v9476_v26, %v9469_v49  ;;  %v21708_v19 = vpack.c.bf16 %v9701_v51, %v9694_v0  ;;  %v9532_v49 = vld [vmem:[%s29985_s11 + $0x610] sm:$0xff]  ;;  %v9757_v0 = vld [vmem:[%s29985_s11 + $0xd18] sm:$0xff] }
 0x390   : > { %18827 = vmatmul.mubr.msk.f32.gmra.mrb[18].mxu1 %vm10038_vm12, %v26600_v4  ;;  %21677 = vmatprep.subr.bf16.mxu0 %v21676_v14  ;;  %v9427_v14 = vld [vmem:[%s29985_s11 + $0x2c8] sm:$0xff]  ;;  %v21694_v41 = vpack.c.bf16 %v9421_v39, %v9414_v5  ;;  %v9582_v5 = vld [vmem:[%s29985_s11 + $0x7a0] sm:$0xff] }
 0x391   : > { %18831 = vmatmul.mubr.msk.f32.gmra.mrb[16].mxu0 %vm10038_vm12, %v26600_v4  ;;  %21477 = vmatpush1.bf16.msra.mxu1 %v21476_v29  ;;  %v9547_v29 = vld [vmem:[%s29985_s11 + $0x688] sm:$0xff]  ;;  %v9750_v26 = vld [vmem:[%s29985_s11 + $0xce0] sm:$0xff] }
 0x392   : > { %10747 = vmatprep.mubr.f32.mxu1 %v25639_v34  ;;  %21679 = vmatpush3.bf16.msra.mxu0 %v21678_v16  ;;  %v21494_v16 = vpack.c.bf16 %v9434_v43, %v9427_v14  ;;  %v9483_v39 = vld [vmem:[%s29985_s11 + $0x488] sm:$0xff]  ;;  %v9490_v14 = vld [vmem:[%s29985_s11 + $0x4c0] sm:$0xff]  ;;  %v9708_v43 = vld [vmem:[%s29985_s11 + $0xb90] sm:$0xff] }
 0x393   : > { %11055 = vmatprep.mubr.f32.mxu0 %v25639_v34  ;;  %21479 = vmatprep.subr.bf16.mxu1 %v21478_v53  ;;  %v9519_v34 = vld [vmem:[%s29985_s11 + $0x5a8] sm:$0xff]  ;;  %v21696_v53 = vpack.c.bf16 %v9547_v29, %v9540_v50  ;;  %v21510_v9 = vpack.c.bf16 %v9490_v14, %v9483_v39  ;;  %v9546_v39 = vld [vmem:[%s29985_s11 + $0x680] sm:$0xff]  ;;  %v9764_v14 = vld [vmem:[%s29985_s11 + $0xd50] sm:$0xff] }
 0x394   : > { %21681 = vmatprep.subr.bf16.mxu0 %v21680_v15  ;;  %v21688_v18 = vpack.c.bf16 %v9519_v34, %v9512_v55  ;;  %v9554_v15 = vld [vmem:[%s29985_s11 + $0x6c0] sm:$0xff]  ;;  %v9687_v55 = vld [vmem:[%s29985_s11 + $0xae8] sm:$0xff] }
 0x395   : > { %21481 = vmatpush1.bf16.msra.mxu1 %v21480_v25  ;;  %v21698_v25 = vpack.c.bf16 %v9435_v60, %v9428_v59  ;;  %v21700_v22 = vpack.c.bf16 %v9561_v21, %v9554_v15  ;;  %v21704_v2 = vpack.c.bf16 %v9687_v55, %v9680_v11  ;;  %v9715_v50 = vld [vmem:[%s29985_s11 + $0xbc8] sm:$0xff]  ;;  %v9497_v60 = vld [vmem:[%s29985_s11 + $0x4f8] sm:$0xff] }
 0x396   : > { %21683 = vmatpush3.bf16.msra.mxu0 %v21682_v28  ;;  %21483 = vmatprep.subr.bf16.mxu1 %v21482_v42  ;;  %v21498_v28 = vpack.c.bf16 %v9448_v48, %v9441_v7  ;;  %v9440_v42 = vld [vmem:[%s29985_s11 + $0x330] sm:$0xff]  ;;  %v21712_v59 = vpack.c.bf16 %v9715_v50, %v9708_v43  ;;  %v9722_v48 = vld [vmem:[%s29985_s11 + $0xc00] sm:$0xff]  ;;  %v9729_v15 = vld [vmem:[%s29985_s11 + $0xc38] sm:$0xff] }
 0x397   : > { %21685 = vmatprep.subr.bf16.mxu0 %v21684_v61  ;;  %v9449_v61 = vld [vmem:[%s29985_s11 + $0x378] sm:$0xff]  ;;  %v21500_v34 = vpack.c.bf16 %v9447_v23, %v9440_v42  ;;  %v9504_v7 = vld [vmem:[%s29985_s11 + $0x530] sm:$0xff]  ;;  %v9503_v42 = vld [vmem:[%s29985_s11 + $0x528] sm:$0xff] }
 0x398   : > { %v9610_v23 = vld [vmem:[%s29985_s11 + $0x880] sm:$0xff]  ;;  %v9743_v11 = vld [vmem:[%s29985_s11 + $0xca8] sm:$0xff] }
 0x399   : > { %21485 = vmatpush1.bf16.msra.mxu1 %v21484_v38  ;;  %v21702_v38 = vpack.c.bf16 %v9449_v61, %v9442_v32  ;;  %v21716_v32 = vpack.c.bf16 %v9729_v15, %v9722_v48  ;;  %v9511_v61 = vld [vmem:[%s29985_s11 + $0x568] sm:$0xff]  ;;  %v9785_v48 = vld [vmem:[%s29985_s11 + $0xdf8] sm:$0xff] }
 0x39a   : > { %21687 = vmatpush3.bf16.msra.mxu0 %v21686_v46  ;;  %21487 = vmatprep.subr.bf16.mxu1 %v21486_v47  ;;  %v21502_v46 = vpack.c.bf16 %v9462_v27, %v9455_v3  ;;  %v9454_v47 = vld [vmem:[%s29985_s11 + $0x3a0] sm:$0xff]  ;;  %v9736_v27 = vld [vmem:[%s29985_s11 + $0xc70] sm:$0xff]  ;;  %v9771_v43 = vld [vmem:[%s29985_s11 + $0xd88] sm:$0xff] }
 0x39b   : > { %21689 = vmatprep.subr.bf16.mxu0 %v21688_v18  ;;  %v9575_v18 = vld [vmem:[%s29985_s11 + $0x768] sm:$0xff]  ;;  %v21504_v1 = vpack.c.bf16 %v9461_v54, %v9454_v47  ;;  %v9518_v3 = vld [vmem:[%s29985_s11 + $0x5a0] sm:$0xff]  ;;  %v9517_v47 = vld [vmem:[%s29985_s11 + $0x598] sm:$0xff] }
 0x39c   : > { %v9624_v54 = vld [vmem:[%s29985_s11 + $0x8f0] sm:$0xff] }
 0x39d   : > { %21489 = vmatpush1.bf16.msra.mxu1 %v21488_v20  ;;  %v21706_v20 = vpack.c.bf16 %v9575_v18, %v9568_v30  ;;  %v9631_v30 = vld [vmem:[%s29985_s11 + $0x928] sm:$0xff]  ;;  %v9525_v18 = vld [vmem:[%s29985_s11 + $0x5d8] sm:$0xff] }
 0x39e   : > { %21691 = vmatpush3.bf16.msra.mxu0 %v21690_v8  ;;  %21491 = vmatprep.subr.bf16.mxu1 %v21490_v10  ;;  %v9468_v8 = vld [vmem:[%s29985_s11 + $0x410] sm:$0xff]  ;;  %v9475_v10 = vld [vmem:[%s29985_s11 + $0x448] sm:$0xff] }
 0x39f   : > { %21693 = vmatprep.subr.bf16.mxu0 %v21692_v33  ;;  %v9589_v33 = vld [vmem:[%s29985_s11 + $0x7d8] sm:$0xff]  ;;  %v21508_v29 = vpack.c.bf16 %v9475_v10, %v9468_v8  ;;  %v9524_v8 = vld [vmem:[%s29985_s11 + $0x5d0] sm:$0xff]  ;;  %v9531_v10 = vld [vmem:[%s29985_s11 + $0x608] sm:$0xff] }
 0x3a0   : > { %v21524_v50 = vpack.c.bf16 %v9531_v10, %v9524_v8  ;;  %v9587_v8 = vld [vmem:[%s29985_s11 + $0x7c8] sm:$0xff]  ;;  %v9806_v10 = vld [vmem:[%s29985_s11 + $0xea0] sm:$0xff] }
 0x3a1   : > { %21493 = vmatpush1.bf16.msra.mxu1 %v21492_v45  ;;  %v21710_v45 = vpack.c.bf16 %v9589_v33, %v9582_v5  ;;  %v9645_v5 = vld [vmem:[%s29985_s11 + $0x998] sm:$0xff]  ;;  %v9539_v33 = vld [vmem:[%s29985_s11 + $0x648] sm:$0xff] }
 0x3a2   : > { %21695 = vmatpush3.bf16.msra.mxu0 %v21694_v41  ;;  %21495 = vmatprep.subr.bf16.mxu1 %v21494_v16  ;;  %v9482_v41 = vld [vmem:[%s29985_s11 + $0x480] sm:$0xff]  ;;  %v9489_v16 = vld [vmem:[%s29985_s11 + $0x4b8] sm:$0xff] }
 0x3a3   : > { %21697 = vmatprep.subr.bf16.mxu0 %v21696_v53  ;;  %v9603_v53 = vld [vmem:[%s29985_s11 + $0x848] sm:$0xff]  ;;  %v21512_v21 = vpack.c.bf16 %v9489_v16, %v9482_v41  ;;  %v9538_v41 = vld [vmem:[%s29985_s11 + $0x640] sm:$0xff]  ;;  %v9545_v16 = vld [vmem:[%s29985_s11 + $0x678] sm:$0xff] }
 0x3a4   : > { %v21528_v15 = vpack.c.bf16 %v9545_v16, %v9538_v41  ;;  %v9827_v16 = vld [vmem:[%s29985_s11 + $0xf48] sm:$0xff] }
 0x3a5   : > { %21497 = vmatpush1.bf16.msra.mxu1 %v21496_v17  ;;  %v21714_v17 = vpack.c.bf16 %v9603_v53, %v9596_v58  ;;  %v9652_v58 = vld [vmem:[%s29985_s11 + $0x9d0] sm:$0xff]  ;;  %v9553_v53 = vld [vmem:[%s29985_s11 + $0x6b8] sm:$0xff] }
 0x3a6   : > { %21699 = vmatpush3.bf16.msra.mxu0 %v21698_v25  ;;  %21499 = vmatprep.subr.bf16.mxu1 %v21498_v28  ;;  %v21514_v25 = vpack.c.bf16 %v9504_v7, %v9497_v60  ;;  %v9496_v28 = vld [vmem:[%s29985_s11 + $0x4f0] sm:$0xff]  ;;  %v9778_v7 = vld [vmem:[%s29985_s11 + $0xdc0] sm:$0xff] }
 0x3a7   : > { %21701 = vmatprep.subr.bf16.mxu0 %v21700_v22  ;;  %v9617_v22 = vld [vmem:[%s29985_s11 + $0x8b8] sm:$0xff]  ;;  %v21516_v55 = vpack.c.bf16 %v9503_v42, %v9496_v28  ;;  %v9560_v60 = vld [vmem:[%s29985_s11 + $0x6f0] sm:$0xff]  ;;  %v9559_v28 = vld [vmem:[%s29985_s11 + $0x6e8] sm:$0xff] }
 0x3a8   : > { %v9666_v42 = vld [vmem:[%s29985_s11 + $0xa40] sm:$0xff] }
 0x3a9   : > { %21501 = vmatpush1.bf16.msra.mxu1 %v21500_v34  ;;  %v21718_v34 = vpack.c.bf16 %v9617_v22, %v9610_v23  ;;  %v21732_v23 = vpack.c.bf16 %v9785_v48, %v9778_v7  ;;  %v9567_v22 = vld [vmem:[%s29985_s11 + $0x728] sm:$0xff] }
 0x3aa   : > { %21703 = vmatpush3.bf16.msra.mxu0 %v21702_v38  ;;  %21503 = vmatprep.subr.bf16.mxu1 %v21502_v46  ;;  %v21518_v38 = vpack.c.bf16 %v9518_v3, %v9511_v61  ;;  %v9510_v46 = vld [vmem:[%s29985_s11 + $0x560] sm:$0xff]  ;;  %v9904_v3 = vld [vmem:[%s29985_s11 + $0x11b0] sm:$0xff]  ;;  %v9615_v48 = vld [vmem:[%s29985_s11 + $0x8a8] sm:$0xff] }
 0x3ab   : > { %21705 = vmatprep.subr.bf16.mxu0 %v21704_v2  ;;  %v21720_v2 = vpack.c.bf16 %v9743_v11, %v9736_v27  ;;  %v21520_v51 = vpack.c.bf16 %v9517_v47, %v9510_v46  ;;  %v9574_v61 = vld [vmem:[%s29985_s11 + $0x760] sm:$0xff]  ;;  %v9911_v27 = vld [vmem:[%s29985_s11 + $0x11e8] sm:$0xff]  ;;  %v9573_v47 = vld [vmem:[%s29985_s11 + $0x758] sm:$0xff] }
 0x3ac   : > { %v9566_v46 = vld [vmem:[%s29985_s11 + $0x720] sm:$0xff] }
 0x3ad   : > { %11056 = vmatmul.mubr.f32.vlgmr.msra.gmra.mrb[18].mxu0 %v25637_v37  ;;  %21505 = vmatpush1.bf16.msra.mxu1 %v21504_v1  ;;  %v21722_v1 = vpack.c.bf16 %v9631_v30, %v9624_v54  ;;  %v9792_v54 = vld [vmem:[%s29985_s11 + $0xe30] sm:$0xff]  ;;  %v9581_v30 = vld [vmem:[%s29985_s11 + $0x798] sm:$0xff] }
 0x3ae   : > { %11060 = vmatprep.mubr.f32.mxu0 %v25680_v62  ;;  %21707 = vmatpush3.bf16.msra.mxu0 %v21706_v20  ;;  %v21522_v20 = vpack.c.bf16 %v9532_v49, %v9525_v18  ;;  %v9588_v18 = vld [vmem:[%s29985_s11 + $0x7d0] sm:$0xff]  ;;  %v9918_v49 = vld [vmem:[%s29985_s11 + $0x1220] sm:$0xff] }
 0x3af   : > { %21507 = vmatprep.subr.bf16.mxu1 %v21506_v24  ;;  %21709 = vmatprep.subr.bf16.mxu0 %v21708_v19  ;;  %v9638_v24 = vld [vmem:[%s29985_s11 + $0x960] sm:$0xff]  ;;  %v21724_v19 = vpack.c.bf16 %v9757_v0, %v9750_v26  ;;  %v9925_v26 = vld [vmem:[%s29985_s11 + $0x1258] sm:$0xff]  ;;  %v21536_v0 = vpack.c.bf16 %v9573_v47, %v9566_v46  ;;  %v9644_v46 = vld [vmem:[%s29985_s11 + $0x990] sm:$0xff] }
 0x3b0   : > { %v9974_v47 = vld [vmem:[%s29985_s11 + $0x13e0] sm:$0xff] }
 0x3b1   : > { %11061 = vmatmul.mubr.f32.gmra.mrb[20].mxu0 %v25683_v57  ;;  %21509 = vmatpush1.bf16.msra.mxu1 %v21508_v29  ;;  %v21726_v29 = vpack.c.bf16 %v9645_v5, %v9638_v24  ;;  %v21740_v24 = vpack.c.bf16 %v9925_v26, %v9918_v49  ;;  %v9595_v5 = vld [vmem:[%s29985_s11 + $0x808] sm:$0xff]  ;;  %v9636_v49 = vld [vmem:[%s29985_s11 + $0x950] sm:$0xff] }
 0x3b2   : > { %21711 = vmatpush3.bf16.msra.mxu0 %v21710_v45  ;;  %11130 = vmatprep.mubr.f32.mxu0 %v25704_v13  ;;  %v21526_v45 = vpack.c.bf16 %v9546_v39, %v9539_v33  ;;  %v9602_v33 = vld [vmem:[%s29985_s11 + $0x840] sm:$0xff]  ;;  %v9939_v39 = vld [vmem:[%s29985_s11 + $0x12c8] sm:$0xff] }
 0x3b3   : > { %21511 = vmatprep.subr.bf16.mxu1 %v21510_v9  ;;  %21713 = vmatprep.subr.bf16.mxu0 %v21712_v59  ;;  %v21728_v9 = vpack.c.bf16 %v9771_v43, %v9764_v14  ;;  %v9659_v59 = vld [vmem:[%s29985_s11 + $0xa08] sm:$0xff] }
 0x3b4   : > { %v9643_v26 = vld [vmem:[%s29985_s11 + $0x988] sm:$0xff] }
 0x3b5   : > { %21513 = vmatpush1.bf16.msra.mxu1 %v21512_v21  ;;  %v21730_v21 = vpack.c.bf16 %v9659_v59, %v9652_v58  ;;  %v9609_v58 = vld [vmem:[%s29985_s11 + $0x878] sm:$0xff] }
 0x3b6   : > { %21715 = vmatpush3.bf16.msra.mxu0 %v21714_v17  ;;  %21515 = vmatprep.subr.bf16.mxu1 %v21514_v25  ;;  %v21530_v17 = vpack.c.bf16 %v9560_v60, %v9553_v53  ;;  %v9552_v25 = vld [vmem:[%s29985_s11 + $0x6b0] sm:$0xff]  ;;  %v9953_v59 = vld [vmem:[%s29985_s11 + $0x1338] sm:$0xff] }
 0x3b7   : > { %21717 = vmatprep.subr.bf16.mxu0 %v21716_v32  ;;  %v9673_v32 = vld [vmem:[%s29985_s11 + $0xa78] sm:$0xff]  ;;  %v21532_v11 = vpack.c.bf16 %v9559_v28, %v9552_v25  ;;  %v9623_v25 = vld [vmem:[%s29985_s11 + $0x8e8] sm:$0xff]  ;;  %v9630_v28 = vld [vmem:[%s29985_s11 + $0x920] sm:$0xff] }
 0x3b9   : > { %21517 = vmatpush1.bf16.msra.mxu1 %v21516_v55  ;;  %v21734_v55 = vpack.c.bf16 %v9673_v32, %v9666_v42  ;;  %v9960_v42 = vld [vmem:[%s29985_s11 + $0x1370] sm:$0xff] }
 0x3ba   : > { %21719 = vmatpush3.bf16.msra.mxu0 %v21718_v34  ;;  %21519 = vmatprep.subr.bf16.mxu1 %v21518_v38  ;;  %v21534_v34 = vpack.c.bf16 %v9574_v61, %v9567_v22  ;;  %v21736_v38 = vpack.c.bf16 %v9911_v27, %v9904_v3  ;;  %v21550_v61 = vpack.c.bf16 %v9630_v28, %v9623_v25  ;;  %v9622_v3 = vld [vmem:[%s29985_s11 + $0x8e0] sm:$0xff]  ;;  %v9629_v27 = vld [vmem:[%s29985_s11 + $0x918] sm:$0xff] }
 0x3bb   : > { %21721 = vmatprep.subr.bf16.mxu0 %v21720_v2  ;;  %v9799_v2 = vld [vmem:[%s29985_s11 + $0xe68] sm:$0xff] }
 0x3bd   : > { %21521 = vmatpush1.bf16.msra.mxu1 %v21520_v51  ;;  %v21738_v51 = vpack.c.bf16 %v9799_v2, %v9792_v54  ;;  %v9981_v54 = vld [vmem:[%s29985_s11 + $0x1418] sm:$0xff]  ;;  %v21552_v2 = vpack.c.bf16 %v9629_v27, %v9622_v3  ;;  %v10030_v3 = vld [vmem:[%s29985_s11 + $0x15a0] sm:$0xff] }
 0x3be   : > { %21723 = vmatpush3.bf16.msra.mxu0 %v21722_v1  ;;  %21523 = vmatprep.subr.bf16.mxu1 %v21522_v20  ;;  %v21538_v1 = vpack.c.bf16 %v9588_v18, %v9581_v30  ;;  %v9580_v20 = vld [vmem:[%s29985_s11 + $0x790] sm:$0xff]  ;;  %v10037_v27 = vld [vmem:[%s29985_s11 + $0x15d8] sm:$0x3f] }
 0x3bf   : > { %21725 = vmatprep.subr.bf16.mxu0 %v21724_v19  ;;  %v9813_v19 = vld [vmem:[%s29985_s11 + $0xed8] sm:$0xff]  ;;  %v21540_v14 = vpack.c.bf16 %v9587_v8, %v9580_v20  ;;  %v9651_v20 = vld [vmem:[%s29985_s11 + $0x9c8] sm:$0xff]  ;;  %v9658_v8 = vld [vmem:[%s29985_s11 + $0xa00] sm:$0xff] }
 0x3c0   : > { %v21742_v43 = vpack.c.bf16 %v9813_v19, %v9806_v10  ;;  %v9988_v10 = vld [vmem:[%s29985_s11 + $0x1450] sm:$0xff]  ;;  %v21556_v19 = vpack.c.bf16 %v9643_v26, %v9636_v49  ;;  %v9721_v26 = vld [vmem:[%s29985_s11 + $0xbf8] sm:$0xff] }
 0x3c1   : > { %21525 = vmatpush1.bf16.msra.mxu1 %v21524_v50  ;;  %v21542_v50 = vpack.c.bf16 %v9602_v33, %v9595_v5  ;;  %v21558_v33 = vpack.c.bf16 %v9658_v8, %v9651_v20  ;;  %v9720_v20 = vld [vmem:[%s29985_s11 + $0xbf0] sm:$0xff]  ;;  %v9727_v8 = vld [vmem:[%s29985_s11 + $0xc28] sm:$0xff] }
 0x3c2   : > { %21727 = vmatpush3.bf16.msra.mxu0 %v21726_v29  ;;  %21527 = vmatprep.subr.bf16.mxu1 %v21526_v45  ;;  %v9601_v29 = vld [vmem:[%s29985_s11 + $0x838] sm:$0xff]  ;;  %v9820_v45 = vld [vmem:[%s29985_s11 + $0xf10] sm:$0xff] }
 0x3c3   : > { %21729 = vmatprep.subr.bf16.mxu0 %v21728_v9  ;;  %v9616_v9 = vld [vmem:[%s29985_s11 + $0x8b0] sm:$0xff]  ;;  %v21746_v60 = vpack.c.bf16 %v9827_v16, %v9820_v45  ;;  %v10002_v45 = vld [vmem:[%s29985_s11 + $0x14c0] sm:$0xff] }
 0x3c4   : > { %v21546_v7 = vpack.c.bf16 %v9616_v9, %v9609_v58 }
 0x3c5   : > { %21529 = vmatpush1.bf16.msra.mxu1 %v21528_v15  ;;  %v9834_v15 = vld [vmem:[%s29985_s11 + $0xf80] sm:$0xff] }
 0x3c6   : > { %21731 = vmatpush3.bf16.msra.mxu0 %v21730_v21  ;;  %21531 = vmatprep.subr.bf16.mxu1 %v21530_v17  ;;  %v9841_v17 = vld [vmem:[%s29985_s11 + $0xfb8] sm:$0xff] }
 0x3c7   : > { %21733 = vmatprep.subr.bf16.mxu0 %v21732_v23  ;;  %v9967_v23 = vld [vmem:[%s29985_s11 + $0x13a8] sm:$0xff]  ;;  %v21750_v22 = vpack.c.bf16 %v9841_v17, %v9834_v15  ;;  %v10016_v15 = vld [vmem:[%s29985_s11 + $0x1530] sm:$0xff] }
 0x3c9   : > { %21533 = vmatpush1.bf16.msra.mxu1 %v21532_v11  ;;  %v9848_v11 = vld [vmem:[%s29985_s11 + $0xff0] sm:$0xff] }
 0x3ca   : > { %21735 = vmatpush3.bf16.msra.mxu0 %v21734_v55  ;;  %21535 = vmatprep.subr.bf16.mxu1 %v21534_v34  ;;  %v21752_v55 = vpack.c.bf16 %v9967_v23, %v9960_v42  ;;  %v9855_v34 = vld [vmem:[%s29985_s11 + $0x1028] sm:$0xff]  ;;  %v9678_v42 = vld [vmem:[%s29985_s11 + $0xaa0] sm:$0xff]  ;;  %v9685_v23 = vld [vmem:[%s29985_s11 + $0xad8] sm:$0xff] }
 0x3cb   : > { %21737 = vmatprep.subr.bf16.mxu0 %v21736_v38  ;;  %v9637_v38 = vld [vmem:[%s29985_s11 + $0x958] sm:$0xff]  ;;  %v21754_v30 = vpack.c.bf16 %v9855_v34, %v9848_v11  ;;  %v21568_v11 = vpack.c.bf16 %v9685_v23, %v9678_v42  ;;  %v9699_v34 = vld [vmem:[%s29985_s11 + $0xb48] sm:$0xff] }
 0x3cc   : > { %10748 = vmatmul.mubr.f32.vlgmr.msra.gmra.mrb[20].mxu1 %v25637_v37  ;;  %v9932_v37 = vld [vmem:[%s29985_s11 + $0x1290] sm:$0xff]  ;;  %v21554_v18 = vpack.c.bf16 %v9644_v46, %v9637_v38  ;;  %v21772_v46 = vpack.c.bf16 %v10037_v27, %v10030_v3  ;;  %v9797_v42 = vld [vmem:[%s29985_s11 + $0xe58] sm:$0xff]  ;;  %v9811_v27 = vld [vmem:[%s29985_s11 + $0xec8] sm:$0xff] }
 0x3cd   : > { %11131 = vmatmul.mubr.f32.vlgmr.msra.gmra.mrb[22].mxu0 %v25655_v44  ;;  %10753 = vmatprep.mubr.f32.mxu1 %v25680_v62  ;;  %v9594_v62 = vld [vmem:[%s29985_s11 + $0x800] sm:$0xff]  ;;  %v21744_v41 = vpack.c.bf16 %v9939_v39, %v9932_v37  ;;  %v9657_v39 = vld [vmem:[%s29985_s11 + $0x9f8] sm:$0xff]  ;;  %v9804_v3 = vld [vmem:[%s29985_s11 + $0xe90] sm:$0xff] }
 0x3ce   : > { %21537 = vmatpush1.bf16.msra.mxu1 %v21536_v0  ;;  %11135 = vmatprep.mubr.f32.mxu0 %v26089_v36  ;;  %v21544_v53 = vpack.c.bf16 %v9601_v29, %v9594_v62  ;;  %v9862_v0 = vld [vmem:[%s29985_s11 + $0x1060] sm:$0xff]  ;;  %v9665_v62 = vld [vmem:[%s29985_s11 + $0xa38] sm:$0xff]  ;;  %v9672_v29 = vld [vmem:[%s29985_s11 + $0xa70] sm:$0xff] }
 0x3cf   : > { %21739 = vmatpush3.bf16.msra.mxu0 %v21738_v51  ;;  %21539 = vmatprep.subr.bf16.mxu1 %v21538_v1  ;;  %v21756_v51 = vpack.c.bf16 %v9981_v54, %v9974_v47  ;;  %v9869_v1 = vld [vmem:[%s29985_s11 + $0x1098] sm:$0xff]  ;;  %v9650_v37 = vld [vmem:[%s29985_s11 + $0x9c0] sm:$0xff]  ;;  %v21562_v9 = vpack.c.bf16 %v9672_v29, %v9665_v62  ;;  %v9707_v47 = vld [vmem:[%s29985_s11 + $0xb88] sm:$0xff] }
 0x3d0   : > { %10754 = vmatmul.mubr.f32.gmra.mrb[22].mxu1 %v25683_v57  ;;  %21741 = vmatprep.subr.bf16.mxu0 %v21740_v24  ;;  %v9946_v57 = vld [vmem:[%s29985_s11 + $0x1300] sm:$0xff]  ;;  %v9995_v24 = vld [vmem:[%s29985_s11 + $0x1488] sm:$0xff]  ;;  %v21758_v5 = vpack.c.bf16 %v9869_v1, %v9862_v0  ;;  %v21560_v16 = vpack.c.bf16 %v9657_v39, %v9650_v37  ;;  %v9728_v0 = vld [vmem:[%s29985_s11 + $0xc30] sm:$0xff] }
 0x3d1   : > { %11136 = vmatmul.mubr.f32.gmra.mrb[24].mxu0 %v25731_v12  ;;  %10824 = vmatprep.mubr.f32.mxu1 %v25704_v13  ;;  %v9608_v13 = vld [vmem:[%s29985_s11 + $0x870] sm:$0xff]  ;;  %v21748_v21 = vpack.c.bf16 %v9953_v59, %v9946_v57  ;;  %v9671_v59 = vld [vmem:[%s29985_s11 + $0xa68] sm:$0xff]  ;;  %v9714_v54 = vld [vmem:[%s29985_s11 + $0xbc0] sm:$0xff]  ;;  %v21578_v1 = vpack.c.bf16 %v9728_v0, %v9721_v26 }
 0x3d2   : > { %21541 = vmatpush1.bf16.msra.mxu1 %v21540_v14  ;;  %11205 = vmatprep.mubr.f32.mxu0 %v26126_v31  ;;  %v21548_v32 = vpack.c.bf16 %v9615_v48, %v9608_v13  ;;  %v9876_v14 = vld [vmem:[%s29985_s11 + $0x10d0] sm:$0xff]  ;;  %v9679_v13 = vld [vmem:[%s29985_s11 + $0xaa8] sm:$0xff]  ;;  %v9686_v48 = vld [vmem:[%s29985_s11 + $0xae0] sm:$0xff]  ;;  %v21574_v49 = vpack.c.bf16 %v9714_v54, %v9707_v47 }
 0x3d3   : > { %21743 = vmatpush3.bf16.msra.mxu0 %v21742_v43  ;;  %21543 = vmatprep.subr.bf16.mxu1 %v21542_v50  ;;  %v21760_v43 = vpack.c.bf16 %v9995_v24, %v9988_v10  ;;  %v9883_v50 = vld [vmem:[%s29985_s11 + $0x1108] sm:$0xff]  ;;  %v9664_v57 = vld [vmem:[%s29985_s11 + $0xa30] sm:$0xff]  ;;  %v21566_v28 = vpack.c.bf16 %v9686_v48, %v9679_v13  ;;  %v9742_v24 = vld [vmem:[%s29985_s11 + $0xca0] sm:$0xff] }
 0x3d4   : > { %21745 = vmatprep.subr.bf16.mxu0 %v21744_v41  ;;  %v10009_v41 = vld [vmem:[%s29985_s11 + $0x14f8] sm:$0xff]  ;;  %v21762_v58 = vpack.c.bf16 %v9883_v50, %v9876_v14  ;;  %v21564_v17 = vpack.c.bf16 %v9671_v59, %v9664_v57  ;;  %v9735_v10 = vld [vmem:[%s29985_s11 + $0xc68] sm:$0xff]  ;;  %v9756_v14 = vld [vmem:[%s29985_s11 + $0xd10] sm:$0xff] }
 0x3d5   : > { %v9741_v37 = vld [vmem:[%s29985_s11 + $0xc98] sm:$0xff]  ;;  %v9748_v62 = vld [vmem:[%s29985_s11 + $0xcd0] sm:$0xff]  ;;  %v9755_v29 = vld [vmem:[%s29985_s11 + $0xd08] sm:$0xff] }
 0x3d6   : > { %21545 = vmatpush1.bf16.msra.mxu1 %v21544_v53  ;;  %v9890_v53 = vld [vmem:[%s29985_s11 + $0x1140] sm:$0xff]  ;;  %v9749_v39 = vld [vmem:[%s29985_s11 + $0xcd8] sm:$0xff]  ;;  %v9776_v13 = vld [vmem:[%s29985_s11 + $0xdb0] sm:$0xff] }
 0x3d7   : > { %21747 = vmatpush3.bf16.msra.mxu0 %v21746_v60  ;;  %21547 = vmatprep.subr.bf16.mxu1 %v21546_v7  ;;  %v21764_v60 = vpack.c.bf16 %v10009_v41, %v10002_v45  ;;  %v9897_v7 = vld [vmem:[%s29985_s11 + $0x1178] sm:$0xff]  ;;  %v21586_v50 = vpack.c.bf16 %v9756_v14, %v9749_v39  ;;  %v9763_v45 = vld [vmem:[%s29985_s11 + $0xd48] sm:$0xff]  ;;  %v9770_v41 = vld [vmem:[%s29985_s11 + $0xd80] sm:$0xff] }
 0x3d8   : > { %21749 = vmatprep.subr.bf16.mxu0 %v21748_v21  ;;  %v10023_v21 = vld [vmem:[%s29985_s11 + $0x1568] sm:$0xff]  ;;  %v21766_v25 = vpack.c.bf16 %v9897_v7, %v9890_v53  ;;  %v9769_v57 = vld [vmem:[%s29985_s11 + $0xd78] sm:$0xff]  ;;  %v9784_v53 = vld [vmem:[%s29985_s11 + $0xdf0] sm:$0xff] }
 0x3d9   : > { %v9777_v59 = vld [vmem:[%s29985_s11 + $0xdb8] sm:$0xff]  ;;  %v9783_v48 = vld [vmem:[%s29985_s11 + $0xde8] sm:$0xff]  ;;  %v9846_v0 = vld [vmem:[%s29985_s11 + $0xfe0] sm:$0xff] }
 0x3da   : > { %21549 = vmatpush1.bf16.msra.mxu1 %v21548_v32  ;;  %v21768_v32 = vpack.c.bf16 %v10023_v21, %v10016_v15  ;;  %v21594_v7 = vpack.c.bf16 %v9784_v53, %v9777_v59  ;;  %v9791_v15 = vld [vmem:[%s29985_s11 + $0xe28] sm:$0xff]  ;;  %v9798_v21 = vld [vmem:[%s29985_s11 + $0xe60] sm:$0xff]  ;;  %v9805_v23 = vld [vmem:[%s29985_s11 + $0xe98] sm:$0xff] }
 0x3db   : > { %21751 = vmatpush3.bf16.msra.mxu0 %v21750_v22  ;;  %21551 = vmatprep.subr.bf16.mxu1 %v21550_v61  ;;  %v9693_v22 = vld [vmem:[%s29985_s11 + $0xb18] sm:$0xff]  ;;  %v9700_v61 = vld [vmem:[%s29985_s11 + $0xb50] sm:$0xff]  ;;  %v9874_v14 = vld [vmem:[%s29985_s11 + $0x10c0] sm:$0xff] }
 0x3dc   : > { %21753 = vmatprep.subr.bf16.mxu0 %v21752_v55  ;;  %v9692_v55 = vld [vmem:[%s29985_s11 + $0xb10] sm:$0xff]  ;;  %v21570_v38 = vpack.c.bf16 %v9700_v61, %v9693_v22  ;;  %v9825_v47 = vld [vmem:[%s29985_s11 + $0xf38] sm:$0xff]  ;;  %v9902_v53 = vld [vmem:[%s29985_s11 + $0x11a0] sm:$0xff] }
 0x3dd   : > { %v9833_v54 = vld [vmem:[%s29985_s11 + $0xf78] sm:$0xff] }
 0x3de   : > { %21553 = vmatpush1.bf16.msra.mxu1 %v21552_v2  ;;  %v21572_v2 = vpack.c.bf16 %v9699_v34, %v9692_v55  ;;  %v9826_v55 = vld [vmem:[%s29985_s11 + $0xf40] sm:$0xff]  ;;  %v21604_v34 = vpack.c.bf16 %v9811_v27, %v9804_v3  ;;  %v9952_v3 = vld [vmem:[%s29985_s11 + $0x1330] sm:$0xff] }
 0x3df   : > { %21755 = vmatpush3.bf16.msra.mxu0 %v21754_v30  ;;  %21555 = vmatprep.subr.bf16.mxu1 %v21554_v18  ;;  %v9706_v30 = vld [vmem:[%s29985_s11 + $0xb80] sm:$0xff]  ;;  %v9713_v18 = vld [vmem:[%s29985_s11 + $0xbb8] sm:$0xff] }
 0x3e0   : > { %21757 = vmatprep.subr.bf16.mxu0 %v21756_v51  ;;  %v21576_v51 = vpack.c.bf16 %v9713_v18, %v9706_v30  ;;  %v9832_v30 = vld [vmem:[%s29985_s11 + $0xf70] sm:$0xff]  ;;  %v9839_v18 = vld [vmem:[%s29985_s11 + $0xfa8] sm:$0xff] }
 0x3e2   : > { %21557 = vmatpush1.bf16.msra.mxu1 %v21556_v19  ;;  %v21580_v19 = vpack.c.bf16 %v9727_v8, %v9720_v20  ;;  %v9868_v20 = vld [vmem:[%s29985_s11 + $0x1090] sm:$0xff] }
 0x3e3   : > { %21759 = vmatpush3.bf16.msra.mxu0 %v21758_v5  ;;  %21559 = vmatprep.subr.bf16.mxu1 %v21558_v33  ;;  %v21582_v5 = vpack.c.bf16 %v9742_v24, %v9735_v10  ;;  %v9734_v33 = vld [vmem:[%s29985_s11 + $0xc60] sm:$0xff]  ;;  %v9860_v24 = vld [vmem:[%s29985_s11 + $0x1050] sm:$0xff] }
 0x3e4   : > { %21761 = vmatprep.subr.bf16.mxu0 %v21760_v43  ;;  %v21584_v43 = vpack.c.bf16 %v9741_v37, %v9734_v33  ;;  %v9882_v33 = vld [vmem:[%s29985_s11 + $0x1100] sm:$0xff] }
 0x3e6   : > { %21561 = vmatpush1.bf16.msra.mxu1 %v21560_v16  ;;  %v21588_v16 = vpack.c.bf16 %v9755_v29, %v9748_v62  ;;  %v9896_v62 = vld [vmem:[%s29985_s11 + $0x1170] sm:$0xff] }
 0x3e7   : > { %21763 = vmatpush3.bf16.msra.mxu0 %v21762_v58  ;;  %21563 = vmatprep.subr.bf16.mxu1 %v21562_v9  ;;  %v21590_v58 = vpack.c.bf16 %v9770_v41, %v9763_v45  ;;  %v9762_v9 = vld [vmem:[%s29985_s11 + $0xd40] sm:$0xff]  ;;  %v9888_v41 = vld [vmem:[%s29985_s11 + $0x1130] sm:$0xff] }
 0x3e8   : > { %21765 = vmatprep.subr.bf16.mxu0 %v21764_v60  ;;  %v21592_v60 = vpack.c.bf16 %v9769_v57, %v9762_v9  ;;  %v9910_v9 = vld [vmem:[%s29985_s11 + $0x11e0] sm:$0xff] }
 0x3ea   : > { %21565 = vmatpush1.bf16.msra.mxu1 %v21564_v17  ;;  %v21596_v17 = vpack.c.bf16 %v9783_v48, %v9776_v13  ;;  %v9924_v13 = vld [vmem:[%s29985_s11 + $0x1250] sm:$0xff] }
 0x3eb   : > { %21767 = vmatpush3.bf16.msra.mxu0 %v21766_v25  ;;  %21567 = vmatprep.subr.bf16.mxu1 %v21566_v28  ;;  %v21598_v25 = vpack.c.bf16 %v9798_v21, %v9791_v15  ;;  %v9790_v28 = vld [vmem:[%s29985_s11 + $0xe20] sm:$0xff]  ;;  %v9916_v21 = vld [vmem:[%s29985_s11 + $0x1210] sm:$0xff] }
 0x3ec   : > { %21769 = vmatprep.subr.bf16.mxu0 %v21768_v32  ;;  %v21600_v22 = vpack.c.bf16 %v9797_v42, %v9790_v28  ;;  %v9938_v28 = vld [vmem:[%s29985_s11 + $0x12c0] sm:$0xff] }
 0x3ee   : > { %11206 = vmatmul.mubr.f32.vlgmr.msra.gmra.mrb[26].mxu0 %v26492_v35  ;;  %21569 = vmatpush1.bf16.msra.mxu1 %v21568_v11  ;;  %v9819_v11 = vld [vmem:[%s29985_s11 + $0xf08] sm:$0xff] }
 0x3ef   : > { %11210 = vmatprep.mubr.f32.mxu0 %v26498_v40  ;;  %21771 = vmatpush3.bf16.msra.mxu0 %v21768_v32  ;;  %v9812_v32 = vld [vmem:[%s29985_s11 + $0xed0] sm:$0xff] }
 0x3f0   : > { %21571 = vmatprep.subr.bf16.mxu1 %v21570_v38  ;;  %21774 = vmatprep.subr.msk.bf16.mxu0 %vm26511_vm11, %v21772_v46  ;;  %v21602_v61 = vpack.c.bf16 %v9812_v32, %v9805_v23  ;;  %v21606_v38 = vpack.c.bf16 %v9826_v55, %v9819_v11  ;;  %v9930_v32 = vld [vmem:[%s29985_s11 + $0x1280] sm:$0xff]  ;;  %v9944_v55 = vld [vmem:[%s29985_s11 + $0x12f0] sm:$0xff] }
 0x3f2   : > { %11211 = vmatmul.mubr.f32.gmra.mrb[28].mxu0 %v25776_v63  ;;  %21573 = vmatpush1.bf16.msra.mxu1 %v21572_v2 }
 0x3f3   : > { %21777 = vmatpush3.bf16.msk.msra.mxu0 %vm26511_vm11, %v21772_v46  ;;  %20142 = vmatprep.mubr.msk.f32.mxu0 %vm10038_vm12, %v26566_v52  ;;  %v9818_v46 = vld [vmem:[%s29985_s11 + $0xf00] sm:$0xff] }
 0x3f4   : > { %21575 = vmatprep.subr.bf16.mxu1 %v21574_v49  ;;  %v9847_v49 = vld [vmem:[%s29985_s11 + $0xfe8] sm:$0xff] }
 0x3f6   : > { %20143 = vmatmul.mubr.msk.f32.vlgmr.msra.gmra.mrb[30].mxu0 %vm10038_vm12, %v26600_v4  ;;  %21577 = vmatpush1.bf16.msra.mxu1 %v21576_v51  ;;  %v9853_v51 = vld [vmem:[%s29985_s11 + $0x1018] sm:$0xff] }
 0x3f7   : > { %21579 = vmatprep.subr.bf16.mxu1 %v21578_v1  ;;  %11497 = vmatprep.mubr.f32.mxu0 %v23501_v6  ;;  %v9861_v1 = vld [vmem:[%s29985_s11 + $0x1058] sm:$0xff]  ;;  %v21616_v8 = vpack.c.bf16 %v9853_v51, %v9846_v0  ;;  %v9994_v0 = vld [vmem:[%s29985_s11 + $0x1480] sm:$0xff] }
 0x3f8   : > { %v21618_v10 = vpack.c.bf16 %v9868_v20, %v9861_v1  ;;  %v9986_v20 = vld [vmem:[%s29985_s11 + $0x1440] sm:$0xff] }
 0x3fa   : > { %21581 = vmatpush1.bf16.msra.mxu1 %v21580_v19  ;;  %v9867_v19 = vld [vmem:[%s29985_s11 + $0x1088] sm:$0xff] }
 0x3fb   : > { %21583 = vmatprep.subr.bf16.mxu1 %v21582_v5  ;;  %v9875_v5 = vld [vmem:[%s29985_s11 + $0x10c8] sm:$0xff]  ;;  %v21620_v37 = vpack.c.bf16 %v9867_v19, %v9860_v24  ;;  %v10008_v24 = vld [vmem:[%s29985_s11 + $0x14f0] sm:$0xff] }
 0x3fc   : > { %v21622_v39 = vpack.c.bf16 %v9882_v33, %v9875_v5  ;;  %v10000_v33 = vld [vmem:[%s29985_s11 + $0x14b0] sm:$0xff] }
 0x3fe   : > { %21585 = vmatpush1.bf16.msra.mxu1 %v21584_v43  ;;  %v9881_v43 = vld [vmem:[%s29985_s11 + $0x10f8] sm:$0xff] }
 0x3ff   : > { %21587 = vmatprep.subr.bf16.mxu1 %v21586_v50  ;;  %v9889_v50 = vld [vmem:[%s29985_s11 + $0x1138] sm:$0xff]  ;;  %v21624_v29 = vpack.c.bf16 %v9881_v43, %v9874_v14  ;;  %v10022_v14 = vld [vmem:[%s29985_s11 + $0x1560] sm:$0xff] }
 0x400   : > { %v21626_v45 = vpack.c.bf16 %v9896_v62, %v9889_v50  ;;  %v10014_v62 = vld [vmem:[%s29985_s11 + $0x1520] sm:$0xff] }
 0x402   : > { %21589 = vmatpush1.bf16.msra.mxu1 %v21588_v16  ;;  %v9895_v16 = vld [vmem:[%s29985_s11 + $0x1168] sm:$0xff] }
 0x403   : > { %21591 = vmatprep.subr.bf16.mxu1 %v21590_v58  ;;  %v9903_v58 = vld [vmem:[%s29985_s11 + $0x11a8] sm:$0xff]  ;;  %v21628_v57 = vpack.c.bf16 %v9895_v16, %v9888_v41  ;;  %v10036_v41 = vld [vmem:[%s29985_s11 + $0x15d0] sm:$0x3f] }
 0x404   : > { %v21630_v59 = vpack.c.bf16 %v9910_v9, %v9903_v58  ;;  %v10028_v9 = vld [vmem:[%s29985_s11 + $0x1590] sm:$0xff] }
 0x406   : > { %21593 = vmatpush1.bf16.msra.mxu1 %v21592_v60  ;;  %v9909_v60 = vld [vmem:[%s29985_s11 + $0x11d8] sm:$0xff] }
 0x407   : > { %21595 = vmatprep.subr.bf16.mxu1 %v21594_v7  ;;  %v9917_v7 = vld [vmem:[%s29985_s11 + $0x1218] sm:$0xff]  ;;  %v21632_v48 = vpack.c.bf16 %v9909_v60, %v9902_v53 }
 0x408   : > { %v21634_v15 = vpack.c.bf16 %v9924_v13, %v9917_v7 }
 0x40a   : > { %21597 = vmatpush1.bf16.msra.mxu1 %v21596_v17  ;;  %v9923_v17 = vld [vmem:[%s29985_s11 + $0x1248] sm:$0xff] }
 0x40b   : > { %21599 = vmatprep.subr.bf16.mxu1 %v21598_v25  ;;  %v9931_v25 = vld [vmem:[%s29985_s11 + $0x1288] sm:$0xff]  ;;  %v21636_v42 = vpack.c.bf16 %v9923_v17, %v9916_v21 }
 0x40c   : > { %v21638_v23 = vpack.c.bf16 %v9938_v28, %v9931_v25 }
 0x40d   : > { %10825 = vmatmul.mubr.f32.vlgmr.msra.gmra.mrb[20].mxu1 %v25655_v44  ;;  %v9840_v44 = vld [vmem:[%s29985_s11 + $0xfb0] sm:$0xff] }
 0x40e   : > { %10830 = vmatprep.mubr.f32.mxu1 %v26089_v36  ;;  %21601 = vmatpush1.bf16.msra.mxu1 %v21600_v22  ;;  %v21608_v36 = vpack.c.bf16 %v9825_v47, %v9818_v46  ;;  %v21610_v2 = vpack.c.bf16 %v9840_v44, %v9833_v54  ;;  %v9937_v22 = vld [vmem:[%s29985_s11 + $0x12b8] sm:$0xff]  ;;  %v9966_v46 = vld [vmem:[%s29985_s11 + $0x13a0] sm:$0xff] }
 0x40f   : > { %21603 = vmatprep.subr.bf16.mxu1 %v21602_v61  ;;  %v9945_v61 = vld [vmem:[%s29985_s11 + $0x12f8] sm:$0xff]  ;;  %v21640_v27 = vpack.c.bf16 %v9937_v22, %v9930_v32  ;;  %v9958_v44 = vld [vmem:[%s29985_s11 + $0x1360] sm:$0xff] }
 0x410   : > { %v21642_v11 = vpack.c.bf16 %v9952_v3, %v9945_v61 }
 0x411   : > { %10831 = vmatmul.mubr.f32.gmra.mrb[22].mxu1 %v25731_v12  ;;  %v9854_v12 = vld [vmem:[%s29985_s11 + $0x1020] sm:$0xff] }
 0x412   : > { %21605 = vmatpush1.bf16.msra.mxu1 %v21604_v34  ;;  %10901 = vmatprep.mubr.f32.mxu1 %v26126_v31  ;;  %v21612_v31 = vpack.c.bf16 %v9839_v18, %v9832_v30  ;;  %v21614_v26 = vpack.c.bf16 %v9854_v12, %v9847_v49  ;;  %v9951_v34 = vld [vmem:[%s29985_s11 + $0x1328] sm:$0xff]  ;;  %v9980_v30 = vld [vmem:[%s29985_s11 + $0x1410] sm:$0xff] }
 0x413   : > { %21607 = vmatprep.subr.bf16.mxu1 %v21606_v38  ;;  %v9959_v38 = vld [vmem:[%s29985_s11 + $0x1368] sm:$0xff]  ;;  %v21644_v47 = vpack.c.bf16 %v9951_v34, %v9944_v55  ;;  %v9972_v12 = vld [vmem:[%s29985_s11 + $0x13d0] sm:$0xff] }
 0x414   : > { %v21646_v54 = vpack.c.bf16 %v9966_v46, %v9959_v38 }
 0x416   : > { %21609 = vmatpush1.bf16.msra.mxu1 %v21608_v36  ;;  %v9965_v36 = vld [vmem:[%s29985_s11 + $0x1398] sm:$0xff] }
 0x417   : > { %21611 = vmatprep.subr.bf16.mxu1 %v21610_v2  ;;  %v9973_v2 = vld [vmem:[%s29985_s11 + $0x13d8] sm:$0xff]  ;;  %v21648_v18 = vpack.c.bf16 %v9965_v36, %v9958_v44 }
 0x418   : > { %v21650_v49 = vpack.c.bf16 %v9980_v30, %v9973_v2 }
 0x41a   : > { %21613 = vmatpush1.bf16.msra.mxu1 %v21612_v31  ;;  %v9979_v31 = vld [vmem:[%s29985_s11 + $0x1408] sm:$0xff] }
 0x41b   : > { %21615 = vmatprep.subr.bf16.mxu1 %v21614_v26  ;;  %v9987_v26 = vld [vmem:[%s29985_s11 + $0x1448] sm:$0xff]  ;;  %v21652_v51 = vpack.c.bf16 %v9979_v31, %v9972_v12 }
 0x41c   : > { %v21654_v1 = vpack.c.bf16 %v9994_v0, %v9987_v26 }
 0x41e   : > { %21617 = vmatpush1.bf16.msra.mxu1 %v21616_v8  ;;  %v9993_v8 = vld [vmem:[%s29985_s11 + $0x1478] sm:$0xff] }
 0x41f   : > { %21619 = vmatprep.subr.bf16.mxu1 %v21618_v10  ;;  %v10001_v10 = vld [vmem:[%s29985_s11 + $0x14b8] sm:$0xff]  ;;  %v21656_v19 = vpack.c.bf16 %v9993_v8, %v9986_v20  ;;  %v27521_v20 = vld [vmem:[%s30017_s22] sm:$0xff]  ;;  %v27529_v8 = vld [vmem:[%s30017_s22 + $0x8] sm:$0xff] }
 0x420   : > { %v21658_v5 = vpack.c.bf16 %v10008_v24, %v10001_v10  ;;  %v27537_v10 = vld [vmem:[%s30017_s22 + $0x10] sm:$0xff]  ;;  %v27545_v24 = vld [vmem:[%s30017_s22 + $0x18] sm:$0xff] }
 0x422   : > { %21621 = vmatpush1.bf16.msra.mxu1 %v21620_v37  ;;  %v10007_v37 = vld [vmem:[%s29985_s11 + $0x14e8] sm:$0xff] }
 0x423   : > { %21623 = vmatprep.subr.bf16.mxu1 %v21622_v39  ;;  %v10015_v39 = vld [vmem:[%s29985_s11 + $0x1528] sm:$0xff]  ;;  %v21660_v43 = vpack.c.bf16 %v10007_v37, %v10000_v33 }
 0x424   : > { %v21662_v50 = vpack.c.bf16 %v10022_v14, %v10015_v39 }
 0x426   : > { %21625 = vmatpush1.bf16.msra.mxu1 %v21624_v29  ;;  %v10021_v29 = vld [vmem:[%s29985_s11 + $0x1558] sm:$0xff] }
 0x427   : > { %21627 = vmatprep.subr.bf16.mxu1 %v21626_v45  ;;  %v10029_v45 = vld [vmem:[%s29985_s11 + $0x1598] sm:$0xff]  ;;  %v21664_v16 = vpack.c.bf16 %v10021_v29, %v10014_v62 }
 0x428   : > { %v21666_v58 = vpack.c.bf16 %v10036_v41, %v10029_v45  ;;  %v12884_v45 = vld [vmem:[%s29978_s4] sm:$0xff]  ;;  %v12886_v41 = vld [vmem:[%s29978_s4 + $0x10] sm:$0xff] }
 0x42a   : > { %21629 = vmatpush1.bf16.msra.mxu1 %v21628_v57  ;;  %v10035_v57 = vld [vmem:[%s29985_s11 + $0x15c8] sm:$0x3f] }
 0x42b   : > { %21631 = vmatprep.subr.bf16.mxu1 %v21630_v59  ;;  %v21669_v59 = vpack.c.bf16 %v10035_v57, %v10028_v9 }
 0x42e   : > { %21633 = vmatpush1.bf16.msra.mxu1 %v21632_v48 }
 0x42f   : > { %21635 = vmatprep.subr.bf16.mxu1 %v21634_v15 }
 0x432   : > { %21637 = vmatpush1.bf16.msra.mxu1 %v21636_v42 }
 0x433   : > { %21639 = vmatprep.subr.bf16.mxu1 %v21638_v23 }
 0x436   : > { %21641 = vmatpush1.bf16.msra.mxu1 %v21640_v27 }
 0x437   : > { %21643 = vmatprep.subr.bf16.mxu1 %v21642_v11 }
 0x43a   : > { %21645 = vmatpush1.bf16.msra.mxu1 %v21644_v47 }
 0x43b   : > { %21647 = vmatprep.subr.bf16.mxu1 %v21646_v54 }
 0x43e   : > { %21649 = vmatpush1.bf16.msra.mxu1 %v21648_v18 }
 0x43f   : > { %21651 = vmatprep.subr.bf16.mxu1 %v21650_v49 }
 0x442   : > { %21653 = vmatpush1.bf16.msra.mxu1 %v21652_v51 }
 0x443   : > { %21655 = vmatprep.subr.bf16.mxu1 %v21654_v1 }
 0x446   : > { %21657 = vmatpush1.bf16.msra.mxu1 %v21656_v19 }
 0x447   : > { %21659 = vmatprep.subr.bf16.mxu1 %v21658_v5 }
 0x44a   : > { %21661 = vmatpush1.bf16.msra.mxu1 %v21660_v43 }
 0x44b   : > { %21663 = vmatprep.subr.bf16.mxu1 %v21662_v50 }
 0x44d   : > { %10902 = vmatmul.mubr.f32.vlgmr.msra.gmra.mrb[20].mxu1 %v26492_v35 }
 0x44e   : > { %10907 = vmatprep.mubr.f32.mxu1 %v26498_v40  ;;  %21665 = vmatpush1.bf16.msra.mxu1 %v21664_v16  ;;  %v12885_v16 = vld [vmem:[%s29978_s4 + $0x8] sm:$0xff] }
 0x44f   : > { %21668 = vmatprep.subr.msk.bf16.mxu1 %vm26511_vm11, %v21666_v58  ;;  %v12887_v58 = vld [vmem:[%s29978_s4 + $0x18] sm:$0xff] }
 0x451   : > { %10908 = vmatmul.mubr.f32.gmra.mrb[22].mxu1 %v25776_v63 }
 0x452   : > { %21671 = vmatpush1.bf16.msk.msra.mxu1 %vm26511_vm11, %v21669_v59  ;;  %10978 = vmatprep.mubr.f32.mxu1 %v23501_v6  ;;  %vm23526_vm11 = vmmov 0  }
 0x455   : > { %18834 = vmatmul.mubr.msk.f32.vlgmr.msra.gmra.mrb[20].mxu1 %vm10038_vm12, %v26566_v52 }
 0x456   : > { %10984 = vmatprep.mubr.f32.mxu1 %v23501_v6 }
 0x459   : > { %18835 = vmatmul.mubr.msk.f32.gmra.mrb[22].mxu1 %vm10038_vm12, %v26600_v4  ;;  %vm18393_vm12 = vcmask 6144  }
 0x45a   : > { %11396 = vmatprep.mubr.f32.mxu1 %v23501_v6 }
 0x45f   : > { %v27492_v35 = vpop.f32.mrb[16].mxu1 }
 0x460   : > { %v10672_v40 = vpop.f32.mrb[14].mxu0  ;;  %v27494_v53 = vpop.f32.mrb[17].mxu1 }
 0x461   : > { %v27497_v63 = vpack.i.bf16 %v10672_v40, %v27494_v53  ;;  %v23002_v56 = vpack.i.bf16 %v27494_v53, %v27492_v35  ;;  %v10674_v60 = vpop.f32.mrb[15].mxu0 }
 0x462   : > { %v27501_v52 = vpack.i.bf16 %v10674_v60, %v10672_v40 }
 0x463   : > { %v27503_v7 = vpop.f32.mrb[18].mxu1 }
 0x464   : > { %v21784_v4 = vpack.c.bf16 %v27503_v7, %v27492_v35  ;;  %v10678_v13 = vpop.f32.mrb[16].mxu0  ;;  %v27507_v48 = vpop.f32.mrb[19].mxu1 }
 0x465   : > { %v27510_v15 = vpack.i.bf16 %v10678_v13, %v27507_v48  ;;  %v23007_v21 = vpack.i.bf16 %v27507_v48, %v27503_v7  ;;  %v10680_v17 = vpop.f32.mrb[17].mxu0  ;;  %v21782_v25 = vpack.c.bf16 %v27507_v48, %v27494_v53 }
 0x466   : > { %v27516_v28 = vpack.i.bf16 %v10680_v17, %v10678_v13 }
 0x467   : > { %21783 = vmatprep.subr.bf16.mxu0 %v21782_v25  ;;  %v27591_v25 = vld [vmem:[%s30017_s22 + $0x20] sm:$0xff] }
 0x468   : > { %21785 = vmatpush1.bf16.msra.mxu0 %v21784_v4 }
 0x46b   : > { %18847 = vmatmul.mubr.msk.f32.vlgmr.msra.gmra.mrb[32].mxu0 %vm11319_vm13, %v27521_v20 }
 0x46c   : > { %11503 = vmatprep.mubr.f32.mxu0 %v23501_v6 }
 0x46f   : > { %18848 = vmatmul.mubr.msk.f32.gmra.mrb[34].mxu0 %vm11319_vm13, %v27529_v8 }
 0x470   : > { %11509 = vmatprep.mubr.f32.mxu0 %v23501_v6 }
 0x473   : > { %18849 = vmatmul.mubr.msk.f32.gmra.mrb[36].mxu0 %vm11319_vm13, %v27537_v10 }
 0x474   : > { %11515 = vmatprep.mubr.f32.mxu0 %v23501_v6 }
 0x477   : > { %18850 = vmatmul.mubr.msk.f32.gmra.mrb[38].mxu0 %vm11319_vm13, %v27545_v24 }
 0x478   : > { %11605 = vmatprep.mubr.f32.mxu0 %v23501_v6 }
 0x480   : > { %v19306_v42 = vpop.f32.mrb[18].mxu0 }
 0x481   : > { %v19307_v23 = vpop.f32.mrb[19].mxu0 }
 0x482   : > { %v19308_v32 = vadd.f32 %v19307_v23, %v19306_v42 }
 0x484   : > { %v19309_v22 = vpop.f32.mrb[20].mxu0 }
 0x485   : > { %v19310_v61 = vpop.f32.mrb[21].mxu0 }
 0x486   : > { %v19311_v3 = vadd.f32 %v19310_v61, %v19309_v22 }
 0x4a0   : > { %v19344_v27 = vpop.f32.mrb[22].mxu0 }
 0x4a1   : > { %v19345_v11 = vpop.f32.mrb[23].mxu0 }
 0x4a2   : > { %v19346_v55 = vadd.f32 %v19345_v11, %v19344_v27  ;;  %v18840_v11 = vld [vmem:[%s30017_s22 + $0x28] sm:$0xff] }
 0x4a4   : > { %v11133_v34 = vadd.f32 %v19346_v55, %v19308_v32  ;;  %v19347_v38 = vpop.f32.mrb[24].mxu0 }
 0x4a5   : > { %v19348_v46 = vpop.f32.mrb[25].mxu0 }
 0x4a6   : > { %v19349_v47 = vadd.f32 %v19348_v46, %v19347_v38  ;;  %v18841_v46 = vld [vmem:[%s30017_s22 + $0x30] sm:$0xff] }
 0x4a8   : > { %v11138_v54 = vadd.f32 %v19349_v47, %v19311_v3 }
 0x4c1   : > { %v19382_v44 = vpop.f32.mrb[26].mxu0 }
 0x4c2   : > { %v19383_v36 = vpop.f32.mrb[27].mxu0 }
 0x4c3   : > { %v19384_v2 = vadd.f32 %v19383_v36, %v19382_v44  ;;  %v18842_v36 = vld [vmem:[%s30017_s22 + $0x38] sm:$0xff] }
 0x4c5   : > { %v19385_v30 = vpop.f32.mrb[28].mxu0  ;;  %v11208_v18 = vadd.f32 %v19384_v2, %v11133_v34 }
 0x4c6   : > { %v19386_v49 = vpop.f32.mrb[29].mxu0 }
 0x4c7   : > { %v19387_v12 = vadd.f32 %v19386_v49, %v19385_v30 }
 0x4c9   : > { %v11213_v31 = vadd.f32 %v19387_v12, %v11138_v54  ;;  %v20144_v26 = vpop.f32.mrb[30].mxu0 }
 0x4ca   : > { %v11282_v0 = vpop.f32.mrb[31].mxu0 }
 0x4cb   : > { %v11288_v51 = vadd.f32 %v20144_v26, %v11213_v31  ;;  %v11283_v1 = vadd.f32 %v11282_v0, %v11208_v18 }
 0x528   : > { %v10980_v19 = vpop.f32.mrb[20].mxu1 }
 0x529   : > { %v23042_v5 = vpack.i.bf16 %v10980_v19, %v10674_v60  ;;  %v10982_v33 = vpop.f32.mrb[21].mxu1 }
 0x52a   : > { %v22992_v37 = vpack.i.bf16 %v11283_v1, %v10982_v33  ;;  %v22962_v39 = vpack.i.bf16 %v10982_v33, %v10980_v19 }
 0x52c   : > { %22963 = vrot.lane.b32.xlu1 %v22962_v39, %s23511_s24  ;;  %v10986_v14 = vpop.f32.mrb[22].mxu1 }
 0x52d   : > { %v23047_v43 = vpack.i.bf16 %v10986_v14, %v10680_v17  ;;  %v10988_v50 = vpop.f32.mrb[23].mxu1 }
 0x52e   : > { %v22997_v62 = vpack.i.bf16 %v11288_v51, %v10988_v50  ;;  %v22967_v29 = vpack.i.bf16 %v10988_v50, %v10986_v14 }
 0x530   : > { %22973 = vrot.lane.b32.xlu1 %v23042_v5, %s23512_s28  ;;  %22968 = vrot.lane.b32.xlu0 %v22967_v29, %s23511_s24  ;;  %s23523_s24 = smov 126  }
 0x534   : > { %22983 = vrot.lane.b32.xlu1 %v27501_v52, %s23513_s1  ;;  %22978 = vrot.lane.b32.xlu0 %v23047_v43, %s23512_s28  ;;  %s30018_s28 = smov 95  }
 0x538   : > { %22993 = vrot.lane.b32.xlu1 %v22992_v37, %s23514_s3  ;;  %22988 = vrot.lane.b32.xlu0 %v27516_v28, %s23513_s1  ;;  %s23522_s1 = smov 104  }
 0x53c   : > { %23003 = vrot.lane.b32.xlu1 %v23002_v56, %s30014_s25  ;;  %22998 = vrot.lane.b32.xlu0 %v22997_v62, %s23514_s3  ;;  %s30019_s3 = smov 112  }
 0x540   : > { %23013 = vrot.lane.b32.xlu1 %v27497_v63, %s30003_s23  ;;  %23008 = vrot.lane.b32.xlu0 %v23007_v21, %s30014_s25 }
 0x544   : > { %23023 = vrot.lane.b32.xlu1 %v27501_v52, %s23516_s26  ;;  %23018 = vrot.lane.b32.xlu0 %v27510_v15, %s30003_s23  ;;  %s18473_s23 = sshll.u32 %s30022_s30, 3 }
 0x548   : > { %23033 = vrot.lane.b32.xlu1 %v27497_v63, %s23517_s27  ;;  %23028 = vrot.lane.b32.xlu0 %v27516_v28, %s23516_s26  ;;  %s23519_s26 = smov 29  }
 0x54c   : > { %23043 = vrot.lane.b32.xlu1 %v23042_v5, %s30005_s29  ;;  %23038 = vrot.lane.b32.xlu0 %v27510_v15, %s23517_s27  ;;  %s23520_s27 = smov 62  }
 0x550   : > { %12890 = vperm.xlu1 %22941, %v12884_v45   ;;  %23048 = vrot.lane.b32.xlu0 %v23047_v43, %s30005_s29  ;;  %s600_s29 = scalar_lea.vmem %s29993_s19, %s18473_s23 }
 0x554   : > { %12900 = vperm.xlu1 %22941, %v12886_v41   ;;  %12895 = vperm.xlu0 %22940, %v12885_v16  }
 0x558   : > { %12905 = vperm.xlu0 %22940, %v12887_v58   ;;  %v18861_v58 = vld [vmem:[%s30017_s22 + $0x50] sm:$0xff] }
 0x59e   : > { %v22964_v9 = vpop.permute.xlu1 %22963 }
 0x59f   : > { %v22966_v57 = vunpack.i.h.bf16 %v22964_v9  ;;  %v22965_v59 = vunpack.i.l.bf16 %v22964_v9  ;;  %v18862_v9 = vld [vmem:[%s30017_s22 + $0x58] sm:$0xff] }
 0x5a1   : > { %v11535_v56 = vsel %vm11534_vm14, %v22965_v59, %v22966_v57 }
 0x5a2   : > { %v22974_v35 = vpop.permute.xlu1 %22973  ;;  %v22969_v40 = vpop.permute.xlu0 %22968 }
 0x5a3   : > { %v22971_v53 = vunpack.i.h.bf16 %v22969_v40  ;;  %v22970_v63 = vunpack.i.l.bf16 %v22969_v40  ;;  %v22976_v60 = vunpack.i.h.bf16 %v22974_v35  ;;  %v22975_v52 = vunpack.i.l.bf16 %v22974_v35 }
 0x5a5   : > { %v11536_v7 = vsel %vm11534_vm14, %v22970_v63, %v22971_v53  ;;  %v27582_v4 = vpack.c.bf16 %v22971_v53, %v22966_v57  ;;  %v11641_v28 = vsel %vm11640_vm15, %v22975_v52, %v22976_v60 }
 0x5a6   : > { %v22984_v13 = vpop.permute.xlu1 %22983  ;;  %v22979_v48 = vpop.permute.xlu0 %22978  ;;  %v27584_v15 = vpack.c.bf16 %v11536_v7, %v11535_v56  ;;  %v18871_v56 = vld [vmem:[%s30017_s22 + $0x60] sm:$0xff]  ;;  %v18872_v7 = vld [vmem:[%s30017_s22 + $0x68] sm:$0xff] }
 0x5a7   : > { %v22981_v21 = vunpack.i.h.bf16 %v22979_v48  ;;  %v22980_v17 = vunpack.i.l.bf16 %v22979_v48  ;;  %21787 = vmatprep.subr.bf16.mxu0 %v27582_v4  ;;  %v22986_v3 = vunpack.i.h.bf16 %v22984_v13  ;;  %v22985_v2 = vunpack.i.l.bf16 %v22984_v13  ;;  %v18873_v13 = vld [vmem:[%s30017_s22 + $0x70] sm:$0xff]  ;;  %v18874_v48 = vld [vmem:[%s30017_s22 + $0x78] sm:$0xff] }
 0x5a8   : > { %21789 = vmatpush1.bf16.msra.mxu0 %v27584_v15 }
 0x5a9   : > { %v11642_v42 = vsel %vm11640_vm15, %v22980_v17, %v22981_v21  ;;  %v27593_v23 = vpack.c.bf16 %v22981_v21, %v22976_v60  ;;  %v11750_v31 = vsel %vm11749_vm0, %v22985_v2, %v22986_v3  ;;  %v18897_v2 = vld [vmem:[%s30017_s22 + $0xb0] sm:$0xff] }
 0x5aa   : > { %v27595_v32 = vpop.permute.xlu1 %22993  ;;  %v22989_v22 = vpop.permute.xlu0 %22988  ;;  %v27597_v61 = vpack.c.bf16 %v11642_v42, %v11641_v28 }
 0x5ab   : > { %v22991_v27 = vunpack.i.h.bf16 %v22989_v22  ;;  %18851 = vmatmul.mubr.msk.f32.vlgmr.msra.gmra.mrb[40].mxu0 %vm11319_vm13, %v27591_v25  ;;  %21791 = vmatprep.subr.bf16.mxu0 %v27593_v23  ;;  %v22990_v44 = vunpack.i.l.bf16 %v22989_v22  ;;  %v22996_v26 = vunpack.i.h.bf16 %v27595_v32  ;;  %v22995_v45 = vunpack.i.l.bf16 %v27595_v32  ;;  %v18884_v22 = vld [vmem:[%s30017_s22 + $0x88] sm:$0xff] }
 0x5ac   : > { %21793 = vmatpush1.bf16.msra.mxu0 %v27597_v61  ;;  %11611 = vmatprep.mubr.f32.mxu0 %v23501_v6 }
 0x5ad   : > { %v21794_v55 = vpack.c.bf16 %v22991_v27, %v22986_v3  ;;  %v11751_v49 = vsel %vm11749_vm0, %v22990_v44, %v22991_v27  ;;  %v18886_v3 = vld [vmem:[%s30017_s22 + $0x98] sm:$0xff] }
 0x5ae   : > { %v27607_v34 = vpop.permute.xlu1 %23003  ;;  %v22999_v38 = vpop.permute.xlu0 %22998  ;;  %v21796_v1 = vpack.c.bf16 %v11751_v49, %v11750_v31 }
 0x5af   : > { %18852 = vmatmul.mubr.msk.f32.gmra.mrb[42].mxu0 %vm11319_vm13, %v18840_v11  ;;  %21795 = vmatprep.subr.bf16.mxu0 %v21794_v55  ;;  %v23001_v12 = vunpack.i.h.bf16 %v22999_v38  ;;  %v23000_v29 = vunpack.i.l.bf16 %v22999_v38  ;;  %v23006_v59 = vunpack.i.h.bf16 %v27607_v34  ;;  %v23005_v53 = vunpack.i.l.bf16 %v27607_v34 }
 0x5b0   : > { %11617 = vmatprep.mubr.f32.mxu0 %v23501_v6 }
 0x5b1   : > { %v27634_v19 = vpack.c.bf16 %v23001_v12, %v22996_v26  ;;  %v11877_v41 = vsel %vm11875_vm2, %v23000_v29, %v23001_v12  ;;  %v12103_v60 = vsel %vm4895_vm5, %v23005_v53, %v23006_v59  ;;  %v12996_v53 = vld [vmem:[%s29986_s12 + $0x20] sm:$0xff] }
 0x5b2   : > { %v27614_v47 = vpop.permute.xlu1 %23013  ;;  %v27616_v54 = vpop.permute.xlu0 %23008 }
 0x5b3   : > { %18853 = vmatmul.mubr.msk.f32.gmra.mrb[44].mxu0 %vm11319_vm13, %v18841_v46  ;;  %v23011_v57 = vunpack.i.h.bf16 %v27616_v54  ;;  %v23010_v40 = vunpack.i.l.bf16 %v27616_v54  ;;  %v23015_v28 = vunpack.i.l.bf16 %v27614_v47 }
 0x5b4   : > { %11623 = vmatprep.mubr.f32.mxu0 %v23501_v6 }
 0x5b5   : > { %v27683_v35 = vpack.c.bf16 %v23011_v57, %v23006_v59  ;;  %v12104_v63 = vsel %vm4895_vm5, %v23010_v40, %v23011_v57  ;;  %v12997_v57 = vld [vmem:[%s29986_s12 + $0x28] sm:$0xff]  ;;  %v12999_v59 = vld [vmem:[%s29986_s12 + $0x38] sm:$0xff] }
 0x5b6   : > { %v27623_v30 = vpop.permute.xlu1 %23023  ;;  %v27625_v18 = vpop.permute.xlu0 %23018  ;;  %v27701_v52 = vpack.c.bf16 %v12104_v63, %v12103_v60  ;;  %v21838_v40 = vpack.c.bf16 %v12999_v59, %v12997_v57  ;;  %v12998_v63 = vld [vmem:[%s29986_s12 + $0x30] sm:$0xff]  ;;  %v13003_v60 = vld [vmem:[%s29986_s12 + $0x58] sm:$0xff] }
 0x5b7   : > { %18854 = vmatmul.mubr.msk.f32.gmra.mrb[46].mxu0 %vm11319_vm13, %v18842_v36  ;;  %v23021_v21 = vunpack.i.h.bf16 %v27625_v18  ;;  %v23025_v38 = vunpack.i.l.bf16 %v27623_v30 }
 0x5b8   : > { %11711 = vmatprep.mubr.f32.mxu0 %v23501_v6 }
 0x5ba   : > { %v23034_v0 = vpop.permute.xlu1 %23033  ;;  %v27630_v51 = vpop.permute.xlu0 %23028 }
 0x5bb   : > { %18855 = vmatmul.mubr.msk.f32.vlgmr.msra.gmra.mrb[40].mxu0 %vm11319_vm13, %v27521_v20  ;;  %v23036_v5 = vunpack.i.h.bf16 %v23034_v0  ;;  %v23035_v33 = vunpack.i.l.bf16 %v23034_v0  ;;  %v23031_v27 = vunpack.i.h.bf16 %v27630_v51  ;;  %v23030_v34 = vunpack.i.l.bf16 %v27630_v51 }
 0x5bc   : > { %21797 = vmatpush1.bf16.msra.mxu0 %v21796_v1  ;;  %11717 = vmatprep.mubr.f32.mxu0 %v23501_v6 }
 0x5bd   : > { %21799 = vmatprep.subr.bf16.mxu0 %v27634_v19  ;;  %v11313_v43 = vsel %vm11312_vm1, %v23035_v33, %v23036_v5 }
 0x5be   : > { %v23039_v37 = vpop.permute.xlu0 %23038  ;;  %v23044_v49 = vpop.permute.xlu1 %23043 }
 0x5bf   : > { %v23041_v39 = vunpack.i.h.bf16 %v23039_v37  ;;  %v23040_v14 = vunpack.i.l.bf16 %v23039_v37  ;;  %18856 = vmatmul.mubr.msk.f32.gmra.mrb[42].mxu0 %vm11319_vm13, %v27529_v8  ;;  %v18859_v8 = vld [vmem:[%s30017_s22 + $0x40] sm:$0xff]  ;;  %v23046_v31 = vunpack.i.h.bf16 %v23044_v49  ;;  %v23045_v51 = vunpack.i.l.bf16 %v23044_v49  ;;  %v18908_v37 = vld [vmem:[%s30017_s22 + $0xc8] sm:$0xff]  ;;  %v13023_v49 = vld [vmem:[%s29986_s12 + $0xf8] sm:$0xff] }
 0x5c0   : > { %11723 = vmatprep.mubr.f32.mxu0 %v23501_v6 }
 0x5c1   : > { %v11314_v20 = vsel %vm11312_vm1, %v23040_v14, %v23041_v39  ;;  %v21778_v50 = vpack.c.bf16 %v23041_v39, %v23036_v5  ;;  %v12781_v5 = vsel %vm12780_vm8, %v23045_v51, %v23046_v31  ;;  %v18909_v39 = vld [vmem:[%s30017_s22 + $0xd0] sm:$0xff]  ;;  %v18910_v14 = vld [vmem:[%s30017_s22 + $0xd8] sm:$0xff] }
 0x5c2   : > { %v21780_v62 = vpack.c.bf16 %v11314_v20, %v11313_v43 }
 0x5c3   : > { %21779 = vmatprep.subr.bf16.mxu1 %v21778_v50  ;;  %18857 = vmatmul.mubr.msk.f32.gmra.mrb[44].mxu0 %vm11319_vm13, %v27537_v10  ;;  %v11876_v10 = vsel %vm11875_vm2, %v22995_v45, %v22996_v26 }
 0x5c4   : > { %21781 = vmatpush1.bf16.msra.mxu1 %v21780_v62  ;;  %11729 = vmatprep.mubr.f32.mxu0 %v23501_v6  ;;  %v27654_v16 = vpack.c.bf16 %v11877_v41, %v11876_v10  ;;  %v12993_v10 = vld [vmem:[%s29986_s12 + $0x8] sm:$0xff] }
 0x5c7   : > { %18858 = vmatmul.mubr.msk.f32.gmra.mrb[46].mxu0 %vm11319_vm13, %v27545_v24  ;;  %18843 = vmatmul.mubr.msk.f32.vlgmr.msra.gmra.mrb[24].mxu1 %vm11319_vm13, %v27591_v25  ;;  %v18860_v24 = vld [vmem:[%s30017_s22 + $0x48] sm:$0xff]  ;;  %v23020_v25 = vunpack.i.l.bf16 %v27625_v18  ;;  %v18898_v18 = vld [vmem:[%s30017_s22 + $0xb8] sm:$0xff] }
 0x5c8   : > { %11832 = vmatprep.mubr.f32.mxu0 %v23501_v6  ;;  %11402 = vmatprep.mubr.f32.mxu1 %v23501_v6 }
 0x5c9   : > { %v12330_v42 = vsel %vm12328_vm6, %v23020_v25, %v23021_v21 }
 0x5cb   : > { %18863 = vmatmul.mubr.msk.f32.vlgmr.msra.gmra.mrb[32].mxu0 %vm11319_vm13, %v18859_v8  ;;  %18844 = vmatmul.mubr.msk.f32.gmra.mrb[26].mxu1 %vm11319_vm13, %v18840_v11  ;;  %v23026_v11 = vunpack.i.h.bf16 %v27623_v30  ;;  %v23049_v30 = vpop.permute.xlu0 %23048 }
 0x5cc   : > { %21801 = vmatpush1.bf16.msra.mxu0 %v27654_v16  ;;  %11838 = vmatprep.mubr.f32.mxu0 %v23501_v6  ;;  %v23051_v12 = vunpack.i.h.bf16 %v23049_v30  ;;  %v23050_v0 = vunpack.i.l.bf16 %v23049_v30  ;;  %v13018_v30 = vld [vmem:[%s29986_s12 + $0xd0] sm:$0xff] }
 0x5cd   : > { %21803 = vmatprep.subr.bf16.mxu0 %v27593_v23  ;;  %11408 = vmatprep.mubr.f32.mxu1 %v23501_v6  ;;  %v21822_v55 = vpack.c.bf16 %v23031_v27, %v23026_v11  ;;  %v12555_v54 = vsel %vm12554_vm7, %v23025_v38, %v23026_v11  ;;  %v13015_v11 = vld [vmem:[%s29986_s12 + $0xb8] sm:$0xff]  ;;  %v13012_v38 = vld [vmem:[%s29986_s12 + $0xa0] sm:$0xff] }
 0x5ce   : > { %v21830_v26 = vpack.c.bf16 %v23051_v12, %v23046_v31  ;;  %v12782_v1 = vsel %vm12780_vm8, %v23050_v0, %v23051_v12  ;;  %v13022_v0 = vld [vmem:[%s29986_s12 + $0xf0] sm:$0xff] }
 0x5cf   : > { %18864 = vmatmul.mubr.msk.f32.gmra.mrb[34].mxu0 %vm11319_vm13, %v18860_v24  ;;  %18845 = vmatmul.mubr.msk.f32.gmra.mrb[28].mxu1 %vm11319_vm13, %v18841_v46  ;;  %v12556_v46 = vsel %vm12554_vm7, %v23030_v34, %v23031_v27  ;;  %v21832_v33 = vpack.c.bf16 %v12782_v1, %v12781_v5  ;;  %v13013_v27 = vld [vmem:[%s29986_s12 + $0xa8] sm:$0xff] }
 0x5d0   : > { %11844 = vmatprep.mubr.f32.mxu0 %v23501_v6  ;;  %11414 = vmatprep.mubr.f32.mxu1 %v23501_v6  ;;  %v21824_v44 = vpack.c.bf16 %v12556_v46, %v12555_v54  ;;  %v21854_v34 = vpack.c.bf16 %v13015_v11, %v13013_v27  ;;  %v13014_v46 = vld [vmem:[%s29986_s12 + $0xb0] sm:$0xff]  ;;  %v13019_v54 = vld [vmem:[%s29986_s12 + $0xd8] sm:$0xff]  ;;  %v13025_v1 = vld [vmem:[%s29986_s12 + $0x108] sm:$0x7] }
 0x5d3   : > { %18865 = vmatmul.mubr.msk.f32.gmra.mrb[36].mxu0 %vm11319_vm13, %v18861_v58  ;;  %18846 = vmatmul.mubr.msk.f32.gmra.mrb[30].mxu1 %vm11319_vm13, %v18842_v36  ;;  %v18896_v36 = vld [vmem:[%s30017_s22 + $0xa8] sm:$0xff]  ;;  %v12896_v59 = vpop.permute.xlu0 %12895 }
 0x5d4   : > { %11850 = vmatprep.mubr.f32.mxu0 %v23501_v6 }
 0x5d7   : > { %18866 = vmatmul.mubr.msk.f32.gmra.mrb[38].mxu0 %vm11319_vm13, %v18862_v9 }
 0x5d8   : > { %11946 = vmatprep.mubr.f32.mxu0 %v23501_v6 }
 0x5db   : > { %18867 = vmatmul.mubr.msk.f32.vlgmr.msra.gmra.mrb[40].mxu0 %vm11319_vm13, %v18859_v8 }
 0x5dc   : > { %21805 = vmatpush1.bf16.msra.mxu0 %v27597_v61  ;;  %11952 = vmatprep.mubr.f32.mxu0 %v23501_v6  ;;  %v18885_v61 = vld [vmem:[%s30017_s22 + $0x90] sm:$0xff] }
 0x5dd   : > { %21807 = vmatprep.subr.bf16.mxu0 %v27683_v35 }
 0x5df   : > { %18868 = vmatmul.mubr.msk.f32.gmra.mrb[42].mxu0 %vm11319_vm13, %v18860_v24  ;;  %v12992_v24 = vld [vmem:[%s29986_s12] sm:$0xff] }
 0x5e0   : > { %11958 = vmatprep.mubr.f32.mxu0 %v23501_v6 }
 0x5e3   : > { %18869 = vmatmul.mubr.msk.f32.gmra.mrb[44].mxu0 %vm11319_vm13, %v18861_v58 }
 0x5e4   : > { %11964 = vmatprep.mubr.f32.mxu0 %v23501_v6 }
 0x5e7   : > { %18870 = vmatmul.mubr.msk.f32.gmra.mrb[46].mxu0 %vm11319_vm13, %v18862_v9  ;;  %v12994_v9 = vld [vmem:[%s29986_s12 + $0x10] sm:$0xff] }
 0x5e8   : > { %12060 = vmatprep.mubr.f32.mxu0 %v23501_v6 }
 0x5eb   : > { %18875 = vmatmul.mubr.msk.f32.vlgmr.msra.gmra.mrb[32].mxu0 %vm11319_vm13, %v18871_v56 }
 0x5ec   : > { %21809 = vmatpush1.bf16.msra.mxu0 %v27701_v52  ;;  %12066 = vmatprep.mubr.f32.mxu0 %v23501_v6 }
 0x5ed   : > { %21811 = vmatprep.subr.bf16.mxu0 %v27582_v4  ;;  %v23016_v4 = vunpack.i.h.bf16 %v27614_v47  ;;  %v18895_v47 = vld [vmem:[%s30017_s22 + $0xa0] sm:$0xff] }
 0x5ef   : > { %18876 = vmatmul.mubr.msk.f32.gmra.mrb[34].mxu0 %vm11319_vm13, %v18872_v7  ;;  %v21814_v17 = vpack.c.bf16 %v23021_v21, %v23016_v4  ;;  %v12329_v23 = vsel %vm12328_vm6, %v23015_v28, %v23016_v4  ;;  %v13005_v21 = vld [vmem:[%s29986_s12 + $0x68] sm:$0xff]  ;;  %v13007_v4 = vld [vmem:[%s29986_s12 + $0x78] sm:$0xff]  ;;  %v13004_v28 = vld [vmem:[%s29986_s12 + $0x60] sm:$0xff] }
 0x5f0   : > { %12072 = vmatprep.mubr.f32.mxu0 %v23501_v6  ;;  %v21816_v32 = vpack.c.bf16 %v12330_v42, %v12329_v23  ;;  %v21846_v25 = vpack.c.bf16 %v13007_v4, %v13005_v21  ;;  %v13006_v42 = vld [vmem:[%s29986_s12 + $0x70] sm:$0xff]  ;;  %v13011_v23 = vld [vmem:[%s29986_s12 + $0x98] sm:$0xff] }
 0x5f3   : > { %18877 = vmatmul.mubr.msk.f32.gmra.mrb[36].mxu0 %vm11319_vm13, %v18873_v13 }
 0x5f4   : > { %12078 = vmatprep.mubr.f32.mxu0 %v23501_v6 }
 0x5f7   : > { %18878 = vmatmul.mubr.msk.f32.gmra.mrb[38].mxu0 %vm11319_vm13, %v18874_v48 }
 0x5f8   : > { %12173 = vmatprep.mubr.f32.mxu0 %v23501_v6 }
 0x5fb   : > { %18879 = vmatmul.mubr.msk.f32.vlgmr.msra.gmra.mrb[40].mxu0 %vm11319_vm13, %v18871_v56  ;;  %v13001_v56 = vld [vmem:[%s29986_s12 + $0x48] sm:$0xff] }
 0x5fc   : > { %21813 = vmatpush1.bf16.msra.mxu0 %v27584_v15  ;;  %12179 = vmatprep.mubr.f32.mxu0 %v23501_v6  ;;  %v18883_v15 = vld [vmem:[%s30017_s22 + $0x80] sm:$0xff] }
 0x5fd   : > { %21815 = vmatprep.subr.bf16.mxu0 %v21814_v17 }
 0x5ff   : > { %18880 = vmatmul.mubr.msk.f32.gmra.mrb[42].mxu0 %vm11319_vm13, %v18872_v7  ;;  %v21842_v7 = vpack.c.bf16 %v13003_v60, %v13001_v56 }
 0x600   : > { %12185 = vmatprep.mubr.f32.mxu0 %v23501_v6 }
 0x603   : > { %18881 = vmatmul.mubr.msk.f32.gmra.mrb[44].mxu0 %vm11319_vm13, %v18873_v13  ;;  %v13000_v13 = vld [vmem:[%s29986_s12 + $0x40] sm:$0xff] }
 0x604   : > { %12191 = vmatprep.mubr.f32.mxu0 %v23501_v6 }
 0x607   : > { %18882 = vmatmul.mubr.msk.f32.gmra.mrb[46].mxu0 %vm11319_vm13, %v18874_v48  ;;  %v13002_v48 = vld [vmem:[%s29986_s12 + $0x50] sm:$0xff] }
 0x608   : > { %12287 = vmatprep.mubr.f32.mxu0 %v23501_v6  ;;  %v21844_v17 = vpack.c.bf16 %v13002_v48, %v13000_v13 }
 0x60b   : > { %18887 = vmatmul.mubr.msk.f32.vlgmr.msra.gmra.mrb[32].mxu0 %vm11319_vm13, %v18883_v15 }
 0x60c   : > { %21817 = vmatpush1.bf16.msra.mxu0 %v21816_v32  ;;  %12293 = vmatprep.mubr.f32.mxu0 %v23501_v6  ;;  %v21848_v32 = vpack.c.bf16 %v13006_v42, %v13004_v28 }
 0x60d   : > { %21819 = vmatprep.subr.bf16.mxu0 %v27634_v19  ;;  %v18907_v19 = vld [vmem:[%s30017_s22 + $0xc0] sm:$0xff] }
 0x60f   : > { %18888 = vmatmul.mubr.msk.f32.gmra.mrb[34].mxu0 %vm11319_vm13, %v18884_v22 }
 0x610   : > { %12299 = vmatprep.mubr.f32.mxu0 %v23501_v6 }
 0x613   : > { %18889 = vmatmul.mubr.msk.f32.gmra.mrb[36].mxu0 %vm11319_vm13, %v18885_v61 }
 0x614   : > { %12305 = vmatprep.mubr.f32.mxu0 %v23501_v6 }
 0x617   : > { %18890 = vmatmul.mubr.msk.f32.gmra.mrb[38].mxu0 %vm11319_vm13, %v18886_v3 }
 0x618   : > { %12399 = vmatprep.mubr.f32.mxu0 %v23501_v6 }
 0x61b   : > { %18891 = vmatmul.mubr.msk.f32.vlgmr.msra.gmra.mrb[40].mxu0 %vm11319_vm13, %v18883_v15  ;;  %v13009_v15 = vld [vmem:[%s29986_s12 + $0x88] sm:$0xff] }
 0x61c   : > { %21821 = vmatpush1.bf16.msra.mxu0 %v27654_v16  ;;  %12405 = vmatprep.mubr.f32.mxu0 %v23501_v6  ;;  %v12995_v16 = vld [vmem:[%s29986_s12 + $0x18] sm:$0xff] }
 0x61d   : > { %21823 = vmatprep.subr.bf16.mxu0 %v21822_v55  ;;  %v21834_v58 = vpack.c.bf16 %v12995_v16, %v12993_v10 }
 0x61f   : > { %18892 = vmatmul.mubr.msk.f32.gmra.mrb[42].mxu0 %vm11319_vm13, %v18884_v22  ;;  %21835 = vmatprep.subr.bf16.mxu1 %v21834_v58  ;;  %v21850_v22 = vpack.c.bf16 %v13011_v23, %v13009_v15 }
 0x620   : > { %12411 = vmatprep.mubr.f32.mxu0 %v23501_v6 }
 0x623   : > { %18893 = vmatmul.mubr.msk.f32.gmra.mrb[44].mxu0 %vm11319_vm13, %v18885_v61  ;;  %v13008_v61 = vld [vmem:[%s29986_s12 + $0x80] sm:$0xff] }
 0x624   : > { %12417 = vmatprep.mubr.f32.mxu0 %v23501_v6 }
 0x627   : > { %18894 = vmatmul.mubr.msk.f32.gmra.mrb[46].mxu0 %vm11319_vm13, %v18886_v3  ;;  %v13010_v3 = vld [vmem:[%s29986_s12 + $0x90] sm:$0xff] }
 0x628   : > { %12513 = vmatprep.mubr.f32.mxu0 %v23501_v6  ;;  %v21852_v55 = vpack.c.bf16 %v13010_v3, %v13008_v61 }
 0x62b   : > { %18899 = vmatmul.mubr.msk.f32.vlgmr.msra.gmra.mrb[32].mxu0 %vm11319_vm13, %v18895_v47 }
 0x62c   : > { %21825 = vmatpush1.bf16.msra.mxu0 %v21824_v44  ;;  %12519 = vmatprep.mubr.f32.mxu0 %v23501_v6  ;;  %v21856_v44 = vpack.c.bf16 %v13014_v46, %v13012_v38 }
 0x62d   : > { %21827 = vmatprep.subr.bf16.mxu0 %v27683_v35  ;;  %v21836_v35 = vpack.c.bf16 %v12994_v9, %v12992_v24 }
 0x62f   : > { %18900 = vmatmul.mubr.msk.f32.gmra.mrb[34].mxu0 %vm11319_vm13, %v18896_v36  ;;  %21837 = vmatpush1.bf16.msra.mxu1 %v21836_v35 }
 0x630   : > { %12525 = vmatprep.mubr.f32.mxu0 %v23501_v6  ;;  %21839 = vmatprep.subr.bf16.mxu1 %v21838_v40 }
 0x633   : > { %18901 = vmatmul.mubr.msk.f32.gmra.mrb[36].mxu0 %vm11319_vm13, %v18897_v2 }
 0x634   : > { %12531 = vmatprep.mubr.f32.mxu0 %v23501_v6 }
 0x637   : > { %18902 = vmatmul.mubr.msk.f32.gmra.mrb[38].mxu0 %vm11319_vm13, %v18898_v18 }
 0x638   : > { %12625 = vmatprep.mubr.f32.mxu0 %v23501_v6 }
 0x63b   : > { %18903 = vmatmul.mubr.msk.f32.vlgmr.msra.gmra.mrb[40].mxu0 %vm11319_vm13, %v18895_v47  ;;  %v13017_v47 = vld [vmem:[%s29986_s12 + $0xc8] sm:$0xff] }
 0x63c   : > { %21829 = vmatpush1.bf16.msra.mxu0 %v27701_v52  ;;  %12631 = vmatprep.mubr.f32.mxu0 %v23501_v6  ;;  %v21840_v52 = vpack.c.bf16 %v12998_v63, %v12996_v53 }
 0x63d   : > { %21831 = vmatprep.subr.bf16.mxu0 %v21830_v26  ;;  %v13020_v26 = vld [vmem:[%s29986_s12 + $0xe0] sm:$0xff] }
 0x63e   : > { %21841 = vmatpush1.bf16.msra.mxu1 %v21840_v52  ;;  %v21864_v51 = vpack.c.bf16 %v13022_v0, %v13020_v26 }
 0x63f   : > { %18904 = vmatmul.mubr.msk.f32.gmra.mrb[42].mxu0 %vm11319_vm13, %v18896_v36  ;;  %21843 = vmatprep.subr.bf16.mxu1 %v21842_v7  ;;  %v21858_v36 = vpack.c.bf16 %v13019_v54, %v13017_v47 }
 0x640   : > { %12637 = vmatprep.mubr.f32.mxu0 %v23501_v6 }
 0x642   : > { %21845 = vmatpush1.bf16.msra.mxu1 %v21844_v17 }
 0x643   : > { %18905 = vmatmul.mubr.msk.f32.gmra.mrb[44].mxu0 %vm11319_vm13, %v18897_v2  ;;  %21847 = vmatprep.subr.bf16.mxu1 %v21846_v25  ;;  %v13016_v2 = vld [vmem:[%s29986_s12 + $0xc0] sm:$0xff]  ;;  %v12906_v25 = vpop.permute.xlu0 %12905 }
 0x644   : > { %12643 = vmatprep.mubr.f32.mxu0 %v23501_v6  ;;  %v21860_v12 = vpack.c.bf16 %v13018_v30, %v13016_v2 }
 0x646   : > { %21849 = vmatpush1.bf16.msra.mxu1 %v21848_v32 }
 0x647   : > { %18906 = vmatmul.mubr.msk.f32.gmra.mrb[46].mxu0 %vm11319_vm13, %v18898_v18  ;;  %21851 = vmatprep.subr.bf16.mxu1 %v21850_v22  ;;  %v13021_v18 = vld [vmem:[%s29986_s12 + $0xe8] sm:$0xff] }
 0x648   : > { %12739 = vmatprep.mubr.f32.mxu0 %v23501_v6  ;;  %v21862_v31 = vpack.c.bf16 %v13023_v49, %v13021_v18 }
 0x64a   : > { %21853 = vmatpush1.bf16.msra.mxu1 %v21852_v55 }
 0x64b   : > { %18911 = vmatmul.mubr.msk.f32.vlgmr.msra.gmra.mrb[32].mxu0 %vm11319_vm13, %v18907_v19  ;;  %21855 = vmatprep.subr.bf16.mxu1 %v21854_v34 }
 0x64c   : > { %21833 = vmatpush1.bf16.msra.mxu0 %v21832_v33  ;;  %12745 = vmatprep.mubr.f32.mxu0 %v23501_v6 }
 0x64e   : > { %21857 = vmatpush1.bf16.msra.mxu1 %v21856_v44 }
 0x64f   : > { %18912 = vmatmul.mubr.msk.f32.gmra.mrb[34].mxu0 %vm11319_vm13, %v18908_v37  ;;  %21859 = vmatprep.subr.bf16.mxu1 %v21858_v36 }
 0x650   : > { %12751 = vmatprep.mubr.f32.mxu0 %v23501_v6 }
 0x652   : > { %21861 = vmatpush1.bf16.msra.mxu1 %v21860_v12 }
 0x653   : > { %18913 = vmatmul.mubr.msk.f32.gmra.mrb[36].mxu0 %vm11319_vm13, %v18909_v39  ;;  %21863 = vmatprep.subr.bf16.mxu1 %v21862_v31 }
 0x654   : > { %12757 = vmatprep.mubr.f32.mxu0 %v23501_v6 }
 0x656   : > { %21865 = vmatpush1.bf16.msra.mxu1 %v21864_v51 }
 0x657   : > { %18914 = vmatmul.mubr.msk.f32.gmra.mrb[38].mxu0 %vm11319_vm13, %v18910_v14  ;;  %18919 = vmatprep.subr.msk.mxu1 %vm13039_vm9, %v13025_v1 }
 0x658   : > { %12851 = vmatprep.mubr.f32.mxu0 %v23501_v6 }
 0x65b   : > { %18915 = vmatmul.mubr.msk.f32.vlgmr.msra.gmra.mrb[40].mxu0 %vm11319_vm13, %v18907_v19  ;;  %v13024_v19 = vld [vmem:[%s29986_s12 + $0x100] sm:$0x7] }
 0x65c   : > { %12857 = vmatprep.mubr.f32.mxu0 %v23501_v6  ;;  %18920 = vmatpush1.msk.msra.mxu1 %vm13039_vm9, %v13024_v19 }
 0x65f   : > { %18916 = vmatmul.mubr.msk.f32.gmra.mrb[42].mxu0 %vm11319_vm13, %v18908_v37 }
 0x660   : > { %12863 = vmatprep.mubr.f32.mxu0 %v23501_v6 }
 0x663   : > { %18917 = vmatmul.mubr.msk.f32.gmra.mrb[44].mxu0 %vm11319_vm13, %v18909_v39  ;;  %v12891_v39 = vpop.permute.xlu1 %12890 }
 0x664   : > { %12869 = vmatprep.mubr.f32.mxu0 %v23501_v6 }
 0x667   : > { %18918 = vmatmul.mubr.msk.f32.gmra.mrb[46].mxu0 %vm11319_vm13, %v18910_v14  ;;  %v12901_v52 = vpop.permute.xlu1 %12900 }
 0x69a   : > { %v27826_v43 = vpop.f32.mrb[24].mxu1 }
 0x69b   : > { %v27828_v20 = vpop.f32.mrb[25].mxu1 }
 0x69e   : > { %v27830_v50 = vpop.f32.mrb[26].mxu1 }
 0x69f   : > { %v27832_v62 = vpop.f32.mrb[27].mxu1 }
 0x6a2   : > { %v27834_v29 = vpop.f32.mrb[28].mxu1 }
 0x6a3   : > { %v27836_v45 = vpop.f32.mrb[29].mxu1 }
 0x6a6   : > { %v27838_v41 = vpop.f32.mrb[30].mxu1 }
 0x6a7   : > { %v27840_v8 = vpop.f32.mrb[31].mxu1 }
 0x71e   : > { %v12741_v5 = vpop.f32.mrb[32].mxu0 }
 0x71f   : > { %v22270_v33 = vadd.f32 %v12741_v5, %v27826_v43  ;;  %v12743_v37 = vpop.f32.mrb[33].mxu0 }
 0x720   : > { %v22271_v14 = vadd.f32 %v12743_v37, %v27828_v20 }
 0x721   : > { %v12908_v10 = vadd.f32 %v22270_v33, %v12891_v39 }
 0x722   : > { %v12909_v16 = vadd.f32 %v22271_v14, %v12891_v39  ;;  %v12747_v24 = vpop.f32.mrb[34].mxu0 }
 0x723   : > { %v12916_v58 = vmax.f32 %v12908_v10, 0.0  ;;  %v22272_v9 = vadd.f32 %v12747_v24, %v27830_v50  ;;  %v12749_v57 = vpop.f32.mrb[35].mxu0 }
 0x724   : > { %v12917_v35 = vmax.f32 %v12909_v16, 0.0  ;;  %v22273_v40 = vadd.f32 %v12749_v57, %v27832_v62 }
 0x725   : > { %v12910_v53 = vadd.f32 %v22272_v9, %v12896_v59  ;;  %12956 = vrot.lane.b32.xlu1 %v12916_v58, %s30014_s25 }
 0x726   : > { %v12911_v63 = vadd.f32 %v22273_v40, %v12896_v59  ;;  %12958 = vrot.lane.b32.xlu0 %v12917_v35, %s30014_s25  ;;  %v12753_v43 = vpop.f32.mrb[36].mxu0 }
 0x727   : > { %v12918_v56 = vmax.f32 %v12910_v53, 0.0  ;;  %v22274_v20 = vadd.f32 %v12753_v43, %v27834_v29  ;;  %v12755_v60 = vpop.f32.mrb[37].mxu0 }
 0x728   : > { %v12919_v7 = vmax.f32 %v12911_v63, 0.0  ;;  %v22275_v50 = vadd.f32 %v12755_v60, %v27836_v45 }
 0x729   : > { %v12912_v13 = vadd.f32 %v22274_v20, %v12901_v52  ;;  %12960 = vrot.lane.b32.xlu1 %v12918_v56, %s30014_s25 }
 0x72a   : > { %v12913_v48 = vadd.f32 %v22275_v50, %v12901_v52  ;;  %12962 = vrot.lane.b32.xlu0 %v12919_v7, %s30014_s25  ;;  %v12759_v62 = vpop.f32.mrb[38].mxu0 }
 0x72b   : > { %v12920_v21 = vmax.f32 %v12912_v13, 0.0  ;;  %v22276_v4 = vadd.f32 %v12759_v62, %v27838_v41  ;;  %v12761_v17 = vpop.f32.mrb[39].mxu0 }
 0x72c   : > { %v12921_v28 = vmax.f32 %v12913_v48, 0.0  ;;  %v22277_v29 = vadd.f32 %v12761_v17, %v27840_v8 }
 0x72d   : > { %v12914_v42 = vadd.f32 %v22276_v4, %v12906_v25  ;;  %12964 = vrot.lane.b32.xlu1 %v12920_v21, %s30014_s25 }
 0x72e   : > { %v12915_v15 = vadd.f32 %v22277_v29, %v12906_v25  ;;  %12966 = vrot.lane.b32.xlu0 %v12921_v28, %s30014_s25  ;;  %v12853_v45 = vpop.f32.mrb[40].mxu0 }
 0x72f   : > { %v12922_v23 = vmax.f32 %v12914_v42, 0.0  ;;  %v12924_v32 = vadd.f32 %v12891_v39, %v12853_v45  ;;  %v12855_v22 = vpop.f32.mrb[41].mxu0 }
 0x730   : > { %v12923_v61 = vmax.f32 %v12915_v15, 0.0  ;;  %v12925_v3 = vadd.f32 %v12891_v39, %v12855_v22 }
 0x731   : > { %v12932_v27 = vmax.f32 %v12924_v32, 0.0  ;;  %12968 = vrot.lane.b32.xlu1 %v12922_v23, %s30014_s25 }
 0x732   : > { %v12933_v41 = vmax.f32 %v12925_v3, 0.0  ;;  %v12859_v11 = vpop.f32.mrb[42].mxu0  ;;  %12970 = vrot.lane.b32.xlu0 %v12923_v61, %s30014_s25 }
 0x733   : > { %v12940_v8 = vmax.f32 %v12916_v58, %v12932_v27  ;;  %v12926_v55 = vadd.f32 %v12896_v59, %v12859_v11  ;;  %v12861_v34 = vpop.f32.mrb[43].mxu0  ;;  %v13948_v11 = vld [vmem:[%s29980_s6] sm:$0xff] }
 0x734   : > { %v12941_v38 = vmax.f32 %v12917_v35, %v12933_v41  ;;  %v12927_v46 = vadd.f32 %v12896_v59, %v12861_v34  ;;  %v13949_v34 = vld [vmem:[%s29980_s6 + $0x8] sm:$0xff] }
 0x735   : > { %v12934_v47 = vmax.f32 %v12926_v55, 0.0  ;;  %v13952_v55 = vld [vmem:[%s29980_s6 + $0x20] sm:$0xff] }
 0x736   : > { %v12935_v54 = vmax.f32 %v12927_v46, 0.0  ;;  %v12865_v44 = vpop.f32.mrb[44].mxu0  ;;  %v13951_v46 = vld [vmem:[%s29980_s6 + $0x18] sm:$0xff] }
 0x737   : > { %v12942_v36 = vmax.f32 %v12918_v56, %v12934_v47  ;;  %v12928_v2 = vadd.f32 %v12901_v52, %v12865_v44  ;;  %v12867_v30 = vpop.f32.mrb[45].mxu0  ;;  %v13953_v47 = vld [vmem:[%s29980_s6 + $0x28] sm:$0xff] }
 0x738   : > { %v12943_v18 = vmax.f32 %v12919_v7, %v12935_v54  ;;  %v12929_v49 = vadd.f32 %v12901_v52, %v12867_v30  ;;  %v13955_v54 = vld [vmem:[%s29980_s6 + $0x38] sm:$0xff] }
 0x739   : > { %v12936_v12 = vmax.f32 %v12928_v2, 0.0 }
 0x73a   : > { %v12937_v31 = vmax.f32 %v12929_v49, 0.0  ;;  %v12871_v26 = vpop.f32.mrb[46].mxu0 }
 0x73b   : > { %v12944_v0 = vmax.f32 %v12920_v21, %v12936_v12  ;;  %v12930_v51 = vadd.f32 %v12906_v25, %v12871_v26  ;;  %v12873_v1 = vpop.f32.mrb[47].mxu0 }
 0x73c   : > { %v12945_v19 = vmax.f32 %v12921_v28, %v12937_v31  ;;  %v12931_v5 = vadd.f32 %v12906_v25, %v12873_v1 }
 0x73d   : > { %v12938_v33 = vmax.f32 %v12930_v51, 0.0 }
 0x73e   : > { %v12939_v37 = vmax.f32 %v12931_v5, 0.0  ;;  %v28011_v5 = vld [vmem:[%s29979_s5 + $0x50] sm:$0xff] }
 0x73f   : > { %v12946_v39 = vmax.f32 %v12922_v23, %v12938_v33  ;;  %v27972_v23 = vld [vmem:[%s29979_s5 + $0x40] sm:$0xff] }
 0x740   : > { %v12947_v14 = vmax.f32 %v12923_v61, %v12939_v37 }
 0x797   : > { %v12957_v10 = vpop.permute.xlu1 %12956 }
 0x798   : > { %v12959_v16 = vpop.permute.xlu0 %12958 }
 0x799   : > { %v12972_v24 = vsel %vm4895_vm5, %v12957_v10, %v12959_v16  ;;  %v12985_v58 = vmax.f32 %v12941_v38, %v12959_v16  ;;  %v13954_v38 = vld [vmem:[%s29980_s6 + $0x30] sm:$0xff]  ;;  %v18929_v10 = vld [vmem:[%s29979_s5 + $0x60] sm:$0xff] }
 0x79a   : > { %v12984_v9 = vmax.f32 %v12940_v8, %v12972_v24  ;;  %v13950_v8 = vld [vmem:[%s29980_s6 + $0x10] sm:$0xff] }
 0x79b   : > { %v12961_v57 = vpop.permute.xlu1 %12960  ;;  %18921 = vmatprep.mubr.msk.f32.mxu1 %vm13026_vm10, %v12985_v58  ;;  %v18930_v58 = vld [vmem:[%s29979_s5 + $0x68] sm:$0xff] }
 0x79c   : > { %v12963_v59 = vpop.permute.xlu0 %12962  ;;  %13111 = vmatmul.mubr.f32.vlgmr.msra.gmra.mrb[32].mxu1 %v12984_v9 }
 0x79d   : > { %v12973_v35 = vsel %vm4895_vm5, %v12961_v57, %v12963_v59  ;;  %v12987_v40 = vmax.f32 %v12943_v18, %v12963_v59  ;;  %v18931_v57 = vld [vmem:[%s29979_s5 + $0x70] sm:$0xff] }
 0x79e   : > { %v12986_v53 = vmax.f32 %v12942_v36, %v12973_v35 }
 0x79f   : > { %v12965_v63 = vpop.permute.xlu1 %12964  ;;  %18922 = vmatprep.mubr.msk.f32.mxu1 %vm13026_vm10, %v12987_v40 }
 0x7a0   : > { %v12967_v43 = vpop.permute.xlu0 %12966  ;;  %13117 = vmatmul.mubr.f32.gmra.mrb[34].mxu1 %v12986_v53  ;;  %v18932_v53 = vld [vmem:[%s29979_s5 + $0x78] sm:$0xff] }
 0x7a1   : > { %v12974_v56 = vsel %vm4895_vm5, %v12965_v63, %v12967_v43  ;;  %v12989_v20 = vmax.f32 %v12945_v19, %v12967_v43  ;;  %v28006_v19 = vld [vmem:[%s29979_s5 + $0x48] sm:$0xff]  ;;  %v13135_v63 = vld [vmem:[%s29979_s5] sm:$0xff] }
 0x7a2   : > { %v12988_v60 = vmax.f32 %v12944_v0, %v12974_v56 }
 0x7a3   : > { %v12969_v52 = vpop.permute.xlu1 %12968  ;;  %18923 = vmatprep.mubr.msk.f32.mxu1 %vm13026_vm10, %v12989_v20 }
 0x7a4   : > { %13123 = vmatmul.mubr.f32.gmra.mrb[36].mxu1 %v12988_v60  ;;  %v12971_v7 = vpop.permute.xlu0 %12970  ;;  %v13136_v60 = vld [vmem:[%s29979_s5 + $0x8] sm:$0xff] }
 0x7a5   : > { %v12975_v50 = vsel %vm4895_vm5, %v12969_v52, %v12971_v7  ;;  %v12991_v13 = vmax.f32 %v12947_v14, %v12971_v7  ;;  %vm13446_vm5 = vcmask 236544   ;;  %v13137_v7 = vld [vmem:[%s29979_s5 + $0x10] sm:$0xff] }
 0x7a6   : > { %v12990_v48 = vmax.f32 %v12946_v39, %v12975_v50  ;;  %v18928_v39 = vld [vmem:[%s29979_s5 + $0x58] sm:$0xff] }
 0x7a7   : > { %18924 = vmatprep.mubr.msk.f32.mxu1 %vm13026_vm10, %v12991_v13 }
 0x7a8   : > { %13129 = vmatmul.mubr.f32.gmra.mrb[38].mxu1 %v12990_v48 }
 0x7a9   : > { %20153 = vmatprep.mubr.msk.f32.mxu1 %vm2561_vm4, %v27972_v23 }
 0x86f   : > { %v13112_v62 = vpop.f32.mrb[32].mxu1 }
 0x870   : > { %v13114_v21 = vpop.f32.mrb[33].mxu1 }
 0x871   : > { %v23062_v4 = vpack.i.bf16 %v13114_v21, %v13112_v62  ;;  %v13138_v21 = vld [vmem:[%s29979_s5 + $0x18] sm:$0xff] }
 0x873   : > { %v13118_v17 = vpop.f32.mrb[34].mxu1 }
 0x874   : > { %v13120_v25 = vpop.f32.mrb[35].mxu1  ;;  %v23052_v28 = vpack.i.bf16 %v13118_v17, %v13112_v62  ;;  %v21874_v29 = vpack.c.bf16 %v13118_v17, %v13112_v62 }
 0x875   : > { %v23067_v42 = vpack.i.bf16 %v13120_v25, %v13118_v17  ;;  %v13140_v25 = vld [vmem:[%s29979_s5 + $0x28] sm:$0xff] }
 0x876   : > { %23053 = vrot.lane.b32.xlu1 %v23052_v28, %s30018_s28 }
 0x877   : > { %v13124_v15 = vpop.f32.mrb[36].mxu1 }
 0x878   : > { %v13126_v45 = vpop.f32.mrb[37].mxu1 }
 0x879   : > { %v23072_v32 = vpack.i.bf16 %v13126_v45, %v13124_v15 }
 0x87a   : > { %23063 = vrot.lane.b32.xlu1 %v23062_v4, %s23519_s26  ;;  %v13139_v4 = vld [vmem:[%s29979_s5 + $0x20] sm:$0xff] }
 0x87b   : > { %v13130_v22 = vpop.f32.mrb[38].mxu1 }
 0x87c   : > { %v13132_v61 = vpop.f32.mrb[39].mxu1  ;;  %v23057_v3 = vpack.i.bf16 %v13130_v22, %v13124_v15  ;;  %v21878_v27 = vpack.c.bf16 %v13130_v22, %v13124_v15 }
 0x87d   : > { %v23077_v41 = vpack.i.bf16 %v13132_v61, %v13130_v22 }
 0x87e   : > { %23073 = vrot.lane.b32.xlu1 %v23072_v32, %s23519_s26  ;;  %23058 = vrot.lane.b32.xlu0 %v23057_v3, %s30018_s28 }
 0x882   : > { %23083 = vrot.lane.b32.xlu1 %v23052_v28, %s23520_s27  ;;  %23068 = vrot.lane.b32.xlu0 %v23067_v42, %s23519_s26  ;;  %v13142_v42 = vld [vmem:[%s29979_s5 + $0x38] sm:$0xff] }
 0x886   : > { %23093 = vrot.lane.b32.xlu1 %v23052_v28, %s30014_s25  ;;  %23078 = vrot.lane.b32.xlu0 %v23077_v41, %s23519_s26  ;;  %v13141_v28 = vld [vmem:[%s29979_s5 + $0x30] sm:$0xff]  ;;  %v18965_v41 = vld [vmem:[%s29979_s5 + $0x80] sm:$0xff]  ;;  %s23524_s26 = smov 124  }
 0x88a   : > { %13958 = vperm.xlu1 %22941, %v13948_v11   ;;  %23088 = vrot.lane.b32.xlu0 %v23057_v3, %s23520_s27 }
 0x88e   : > { %13968 = vperm.xlu1 %22941, %v13950_v8   ;;  %23098 = vrot.lane.b32.xlu0 %v23057_v3, %s30014_s25 }
 0x892   : > { %13978 = vperm.xlu1 %22941, %v13952_v55   ;;  %13963 = vperm.xlu0 %22940, %v13949_v34   ;;  %v18966_v55 = vld [vmem:[%s29979_s5 + $0x88] sm:$0xff]  ;;  %v18967_v34 = vld [vmem:[%s29979_s5 + $0x90] sm:$0xff] }
 0x896   : > { %13988 = vperm.xlu1 %22941, %v13954_v38   ;;  %13973 = vperm.xlu0 %22940, %v13951_v46   ;;  %v18968_v46 = vld [vmem:[%s29979_s5 + $0x98] sm:$0xff] }
 0x89a   : > { %13983 = vperm.xlu0 %22940, %v13953_v47   ;;  %v18969_v47 = vld [vmem:[%s29979_s5 + $0xa0] sm:$0xff] }
 0x89e   : > { %13993 = vperm.xlu0 %22940, %v13955_v54   ;;  %v18970_v54 = vld [vmem:[%s29979_s5 + $0xa8] sm:$0xff] }
 0x8e8   : > { %v23054_v44 = vpop.permute.xlu1 %23053 }
 0x8e9   : > { %v23056_v36 = vunpack.i.h.bf16 %v23054_v44  ;;  %v23055_v2 = vunpack.i.l.bf16 %v23054_v44  ;;  %v18971_v44 = vld [vmem:[%s29979_s5 + $0xb0] sm:$0xff] }
 0x8eb   : > { %v21866_v30 = vpack.c.bf16 %v23056_v36, %v23055_v2  ;;  %v18972_v36 = vld [vmem:[%s29979_s5 + $0xb8] sm:$0xff]  ;;  %v14076_v2 = vld [vmem:[%s29987_s13] sm:$0xff] }
 0x8ec   : > { %v23064_v0 = vpop.permute.xlu1 %23063 }
 0x8ed   : > { %21867 = vmatprep.subr.bf16.mxu1 %v21866_v30  ;;  %v23066_v33 = vunpack.i.h.bf16 %v23064_v0  ;;  %v23065_v37 = vunpack.i.l.bf16 %v23064_v0 }
 0x8ee   : > { %21869 = vmatpush3.bf16.msra.mxu1 %v21866_v30  ;;  %v14077_v30 = vld [vmem:[%s29987_s13 + $0x8] sm:$0xff] }
 0x8ef   : > { %v13447_v16 = vsel %vm13446_vm5, %v23065_v37, %v23066_v33 }
 0x8f0   : > { %v23059_v18 = vpop.permute.xlu0 %23058  ;;  %v23074_v59 = vpop.permute.xlu1 %23073 }
 0x8f1   : > { %v23061_v49 = vunpack.i.h.bf16 %v23059_v18  ;;  %v23060_v12 = vunpack.i.l.bf16 %v23059_v18  ;;  %v23076_v43 = vunpack.i.h.bf16 %v23074_v59  ;;  %v23075_v56 = vunpack.i.l.bf16 %v23074_v59 }
 0x8f2   : > { %v21914_v18 = vpack.c.bf16 %v14077_v30, %v14076_v2 }
 0x8f3   : > { %v21870_v31 = vpack.c.bf16 %v23061_v49, %v23060_v12  ;;  %v13449_v50 = vsel %vm13446_vm5, %v23075_v56, %v23076_v43  ;;  %v14078_v49 = vld [vmem:[%s29987_s13 + $0x10] sm:$0xff]  ;;  %v14079_v12 = vld [vmem:[%s29987_s13 + $0x18] sm:$0xff] }
 0x8f4   : > { %v23069_v26 = vpop.permute.xlu0 %23068  ;;  %v23084_v20 = vpop.permute.xlu1 %23083  ;;  %21915 = vmatprep.subr.bf16.mxu0 %v21914_v18 }
 0x8f5   : > { %21871 = vmatprep.subr.bf16.mxu1 %v21870_v31  ;;  %v23071_v51 = vunpack.i.h.bf16 %v23069_v26  ;;  %v23070_v1 = vunpack.i.l.bf16 %v23069_v26  ;;  %v23086_v13 = vunpack.i.h.bf16 %v23084_v20  ;;  %v23085_v48 = vunpack.i.l.bf16 %v23084_v20  ;;  %21917 = vmatpush3.bf16.msra.mxu0 %v21914_v18 }
 0x8f6   : > { %21873 = vmatpush3.bf16.msra.mxu1 %v21870_v31  ;;  %v21918_v31 = vpack.c.bf16 %v14079_v12, %v14078_v49 }
 0x8f7   : > { %21875 = vmatprep.subr.bf16.mxu1 %v21874_v29  ;;  %v13448_v14 = vsel %vm13446_vm5, %v23070_v1, %v23071_v51  ;;  %v21890_v17 = vpack.c.bf16 %v23086_v13, %v23085_v48 }
 0x8f8   : > { %v21882_v24 = vpack.c.bf16 %v13448_v14, %v13447_v16  ;;  %v23079_v9 = vpop.permute.xlu0 %23078  ;;  %21919 = vmatprep.subr.bf16.mxu0 %v21918_v31 }
 0x8f9   : > { %20154 = vmatmul.mubr.msk.f32.vlgmr.msra.gmra.mrb[40].mxu1 %vm2561_vm4, %v28006_v19  ;;  %v23081_v35 = vunpack.i.h.bf16 %v23079_v9  ;;  %v23080_v40 = vunpack.i.l.bf16 %v23079_v9  ;;  %21921 = vmatpush3.bf16.msra.mxu0 %v21918_v31 }
 0x8fa   : > { %21877 = vmatpush3.bf16.msra.mxu1 %v21874_v29  ;;  %20156 = vmatprep.mubr.msk.f32.mxu1 %vm2561_vm4, %v28011_v5 }
 0x8fb   : > { %21879 = vmatprep.subr.bf16.mxu1 %v21878_v27  ;;  %v13450_v52 = vsel %vm13446_vm5, %v23080_v40, %v23081_v35 }
 0x8fc   : > { %v21886_v62 = vpack.c.bf16 %v13450_v52, %v13449_v50  ;;  %v23089_v29 = vpop.permute.xlu0 %23088 }
 0x8fd   : > { %20157 = vmatmul.mubr.msk.f32.gmra.mrb[42].mxu1 %vm2561_vm4, %v18928_v39  ;;  %v23091_v15 = vunpack.i.h.bf16 %v23089_v29  ;;  %v23090_v45 = vunpack.i.l.bf16 %v23089_v29 }
 0x8fe   : > { %21881 = vmatpush3.bf16.msra.mxu1 %v21878_v27  ;;  %20159 = vmatprep.mubr.msk.f32.mxu1 %vm2561_vm4, %v18929_v10 }
 0x8ff   : > { %21883 = vmatprep.subr.bf16.mxu1 %v21882_v24  ;;  %v21894_v32 = vpack.c.bf16 %v23091_v15, %v23090_v45 }
 0x900   : > { %v23099_v27 = vpop.permute.xlu0 %23098 }
 0x901   : > { %20160 = vmatmul.mubr.msk.f32.gmra.mrb[44].mxu1 %vm2561_vm4, %v18930_v58  ;;  %v23101_v11 = vunpack.i.h.bf16 %v23099_v27  ;;  %v23100_v8 = vunpack.i.l.bf16 %v23099_v27 }
 0x902   : > { %20162 = vmatprep.mubr.msk.f32.mxu1 %vm2561_vm4, %v18931_v57 }
 0x903   : > { %v21910_v38 = vpack.c.bf16 %v23101_v11, %v23100_v8 }
 0x905   : > { %20163 = vmatmul.mubr.msk.f32.gmra.mrb[46].mxu1 %vm2561_vm4, %v18932_v53 }
 0x906   : > { %20173 = vmatprep.mubr.msk.f32.mxu1 %vm2561_vm4, %v13135_v63 }
 0x909   : > { %20174 = vmatmul.mubr.msk.f32.vlgmr.msra.gmra.mrb[40].mxu1 %vm2561_vm4, %v13136_v60 }
 0x90a   : > { %21885 = vmatpush3.bf16.msra.mxu1 %v21882_v24  ;;  %20176 = vmatprep.mubr.msk.f32.mxu1 %vm2561_vm4, %v13137_v7 }
 0x90b   : > { %21887 = vmatprep.subr.bf16.mxu1 %v21886_v62 }
 0x90d   : > { %20177 = vmatmul.mubr.msk.f32.gmra.mrb[42].mxu1 %vm2561_vm4, %v13138_v21 }
 0x90e   : > { %21889 = vmatpush3.bf16.msra.mxu1 %v21886_v62  ;;  %20179 = vmatprep.mubr.msk.f32.mxu1 %vm2561_vm4, %v13139_v4 }
 0x90f   : > { %21891 = vmatprep.subr.bf16.mxu1 %v21890_v17 }
 0x911   : > { %20180 = vmatmul.mubr.msk.f32.gmra.mrb[44].mxu1 %vm2561_vm4, %v13140_v25  ;;  %v13964_v26 = vpop.permute.xlu0 %13963 }
 0x912   : > { %20182 = vmatprep.mubr.msk.f32.mxu1 %vm2561_vm4, %v13141_v28 }
 0x915   : > { %20183 = vmatmul.mubr.msk.f32.gmra.mrb[46].mxu1 %vm2561_vm4, %v13142_v42  ;;  %v13974_v51 = vpop.permute.xlu0 %13973 }
 0x916   : > { %20193 = vmatprep.mubr.msk.f32.mxu1 %vm2561_vm4, %v27972_v23  ;;  %v23094_v23 = vpop.permute.xlu1 %23093 }
 0x917   : > { %v23096_v22 = vunpack.i.h.bf16 %v23094_v23  ;;  %v23095_v61 = vunpack.i.l.bf16 %v23094_v23 }
 0x919   : > { %20194 = vmatmul.mubr.msk.f32.vlgmr.msra.gmra.mrb[48].mxu1 %vm2561_vm4, %v28006_v19  ;;  %v21906_v3 = vpack.c.bf16 %v23096_v22, %v23095_v61 }
 0x91a   : > { %21893 = vmatpush3.bf16.msra.mxu1 %v21890_v17  ;;  %20196 = vmatprep.mubr.msk.f32.mxu1 %vm2561_vm4, %v28011_v5  ;;  %v13959_v0 = vpop.permute.xlu1 %13958 }
 0x91b   : > { %21895 = vmatprep.subr.bf16.mxu1 %v21894_v32 }
 0x91d   : > { %20197 = vmatmul.mubr.msk.f32.gmra.mrb[50].mxu1 %vm2561_vm4, %v18928_v39 }
 0x91e   : > { %21897 = vmatpush3.bf16.msra.mxu1 %v21894_v32  ;;  %20199 = vmatprep.mubr.msk.f32.mxu1 %vm2561_vm4, %v18929_v10  ;;  %v13969_v19 = vpop.permute.xlu1 %13968 }
 0x91f   : > { %21899 = vmatprep.subr.bf16.mxu1 %v21890_v17 }
 0x921   : > { %20200 = vmatmul.mubr.msk.f32.gmra.mrb[52].mxu1 %vm2561_vm4, %v18930_v58  ;;  %v13984_v58 = vpop.permute.xlu0 %13983 }
 0x922   : > { %20202 = vmatprep.mubr.msk.f32.mxu1 %vm2561_vm4, %v18931_v57  ;;  %v13979_v57 = vpop.permute.xlu1 %13978 }
 0x925   : > { %20203 = vmatmul.mubr.msk.f32.gmra.mrb[54].mxu1 %vm2561_vm4, %v18932_v53  ;;  %v13994_v20 = vpop.permute.xlu0 %13993 }
 0x926   : > { %20213 = vmatprep.mubr.msk.f32.mxu1 %vm2561_vm4, %v13135_v63 }
 0x929   : > { %20214 = vmatmul.mubr.msk.f32.vlgmr.msra.gmra.mrb[48].mxu1 %vm2561_vm4, %v13136_v60 }
 0x92a   : > { %21901 = vmatpush3.bf16.msra.mxu1 %v21890_v17  ;;  %20216 = vmatprep.mubr.msk.f32.mxu1 %vm2561_vm4, %v13137_v7  ;;  %v13989_v7 = vpop.permute.xlu1 %13988 }
 0x92b   : > { %21903 = vmatprep.subr.bf16.mxu1 %v21894_v32 }
 0x92d   : > { %20217 = vmatmul.mubr.msk.f32.gmra.mrb[50].mxu1 %vm2561_vm4, %v13138_v21 }
 0x92e   : > { %21905 = vmatpush3.bf16.msra.mxu1 %v21894_v32  ;;  %20219 = vmatprep.mubr.msk.f32.mxu1 %vm2561_vm4, %v13139_v4 }
 0x92f   : > { %21907 = vmatprep.subr.bf16.mxu1 %v21906_v3 }
 0x931   : > { %20220 = vmatmul.mubr.msk.f32.gmra.mrb[52].mxu1 %vm2561_vm4, %v13140_v25 }
 0x932   : > { %20222 = vmatprep.mubr.msk.f32.mxu1 %vm2561_vm4, %v13141_v28 }
 0x935   : > { %20223 = vmatmul.mubr.msk.f32.gmra.mrb[54].mxu1 %vm2561_vm4, %v13142_v42 }
 0x936   : > { %20233 = vmatprep.mubr.msk.f32.mxu1 %vm2561_vm4, %v18965_v41 }
 0x939   : > { %20234 = vmatmul.mubr.msk.f32.vlgmr.msra.gmra.mrb[40].mxu1 %vm2561_vm4, %v18966_v55 }
 0x93a   : > { %21909 = vmatpush3.bf16.msra.mxu1 %v21906_v3  ;;  %20236 = vmatprep.mubr.msk.f32.mxu1 %vm2561_vm4, %v18967_v34 }
 0x93b   : > { %21911 = vmatprep.subr.bf16.mxu1 %v21910_v38 }
 0x93d   : > { %20237 = vmatmul.mubr.msk.f32.gmra.mrb[42].mxu1 %vm2561_vm4, %v18968_v46 }
 0x93e   : > { %21913 = vmatpush3.bf16.msra.mxu1 %v21910_v38  ;;  %20239 = vmatprep.mubr.msk.f32.mxu1 %vm2561_vm4, %v18969_v47 }
 0x941   : > { %20240 = vmatmul.mubr.msk.f32.gmra.mrb[44].mxu1 %vm2561_vm4, %v18970_v54 }
 0x942   : > { %20242 = vmatprep.mubr.msk.f32.mxu1 %vm2561_vm4, %v18971_v44 }
 0x945   : > { %20243 = vmatmul.mubr.msk.f32.gmra.mrb[46].mxu1 %vm2561_vm4, %v18972_v36 }
 0x946   : > { %20253 = vmatprep.mubr.msk.f32.mxu1 %vm2561_vm4, %v18965_v41 }
 0x949   : > { %20254 = vmatmul.mubr.msk.f32.vlgmr.msra.gmra.mrb[48].mxu1 %vm2561_vm4, %v18966_v55 }
 0x94a   : > { %20256 = vmatprep.mubr.msk.f32.mxu1 %vm2561_vm4, %v18967_v34 }
 0x94d   : > { %20257 = vmatmul.mubr.msk.f32.gmra.mrb[50].mxu1 %vm2561_vm4, %v18968_v46 }
 0x94e   : > { %20259 = vmatprep.mubr.msk.f32.mxu1 %vm2561_vm4, %v18969_v47 }
 0x951   : > { %20260 = vmatmul.mubr.msk.f32.gmra.mrb[52].mxu1 %vm2561_vm4, %v18970_v54 }
 0x952   : > { %20262 = vmatprep.mubr.msk.f32.mxu1 %vm2561_vm4, %v18971_v44 }
 0x955   : > { %20263 = vmatmul.mubr.msk.f32.gmra.mrb[54].mxu1 %vm2561_vm4, %v18972_v36 }
 0xa0c   : > { %v20235_v1 = vpop.f32.mrb[40].mxu1 }
 0xa0d   : > { %v13997_v5 = vadd.f32 %v20235_v1, %v13964_v26  ;;  %v13776_v33 = vpop.f32.mrb[41].mxu1 }
 0xa0e   : > { %v13996_v37 = vadd.f32 %v13959_v0, %v13776_v33 }
 0xa0f   : > { %v14005_v39 = vmax.f32 %v13997_v5, 0.0 }
 0xa10   : > { %v14004_v14 = vmax.f32 %v13996_v37, 0.0  ;;  %v20238_v10 = vpop.f32.mrb[42].mxu1 }
 0xa11   : > { %v13999_v16 = vadd.f32 %v20238_v10, %v13974_v51  ;;  %14046 = vrot.lane.b32.xlu0 %v14005_v39, %s30014_s25  ;;  %v13786_v24 = vpop.f32.mrb[43].mxu1 }
 0xa12   : > { %v13998_v9 = vadd.f32 %v13969_v19, %v13786_v24  ;;  %14044 = vrot.lane.b32.xlu1 %v14004_v14, %s30014_s25 }
 0xa13   : > { %v14007_v59 = vmax.f32 %v13999_v16, 0.0 }
 0xa14   : > { %v14006_v35 = vmax.f32 %v13998_v9, 0.0  ;;  %v20241_v40 = vpop.f32.mrb[44].mxu1 }
 0xa15   : > { %v14001_v53 = vadd.f32 %v20241_v40, %v13984_v58  ;;  %14050 = vrot.lane.b32.xlu0 %v14007_v59, %s30014_s25  ;;  %v13796_v63 = vpop.f32.mrb[45].mxu1 }
 0xa16   : > { %v14000_v43 = vadd.f32 %v13979_v57, %v13796_v63  ;;  %14048 = vrot.lane.b32.xlu1 %v14006_v35, %s30014_s25 }
 0xa17   : > { %v14009_v56 = vmax.f32 %v14001_v53, 0.0 }
 0xa18   : > { %v14008_v60 = vmax.f32 %v14000_v43, 0.0  ;;  %v20244_v52 = vpop.f32.mrb[46].mxu1 }
 0xa19   : > { %v14003_v50 = vadd.f32 %v20244_v52, %v13994_v20  ;;  %14054 = vrot.lane.b32.xlu0 %v14009_v56, %s30014_s25  ;;  %v13806_v13 = vpop.f32.mrb[47].mxu1 }
 0xa1a   : > { %v14002_v48 = vadd.f32 %v13989_v7, %v13806_v13  ;;  %14052 = vrot.lane.b32.xlu1 %v14008_v60, %s30014_s25 }
 0xa1b   : > { %v14011_v62 = vmax.f32 %v14003_v50, 0.0  ;;  %v18997_v50 = vld [vmem:[%s29981_s7 + $0x80] sm:$0xff] }
 0xa1c   : > { %v14010_v21 = vmax.f32 %v14002_v48, 0.0  ;;  %v20255_v4 = vpop.f32.mrb[48].mxu1  ;;  %20301 = vmatprep.mubr.msk.f32.mxu1 %vm1408_vm3, %v18997_v50 }
 0xa1d   : > { %v14013_v17 = vadd.f32 %v20255_v4, %v13964_v26  ;;  %14058 = vrot.lane.b32.xlu0 %v14011_v62, %s30014_s25  ;;  %v13901_v25 = vpop.f32.mrb[49].mxu1 }
 0xa1e   : > { %v14012_v28 = vadd.f32 %v13959_v0, %v13901_v25  ;;  %14056 = vrot.lane.b32.xlu1 %v14010_v21, %s30014_s25  ;;  %v15409_v25 = vld [vmem:[%s29982_s8] sm:$0xff] }
 0xa1f   : > { %v14021_v29 = vmax.f32 %v14013_v17, 0.0 }
 0xa20   : > { %v14020_v42 = vmax.f32 %v14012_v28, 0.0  ;;  %v20258_v15 = vpop.f32.mrb[50].mxu1  ;;  %v15411_v28 = vld [vmem:[%s29982_s8 + $0x10] sm:$0xff] }
 0xa21   : > { %v14029_v45 = vmax.f32 %v14005_v39, %v14021_v29  ;;  %v14015_v32 = vadd.f32 %v20258_v15, %v13974_v51  ;;  %v13911_v23 = vpop.f32.mrb[51].mxu1  ;;  %v15410_v29 = vld [vmem:[%s29982_s8 + $0x8] sm:$0xff]  ;;  %v15412_v15 = vld [vmem:[%s29982_s8 + $0x18] sm:$0xff] }
 0xa22   : > { %v14028_v22 = vmax.f32 %v14004_v14, %v14020_v42  ;;  %v14014_v61 = vadd.f32 %v13969_v19, %v13911_v23  ;;  %v15413_v42 = vld [vmem:[%s29982_s8 + $0x20] sm:$0xff] }
 0xa23   : > { %v14023_v3 = vmax.f32 %v14015_v32, 0.0  ;;  %v15414_v32 = vld [vmem:[%s29982_s8 + $0x28] sm:$0xff]  ;;  %v15417_v23 = vld [vmem:[%s29982_s8 + $0x40] sm:$0xff] }
 0xa24   : > { %v14022_v27 = vmax.f32 %v14014_v61, 0.0  ;;  %v20261_v41 = vpop.f32.mrb[52].mxu1  ;;  %v15419_v61 = vld [vmem:[%s29982_s8 + $0x50] sm:$0xff] }
 0xa25   : > { %v14031_v11 = vmax.f32 %v14007_v59, %v14023_v3  ;;  %v14017_v8 = vadd.f32 %v20261_v41, %v13984_v58  ;;  %v13921_v55 = vpop.f32.mrb[53].mxu1  ;;  %v15418_v3 = vld [vmem:[%s29982_s8 + $0x48] sm:$0xff]  ;;  %v15420_v41 = vld [vmem:[%s29982_s8 + $0x58] sm:$0xff] }
 0xa26   : > { %v14030_v34 = vmax.f32 %v14006_v35, %v14022_v27  ;;  %v14016_v38 = vadd.f32 %v13979_v57, %v13921_v55  ;;  %v15421_v27 = vld [vmem:[%s29982_s8 + $0x60] sm:$0xff]  ;;  %v15424_v55 = vld [vmem:[%s29982_s8 + $0x78] sm:$0xff] }
 0xa27   : > { %v14025_v46 = vmax.f32 %v14017_v8, 0.0  ;;  %v15422_v8 = vld [vmem:[%s29982_s8 + $0x68] sm:$0xff] }
 0xa28   : > { %v14024_v47 = vmax.f32 %v14016_v38, 0.0  ;;  %v20264_v54 = vpop.f32.mrb[54].mxu1 }
 0xa29   : > { %v14033_v44 = vmax.f32 %v14009_v56, %v14025_v46  ;;  %v14019_v36 = vadd.f32 %v20264_v54, %v13994_v20  ;;  %v13931_v2 = vpop.f32.mrb[55].mxu1 }
 0xa2a   : > { %v14032_v30 = vmax.f32 %v14008_v60, %v14024_v47  ;;  %v14018_v18 = vadd.f32 %v13989_v7, %v13931_v2 }
 0xa2b   : > { %v14027_v49 = vmax.f32 %v14019_v36, 0.0 }
 0xa2c   : > { %v14026_v12 = vmax.f32 %v14018_v18, 0.0 }
 0xa2d   : > { %v14035_v31 = vmax.f32 %v14011_v62, %v14027_v49 }
 0xa2e   : > { %v14034_v26 = vmax.f32 %v14010_v21, %v14026_v12 }
 0xa83   : > { %v14047_v0 = vpop.permute.xlu0 %14046 }
 0xa84   : > { %v14045_v51 = vpop.permute.xlu1 %14044  ;;  %v14069_v19 = vmax.f32 %v14029_v45, %v14047_v0  ;;  %v15415_v45 = vld [vmem:[%s29982_s8 + $0x30] sm:$0xff] }
 0xa85   : > { %v14068_v1 = vmax.f32 %v14028_v22, %v14045_v51  ;;  %v15416_v22 = vld [vmem:[%s29982_s8 + $0x38] sm:$0xff] }
 0xa87   : > { %v14051_v5 = vpop.permute.xlu0 %14050  ;;  %20273 = vmatprep.mubr.msk.f32.mxu0 %vm2561_vm4, %v14068_v1 }
 0xa88   : > { %v14049_v33 = vpop.permute.xlu1 %14048  ;;  %20274 = vmatmul.mubr.msk.f32.vlgmr.msra.gmra.mrb[48].mxu0 %vm2561_vm4, %v14069_v19  ;;  %v14071_v39 = vmax.f32 %v14031_v11, %v14051_v5  ;;  %v15423_v11 = vld [vmem:[%s29982_s8 + $0x70] sm:$0xff] }
 0xa89   : > { %v14070_v37 = vmax.f32 %v14030_v34, %v14049_v33 }
 0xa8b   : > { %v14055_v14 = vpop.permute.xlu0 %14054  ;;  %20276 = vmatprep.mubr.msk.f32.mxu0 %vm2561_vm4, %v14070_v37 }
 0xa8c   : > { %v14053_v10 = vpop.permute.xlu1 %14052  ;;  %20277 = vmatmul.mubr.msk.f32.gmra.mrb[50].mxu0 %vm2561_vm4, %v14071_v39  ;;  %v14073_v24 = vmax.f32 %v14033_v44, %v14055_v14 }
 0xa8d   : > { %v14072_v16 = vmax.f32 %v14032_v30, %v14053_v10 }
 0xa8f   : > { %v14059_v58 = vpop.permute.xlu0 %14058  ;;  %20279 = vmatprep.mubr.msk.f32.mxu0 %vm2561_vm4, %v14072_v16 }
 0xa90   : > { %v14057_v9 = vpop.permute.xlu1 %14056  ;;  %20280 = vmatmul.mubr.msk.f32.gmra.mrb[52].mxu0 %vm2561_vm4, %v14073_v24  ;;  %v14075_v59 = vmax.f32 %v14035_v31, %v14059_v58  ;;  %v18998_v58 = vld [vmem:[%s29981_s7 + $0x88] sm:$0xff] }
 0xa91   : > { %v14074_v57 = vmax.f32 %v14034_v26, %v14057_v9 }
 0xa93   : > { %20282 = vmatprep.mubr.msk.f32.mxu0 %vm2561_vm4, %v14074_v57 }
 0xa94   : > { %20283 = vmatmul.mubr.msk.f32.gmra.mrb[54].mxu0 %vm2561_vm4, %v14075_v59  ;;  %vm15715_vm4 = vcmask 1046528  }
 0xa95   : > { %20381 = vmatprep.mubr.msk.f32.mxu0 %vm1408_vm3, %v18997_v50  ;;  %v19001_v50 = vld [vmem:[%s29981_s7 + $0xa0] sm:$0xff] }
 0xb5b   : > { %v20275_v35 = vpop.f32.mrb[48].mxu0 }
 0xb5c   : > { %v14170_v40 = vpop.f32.mrb[49].mxu0 }
 0xb5d   : > { %v23102_v53 = vpack.i.bf16 %v20275_v35, %v14170_v40  ;;  %v28160_v63 = vpack.c.bf16 %v20275_v35, %v14170_v40 }
 0xb5f   : > { %23103 = vrot.lane.b32.xlu1 %v23102_v53, %s23521_s2  ;;  %v20278_v43 = vpop.f32.mrb[50].mxu0 }
 0xb60   : > { %v14180_v56 = vpop.f32.mrb[51].mxu0 }
 0xb61   : > { %v23107_v20 = vpack.i.bf16 %v20278_v43, %v14180_v56  ;;  %v28162_v60 = vpack.c.bf16 %v20278_v43, %v14180_v56  ;;  %v18999_v43 = vld [vmem:[%s29981_s7 + $0x90] sm:$0xff]  ;;  %v19000_v56 = vld [vmem:[%s29981_s7 + $0x98] sm:$0xff] }
 0xb63   : > { %23108 = vrot.lane.b32.xlu0 %v23107_v20, %s23521_s2  ;;  %v20281_v52 = vpop.f32.mrb[52].mxu0 }
 0xb64   : > { %v14190_v7 = vpop.f32.mrb[53].mxu0 }
 0xb65   : > { %v23112_v13 = vpack.i.bf16 %v20281_v52, %v14190_v7  ;;  %v28168_v48 = vpack.c.bf16 %v20281_v52, %v14190_v7 }
 0xb67   : > { %23113 = vrot.lane.b32.xlu1 %v23112_v13, %s23521_s2  ;;  %v20284_v62 = vpop.f32.mrb[54].mxu0 }
 0xb68   : > { %v14200_v21 = vpop.f32.mrb[55].mxu0 }
 0xb69   : > { %v23117_v4 = vpack.i.bf16 %v20284_v62, %v14200_v21  ;;  %v28171_v17 = vpack.c.bf16 %v20284_v62, %v14200_v21 }
 0xb6b   : > { %23123 = vrot.lane.b32.xlu1 %v23102_v53, %s23522_s1  ;;  %23118 = vrot.lane.b32.xlu0 %v23117_v4, %s23521_s2 }
 0xb6f   : > { %23133 = vrot.lane.b32.xlu1 %v23112_v13, %s23522_s1  ;;  %23128 = vrot.lane.b32.xlu0 %v23107_v20, %s23522_s1 }
 0xb73   : > { %23148 = vrot.lane.b32.xlu1 %v23117_v4, %s23522_s1  ;;  %23138 = vrot.lane.b32.xlu0 %v23102_v53, %s30019_s3 }
 0xb77   : > { %23153 = vrot.lane.b32.xlu1 %v23112_v13, %s30019_s3  ;;  %23143 = vrot.lane.b32.xlu0 %v23107_v20, %s30019_s3 }
 0xb7b   : > { %23163 = vrot.lane.b32.xlu1 %v23102_v53, %s30014_s25  ;;  %23158 = vrot.lane.b32.xlu0 %v23117_v4, %s30019_s3  ;;  %s30020_s3 = smov 122  }
 0xb7f   : > { %23173 = vrot.lane.b32.xlu1 %v23112_v13, %s30014_s25  ;;  %23168 = vrot.lane.b32.xlu0 %v23107_v20, %s30014_s25  ;;  %v19002_v13 = vld [vmem:[%s29981_s7 + $0xa8] sm:$0xff] }
 0xb83   : > { %15427 = vperm.xlu1 %22941, %v15409_v25   ;;  %23178 = vrot.lane.b32.xlu0 %v23117_v4, %s30014_s25 }
 0xb87   : > { %15437 = vperm.xlu1 %22941, %v15411_v28   ;;  %15432 = vperm.xlu0 %22940, %v15410_v29   ;;  %v19004_v28 = vld [vmem:[%s29981_s7 + $0xb8] sm:$0xff] }
 0xb8b   : > { %15447 = vperm.xlu1 %22941, %v15413_v42   ;;  %15442 = vperm.xlu0 %22940, %v15412_v15  }
 0xb8f   : > { %15457 = vperm.xlu1 %22941, %v15415_v45   ;;  %15452 = vperm.xlu0 %22940, %v15414_v32   ;;  %v19006_v32 = vld [vmem:[%s29981_s7 + $0xc8] sm:$0xff] }
 0xb93   : > { %15467 = vperm.xlu1 %22941, %v15417_v23   ;;  %15462 = vperm.xlu0 %22940, %v15416_v22   ;;  %v19007_v23 = vld [vmem:[%s29981_s7 + $0xd0] sm:$0xff] }
 0xb97   : > { %15477 = vperm.xlu1 %22941, %v15419_v61   ;;  %15472 = vperm.xlu0 %22940, %v15418_v3  }
 0xb9b   : > { %15487 = vperm.xlu1 %22941, %v15421_v27   ;;  %15482 = vperm.xlu0 %22940, %v15420_v41   ;;  %v19008_v27 = vld [vmem:[%s29981_s7 + $0xd8] sm:$0xff]  ;;  %v19009_v41 = vld [vmem:[%s29981_s7 + $0xe0] sm:$0xff] }
 0xb9f   : > { %15497 = vperm.xlu1 %22941, %v15423_v11   ;;  %15492 = vperm.xlu0 %22940, %v15422_v8  }
 0xba3   : > { %15502 = vperm.xlu0 %22940, %v15424_v55  }
 0xbd1   : > { %v23104_v34 = vpop.permute.xlu1 %23103 }
 0xbd2   : > { %v23106_v38 = vunpack.i.h.bf16 %v23104_v34  ;;  %v23105_v46 = vunpack.i.l.bf16 %v23104_v34  ;;  %v19010_v34 = vld [vmem:[%s29981_s7 + $0xe8] sm:$0xff] }
 0xbd4   : > { %v21922_v47 = vpack.c.bf16 %v23106_v38, %v23105_v46  ;;  %v19011_v38 = vld [vmem:[%s29981_s7 + $0xf0] sm:$0xff] }
 0xbd5   : > { %v23109_v54 = vpop.permute.xlu0 %23108 }
 0xbd6   : > { %v23111_v44 = vunpack.i.h.bf16 %v23109_v54  ;;  %v23110_v36 = vunpack.i.l.bf16 %v23109_v54  ;;  %21923 = vmatprep.subr.bf16.mxu1 %v21922_v47  ;;  %v14209_v54 = vld [vmem:[%s29981_s7] sm:$0xff] }
 0xbd7   : > { %21925 = vmatpush3.bf16.msra.mxu1 %v21922_v47  ;;  %v19012_v47 = vld [vmem:[%s29981_s7 + $0xf8] sm:$0xff] }
 0xbd8   : > { %v21926_v2 = vpack.c.bf16 %v23111_v44, %v23110_v36  ;;  %v14210_v44 = vld [vmem:[%s29981_s7 + $0x8] sm:$0xff]  ;;  %v14211_v36 = vld [vmem:[%s29981_s7 + $0x10] sm:$0xff] }
 0xbd9   : > { %v23114_v30 = vpop.permute.xlu1 %23113 }
 0xbda   : > { %v23116_v18 = vunpack.i.h.bf16 %v23114_v30  ;;  %v23115_v49 = vunpack.i.l.bf16 %v23114_v30  ;;  %21927 = vmatprep.subr.bf16.mxu1 %v21926_v2  ;;  %v14213_v30 = vld [vmem:[%s29981_s7 + $0x20] sm:$0xff] }
 0xbdb   : > { %21929 = vmatpush3.bf16.msra.mxu1 %v21926_v2  ;;  %v14212_v2 = vld [vmem:[%s29981_s7 + $0x18] sm:$0xff] }
 0xbdc   : > { %v21930_v12 = vpack.c.bf16 %v23116_v18, %v23115_v49  ;;  %v14214_v49 = vld [vmem:[%s29981_s7 + $0x28] sm:$0xff] }
 0xbdd   : > { %v23124_v31 = vpop.permute.xlu1 %23123  ;;  %v23119_v26 = vpop.permute.xlu0 %23118 }
 0xbde   : > { %v23126_v0 = vunpack.i.h.bf16 %v23124_v31  ;;  %v23125_v51 = vunpack.i.l.bf16 %v23124_v31  ;;  %v23121_v1 = vunpack.i.h.bf16 %v23119_v26  ;;  %v23120_v19 = vunpack.i.l.bf16 %v23119_v26  ;;  %21931 = vmatprep.subr.bf16.mxu1 %v21930_v12 }
 0xbdf   : > { %21933 = vmatpush3.bf16.msra.mxu1 %v21930_v12  ;;  %v14215_v12 = vld [vmem:[%s29981_s7 + $0x30] sm:$0xff] }
 0xbe0   : > { %v21934_v5 = vpack.c.bf16 %v23121_v1, %v23120_v19  ;;  %v21954_v33 = vpack.c.bf16 %v23126_v0, %v23125_v51  ;;  %v14216_v51 = vld [vmem:[%s29981_s7 + $0x38] sm:$0xff]  ;;  %v14217_v1 = vld [vmem:[%s29981_s7 + $0x40] sm:$0xff] }
 0xbe1   : > { %v23134_v37 = vpop.permute.xlu1 %23133  ;;  %v23129_v39 = vpop.permute.xlu0 %23128 }
 0xbe2   : > { %v23136_v14 = vunpack.i.h.bf16 %v23134_v37  ;;  %v23135_v10 = vunpack.i.l.bf16 %v23134_v37  ;;  %v23131_v16 = vunpack.i.h.bf16 %v23129_v39  ;;  %v23130_v24 = vunpack.i.l.bf16 %v23129_v39  ;;  %21935 = vmatprep.subr.bf16.mxu1 %v21934_v5  ;;  %21955 = vmatprep.subr.bf16.mxu0 %v21954_v33  ;;  %v14218_v39 = vld [vmem:[%s29981_s7 + $0x48] sm:$0xff] }
 0xbe3   : > { %21937 = vmatpush3.bf16.msra.mxu1 %v21934_v5  ;;  %21957 = vmatpush3.bf16.msra.mxu0 %v21954_v33 }
 0xbe4   : > { %21939 = vmatprep.subr.bf16.mxu1 %v28160_v63  ;;  %v21958_v9 = vpack.c.bf16 %v23131_v16, %v23130_v24  ;;  %v21962_v53 = vpack.c.bf16 %v23136_v14, %v23135_v10  ;;  %v14219_v14 = vld [vmem:[%s29981_s7 + $0x50] sm:$0xff] }
 0xbe5   : > { %v23149_v57 = vpop.permute.xlu1 %23148  ;;  %v23139_v59 = vpop.permute.xlu0 %23138 }
 0xbe6   : > { %v23151_v35 = vunpack.i.h.bf16 %v23149_v57  ;;  %v23150_v40 = vunpack.i.l.bf16 %v23149_v57  ;;  %20302 = vmatmul.mubr.msk.f32.vlgmr.msra.gmra.mrb[56].mxu1 %vm1408_vm3, %v18998_v58  ;;  %21959 = vmatprep.subr.bf16.mxu0 %v21958_v9  ;;  %v23141_v20 = vunpack.i.h.bf16 %v23139_v59  ;;  %v23140_v52 = vunpack.i.l.bf16 %v23139_v59  ;;  %v14222_v59 = vld [vmem:[%s29981_s7 + $0x68] sm:$0xff] }
 0xbe7   : > { %21941 = vmatpush3.bf16.msra.mxu1 %v28160_v63  ;;  %21961 = vmatpush3.bf16.msra.mxu0 %v21958_v9  ;;  %v14221_v9 = vld [vmem:[%s29981_s7 + $0x60] sm:$0xff] }
 0xbe8   : > { %21943 = vmatprep.subr.bf16.mxu1 %v28162_v60  ;;  %21963 = vmatprep.subr.bf16.mxu0 %v21962_v53  ;;  %v21966_v7 = vpack.c.bf16 %v23151_v35, %v23150_v40  ;;  %v28253_v62 = vpack.c.bf16 %v23141_v20, %v23140_v52  ;;  %v14223_v35 = vld [vmem:[%s29981_s7 + $0x70] sm:$0xff]  ;;  %v14224_v40 = vld [vmem:[%s29981_s7 + $0x78] sm:$0xff]  ;;  %v19081_v52 = vld [vmem:[%s29981_s7 + $0x120] sm:$0xff] }
 0xbe9   : > { %20304 = vmatprep.mubr.msk.f32.mxu1 %vm1408_vm3, %v18999_v43  ;;  %v23144_v63 = vpop.permute.xlu0 %23143  ;;  %v23154_v25 = vpop.permute.xlu1 %23153  ;;  %v19080_v20 = vld [vmem:[%s29981_s7 + $0x118] sm:$0xff] }
 0xbea   : > { %20305 = vmatmul.mubr.msk.f32.gmra.mrb[58].mxu1 %vm1408_vm3, %v19000_v56  ;;  %v23146_v21 = vunpack.i.h.bf16 %v23144_v63  ;;  %v23145_v4 = vunpack.i.l.bf16 %v23144_v63  ;;  %v23156_v29 = vunpack.i.h.bf16 %v23154_v25  ;;  %v23155_v42 = vunpack.i.l.bf16 %v23154_v25  ;;  %v19084_v63 = vld [vmem:[%s29981_s7 + $0x138] sm:$0xff]  ;;  %v19090_v25 = vld [vmem:[%s29981_s7 + $0x168] sm:$0xff] }
 0xbeb   : > { %21945 = vmatpush3.bf16.msra.mxu1 %v28162_v60  ;;  %21965 = vmatpush3.bf16.msra.mxu0 %v21962_v53  ;;  %v19003_v60 = vld [vmem:[%s29981_s7 + $0xb0] sm:$0xff]  ;;  %v19077_v53 = vld [vmem:[%s29981_s7 + $0x100] sm:$0xff] }
 0xbec   : > { %21947 = vmatprep.subr.bf16.mxu1 %v28168_v48  ;;  %21967 = vmatprep.subr.bf16.mxu0 %v21966_v7  ;;  %v21974_v15 = vpack.c.bf16 %v23146_v21, %v23145_v4  ;;  %v21978_v22 = vpack.c.bf16 %v23156_v29, %v23155_v42  ;;  %v19087_v21 = vld [vmem:[%s29981_s7 + $0x150] sm:$0xff]  ;;  %v19088_v4 = vld [vmem:[%s29981_s7 + $0x158] sm:$0xff] }
 0xbed   : > { %20307 = vmatprep.mubr.msk.f32.mxu1 %vm1408_vm3, %v19001_v50  ;;  %v23159_v45 = vpop.permute.xlu0 %23158  ;;  %v23164_v3 = vpop.permute.xlu1 %23163  ;;  %v19092_v29 = vld [vmem:[%s29981_s7 + $0x178] sm:$0xff] }
 0xbee   : > { %20308 = vmatmul.mubr.msk.f32.gmra.mrb[60].mxu1 %vm1408_vm3, %v19002_v13  ;;  %v23161_v61 = vunpack.i.h.bf16 %v23159_v45  ;;  %v23166_v11 = vunpack.i.h.bf16 %v23164_v3  ;;  %v23165_v8 = vunpack.i.l.bf16 %v23164_v3 }
 0xbef   : > { %21949 = vmatpush3.bf16.msra.mxu1 %v28168_v48  ;;  %21969 = vmatpush3.bf16.msra.mxu0 %v21966_v7  ;;  %v19005_v48 = vld [vmem:[%s29981_s7 + $0xc0] sm:$0xff]  ;;  %v19082_v7 = vld [vmem:[%s29981_s7 + $0x128] sm:$0xff] }
 0xbf0   : > { %21951 = vmatprep.subr.bf16.mxu1 %v28171_v17  ;;  %21971 = vmatprep.subr.bf16.mxu0 %v28253_v62  ;;  %v22002_v46 = vpack.c.bf16 %v23166_v11, %v23165_v8 }
 0xbf1   : > { %20310 = vmatprep.mubr.msk.f32.mxu1 %vm1408_vm3, %v19003_v60  ;;  %v23169_v18 = vpop.permute.xlu0 %23168  ;;  %v23174_v0 = vpop.permute.xlu1 %23173 }
 0xbf2   : > { %20311 = vmatmul.mubr.msk.f32.gmra.mrb[62].mxu1 %vm1408_vm3, %v19004_v28  ;;  %20382 = vmatmul.mubr.msk.f32.vlgmr.msra.gmra.mrb[56].mxu0 %vm1408_vm3, %v18998_v58  ;;  %v23171_v31 = vunpack.i.h.bf16 %v23169_v18  ;;  %v23170_v26 = vunpack.i.l.bf16 %v23169_v18  ;;  %v23176_v19 = vunpack.i.h.bf16 %v23174_v0  ;;  %v23175_v5 = vunpack.i.l.bf16 %v23174_v0  ;;  %v14220_v58 = vld [vmem:[%s29981_s7 + $0x58] sm:$0xff] }
 0xbf3   : > { %21953 = vmatpush3.bf16.msra.mxu1 %v28171_v17  ;;  %21973 = vmatpush3.bf16.msra.mxu0 %v28253_v62  ;;  %v23160_v17 = vunpack.i.l.bf16 %v23159_v45 }
 0xbf4   : > { %21975 = vmatprep.subr.bf16.mxu0 %v21974_v15  ;;  %21987 = vmatprep.subr.bf16.mxu1 %v28253_v62  ;;  %v22006_v33 = vpack.c.bf16 %v23171_v31, %v23170_v26  ;;  %v22010_v24 = vpack.c.bf16 %v23176_v19, %v23175_v5 }
 0xbf5   : > { %20313 = vmatprep.mubr.msk.f32.mxu1 %vm1408_vm3, %v19005_v48  ;;  %20384 = vmatprep.mubr.msk.f32.mxu0 %vm1408_vm3, %v18999_v43  ;;  %v21982_v55 = vpack.c.bf16 %v23161_v61, %v23160_v17  ;;  %v23179_v37 = vpop.permute.xlu0 %23178  ;;  %v19078_v43 = vld [vmem:[%s29981_s7 + $0x108] sm:$0xff] }
 0xbf6   : > { %20314 = vmatmul.mubr.msk.f32.gmra.mrb[64].mxu1 %vm1408_vm3, %v19006_v32  ;;  %20385 = vmatmul.mubr.msk.f32.gmra.mrb[58].mxu0 %vm1408_vm3, %v19000_v56  ;;  %v23181_v10 = vunpack.i.h.bf16 %v23179_v37  ;;  %v23180_v16 = vunpack.i.l.bf16 %v23179_v37  ;;  %v19079_v56 = vld [vmem:[%s29981_s7 + $0x110] sm:$0xff] }
 0xbf7   : > { %21977 = vmatpush3.bf16.msra.mxu0 %v21974_v15  ;;  %20316 = vmatprep.mubr.msk.f32.mxu1 %vm1408_vm3, %v19007_v23 }
 0xbf8   : > { %21979 = vmatprep.subr.bf16.mxu0 %v21978_v22  ;;  %20387 = vmatprep.mubr.msk.f32.mxu0 %vm1408_vm3, %v19001_v50  ;;  %v22014_v57 = vpack.c.bf16 %v23181_v10, %v23180_v16  ;;  %v19083_v50 = vld [vmem:[%s29981_s7 + $0x130] sm:$0xff] }
 0xbfa   : > { %20317 = vmatmul.mubr.msk.f32.gmra.mrb[66].mxu1 %vm1408_vm3, %v19008_v27  ;;  %20388 = vmatmul.mubr.msk.f32.gmra.mrb[60].mxu0 %vm1408_vm3, %v19002_v13  ;;  %v19085_v13 = vld [vmem:[%s29981_s7 + $0x140] sm:$0xff] }
 0xbfb   : > { %21981 = vmatpush3.bf16.msra.mxu0 %v21978_v22  ;;  %20319 = vmatprep.mubr.msk.f32.mxu1 %vm1408_vm3, %v19009_v41 }
 0xbfc   : > { %21983 = vmatprep.subr.bf16.mxu0 %v21982_v55  ;;  %20390 = vmatprep.mubr.msk.f32.mxu0 %vm1408_vm3, %v19003_v60  ;;  %v19089_v60 = vld [vmem:[%s29981_s7 + $0x160] sm:$0xff] }
 0xbfe   : > { %20320 = vmatmul.mubr.msk.f32.gmra.mrb[68].mxu1 %vm1408_vm3, %v19010_v34  ;;  %20391 = vmatmul.mubr.msk.f32.gmra.mrb[62].mxu0 %vm1408_vm3, %v19004_v28  ;;  %v19091_v28 = vld [vmem:[%s29981_s7 + $0x170] sm:$0xff] }
 0xbff   : > { %21985 = vmatpush3.bf16.msra.mxu0 %v21982_v55  ;;  %20322 = vmatprep.mubr.msk.f32.mxu1 %vm1408_vm3, %v19011_v38 }
 0xc00   : > { %22003 = vmatprep.subr.bf16.mxu0 %v22002_v46  ;;  %20393 = vmatprep.mubr.msk.f32.mxu0 %vm1408_vm3, %v19005_v48 }
 0xc02   : > { %20323 = vmatmul.mubr.msk.f32.gmra.mrb[70].mxu1 %vm1408_vm3, %v19012_v47  ;;  %20394 = vmatmul.mubr.msk.f32.gmra.mrb[64].mxu0 %vm1408_vm3, %v19006_v32  ;;  %v15428_v42 = vpop.permute.xlu1 %15427 }
 0xc03   : > { %20341 = vmatprep.mubr.msk.f32.mxu1 %vm1408_vm3, %v14209_v54  ;;  %20396 = vmatprep.mubr.msk.f32.mxu0 %vm1408_vm3, %v19007_v23 }
 0xc06   : > { %20342 = vmatmul.mubr.msk.f32.vlgmr.msra.gmra.mrb[56].mxu1 %vm1408_vm3, %v14210_v44  ;;  %20397 = vmatmul.mubr.msk.f32.gmra.mrb[66].mxu0 %vm1408_vm3, %v19008_v27  ;;  %v15438_v48 = vpop.permute.xlu1 %15437 }
 0xc07   : > { %21989 = vmatpush3.bf16.msra.mxu1 %v28253_v62  ;;  %20344 = vmatprep.mubr.msk.f32.mxu1 %vm1408_vm3, %v14211_v36  ;;  %v19086_v62 = vld [vmem:[%s29981_s7 + $0x148] sm:$0xff] }
 0xc08   : > { %21991 = vmatprep.subr.bf16.mxu1 %v21974_v15  ;;  %20399 = vmatprep.mubr.msk.f32.mxu0 %vm1408_vm3, %v19009_v41 }
 0xc0a   : > { %20345 = vmatmul.mubr.msk.f32.gmra.mrb[58].mxu1 %vm1408_vm3, %v14212_v2  ;;  %20400 = vmatmul.mubr.msk.f32.gmra.mrb[68].mxu0 %vm1408_vm3, %v19010_v34  ;;  %v28478_v32 = vpop.permute.xlu1 %15447 }
 0xc0b   : > { %21993 = vmatpush3.bf16.msra.mxu1 %v21974_v15  ;;  %20347 = vmatprep.mubr.msk.f32.mxu1 %vm1408_vm3, %v14213_v30  ;;  %v15433_v15 = vpop.permute.xlu0 %15432 }
 0xc0c   : > { %21995 = vmatprep.subr.bf16.mxu1 %v21978_v22  ;;  %20402 = vmatprep.mubr.msk.f32.mxu0 %vm1408_vm3, %v19011_v38 }
 0xc0e   : > { %20348 = vmatmul.mubr.msk.f32.gmra.mrb[60].mxu1 %vm1408_vm3, %v14214_v49  ;;  %20403 = vmatmul.mubr.msk.f32.gmra.mrb[70].mxu0 %vm1408_vm3, %v19012_v47  ;;  %v28485_v61 = vpop.permute.xlu1 %15457 }
 0xc0f   : > { %21997 = vmatpush3.bf16.msra.mxu1 %v21978_v22  ;;  %20350 = vmatprep.mubr.msk.f32.mxu1 %vm1408_vm3, %v14215_v12  ;;  %v15443_v45 = vpop.permute.xlu0 %15442  ;;  %v15665_v22 = vld [vmem:[%s29988_s14] sm:$0x7f] }
 0xc10   : > { %21999 = vmatprep.subr.bf16.mxu1 %v21982_v55  ;;  %20421 = vmatprep.mubr.msk.f32.mxu0 %vm1408_vm3, %v14209_v54 }
 0xc12   : > { %20351 = vmatmul.mubr.msk.f32.gmra.mrb[62].mxu1 %vm1408_vm3, %v14216_v51  ;;  %20422 = vmatmul.mubr.msk.f32.vlgmr.msra.gmra.mrb[56].mxu0 %vm1408_vm3, %v14210_v44 }
 0xc13   : > { %22001 = vmatpush3.bf16.msra.mxu1 %v21982_v55  ;;  %22005 = vmatpush3.bf16.msra.mxu0 %v22002_v46  ;;  %v28480_v23 = vpop.permute.xlu0 %15452  ;;  %v28489_v55 = vpop.permute.xlu1 %15467 }
 0xc14   : > { %22007 = vmatprep.subr.bf16.mxu0 %v22006_v33  ;;  %20353 = vmatprep.mubr.msk.f32.mxu1 %vm1408_vm3, %v14217_v1 }
 0xc15   : > { %20424 = vmatprep.mubr.msk.f32.mxu0 %vm1408_vm3, %v14211_v36  ;;  %20525 = vmatprep.subr.msk.mxu1 %vm15715_vm4, %v15665_v22 }
 0xc16   : > { %20354 = vmatmul.mubr.msk.f32.gmra.mrb[64].mxu1 %vm1408_vm3, %v14218_v39  ;;  %20425 = vmatmul.mubr.msk.f32.gmra.mrb[58].mxu0 %vm1408_vm3, %v14212_v2 }
 0xc17   : > { %22009 = vmatpush3.bf16.msra.mxu0 %v22006_v33  ;;  %20356 = vmatprep.mubr.msk.f32.mxu1 %vm1408_vm3, %v14219_v14  ;;  %v28487_v17 = vpop.permute.xlu0 %15462  ;;  %v28503_v31 = vpop.permute.xlu1 %15477 }
 0xc18   : > { %22011 = vmatprep.subr.bf16.mxu0 %v22010_v24  ;;  %20427 = vmatprep.mubr.msk.f32.mxu0 %vm1408_vm3, %v14213_v30 }
 0xc1a   : > { %20357 = vmatmul.mubr.msk.f32.gmra.mrb[66].mxu1 %vm1408_vm3, %v14220_v58  ;;  %20428 = vmatmul.mubr.msk.f32.gmra.mrb[60].mxu0 %vm1408_vm3, %v14214_v49 }
 0xc1b   : > { %22013 = vmatpush3.bf16.msra.mxu0 %v22010_v24  ;;  %20359 = vmatprep.mubr.msk.f32.mxu1 %vm1408_vm3, %v14221_v9  ;;  %v28491_v46 = vpop.permute.xlu0 %15472 }
 0xc1c   : > { %22015 = vmatprep.subr.bf16.mxu0 %v22014_v57  ;;  %20430 = vmatprep.mubr.msk.f32.mxu0 %vm1408_vm3, %v14215_v12 }
 0xc1e   : > { %20360 = vmatmul.mubr.msk.f32.gmra.mrb[68].mxu1 %vm1408_vm3, %v14222_v59  ;;  %20431 = vmatmul.mubr.msk.f32.gmra.mrb[62].mxu0 %vm1408_vm3, %v14216_v51 }
 0xc1f   : > { %22017 = vmatpush3.bf16.msra.mxu0 %v22014_v57  ;;  %20362 = vmatprep.mubr.msk.f32.mxu1 %vm1408_vm3, %v14223_v35  ;;  %v28505_v26 = vpop.permute.xlu0 %15482 }
 0xc20   : > { %20433 = vmatprep.mubr.msk.f32.mxu0 %vm1408_vm3, %v14217_v1 }
 0xc22   : > { %20363 = vmatmul.mubr.msk.f32.gmra.mrb[70].mxu1 %vm1408_vm3, %v14224_v40  ;;  %20434 = vmatmul.mubr.msk.f32.gmra.mrb[64].mxu0 %vm1408_vm3, %v14218_v39 }
 0xc23   : > { %20436 = vmatprep.mubr.msk.f32.mxu0 %vm1408_vm3, %v14219_v14  ;;  %20461 = vmatprep.mubr.msk.f32.mxu1 %vm1408_vm3, %v19077_v53 }
 0xc26   : > { %20437 = vmatmul.mubr.msk.f32.gmra.mrb[66].mxu0 %vm1408_vm3, %v14220_v58  ;;  %20462 = vmatmul.mubr.msk.f32.vlgmr.msra.gmra.mrb[56].mxu1 %vm1408_vm3, %v19078_v43 }
 0xc27   : > { %20439 = vmatprep.mubr.msk.f32.mxu0 %vm1408_vm3, %v14221_v9  ;;  %20464 = vmatprep.mubr.msk.f32.mxu1 %vm1408_vm3, %v19079_v56 }
 0xc28   : > { %20526 = vmatpush3.msk.msra.mxu1 %vm15715_vm4, %v15665_v22 }
 0xc2a   : > { %20440 = vmatmul.mubr.msk.f32.gmra.mrb[68].mxu0 %vm1408_vm3, %v14222_v59  ;;  %20465 = vmatmul.mubr.msk.f32.gmra.mrb[58].mxu1 %vm1408_vm3, %v19080_v20 }
 0xc2b   : > { %20442 = vmatprep.mubr.msk.f32.mxu0 %vm1408_vm3, %v14223_v35  ;;  %20467 = vmatprep.mubr.msk.f32.mxu1 %vm1408_vm3, %v19081_v52 }
 0xc2e   : > { %20443 = vmatmul.mubr.msk.f32.gmra.mrb[70].mxu0 %vm1408_vm3, %v14224_v40  ;;  %20468 = vmatmul.mubr.msk.f32.gmra.mrb[60].mxu1 %vm1408_vm3, %v19082_v7 }
 0xc2f   : > { %20470 = vmatprep.mubr.msk.f32.mxu1 %vm1408_vm3, %v19083_v50  ;;  %20501 = vmatprep.mubr.msk.f32.mxu0 %vm1408_vm3, %v19077_v53 }
 0xc32   : > { %20471 = vmatmul.mubr.msk.f32.gmra.mrb[62].mxu1 %vm1408_vm3, %v19084_v63  ;;  %20502 = vmatmul.mubr.msk.f32.vlgmr.msra.gmra.mrb[56].mxu0 %vm1408_vm3, %v19078_v43 }
 0xc33   : > { %20473 = vmatprep.mubr.msk.f32.mxu1 %vm1408_vm3, %v19085_v13  ;;  %20504 = vmatprep.mubr.msk.f32.mxu0 %vm1408_vm3, %v19079_v56 }
 0xc36   : > { %20474 = vmatmul.mubr.msk.f32.gmra.mrb[64].mxu1 %vm1408_vm3, %v19086_v62  ;;  %20505 = vmatmul.mubr.msk.f32.gmra.mrb[58].mxu0 %vm1408_vm3, %v19080_v20 }
 0xc37   : > { %20476 = vmatprep.mubr.msk.f32.mxu1 %vm1408_vm3, %v19087_v21  ;;  %20507 = vmatprep.mubr.msk.f32.mxu0 %vm1408_vm3, %v19081_v52 }
 0xc3a   : > { %20477 = vmatmul.mubr.msk.f32.gmra.mrb[66].mxu1 %vm1408_vm3, %v19088_v4  ;;  %20508 = vmatmul.mubr.msk.f32.gmra.mrb[60].mxu0 %vm1408_vm3, %v19082_v7 }
 0xc3b   : > { %20479 = vmatprep.mubr.msk.f32.mxu1 %vm1408_vm3, %v19089_v60  ;;  %20510 = vmatprep.mubr.msk.f32.mxu0 %vm1408_vm3, %v19083_v50  ;;  %v28535_v50 = vpop.permute.xlu1 %15487 }
 0xc3e   : > { %20480 = vmatmul.mubr.msk.f32.gmra.mrb[68].mxu1 %vm1408_vm3, %v19090_v25  ;;  %20511 = vmatmul.mubr.msk.f32.gmra.mrb[62].mxu0 %vm1408_vm3, %v19084_v63  ;;  %v28537_v63 = vpop.permute.xlu0 %15492 }
 0xc3f   : > { %20482 = vmatprep.mubr.msk.f32.mxu1 %vm1408_vm3, %v19091_v28  ;;  %20513 = vmatprep.mubr.msk.f32.mxu0 %vm1408_vm3, %v19085_v13 }
 0xc42   : > { %20483 = vmatmul.mubr.msk.f32.gmra.mrb[70].mxu1 %vm1408_vm3, %v19092_v29  ;;  %20514 = vmatmul.mubr.msk.f32.gmra.mrb[64].mxu0 %vm1408_vm3, %v19086_v62 }
 0xc43   : > { %20516 = vmatprep.mubr.msk.f32.mxu0 %vm1408_vm3, %v19087_v21 }
 0xc46   : > { %20517 = vmatmul.mubr.msk.f32.gmra.mrb[66].mxu0 %vm1408_vm3, %v19088_v4 }
 0xc47   : > { %20519 = vmatprep.mubr.msk.f32.mxu0 %vm1408_vm3, %v19089_v60 }
 0xc4a   : > { %20520 = vmatmul.mubr.msk.f32.gmra.mrb[68].mxu0 %vm1408_vm3, %v19090_v25 }
 0xc4b   : > { %20522 = vmatprep.mubr.msk.f32.mxu0 %vm1408_vm3, %v19091_v28 }
 0xc4e   : > { %20523 = vmatmul.mubr.msk.f32.gmra.mrb[70].mxu0 %vm1408_vm3, %v19092_v29  ;;  %vm15666_vm3 = vcmask 56320  }
 0xcf9   : > { %v20463_v3 = vpop.f32.mrb[56].mxu1 }
 0xcfa   : > { %v15506_v27 = vadd.f32 %v20463_v3, %v15433_v15  ;;  %v15129_v41 = vpop.f32.mrb[57].mxu1 }
 0xcfb   : > { %v15505_v11 = vadd.f32 %v15428_v42, %v15129_v41 }
 0xcfc   : > { %v15522_v8 = vmax.f32 %v15506_v27, 0.0 }
 0xcfd   : > { %v15521_v34 = vmax.f32 %v15505_v11, 0.0  ;;  %v20466_v38 = vpop.f32.mrb[58].mxu1 }
 0xcfe   : > { %v15508_v47 = vadd.f32 %v20466_v38, %v15443_v45  ;;  %15603 = vrot.lane.b32.xlu0 %v15522_v8, %s30014_s25  ;;  %v15139_v54 = vpop.f32.mrb[59].mxu1 }
 0xcff   : > { %v15507_v44 = vadd.f32 %v15438_v48, %v15139_v54  ;;  %15601 = vrot.lane.b32.xlu1 %v15521_v34, %s30014_s25 }
 0xd00   : > { %v15524_v36 = vmax.f32 %v15508_v47, 0.0 }
 0xd01   : > { %v15523_v2 = vmax.f32 %v15507_v44, 0.0  ;;  %v20469_v30 = vpop.f32.mrb[60].mxu1 }
 0xd02   : > { %v28496_v18 = vadd.f32 %v20469_v30, %v28480_v23  ;;  %15607 = vrot.lane.b32.xlu0 %v15524_v36, %s30014_s25  ;;  %v15149_v49 = vpop.f32.mrb[61].mxu1 }
 0xd03   : > { %v28500_v12 = vadd.f32 %v28478_v32, %v15149_v49  ;;  %15605 = vrot.lane.b32.xlu1 %v15523_v2, %s30014_s25  ;;  %v15503_v49 = vpop.permute.xlu0 %15502 }
 0xd04   : > { %v15526_v0 = vmax.f32 %v28496_v18, 0.0  ;;  %v15498_v18 = vpop.permute.xlu1 %15497 }
 0xd05   : > { %v15525_v51 = vmax.f32 %v28500_v12, 0.0  ;;  %v20472_v1 = vpop.f32.mrb[62].mxu1  ;;  %v20503_v19 = vpop.f32.mrb[56].mxu0 }
 0xd06   : > { %v28510_v5 = vadd.f32 %v20472_v1, %v28487_v17  ;;  %v15538_v33 = vadd.f32 %v20503_v19, %v15433_v15  ;;  %v15314_v37 = vpop.f32.mrb[57].mxu0  ;;  %15611 = vrot.lane.b32.xlu0 %v15526_v0, %s30014_s25  ;;  %v15159_v39 = vpop.f32.mrb[63].mxu1 }
 0xd07   : > { %v15537_v14 = vadd.f32 %v15428_v42, %v15314_v37  ;;  %v28514_v10 = vadd.f32 %v28485_v61, %v15159_v39  ;;  %15609 = vrot.lane.b32.xlu1 %v15525_v51, %s30014_s25 }
 0xd08   : > { %v15528_v16 = vmax.f32 %v28510_v5, 0.0  ;;  %v15554_v24 = vmax.f32 %v15538_v33, 0.0 }
 0xd09   : > { %v15553_v58 = vmax.f32 %v15537_v14, 0.0  ;;  %v15527_v9 = vmax.f32 %v28514_v10, 0.0  ;;  %v20475_v57 = vpop.f32.mrb[64].mxu1  ;;  %v20506_v59 = vpop.f32.mrb[58].mxu0 }
 0xd0a   : > { %v28520_v35 = vadd.f32 %v20475_v57, %v28491_v46  ;;  %v15540_v40 = vadd.f32 %v20506_v59, %v15443_v45  ;;  %v15324_v53 = vpop.f32.mrb[59].mxu0  ;;  %15615 = vrot.lane.b32.xlu0 %v15528_v16, %s30014_s25  ;;  %v15169_v43 = vpop.f32.mrb[65].mxu1  ;;  %v28525_v56 = vmax.f32 %v15522_v8, %v15554_v24 }
 0xd0b   : > { %v15539_v20 = vadd.f32 %v15438_v48, %v15324_v53  ;;  %v28528_v52 = vadd.f32 %v28489_v55, %v15169_v43  ;;  %15613 = vrot.lane.b32.xlu1 %v15527_v9, %s30014_s25  ;;  %v28533_v7 = vmax.f32 %v15521_v34, %v15553_v58 }
 0xd0c   : > { %v15530_v13 = vmax.f32 %v28520_v35, 0.0  ;;  %v15556_v62 = vmax.f32 %v15540_v40, 0.0 }
 0xd0d   : > { %v15555_v21 = vmax.f32 %v15539_v20, 0.0  ;;  %v15529_v4 = vmax.f32 %v28528_v52, 0.0  ;;  %v20478_v60 = vpop.f32.mrb[66].mxu1  ;;  %v20509_v25 = vpop.f32.mrb[60].mxu0 }
 0xd0e   : > { %v15516_v28 = vadd.f32 %v20478_v60, %v28505_v26  ;;  %v15542_v29 = vadd.f32 %v20509_v25, %v28480_v23  ;;  %v15334_v42 = vpop.f32.mrb[61].mxu0  ;;  %15619 = vrot.lane.b32.xlu0 %v15530_v13, %s30014_s25  ;;  %v15179_v15 = vpop.f32.mrb[67].mxu1  ;;  %v28544_v48 = vmax.f32 %v15524_v36, %v15556_v62 }
 0xd0f   : > { %v15541_v45 = vadd.f32 %v28478_v32, %v15334_v42  ;;  %v15515_v22 = vadd.f32 %v28503_v31, %v15179_v15  ;;  %15617 = vrot.lane.b32.xlu1 %v15529_v4, %s30014_s25  ;;  %v28549_v3 = vmax.f32 %v15523_v2, %v15555_v21 }
 0xd10   : > { %v15532_v27 = vmax.f32 %v15516_v28, 0.0  ;;  %v15558_v41 = vmax.f32 %v15542_v29, 0.0 }
 0xd11   : > { %v15557_v11 = vmax.f32 %v15541_v45, 0.0  ;;  %v15531_v8 = vmax.f32 %v15515_v22, 0.0  ;;  %v20481_v34 = vpop.f32.mrb[68].mxu1  ;;  %v20512_v23 = vpop.f32.mrb[62].mxu0 }
 0xd12   : > { %v15518_v38 = vadd.f32 %v20481_v34, %v28537_v63  ;;  %v15544_v47 = vadd.f32 %v20512_v23, %v28487_v17  ;;  %v15344_v54 = vpop.f32.mrb[63].mxu0  ;;  %15623 = vrot.lane.b32.xlu0 %v15532_v27, %s30014_s25  ;;  %v15189_v32 = vpop.f32.mrb[69].mxu1  ;;  %v28554_v44 = vmax.f32 %v15526_v0, %v15558_v41 }
 0xd13   : > { %v15543_v36 = vadd.f32 %v28485_v61, %v15344_v54  ;;  %v15517_v2 = vadd.f32 %v28535_v50, %v15189_v32  ;;  %15621 = vrot.lane.b32.xlu1 %v15531_v8, %s30014_s25  ;;  %v28559_v30 = vmax.f32 %v15525_v51, %v15557_v11 }
 0xd14   : > { %v15534_v12 = vmax.f32 %v15518_v38, 0.0  ;;  %v15560_v1 = vmax.f32 %v15544_v47, 0.0 }
 0xd15   : > { %v15559_v19 = vmax.f32 %v15543_v36, 0.0  ;;  %v15533_v17 = vmax.f32 %v15517_v2, 0.0  ;;  %v20484_v33 = vpop.f32.mrb[70].mxu1  ;;  %v20515_v37 = vpop.f32.mrb[64].mxu0 }
 0xd16   : > { %v15520_v39 = vadd.f32 %v20484_v33, %v15503_v49  ;;  %v15546_v0 = vadd.f32 %v20515_v37, %v28491_v46  ;;  %v15354_v14 = vpop.f32.mrb[65].mxu0  ;;  %15627 = vrot.lane.b32.xlu0 %v15534_v12, %s30014_s25  ;;  %v15199_v61 = vpop.f32.mrb[71].mxu1  ;;  %v28565_v24 = vmax.f32 %v15528_v16, %v15560_v1 }
 0xd17   : > { %v15545_v51 = vadd.f32 %v28489_v55, %v15354_v14  ;;  %v15519_v58 = vadd.f32 %v15498_v18, %v15199_v61  ;;  %15625 = vrot.lane.b32.xlu1 %v15533_v17, %s30014_s25  ;;  %v15575_v57 = vmax.f32 %v15527_v9, %v15559_v19 }
 0xd18   : > { %v15536_v59 = vmax.f32 %v15520_v39, 0.0  ;;  %v15562_v35 = vmax.f32 %v15546_v0, 0.0 }
 0xd19   : > { %v15561_v40 = vmax.f32 %v15545_v51, 0.0  ;;  %v15535_v46 = vmax.f32 %v15519_v58, 0.0  ;;  %v20518_v53 = vpop.f32.mrb[66].mxu0 }
 0xd1a   : > { %v15548_v43 = vadd.f32 %v20518_v53, %v28505_v26  ;;  %v15364_v20 = vpop.f32.mrb[67].mxu0  ;;  %15631 = vrot.lane.b32.xlu0 %v15536_v59, %s30014_s25  ;;  %v15578_v5 = vmax.f32 %v15530_v13, %v15562_v35 }
 0xd1b   : > { %v15547_v16 = vadd.f32 %v28503_v31, %v15364_v20  ;;  %15629 = vrot.lane.b32.xlu1 %v15535_v46, %s30014_s25  ;;  %v15577_v55 = vmax.f32 %v15529_v4, %v15561_v40 }
 0xd1c   : > { %v15564_v52 = vmax.f32 %v15548_v43, 0.0 }
 0xd1d   : > { %v15563_v62 = vmax.f32 %v15547_v16, 0.0  ;;  %v20521_v10 = vpop.f32.mrb[68].mxu0 }
 0xd1e   : > { %v15550_v9 = vadd.f32 %v20521_v10, %v28537_v63  ;;  %v15374_v21 = vpop.f32.mrb[69].mxu0  ;;  %v15580_v60 = vmax.f32 %v15532_v27, %v15564_v52 }
 0xd1f   : > { %v15549_v25 = vadd.f32 %v28535_v50, %v15374_v21  ;;  %v15579_v28 = vmax.f32 %v15531_v8, %v15563_v62 }
 0xd20   : > { %v15566_v26 = vmax.f32 %v15550_v9, 0.0 }
 0xd21   : > { %v15565_v29 = vmax.f32 %v15549_v25, 0.0  ;;  %v20524_v42 = vpop.f32.mrb[70].mxu0 }
 0xd22   : > { %v15552_v15 = vadd.f32 %v20524_v42, %v15503_v49  ;;  %v15384_v13 = vpop.f32.mrb[71].mxu0  ;;  %v15582_v45 = vmax.f32 %v15534_v12, %v15566_v26 }
 0xd23   : > { %v15551_v31 = vadd.f32 %v15498_v18, %v15384_v13  ;;  %v15581_v22 = vmax.f32 %v15533_v17, %v15565_v29 }
 0xd24   : > { %v15568_v41 = vmax.f32 %v15552_v15, 0.0 }
 0xd25   : > { %v15567_v4 = vmax.f32 %v15551_v31, 0.0 }
 0xd26   : > { %v15584_v11 = vmax.f32 %v15536_v59, %v15568_v41 }
 0xd27   : > { %v15583_v34 = vmax.f32 %v15535_v46, %v15567_v4 }
 0xd70   : > { %v15604_v23 = vpop.permute.xlu0 %15603 }
 0xd71   : > { %v15602_v38 = vpop.permute.xlu1 %15601  ;;  %v15650_v50 = vmax.f32 %v28525_v56, %v15604_v23 }
 0xd72   : > { %v15649_v63 = vmax.f32 %v28533_v7, %v15602_v38 }
 0xd74   : > { %20527 = vmatprep.mubr.msk.f32.mxu1 %vm15666_vm3, %v15649_v63  ;;  %v15608_v27 = vpop.permute.xlu0 %15607  ;;  %v17600_v63 = vld [vmem:[%s29984_s10 + $0x80] sm:$0xff] }
 0xd75   : > { %20528 = vmatmul.mubr.msk.f32.vlgmr.msra.gmra.mrb[72].mxu1 %vm15666_vm3, %v15650_v50  ;;  %v15606_v8 = vpop.permute.xlu1 %15605  ;;  %v15652_v54 = vmax.f32 %v28544_v48, %v15608_v27  ;;  %v17584_v50 = vld [vmem:[%s29984_s10] sm:$0xff]  ;;  %v17601_v27 = vld [vmem:[%s29984_s10 + $0x88] sm:$0xff] }
 0xd76   : > { %v15651_v47 = vmax.f32 %v28549_v3, %v15606_v8  ;;  %v17602_v8 = vld [vmem:[%s29984_s10 + $0x90] sm:$0xff] }
 0xd78   : > { %20530 = vmatprep.mubr.msk.f32.mxu1 %vm15666_vm3, %v15651_v47  ;;  %v15612_v32 = vpop.permute.xlu0 %15611  ;;  %v17585_v47 = vld [vmem:[%s29984_s10 + $0x8] sm:$0xff] }
 0xd79   : > { %20531 = vmatmul.mubr.msk.f32.gmra.mrb[74].mxu1 %vm15666_vm3, %v15652_v54  ;;  %v15610_v36 = vpop.permute.xlu1 %15609  ;;  %v15654_v56 = vmax.f32 %v28554_v44, %v15612_v32  ;;  %v17586_v54 = vld [vmem:[%s29984_s10 + $0x10] sm:$0xff]  ;;  %v17603_v32 = vld [vmem:[%s29984_s10 + $0x98] sm:$0xff] }
 0xd7a   : > { %v15653_v7 = vmax.f32 %v28559_v30, %v15610_v36  ;;  %v17604_v36 = vld [vmem:[%s29984_s10 + $0xa0] sm:$0xff] }
 0xd7c   : > { %20533 = vmatprep.mubr.msk.f32.mxu1 %vm15666_vm3, %v15653_v7  ;;  %v15616_v2 = vpop.permute.xlu0 %15615  ;;  %v17587_v7 = vld [vmem:[%s29984_s10 + $0x18] sm:$0xff] }
 0xd7d   : > { %20534 = vmatmul.mubr.msk.f32.gmra.mrb[76].mxu1 %vm15666_vm3, %v15654_v56  ;;  %v15614_v18 = vpop.permute.xlu1 %15613  ;;  %v15656_v3 = vmax.f32 %v28565_v24, %v15616_v2  ;;  %v17588_v56 = vld [vmem:[%s29984_s10 + $0x20] sm:$0xff]  ;;  %v17605_v2 = vld [vmem:[%s29984_s10 + $0xa8] sm:$0xff] }
 0xd7e   : > { %v15655_v49 = vmax.f32 %v15575_v57, %v15614_v18  ;;  %v17606_v18 = vld [vmem:[%s29984_s10 + $0xb0] sm:$0xff] }
 0xd80   : > { %20536 = vmatprep.mubr.msk.f32.mxu1 %vm15666_vm3, %v15655_v49  ;;  %v15620_v48 = vpop.permute.xlu0 %15619  ;;  %v17589_v49 = vld [vmem:[%s29984_s10 + $0x28] sm:$0xff] }
 0xd81   : > { %20537 = vmatmul.mubr.msk.f32.gmra.mrb[78].mxu1 %vm15666_vm3, %v15656_v3  ;;  %v15618_v12 = vpop.permute.xlu1 %15617  ;;  %v15658_v19 = vmax.f32 %v15578_v5, %v15620_v48  ;;  %v17590_v3 = vld [vmem:[%s29984_s10 + $0x30] sm:$0xff]  ;;  %v17607_v48 = vld [vmem:[%s29984_s10 + $0xb8] sm:$0xff] }
 0xd82   : > { %v15657_v1 = vmax.f32 %v15577_v55, %v15618_v12  ;;  %v17608_v12 = vld [vmem:[%s29984_s10 + $0xc0] sm:$0xff] }
 0xd84   : > { %20539 = vmatprep.mubr.msk.f32.mxu1 %vm15666_vm3, %v15657_v1  ;;  %v15624_v44 = vpop.permute.xlu0 %15623  ;;  %v17591_v1 = vld [vmem:[%s29984_s10 + $0x38] sm:$0xff] }
 0xd85   : > { %20540 = vmatmul.mubr.msk.f32.gmra.mrb[80].mxu1 %vm15666_vm3, %v15658_v19  ;;  %v15622_v30 = vpop.permute.xlu1 %15621  ;;  %v15660_v33 = vmax.f32 %v15580_v60, %v15624_v44  ;;  %v17592_v19 = vld [vmem:[%s29984_s10 + $0x40] sm:$0xff]  ;;  %v17609_v44 = vld [vmem:[%s29984_s10 + $0xc8] sm:$0xff] }
 0xd86   : > { %v15659_v17 = vmax.f32 %v15579_v28, %v15622_v30  ;;  %v17610_v30 = vld [vmem:[%s29984_s10 + $0xd0] sm:$0xff] }
 0xd88   : > { %20542 = vmatprep.mubr.msk.f32.mxu1 %vm15666_vm3, %v15659_v17  ;;  %v15628_v37 = vpop.permute.xlu0 %15627  ;;  %v17593_v17 = vld [vmem:[%s29984_s10 + $0x48] sm:$0xff] }
 0xd89   : > { %20543 = vmatmul.mubr.msk.f32.gmra.mrb[82].mxu1 %vm15666_vm3, %v15660_v33  ;;  %v15626_v39 = vpop.permute.xlu1 %15625  ;;  %v15662_v14 = vmax.f32 %v15582_v45, %v15628_v37 }
 0xd8a   : > { %v15661_v0 = vmax.f32 %v15581_v22, %v15626_v39  ;;  %v19142_v22 = vld [vmem:[%s29983_s9 + $0x100] sm:$0xff] }
 0xd8b   : > { %20583 = vmatprep.mubr.f32.mxu0 %v19142_v22 }
 0xd8c   : > { %20545 = vmatprep.mubr.msk.f32.mxu1 %vm15666_vm3, %v15661_v0  ;;  %v15632_v61 = vpop.permute.xlu0 %15631 }
 0xd8d   : > { %20546 = vmatmul.mubr.msk.f32.gmra.mrb[84].mxu1 %vm15666_vm3, %v15662_v14  ;;  %v15630_v24 = vpop.permute.xlu1 %15629  ;;  %v15664_v58 = vmax.f32 %v15584_v11, %v15632_v61  ;;  %v17594_v14 = vld [vmem:[%s29984_s10 + $0x50] sm:$0xff] }
 0xd8e   : > { %v15663_v51 = vmax.f32 %v15583_v34, %v15630_v24  ;;  %v17611_v24 = vld [vmem:[%s29984_s10 + $0xd8] sm:$0xff] }
 0xd90   : > { %20548 = vmatprep.mubr.msk.f32.mxu1 %vm15666_vm3, %v15663_v51 }
 0xd91   : > { %20549 = vmatmul.mubr.msk.f32.gmra.mrb[86].mxu1 %vm15666_vm3, %v15664_v58 }
 0xd92   : > { %20743 = vmatprep.mubr.f32.mxu1 %v19142_v22 }
 0xe48   : > { %v20529_v57 = vpop.f32.mrb[72].mxu1 }
 0xe49   : > { %v15785_v59 = vpop.f32.mrb[73].mxu1 }
 0xe4a   : > { %v23182_v35 = vpack.i.bf16 %v20529_v57, %v15785_v59  ;;  %v28600_v40 = vpack.c.bf16 %v20529_v57, %v15785_v59  ;;  %v17612_v59 = vld [vmem:[%s29984_s10 + $0xe0] sm:$0xff] }
 0xe4c   : > { %v20532_v46 = vpop.f32.mrb[74].mxu1  ;;  %23183 = vrot.lane.b32.xlu1 %v23182_v35, %s23523_s24 }
 0xe4d   : > { %v15795_v53 = vpop.f32.mrb[75].mxu1 }
 0xe4e   : > { %v23187_v43 = vpack.i.bf16 %v20532_v46, %v15795_v53  ;;  %v28603_v20 = vpack.c.bf16 %v20532_v46, %v15795_v53  ;;  %v17595_v46 = vld [vmem:[%s29984_s10 + $0x58] sm:$0xff] }
 0xe50   : > { %23188 = vrot.lane.b32.xlu0 %v23187_v43, %s23523_s24  ;;  %v20535_v5 = vpop.f32.mrb[76].mxu1 }
 0xe51   : > { %v15805_v16 = vpop.f32.mrb[77].mxu1 }
 0xe52   : > { %v23192_v55 = vpack.i.bf16 %v20535_v5, %v15805_v16  ;;  %v28606_v52 = vpack.c.bf16 %v20535_v5, %v15805_v16  ;;  %v17596_v16 = vld [vmem:[%s29984_s10 + $0x60] sm:$0xff] }
 0xe54   : > { %v20538_v62 = vpop.f32.mrb[78].mxu1  ;;  %23193 = vrot.lane.b32.xlu1 %v23192_v55, %s23523_s24 }
 0xe55   : > { %v15815_v10 = vpop.f32.mrb[79].mxu1 }
 0xe56   : > { %v23197_v9 = vpack.i.bf16 %v20538_v62, %v15815_v10  ;;  %v28609_v21 = vpack.c.bf16 %v20538_v62, %v15815_v10  ;;  %v17613_v62 = vld [vmem:[%s29984_s10 + $0xe8] sm:$0xff] }
 0xe58   : > { %23198 = vrot.lane.b32.xlu0 %v23197_v9, %s23523_s24  ;;  %v20541_v60 = vpop.f32.mrb[80].mxu1 }
 0xe59   : > { %v15825_v25 = vpop.f32.mrb[81].mxu1 }
 0xe5a   : > { %v23202_v28 = vpack.i.bf16 %v20541_v60, %v15825_v25  ;;  %v28612_v26 = vpack.c.bf16 %v20541_v60, %v15825_v25  ;;  %v17614_v25 = vld [vmem:[%s29984_s10 + $0xf0] sm:$0xff] }
 0xe5c   : > { %v20544_v29 = vpop.f32.mrb[82].mxu1  ;;  %23203 = vrot.lane.b32.xlu1 %v23202_v28, %s23523_s24 }
 0xe5d   : > { %v15835_v42 = vpop.f32.mrb[83].mxu1 }
 0xe5e   : > { %v23207_v15 = vpack.i.bf16 %v20544_v29, %v15835_v42  ;;  %v28615_v13 = vpack.c.bf16 %v20544_v29, %v15835_v42  ;;  %v17597_v29 = vld [vmem:[%s29984_s10 + $0x68] sm:$0xff] }
 0xe60   : > { %23208 = vrot.lane.b32.xlu0 %v23207_v15, %s23523_s24  ;;  %v20547_v45 = vpop.f32.mrb[84].mxu1 }
 0xe61   : > { %v15845_v31 = vpop.f32.mrb[85].mxu1 }
 0xe62   : > { %v23212_v41 = vpack.i.bf16 %v20547_v45, %v15845_v31  ;;  %v28621_v4 = vpack.c.bf16 %v20547_v45, %v15845_v31  ;;  %v17598_v31 = vld [vmem:[%s29984_s10 + $0x70] sm:$0xff] }
 0xe64   : > { %23213 = vrot.lane.b32.xlu1 %v23212_v41, %s23523_s24  ;;  %v20550_v11 = vpop.f32.mrb[86].mxu1 }
 0xe65   : > { %v15855_v34 = vpop.f32.mrb[87].mxu1 }
 0xe66   : > { %v23217_v23 = vpack.i.bf16 %v20550_v11, %v15855_v34  ;;  %v28624_v38 = vpack.c.bf16 %v20550_v11, %v15855_v34 }
 0xe68   : > { %23223 = vrot.lane.b32.xlu1 %v23182_v35, %s30020_s3  ;;  %23218 = vrot.lane.b32.xlu0 %v23217_v23, %s23523_s24 }
 0xe6c   : > { %23233 = vrot.lane.b32.xlu1 %v23192_v55, %s30020_s3  ;;  %23228 = vrot.lane.b32.xlu0 %v23187_v43, %s30020_s3 }
 0xe70   : > { %23243 = vrot.lane.b32.xlu1 %v23202_v28, %s30020_s3  ;;  %23238 = vrot.lane.b32.xlu0 %v23197_v9, %s30020_s3 }
 0xe74   : > { %23253 = vrot.lane.b32.xlu1 %v23212_v41, %s30020_s3  ;;  %23248 = vrot.lane.b32.xlu0 %v23207_v15, %s30020_s3 }
 0xe78   : > { %23263 = vrot.lane.b32.xlu1 %v23182_v35, %s23524_s26  ;;  %23258 = vrot.lane.b32.xlu0 %v23217_v23, %s30020_s3 }
 0xe7c   : > { %23273 = vrot.lane.b32.xlu1 %v23192_v55, %s23524_s26  ;;  %23268 = vrot.lane.b32.xlu0 %v23187_v43, %s23524_s26 }
 0xe80   : > { %23283 = vrot.lane.b32.xlu1 %v23202_v28, %s23524_s26  ;;  %23278 = vrot.lane.b32.xlu0 %v23197_v9, %s23524_s26 }
 0xe84   : > { %23293 = vrot.lane.b32.xlu1 %v23212_v41, %s23524_s26  ;;  %23288 = vrot.lane.b32.xlu0 %v23207_v15, %s23524_s26 }
 0xe88   : > { %23303 = vrot.lane.b32.xlu1 %v23182_v35, %s30014_s25  ;;  %23298 = vrot.lane.b32.xlu0 %v23217_v23, %s23524_s26 }
 0xe8c   : > { %23313 = vrot.lane.b32.xlu1 %v23192_v55, %s30014_s25  ;;  %23308 = vrot.lane.b32.xlu0 %v23187_v43, %s30014_s25 }
 0xe90   : > { %23323 = vrot.lane.b32.xlu1 %v23202_v28, %s30014_s25  ;;  %23318 = vrot.lane.b32.xlu0 %v23197_v9, %s30014_s25 }
 0xe94   : > { %23333 = vrot.lane.b32.xlu1 %v23212_v41, %s30014_s25  ;;  %23328 = vrot.lane.b32.xlu0 %v23207_v15, %s30014_s25  ;;  %v17615_v41 = vld [vmem:[%s29984_s10 + $0xf8] sm:$0xff] }
 0xe98   : > { %17698 = vperm.xlu1 %22941, %v17600_v63   ;;  %23338 = vrot.lane.b32.xlu0 %v23217_v23, %s30014_s25 }
 0xe9c   : > { %17618 = vperm.xlu1 %22941, %v17584_v50   ;;  %17703 = vperm.xlu0 %22940, %v17601_v27   ;;  %v17599_v50 = vld [vmem:[%s29984_s10 + $0x78] sm:$0xff] }
 0xea0   : > { %17708 = vperm.xlu1 %22941, %v17602_v8   ;;  %17623 = vperm.xlu0 %22940, %v17585_v47  }
 0xea4   : > { %17628 = vperm.xlu1 %22941, %v17586_v54   ;;  %17713 = vperm.xlu0 %22940, %v17603_v32  }
 0xea8   : > { %17718 = vperm.xlu1 %22941, %v17604_v36   ;;  %17633 = vperm.xlu0 %22940, %v17587_v7  }
 0xeac   : > { %17638 = vperm.xlu1 %22941, %v17588_v56   ;;  %17723 = vperm.xlu0 %22940, %v17605_v2  }
 0xeb0   : > { %17728 = vperm.xlu1 %22941, %v17606_v18   ;;  %17643 = vperm.xlu0 %22940, %v17589_v49  }
 0xeb4   : > { %17648 = vperm.xlu1 %22941, %v17590_v3   ;;  %17733 = vperm.xlu0 %22940, %v17607_v48  }
 0xeb8   : > { %17738 = vperm.xlu1 %22941, %v17608_v12   ;;  %17653 = vperm.xlu0 %22940, %v17591_v1  }
 0xebc   : > { %17658 = vperm.xlu1 %22941, %v17592_v19   ;;  %17743 = vperm.xlu0 %22940, %v17609_v44  }
 0xebe   : > { %v23184_v33 = vpop.permute.xlu1 %23183 }
 0xebf   : > { %v23186_v37 = vunpack.i.h.bf16 %v23184_v33  ;;  %v23185_v39 = vunpack.i.l.bf16 %v23184_v33 }
 0xec0   : > { %17748 = vperm.xlu1 %22941, %v17610_v30   ;;  %17663 = vperm.xlu0 %22940, %v17593_v17   ;;  %v28742_v30 = vld [vmem:[%s29983_s9 + $0x108] sm:$0xff] }
 0xec1   : > { %v22018_v0 = vpack.c.bf16 %v23186_v37, %v23185_v39 }
 0xec2   : > { %v23189_v61 = vpop.permute.xlu0 %23188 }
 0xec3   : > { %v23191_v51 = vunpack.i.h.bf16 %v23189_v61  ;;  %v23190_v58 = vunpack.i.l.bf16 %v23189_v61  ;;  %22019 = vmatprep.subr.bf16.mxu0 %v22018_v0 }
 0xec4   : > { %17668 = vperm.xlu1 %22941, %v17594_v14   ;;  %22021 = vmatpush3.bf16.msra.mxu0 %v22018_v0  ;;  %v28749_v14 = vld [vmem:[%s29983_s9 + $0x110] sm:$0xff] }
 0xec5   : > { %v22022_v57 = vpack.c.bf16 %v23191_v51, %v23190_v58  ;;  %17753 = vperm.xlu0 %22940, %v17611_v24   ;;  %v28755_v24 = vld [vmem:[%s29983_s9 + $0x118] sm:$0xff] }
 0xec6   : > { %v23194_v35 = vpop.permute.xlu1 %23193 }
 0xec7   : > { %v23196_v53 = vunpack.i.h.bf16 %v23194_v35  ;;  %v23195_v43 = vunpack.i.l.bf16 %v23194_v35  ;;  %22023 = vmatprep.subr.bf16.mxu0 %v22022_v57  ;;  %v28769_v35 = vld [vmem:[%s29983_s9 + $0x128] sm:$0xff] }
 0xec8   : > { %17758 = vperm.xlu1 %22941, %v17612_v59   ;;  %22025 = vmatpush3.bf16.msra.mxu0 %v22022_v57 }
 0xec9   : > { %v22026_v5 = vpack.c.bf16 %v23196_v53, %v23195_v43  ;;  %17673 = vperm.xlu0 %22940, %v17595_v46  }
 0xeca   : > { %v23199_v55 = vpop.permute.xlu0 %23198 }
 0xecb   : > { %v23201_v10 = vunpack.i.h.bf16 %v23199_v55  ;;  %v23200_v9 = vunpack.i.l.bf16 %v23199_v55  ;;  %22027 = vmatprep.subr.bf16.mxu0 %v22026_v5 }
 0xecc   : > { %17678 = vperm.xlu1 %22941, %v17596_v16   ;;  %22029 = vmatpush3.bf16.msra.mxu0 %v22026_v5  ;;  %v28783_v16 = vld [vmem:[%s29983_s9 + $0x138] sm:$0xff] }
 0xecd   : > { %v22030_v60 = vpack.c.bf16 %v23201_v10, %v23200_v9  ;;  %17763 = vperm.xlu0 %22940, %v17613_v62  }
 0xece   : > { %v23204_v28 = vpop.permute.xlu1 %23203 }
 0xecf   : > { %v23206_v42 = vunpack.i.h.bf16 %v23204_v28  ;;  %v23205_v15 = vunpack.i.l.bf16 %v23204_v28  ;;  %22031 = vmatprep.subr.bf16.mxu0 %v22030_v60 }
 0xed0   : > { %17768 = vperm.xlu1 %22941, %v17614_v25   ;;  %22033 = vmatpush3.bf16.msra.mxu0 %v22030_v60  ;;  %v28797_v60 = vld [vmem:[%s29983_s9 + $0x148] sm:$0xff] }
 0xed1   : > { %v22034_v45 = vpack.c.bf16 %v23206_v42, %v23205_v15  ;;  %17683 = vperm.xlu0 %22940, %v17597_v29   ;;  %v28811_v15 = vld [vmem:[%s29983_s9 + $0x158] sm:$0xff] }
 0xed2   : > { %v23209_v22 = vpop.permute.xlu0 %23208 }
 0xed3   : > { %v23211_v11 = vunpack.i.h.bf16 %v23209_v22  ;;  %v23210_v34 = vunpack.i.l.bf16 %v23209_v22  ;;  %22035 = vmatprep.subr.bf16.mxu0 %v22034_v45 }
 0xed4   : > { %17688 = vperm.xlu1 %22941, %v17598_v31   ;;  %22037 = vmatpush3.bf16.msra.mxu0 %v22034_v45 }
 0xed5   : > { %v22038_v23 = vpack.c.bf16 %v23211_v11, %v23210_v34  ;;  %17773 = vperm.xlu0 %22940, %v17615_v41   ;;  %v28825_v11 = vld [vmem:[%s29983_s9 + $0x168] sm:$0xff] }
 0xed6   : > { %v23214_v63 = vpop.permute.xlu1 %23213 }
 0xed7   : > { %v23216_v27 = vunpack.i.h.bf16 %v23214_v63  ;;  %v23215_v8 = vunpack.i.l.bf16 %v23214_v63  ;;  %22039 = vmatprep.subr.bf16.mxu0 %v22038_v23 }
 0xed8   : > { %22041 = vmatpush3.bf16.msra.mxu0 %v22038_v23 }
 0xed9   : > { %v22042_v47 = vpack.c.bf16 %v23216_v27, %v23215_v8  ;;  %17693 = vperm.xlu0 %22940, %v17599_v50   ;;  %v28841_v27 = vld [vmem:[%s29983_s9 + $0x178] sm:$0xff] }
 0xeda   : > { %v23224_v54 = vpop.permute.xlu1 %23223  ;;  %v23219_v32 = vpop.permute.xlu0 %23218 }
 0xedb   : > { %v23226_v36 = vunpack.i.h.bf16 %v23224_v54  ;;  %v23225_v7 = vunpack.i.l.bf16 %v23224_v54  ;;  %v23221_v56 = vunpack.i.h.bf16 %v23219_v32  ;;  %v23220_v2 = vunpack.i.l.bf16 %v23219_v32  ;;  %22043 = vmatprep.subr.bf16.mxu0 %v22042_v47 }
 0xedc   : > { %22045 = vmatpush3.bf16.msra.mxu0 %v22042_v47 }
 0xedd   : > { %v22082_v18 = vpack.c.bf16 %v23226_v36, %v23225_v7  ;;  %v22046_v49 = vpack.c.bf16 %v23221_v56, %v23220_v2  ;;  %v28860_v36 = vld [vmem:[%s29983_s9 + $0x188] sm:$0xff]  ;;  %v28867_v7 = vld [vmem:[%s29983_s9 + $0x190] sm:$0xff] }
 0xede   : > { %v23234_v3 = vpop.permute.xlu1 %23233  ;;  %v23229_v48 = vpop.permute.xlu0 %23228 }
 0xedf   : > { %v23236_v12 = vunpack.i.h.bf16 %v23234_v3  ;;  %v23235_v1 = vunpack.i.l.bf16 %v23234_v3  ;;  %v23231_v19 = vunpack.i.h.bf16 %v23229_v48  ;;  %v23230_v44 = vunpack.i.l.bf16 %v23229_v48  ;;  %22047 = vmatprep.subr.bf16.mxu0 %v22046_v49  ;;  %22083 = vmatprep.subr.bf16.mxu1 %v22082_v18  ;;  %v28887_v3 = vld [vmem:[%s29983_s9 + $0x1a0] sm:$0xff] }
 0xee0   : > { %22049 = vmatpush3.bf16.msra.mxu0 %v22046_v49  ;;  %22085 = vmatpush3.bf16.msra.mxu1 %v22082_v18  ;;  %v28880_v49 = vld [vmem:[%s29983_s9 + $0x198] sm:$0xff] }
 0xee1   : > { %v22086_v17 = vpack.c.bf16 %v23231_v19, %v23230_v44  ;;  %22051 = vmatprep.subr.bf16.mxu0 %v28600_v40  ;;  %v22090_v37 = vpack.c.bf16 %v23236_v12, %v23235_v1  ;;  %v28898_v44 = vld [vmem:[%s29983_s9 + $0x1a8] sm:$0xff] }
 0xee2   : > { %v23239_v33 = vpop.permute.xlu0 %23238  ;;  %v23244_v61 = vpop.permute.xlu1 %23243 }
 0xee3   : > { %v23241_v39 = vunpack.i.h.bf16 %v23239_v33  ;;  %v23240_v0 = vunpack.i.l.bf16 %v23239_v33  ;;  %20584 = vmatmul.mubr.f32.vlgmr.msra.gmra.mrb[72].mxu0 %v28742_v30  ;;  %22087 = vmatprep.subr.bf16.mxu1 %v22086_v17  ;;  %v23246_v51 = vunpack.i.h.bf16 %v23244_v61  ;;  %v23245_v58 = vunpack.i.l.bf16 %v23244_v61 }
 0xee4   : > { %22053 = vmatpush3.bf16.msra.mxu0 %v28600_v40  ;;  %22089 = vmatpush3.bf16.msra.mxu1 %v22086_v17  ;;  %v28763_v40 = vld [vmem:[%s29983_s9 + $0x120] sm:$0xff] }
 0xee5   : > { %22055 = vmatprep.subr.bf16.mxu0 %v28603_v20  ;;  %22091 = vmatprep.subr.bf16.mxu1 %v22090_v37  ;;  %v22094_v57 = vpack.c.bf16 %v23241_v39, %v23240_v0  ;;  %v22098_v46 = vpack.c.bf16 %v23246_v51, %v23245_v58  ;;  %v28916_v0 = vld [vmem:[%s29983_s9 + $0x1b8] sm:$0xff] }
 0xee6   : > { %20586 = vmatprep.mubr.f32.mxu0 %v28749_v14  ;;  %v23249_v59 = vpop.permute.xlu0 %23248  ;;  %v23254_v5 = vpop.permute.xlu1 %23253 }
 0xee7   : > { %20587 = vmatmul.mubr.f32.gmra.mrb[74].mxu0 %v28755_v24  ;;  %v23251_v53 = vunpack.i.h.bf16 %v23249_v59  ;;  %v23250_v43 = vunpack.i.l.bf16 %v23249_v59  ;;  %v23256_v55 = vunpack.i.h.bf16 %v23254_v5  ;;  %v23255_v62 = vunpack.i.l.bf16 %v23254_v5 }
 0xee8   : > { %22057 = vmatpush3.bf16.msra.mxu0 %v28603_v20  ;;  %22093 = vmatpush3.bf16.msra.mxu1 %v22090_v37  ;;  %v28777_v20 = vld [vmem:[%s29983_s9 + $0x130] sm:$0xff] }
 0xee9   : > { %22059 = vmatprep.subr.bf16.mxu0 %v28606_v52  ;;  %22095 = vmatprep.subr.bf16.mxu1 %v22094_v57  ;;  %v22102_v10 = vpack.c.bf16 %v23251_v53, %v23250_v43  ;;  %v22106_v25 = vpack.c.bf16 %v23256_v55, %v23255_v62  ;;  %v19169_v43 = vld [vmem:[%s29983_s9 + $0x1d8] sm:$0xff]  ;;  %v19171_v62 = vld [vmem:[%s29983_s9 + $0x1e8] sm:$0xff] }
 0xeea   : > { %20589 = vmatprep.mubr.f32.mxu0 %v28763_v40  ;;  %v23259_v9 = vpop.permute.xlu0 %23258  ;;  %v23264_v42 = vpop.permute.xlu1 %23263 }
 0xeeb   : > { %20590 = vmatmul.mubr.f32.gmra.mrb[76].mxu0 %v28769_v35  ;;  %v23261_v28 = vunpack.i.h.bf16 %v23259_v9  ;;  %v23260_v29 = vunpack.i.l.bf16 %v23259_v9  ;;  %v23266_v45 = vunpack.i.h.bf16 %v23264_v42  ;;  %v23265_v31 = vunpack.i.l.bf16 %v23264_v42  ;;  %v19173_v9 = vld [vmem:[%s29983_s9 + $0x1f8] sm:$0xff]  ;;  %v29022_v42 = vld [vmem:[%s29983_s9 + $0x28] sm:$0xff] }
 0xeec   : > { %22061 = vmatpush3.bf16.msra.mxu0 %v28606_v52  ;;  %22097 = vmatpush3.bf16.msra.mxu1 %v22094_v57  ;;  %v28791_v52 = vld [vmem:[%s29983_s9 + $0x140] sm:$0xff]  ;;  %v28934_v57 = vld [vmem:[%s29983_s9 + $0x1c8] sm:$0xff] }
 0xeed   : > { %22063 = vmatprep.subr.bf16.mxu0 %v28609_v21  ;;  %22099 = vmatprep.subr.bf16.mxu1 %v22098_v46  ;;  %v22110_v22 = vpack.c.bf16 %v23261_v28, %v23260_v29  ;;  %v28829_v34 = vpack.c.bf16 %v23266_v45, %v23265_v31  ;;  %v28997_v28 = vld [vmem:[%s29983_s9 + $0x10] sm:$0xff]  ;;  %v29006_v29 = vld [vmem:[%s29983_s9 + $0x18] sm:$0xff]  ;;  %v29045_v31 = vld [vmem:[%s29983_s9 + $0x40] sm:$0xff] }
 0xeee   : > { %20592 = vmatprep.mubr.f32.mxu0 %v28777_v20  ;;  %v23269_v41 = vpop.permute.xlu0 %23268  ;;  %v23274_v50 = vpop.permute.xlu1 %23273  ;;  %v29038_v45 = vld [vmem:[%s29983_s9 + $0x38] sm:$0xff] }
 0xeef   : > { %20593 = vmatmul.mubr.f32.gmra.mrb[78].mxu0 %v28783_v16  ;;  %v23271_v23 = vunpack.i.h.bf16 %v23269_v41  ;;  %v23270_v63 = vunpack.i.l.bf16 %v23269_v41  ;;  %v23276_v8 = vunpack.i.h.bf16 %v23274_v50  ;;  %v23275_v47 = vunpack.i.l.bf16 %v23274_v50  ;;  %v29069_v41 = vld [vmem:[%s29983_s9 + $0x58] sm:$0xff] }
 0xef0   : > { %22065 = vmatpush3.bf16.msra.mxu0 %v28609_v21  ;;  %22101 = vmatpush3.bf16.msra.mxu1 %v22098_v46  ;;  %v28805_v21 = vld [vmem:[%s29983_s9 + $0x150] sm:$0xff] }
 0xef1   : > { %22067 = vmatprep.subr.bf16.mxu0 %v28612_v26  ;;  %22103 = vmatprep.subr.bf16.mxu1 %v22102_v10  ;;  %v28846_v54 = vpack.c.bf16 %v23271_v23, %v23270_v63  ;;  %v29084_v23 = vld [vmem:[%s29983_s9 + $0x68] sm:$0xff]  ;;  %v29090_v63 = vld [vmem:[%s29983_s9 + $0x70] sm:$0xff] }
 0xef2   : > { %20595 = vmatprep.mubr.f32.mxu0 %v28791_v52  ;;  %v23279_v32 = vpop.permute.xlu0 %23278  ;;  %v23284_v18 = vpop.permute.xlu1 %23283 }
 0xef3   : > { %20596 = vmatmul.mubr.f32.gmra.mrb[80].mxu0 %v28797_v60  ;;  %v23281_v56 = vunpack.i.h.bf16 %v23279_v32  ;;  %v23280_v2 = vunpack.i.l.bf16 %v23279_v32  ;;  %v23286_v48 = vunpack.i.h.bf16 %v23284_v18  ;;  %v23285_v12 = vunpack.i.l.bf16 %v23284_v18 }
 0xef4   : > { %22069 = vmatpush3.bf16.msra.mxu0 %v28612_v26  ;;  %22105 = vmatpush3.bf16.msra.mxu1 %v22102_v10  ;;  %v28819_v26 = vld [vmem:[%s29983_s9 + $0x160] sm:$0xff]  ;;  %v19172_v10 = vld [vmem:[%s29983_s9 + $0x1f0] sm:$0xff] }
 0xef5   : > { %22071 = vmatprep.subr.bf16.mxu0 %v28615_v13  ;;  %22107 = vmatprep.subr.bf16.mxu1 %v22106_v25  ;;  %v28889_v1 = vpack.c.bf16 %v23281_v56, %v23280_v2  ;;  %v28907_v17 = vpack.c.bf16 %v23286_v48, %v23285_v12  ;;  %v29135_v48 = vld [vmem:[%s29983_s9 + $0xa0] sm:$0xff] }
 0xef6   : > { %20598 = vmatprep.mubr.f32.mxu0 %v28805_v21  ;;  %v23289_v19 = vpop.permute.xlu0 %23288  ;;  %v23294_v39 = vpop.permute.xlu1 %23293 }
 0xef7   : > { %20599 = vmatmul.mubr.f32.gmra.mrb[82].mxu0 %v28811_v15  ;;  %v23291_v33 = vunpack.i.h.bf16 %v23289_v19  ;;  %v23290_v37 = vunpack.i.l.bf16 %v23289_v19  ;;  %v23296_v61 = vunpack.i.h.bf16 %v23294_v39 }
 0xef8   : > { %22073 = vmatpush3.bf16.msra.mxu0 %v28615_v13  ;;  %22109 = vmatpush3.bf16.msra.mxu1 %v22106_v25  ;;  %v28835_v13 = vld [vmem:[%s29983_s9 + $0x170] sm:$0xff]  ;;  %v28992_v25 = vld [vmem:[%s29983_s9 + $0x8] sm:$0xff] }
 0xef9   : > { %22075 = vmatprep.subr.bf16.mxu0 %v28621_v4  ;;  %22111 = vmatprep.subr.bf16.mxu1 %v22110_v22  ;;  %v28925_v51 = vpack.c.bf16 %v23291_v33, %v23290_v37 }
 0xefa   : > { %20601 = vmatprep.mubr.f32.mxu0 %v28819_v26  ;;  %v23299_v58 = vpop.permute.xlu0 %23298  ;;  %v23304_v53 = vpop.permute.xlu1 %23303 }
 0xefb   : > { %20602 = vmatmul.mubr.f32.gmra.mrb[84].mxu0 %v28825_v11  ;;  %v23300_v46 = vunpack.i.l.bf16 %v23299_v58  ;;  %v23306_v5 = vunpack.i.h.bf16 %v23304_v53 }
 0xefc   : > { %22077 = vmatpush3.bf16.msra.mxu0 %v28621_v4  ;;  %22113 = vmatpush3.bf16.msra.mxu1 %v22110_v22  ;;  %v28853_v4 = vld [vmem:[%s29983_s9 + $0x180] sm:$0xff]  ;;  %v29054_v22 = vld [vmem:[%s29983_s9 + $0x48] sm:$0xff] }
 0xefd   : > { %22079 = vmatprep.subr.bf16.mxu0 %v28624_v38  ;;  %22115 = vmatprep.subr.bf16.mxu1 %v28829_v34 }
 0xefe   : > { %20604 = vmatprep.mubr.f32.mxu0 %v28835_v13 }
 0xeff   : > { %20605 = vmatmul.mubr.f32.gmra.mrb[86].mxu0 %v28841_v27  ;;  %20744 = vmatmul.mubr.f32.vlgmr.msra.gmra.mrb[88].mxu1 %v28742_v30  ;;  %v28905_v30 = vld [vmem:[%s29983_s9 + $0x1b0] sm:$0xff] }
 0xf00   : > { %22081 = vmatpush3.bf16.msra.mxu0 %v28624_v38  ;;  %22117 = vmatpush3.bf16.msra.mxu1 %v28829_v34  ;;  %v28871_v38 = vpack.c.bf16 %v23276_v8, %v23275_v47  ;;  %v29098_v8 = vld [vmem:[%s29983_s9 + $0x78] sm:$0xff]  ;;  %v29105_v47 = vld [vmem:[%s29983_s9 + $0x80] sm:$0xff] }
 0xf01   : > { %22119 = vmatprep.subr.bf16.mxu1 %v28846_v54  ;;  %22147 = vmatprep.subr.bf16.mxu0 %v28829_v34 }
 0xf02   : > { %20607 = vmatprep.mubr.f32.mxu0 %v28853_v4  ;;  %20746 = vmatprep.mubr.f32.mxu1 %v28749_v14  ;;  %v28923_v14 = vld [vmem:[%s29983_s9 + $0x1c0] sm:$0xff] }
 0xf03   : > { %20608 = vmatmul.mubr.f32.gmra.mrb[88].mxu0 %v28860_v36  ;;  %20747 = vmatmul.mubr.f32.gmra.mrb[90].mxu1 %v28755_v24  ;;  %v23295_v24 = vunpack.i.l.bf16 %v23294_v39 }
 0xf04   : > { %22121 = vmatpush3.bf16.msra.mxu1 %v28846_v54  ;;  %20610 = vmatprep.mubr.f32.mxu0 %v28867_v7 }
 0xf05   : > { %22123 = vmatprep.subr.bf16.mxu1 %v28871_v38  ;;  %20749 = vmatprep.mubr.f32.mxu1 %v28763_v40  ;;  %v28941_v40 = vld [vmem:[%s29983_s9 + $0x1d0] sm:$0xff]  ;;  %v28943_v59 = vpack.c.bf16 %v23296_v61, %v23295_v24  ;;  %v15888_v61 = vld [vmem:[%s29983_s9 + $0xc0] sm:$0xff] }
 0xf07   : > { %20611 = vmatmul.mubr.f32.gmra.mrb[90].mxu0 %v28880_v49  ;;  %20750 = vmatmul.mubr.f32.gmra.mrb[92].mxu1 %v28769_v35  ;;  %v23301_v35 = vunpack.i.h.bf16 %v23299_v58 }
 0xf08   : > { %22125 = vmatpush3.bf16.msra.mxu1 %v28871_v38  ;;  %20613 = vmatprep.mubr.f32.mxu0 %v28887_v3 }
 0xf09   : > { %22127 = vmatprep.subr.bf16.mxu1 %v28889_v1  ;;  %20752 = vmatprep.mubr.f32.mxu1 %v28777_v20  ;;  %v28957_v20 = vld [vmem:[%s29983_s9 + $0x1e0] sm:$0xff]  ;;  %v28959_v55 = vpack.c.bf16 %v23301_v35, %v23300_v46 }
 0xf0b   : > { %20614 = vmatmul.mubr.f32.gmra.mrb[92].mxu0 %v28898_v44  ;;  %20753 = vmatmul.mubr.f32.gmra.mrb[94].mxu1 %v28783_v16  ;;  %v23305_v16 = vunpack.i.l.bf16 %v23304_v53 }
 0xf0c   : > { %22129 = vmatpush3.bf16.msra.mxu1 %v28889_v1  ;;  %20616 = vmatprep.mubr.f32.mxu0 %v28905_v30 }
 0xf0d   : > { %22131 = vmatprep.subr.bf16.mxu1 %v28907_v17  ;;  %20755 = vmatprep.mubr.f32.mxu1 %v28791_v52  ;;  %v28972_v52 = vpack.c.bf16 %v23306_v5, %v23305_v16  ;;  %v15893_v16 = vld [vmem:[%s29983_s9 + $0xe8] sm:$0xff] }
 0xf0f   : > { %20617 = vmatmul.mubr.f32.gmra.mrb[94].mxu0 %v28916_v0  ;;  %20756 = vmatmul.mubr.f32.gmra.mrb[96].mxu1 %v28797_v60  ;;  %v28984_v60 = vld [vmem:[%s29983_s9] sm:$0xff] }
 0xf10   : > { %22133 = vmatpush3.bf16.msra.mxu1 %v28907_v17  ;;  %20619 = vmatprep.mubr.f32.mxu0 %v28923_v14 }
 0xf11   : > { %22135 = vmatprep.subr.bf16.mxu1 %v28925_v51  ;;  %20758 = vmatprep.mubr.f32.mxu1 %v28805_v21  ;;  %v29013_v21 = vld [vmem:[%s29983_s9 + $0x20] sm:$0xff] }
 0xf13   : > { %20620 = vmatmul.mubr.f32.gmra.mrb[96].mxu0 %v28934_v57  ;;  %20759 = vmatmul.mubr.f32.gmra.mrb[98].mxu1 %v28811_v15  ;;  %v29029_v15 = vld [vmem:[%s29983_s9 + $0x30] sm:$0xff] }
 0xf14   : > { %22137 = vmatpush3.bf16.msra.mxu1 %v28925_v51  ;;  %20622 = vmatprep.mubr.f32.mxu0 %v28941_v40 }
 0xf15   : > { %22139 = vmatprep.subr.bf16.mxu1 %v28943_v59  ;;  %20761 = vmatprep.mubr.f32.mxu1 %v28819_v26  ;;  %v29061_v26 = vld [vmem:[%s29983_s9 + $0x50] sm:$0xff] }
 0xf17   : > { %20623 = vmatmul.mubr.f32.gmra.mrb[98].mxu0 %v19169_v43  ;;  %20762 = vmatmul.mubr.f32.gmra.mrb[100].mxu1 %v28825_v11  ;;  %v29076_v11 = vld [vmem:[%s29983_s9 + $0x60] sm:$0xff] }
 0xf18   : > { %22141 = vmatpush3.bf16.msra.mxu1 %v28943_v59  ;;  %20625 = vmatprep.mubr.f32.mxu0 %v28957_v20 }
 0xf19   : > { %22143 = vmatprep.subr.bf16.mxu1 %v28959_v55  ;;  %20764 = vmatprep.mubr.f32.mxu1 %v28835_v13 }
 0xf1b   : > { %20626 = vmatmul.mubr.f32.gmra.mrb[100].mxu0 %v19171_v62  ;;  %20765 = vmatmul.mubr.f32.gmra.mrb[102].mxu1 %v28841_v27  ;;  %v23314_v27 = vpop.permute.xlu1 %23313 }
 0xf1c   : > { %22145 = vmatpush3.bf16.msra.mxu1 %v28959_v55  ;;  %20628 = vmatprep.mubr.f32.mxu0 %v19172_v10 }
 0xf1d   : > { %22179 = vmatprep.subr.bf16.mxu1 %v28972_v52  ;;  %20767 = vmatprep.mubr.f32.mxu1 %v28853_v4  ;;  %v23315_v4 = vunpack.i.l.bf16 %v23314_v27 }
 0xf1f   : > { %20629 = vmatmul.mubr.f32.gmra.mrb[102].mxu0 %v19173_v9  ;;  %20768 = vmatmul.mubr.f32.gmra.mrb[104].mxu1 %v28860_v36 }
 0xf20   : > { %20663 = vmatprep.mubr.f32.mxu0 %v28984_v60  ;;  %20770 = vmatprep.mubr.f32.mxu1 %v28867_v7  ;;  %v29114_v7 = vld [vmem:[%s29983_s9 + $0x88] sm:$0xff] }
 0xf23   : > { %20664 = vmatmul.mubr.f32.vlgmr.msra.gmra.mrb[72].mxu0 %v28992_v25  ;;  %20771 = vmatmul.mubr.f32.gmra.mrb[106].mxu1 %v28880_v49  ;;  %v23324_v49 = vpop.permute.xlu1 %23323 }
 0xf24   : > { %22149 = vmatpush3.bf16.msra.mxu0 %v28829_v34  ;;  %20666 = vmatprep.mubr.f32.mxu0 %v28997_v28  ;;  %v23309_v34 = vpop.permute.xlu0 %23308  ;;  %v23326_v12 = vunpack.i.h.bf16 %v23324_v49 }
 0xf25   : > { %22151 = vmatprep.subr.bf16.mxu0 %v28846_v54  ;;  %20773 = vmatprep.mubr.f32.mxu1 %v28887_v3  ;;  %v23311_v13 = vunpack.i.h.bf16 %v23309_v34  ;;  %v23310_v50 = vunpack.i.l.bf16 %v23309_v34  ;;  %v29129_v3 = vld [vmem:[%s29983_s9 + $0x98] sm:$0xff]  ;;  %v19190_v34 = vld [vmem:[%s29983_s9 + $0x280] sm:$0xff] }
 0xf27   : > { %20667 = vmatmul.mubr.f32.gmra.mrb[74].mxu0 %v29006_v29  ;;  %20774 = vmatmul.mubr.f32.gmra.mrb[108].mxu1 %v28898_v44  ;;  %v22182_v32 = vpack.c.bf16 %v23311_v13, %v23310_v50  ;;  %v19193_v13 = vld [vmem:[%s29983_s9 + $0x298] sm:$0xff]  ;;  %v19194_v50 = vld [vmem:[%s29983_s9 + $0x2a0] sm:$0xff] }
 0xf28   : > { %22153 = vmatpush3.bf16.msra.mxu0 %v28846_v54  ;;  %20669 = vmatprep.mubr.f32.mxu0 %v29013_v21  ;;  %v23316_v54 = vunpack.i.h.bf16 %v23314_v27  ;;  %v23319_v36 = vpop.permute.xlu0 %23318  ;;  %v19195_v27 = vld [vmem:[%s29983_s9 + $0x2a8] sm:$0xff] }
 0xf29   : > { %22155 = vmatprep.subr.bf16.mxu0 %v28871_v38  ;;  %20776 = vmatprep.mubr.f32.mxu1 %v28905_v30  ;;  %v23321_v2 = vunpack.i.h.bf16 %v23319_v36  ;;  %v23320_v18 = vunpack.i.l.bf16 %v23319_v36  ;;  %v29143_v30 = vld [vmem:[%s29983_s9 + $0xa8] sm:$0xff]  ;;  %v19201_v36 = vld [vmem:[%s29983_s9 + $0x2d8] sm:$0xff] }
 0xf2a   : > { %v22186_v56 = vpack.c.bf16 %v23316_v54, %v23315_v4  ;;  %v19198_v54 = vld [vmem:[%s29983_s9 + $0x2c0] sm:$0xff]  ;;  %v19199_v4 = vld [vmem:[%s29983_s9 + $0x2c8] sm:$0xff] }
 0xf2b   : > { %20670 = vmatmul.mubr.f32.gmra.mrb[76].mxu0 %v29022_v42  ;;  %20777 = vmatmul.mubr.f32.gmra.mrb[110].mxu1 %v28916_v0  ;;  %v22190_v19 = vpack.c.bf16 %v23321_v2, %v23320_v18  ;;  %v23334_v0 = vpop.permute.xlu1 %23333  ;;  %v19205_v2 = vld [vmem:[%s29983_s9 + $0x2f8] sm:$0xff] }
 0xf2c   : > { %22157 = vmatpush3.bf16.msra.mxu0 %v28871_v38  ;;  %20672 = vmatprep.mubr.f32.mxu0 %v29029_v15  ;;  %v29120_v38 = vld [vmem:[%s29983_s9 + $0x90] sm:$0xff]  ;;  %v23329_v44 = vpop.permute.xlu0 %23328  ;;  %v23336_v24 = vunpack.i.h.bf16 %v23334_v0 }
 0xf2d   : > { %22159 = vmatprep.subr.bf16.mxu0 %v28889_v1  ;;  %20779 = vmatprep.mubr.f32.mxu1 %v28923_v14  ;;  %v23331_v37 = vunpack.i.h.bf16 %v23329_v44  ;;  %v23330_v39 = vunpack.i.l.bf16 %v23329_v44  ;;  %v15887_v14 = vld [vmem:[%s29983_s9 + $0xb8] sm:$0xff] }
 0xf2f   : > { %20673 = vmatmul.mubr.f32.gmra.mrb[78].mxu0 %v29038_v45  ;;  %20780 = vmatmul.mubr.f32.gmra.mrb[112].mxu1 %v28934_v57  ;;  %v22198_v58 = vpack.c.bf16 %v23331_v37, %v23330_v39  ;;  %v29292_v18 = vpop.permute.xlu1 %17698 }
 0xf30   : > { %22161 = vmatpush3.bf16.msra.mxu0 %v28889_v1  ;;  %20675 = vmatprep.mubr.f32.mxu0 %v29045_v31  ;;  %v23325_v1 = vunpack.i.l.bf16 %v23324_v49  ;;  %v23339_v57 = vpop.permute.xlu0 %23338 }
 0xf31   : > { %22163 = vmatprep.subr.bf16.mxu0 %v28907_v17  ;;  %20782 = vmatprep.mubr.f32.mxu1 %v28941_v40  ;;  %v15889_v40 = vld [vmem:[%s29983_s9 + $0xc8] sm:$0xff]  ;;  %v23341_v46 = vunpack.i.h.bf16 %v23339_v57  ;;  %v23340_v53 = vunpack.i.l.bf16 %v23339_v57 }
 0xf32   : > { %v22194_v33 = vpack.c.bf16 %v23326_v12, %v23325_v1 }
 0xf33   : > { %20676 = vmatmul.mubr.f32.gmra.mrb[80].mxu0 %v29054_v22  ;;  %20783 = vmatmul.mubr.f32.gmra.mrb[114].mxu1 %v19169_v43  ;;  %v15891_v43 = vld [vmem:[%s29983_s9 + $0xd8] sm:$0xff]  ;;  %v22206_v5 = vpack.c.bf16 %v23341_v46, %v23340_v53 }
 0xf34   : > { %22165 = vmatpush3.bf16.msra.mxu0 %v28907_v17  ;;  %20678 = vmatprep.mubr.f32.mxu0 %v29061_v26  ;;  %v29149_v17 = vld [vmem:[%s29983_s9 + $0xb0] sm:$0xff]  ;;  %v29294_v49 = vpop.permute.xlu0 %17703 }
 0xf35   : > { %22167 = vmatprep.subr.bf16.mxu0 %v28925_v51  ;;  %20785 = vmatprep.mubr.f32.mxu1 %v28957_v20  ;;  %v15892_v20 = vld [vmem:[%s29983_s9 + $0xe0] sm:$0xff] }
 0xf37   : > { %20679 = vmatmul.mubr.f32.gmra.mrb[82].mxu0 %v29069_v41  ;;  %20786 = vmatmul.mubr.f32.gmra.mrb[116].mxu1 %v19171_v62  ;;  %v15895_v62 = vld [vmem:[%s29983_s9 + $0xf8] sm:$0xff] }
 0xf38   : > { %22169 = vmatpush3.bf16.msra.mxu0 %v28925_v51  ;;  %20681 = vmatprep.mubr.f32.mxu0 %v29076_v11  ;;  %v23335_v51 = vunpack.i.l.bf16 %v23334_v0 }
 0xf39   : > { %22171 = vmatprep.subr.bf16.mxu0 %v28943_v59  ;;  %20788 = vmatprep.mubr.f32.mxu1 %v19172_v10  ;;  %v19174_v10 = vld [vmem:[%s29983_s9 + $0x200] sm:$0xff] }
 0xf3a   : > { %v22202_v35 = vpack.c.bf16 %v23336_v24, %v23335_v51 }
 0xf3b   : > { %20682 = vmatmul.mubr.f32.gmra.mrb[84].mxu0 %v29084_v23  ;;  %20789 = vmatmul.mubr.f32.gmra.mrb[118].mxu1 %v19173_v9  ;;  %v19176_v9 = vld [vmem:[%s29983_s9 + $0x210] sm:$0xff] }
 0xf3c   : > { %22173 = vmatpush3.bf16.msra.mxu0 %v28943_v59  ;;  %20684 = vmatprep.mubr.f32.mxu0 %v29090_v63  ;;  %v15890_v59 = vld [vmem:[%s29983_s9 + $0xd0] sm:$0xff] }
 0xf3d   : > { %22175 = vmatprep.subr.bf16.mxu0 %v28959_v55  ;;  %20823 = vmatprep.mubr.f32.mxu1 %v28984_v60  ;;  %v19177_v60 = vld [vmem:[%s29983_s9 + $0x218] sm:$0xff] }
 0xf3f   : > { %20685 = vmatmul.mubr.f32.gmra.mrb[86].mxu0 %v29098_v8  ;;  %20824 = vmatmul.mubr.f32.vlgmr.msra.gmra.mrb[88].mxu1 %v28992_v25  ;;  %v19178_v25 = vld [vmem:[%s29983_s9 + $0x220] sm:$0xff] }
 0xf40   : > { %22177 = vmatpush3.bf16.msra.mxu0 %v28959_v55  ;;  %22181 = vmatpush3.bf16.msra.mxu1 %v28972_v52  ;;  %v15894_v55 = vld [vmem:[%s29983_s9 + $0xf0] sm:$0xff]  ;;  %v19175_v52 = vld [vmem:[%s29983_s9 + $0x208] sm:$0xff] }
 0xf41   : > { %22183 = vmatprep.subr.bf16.mxu1 %v22182_v32  ;;  %20687 = vmatprep.mubr.f32.mxu0 %v29105_v47 }
 0xf42   : > { %20826 = vmatprep.mubr.f32.mxu1 %v28997_v28  ;;  %v19179_v28 = vld [vmem:[%s29983_s9 + $0x228] sm:$0xff] }
 0xf43   : > { %20688 = vmatmul.mubr.f32.gmra.mrb[88].mxu0 %v29114_v7  ;;  %20827 = vmatmul.mubr.f32.gmra.mrb[90].mxu1 %v29006_v29  ;;  %v19180_v29 = vld [vmem:[%s29983_s9 + $0x230] sm:$0xff] }
 0xf44   : > { %22185 = vmatpush3.bf16.msra.mxu1 %v22182_v32  ;;  %20690 = vmatprep.mubr.f32.mxu0 %v29120_v38  ;;  %v19200_v32 = vld [vmem:[%s29983_s9 + $0x2d0] sm:$0xff] }
 0xf45   : > { %22187 = vmatprep.subr.bf16.mxu1 %v22186_v56  ;;  %20829 = vmatprep.mubr.f32.mxu1 %v29013_v21  ;;  %v19181_v21 = vld [vmem:[%s29983_s9 + $0x238] sm:$0xff] }
 0xf47   : > { %20691 = vmatmul.mubr.f32.gmra.mrb[90].mxu0 %v29129_v3  ;;  %20830 = vmatmul.mubr.f32.gmra.mrb[92].mxu1 %v29022_v42  ;;  %v19182_v42 = vld [vmem:[%s29983_s9 + $0x240] sm:$0xff] }
 0xf48   : > { %22189 = vmatpush3.bf16.msra.mxu1 %v22186_v56  ;;  %20693 = vmatprep.mubr.f32.mxu0 %v29135_v48  ;;  %v19204_v56 = vld [vmem:[%s29983_s9 + $0x2f0] sm:$0xff] }
 0xf49   : > { %22191 = vmatprep.subr.bf16.mxu1 %v22190_v19  ;;  %20832 = vmatprep.mubr.f32.mxu1 %v29029_v15  ;;  %v19183_v15 = vld [vmem:[%s29983_s9 + $0x248] sm:$0xff] }
 0xf4b   : > { %20694 = vmatmul.mubr.f32.gmra.mrb[92].mxu0 %v29143_v30  ;;  %20833 = vmatmul.mubr.f32.gmra.mrb[94].mxu1 %v29038_v45  ;;  %v19184_v45 = vld [vmem:[%s29983_s9 + $0x250] sm:$0xff] }
 0xf4c   : > { %22193 = vmatpush3.bf16.msra.mxu1 %v22190_v19  ;;  %20696 = vmatprep.mubr.f32.mxu0 %v29149_v17 }
 0xf4d   : > { %22195 = vmatprep.subr.bf16.mxu1 %v22194_v33  ;;  %20835 = vmatprep.mubr.f32.mxu1 %v29045_v31  ;;  %v19185_v31 = vld [vmem:[%s29983_s9 + $0x258] sm:$0xff] }
 0xf4f   : > { %20697 = vmatmul.mubr.f32.gmra.mrb[94].mxu0 %v15887_v14  ;;  %20836 = vmatmul.mubr.f32.gmra.mrb[96].mxu1 %v29054_v22  ;;  %v19186_v22 = vld [vmem:[%s29983_s9 + $0x260] sm:$0xff] }
 0xf50   : > { %22197 = vmatpush3.bf16.msra.mxu1 %v22194_v33  ;;  %20699 = vmatprep.mubr.f32.mxu0 %v15888_v61 }
 0xf51   : > { %22199 = vmatprep.subr.bf16.mxu1 %v22198_v58  ;;  %20838 = vmatprep.mubr.f32.mxu1 %v29061_v26  ;;  %v19187_v26 = vld [vmem:[%s29983_s9 + $0x268] sm:$0xff] }
 0xf53   : > { %20700 = vmatmul.mubr.f32.gmra.mrb[96].mxu0 %v15889_v40  ;;  %20839 = vmatmul.mubr.f32.gmra.mrb[98].mxu1 %v29069_v41  ;;  %v19188_v41 = vld [vmem:[%s29983_s9 + $0x270] sm:$0xff] }
 0xf54   : > { %22201 = vmatpush3.bf16.msra.mxu1 %v22198_v58  ;;  %20702 = vmatprep.mubr.f32.mxu0 %v15890_v59 }
 0xf55   : > { %22203 = vmatprep.subr.bf16.mxu1 %v22202_v35  ;;  %20841 = vmatprep.mubr.f32.mxu1 %v29076_v11  ;;  %v19189_v11 = vld [vmem:[%s29983_s9 + $0x278] sm:$0xff] }
 0xf57   : > { %20703 = vmatmul.mubr.f32.gmra.mrb[98].mxu0 %v15891_v43  ;;  %20842 = vmatmul.mubr.f32.gmra.mrb[100].mxu1 %v29084_v23  ;;  %v19191_v23 = vld [vmem:[%s29983_s9 + $0x288] sm:$0xff] }
 0xf58   : > { %22205 = vmatpush3.bf16.msra.mxu1 %v22202_v35  ;;  %20705 = vmatprep.mubr.f32.mxu0 %v15892_v20 }
 0xf59   : > { %22207 = vmatprep.subr.bf16.mxu1 %v22206_v5  ;;  %20844 = vmatprep.mubr.f32.mxu1 %v29090_v63  ;;  %v19192_v63 = vld [vmem:[%s29983_s9 + $0x290] sm:$0xff] }
 0xf5b   : > { %20706 = vmatmul.mubr.f32.gmra.mrb[100].mxu0 %v15893_v16  ;;  %20845 = vmatmul.mubr.f32.gmra.mrb[102].mxu1 %v29098_v8  ;;  %v19196_v8 = vld [vmem:[%s29983_s9 + $0x2b0] sm:$0xff] }
 0xf5c   : > { %22209 = vmatpush3.bf16.msra.mxu1 %v22206_v5  ;;  %20708 = vmatprep.mubr.f32.mxu0 %v15894_v55 }
 0xf5d   : > { %20847 = vmatprep.mubr.f32.mxu1 %v29105_v47  ;;  %v19197_v47 = vld [vmem:[%s29983_s9 + $0x2b8] sm:$0xff] }
 0xf5f   : > { %20709 = vmatmul.mubr.f32.gmra.mrb[102].mxu0 %v15895_v62  ;;  %20848 = vmatmul.mubr.f32.gmra.mrb[104].mxu1 %v29114_v7  ;;  %v19202_v7 = vld [vmem:[%s29983_s9 + $0x2e0] sm:$0xff] }
 0xf60   : > { %20850 = vmatprep.mubr.f32.mxu1 %v29120_v38  ;;  %20903 = vmatprep.mubr.f32.mxu0 %v19174_v10  ;;  %v19203_v38 = vld [vmem:[%s29983_s9 + $0x2e8] sm:$0xff] }
 0xf63   : > { %20851 = vmatmul.mubr.f32.gmra.mrb[106].mxu1 %v29129_v3  ;;  %20904 = vmatmul.mubr.f32.vlgmr.msra.gmra.mrb[72].mxu0 %v19175_v52  ;;  %v17619_v3 = vpop.permute.xlu1 %17618 }
 0xf64   : > { %20853 = vmatprep.mubr.f32.mxu1 %v29135_v48  ;;  %20906 = vmatprep.mubr.f32.mxu0 %v19176_v9  ;;  %v17624_v48 = vpop.permute.xlu0 %17623 }
 0xf67   : > { %20854 = vmatmul.mubr.f32.gmra.mrb[108].mxu1 %v29143_v30  ;;  %20907 = vmatmul.mubr.f32.gmra.mrb[74].mxu0 %v19177_v60  ;;  %v29296_v12 = vpop.permute.xlu1 %17708 }
 0xf68   : > { %20856 = vmatprep.mubr.f32.mxu1 %v29149_v17  ;;  %20909 = vmatprep.mubr.f32.mxu0 %v19178_v25  ;;  %v29298_v1 = vpop.permute.xlu0 %17713 }
 0xf6b   : > { %20857 = vmatmul.mubr.f32.gmra.mrb[110].mxu1 %v15887_v14  ;;  %20910 = vmatmul.mubr.f32.gmra.mrb[76].mxu0 %v19179_v28  ;;  %v17629_v19 = vpop.permute.xlu1 %17628 }
 0xf6c   : > { %20859 = vmatprep.mubr.f32.mxu1 %v15888_v61  ;;  %20912 = vmatprep.mubr.f32.mxu0 %v19180_v29  ;;  %v17634_v44 = vpop.permute.xlu0 %17633 }
 0xf6f   : > { %20860 = vmatmul.mubr.f32.gmra.mrb[112].mxu1 %v15889_v40  ;;  %20913 = vmatmul.mubr.f32.gmra.mrb[78].mxu0 %v19181_v21  ;;  %v29300_v30 = vpop.permute.xlu1 %17718 }
 0xf70   : > { %20862 = vmatprep.mubr.f32.mxu1 %v15890_v59  ;;  %20915 = vmatprep.mubr.f32.mxu0 %v19182_v42  ;;  %v29302_v17 = vpop.permute.xlu0 %17723 }
 0xf73   : > { %20863 = vmatmul.mubr.f32.gmra.mrb[114].mxu1 %v15891_v43  ;;  %20916 = vmatmul.mubr.f32.gmra.mrb[80].mxu0 %v19183_v15  ;;  %v17639_v33 = vpop.permute.xlu1 %17638 }
 0xf74   : > { %20865 = vmatprep.mubr.f32.mxu1 %v15892_v20  ;;  %20918 = vmatprep.mubr.f32.mxu0 %v19184_v45  ;;  %v17644_v37 = vpop.permute.xlu0 %17643 }
 0xf77   : > { %20866 = vmatmul.mubr.f32.gmra.mrb[116].mxu1 %v15893_v16  ;;  %20919 = vmatmul.mubr.f32.gmra.mrb[82].mxu0 %v19185_v31  ;;  %v29304_v39 = vpop.permute.xlu1 %17728 }
 0xf78   : > { %20868 = vmatprep.mubr.f32.mxu1 %v15894_v55  ;;  %20921 = vmatprep.mubr.f32.mxu0 %v19186_v22  ;;  %v29306_v0 = vpop.permute.xlu0 %17733 }
 0xf7b   : > { %20869 = vmatmul.mubr.f32.gmra.mrb[118].mxu1 %v15895_v62  ;;  %20922 = vmatmul.mubr.f32.gmra.mrb[84].mxu0 %v19187_v26  ;;  %v17649_v14 = vpop.permute.xlu1 %17648 }
 0xf7c   : > { %20924 = vmatprep.mubr.f32.mxu0 %v19188_v41  ;;  %20983 = vmatprep.mubr.f32.mxu1 %v19174_v10  ;;  %v17654_v61 = vpop.permute.xlu0 %17653 }
 0xf7f   : > { %20925 = vmatmul.mubr.f32.gmra.mrb[86].mxu0 %v19189_v11  ;;  %20984 = vmatmul.mubr.f32.vlgmr.msra.gmra.mrb[88].mxu1 %v19175_v52  ;;  %v29308_v24 = vpop.permute.xlu1 %17738 }
 0xf80   : > { %20927 = vmatprep.mubr.f32.mxu0 %v19190_v34  ;;  %20986 = vmatprep.mubr.f32.mxu1 %v19176_v9  ;;  %v29310_v51 = vpop.permute.xlu0 %17743 }
 0xf83   : > { %20928 = vmatmul.mubr.f32.gmra.mrb[88].mxu0 %v19191_v23  ;;  %20987 = vmatmul.mubr.f32.gmra.mrb[90].mxu1 %v19177_v60  ;;  %v17659_v58 = vpop.permute.xlu1 %17658 }
 0xf84   : > { %20930 = vmatprep.mubr.f32.mxu0 %v19192_v63  ;;  %20989 = vmatprep.mubr.f32.mxu1 %v19178_v25  ;;  %v17664_v57 = vpop.permute.xlu0 %17663 }
 0xf87   : > { %20931 = vmatmul.mubr.f32.gmra.mrb[90].mxu0 %v19193_v13  ;;  %20990 = vmatmul.mubr.f32.gmra.mrb[92].mxu1 %v19179_v28  ;;  %v29312_v40 = vpop.permute.xlu1 %17748 }
 0xf88   : > { %20933 = vmatprep.mubr.f32.mxu0 %v19194_v50  ;;  %20992 = vmatprep.mubr.f32.mxu1 %v19180_v29  ;;  %v29314_v59 = vpop.permute.xlu0 %17753 }
 0xf8b   : > { %20934 = vmatmul.mubr.f32.gmra.mrb[92].mxu0 %v19195_v27  ;;  %20993 = vmatmul.mubr.f32.gmra.mrb[94].mxu1 %v19181_v21  ;;  %v17669_v43 = vpop.permute.xlu1 %17668 }
 0xf8c   : > { %20936 = vmatprep.mubr.f32.mxu0 %v19196_v8  ;;  %20995 = vmatprep.mubr.f32.mxu1 %v19182_v42  ;;  %v17674_v5 = vpop.permute.xlu0 %17673 }
 0xf8f   : > { %20937 = vmatmul.mubr.f32.gmra.mrb[94].mxu0 %v19197_v47  ;;  %20996 = vmatmul.mubr.f32.gmra.mrb[96].mxu1 %v19183_v15  ;;  %v29331_v28 = vpop.permute.xlu1 %17758 }
 0xf90   : > { %20939 = vmatprep.mubr.f32.mxu0 %v19198_v54  ;;  %20998 = vmatprep.mubr.f32.mxu1 %v19184_v45  ;;  %v29335_v42 = vpop.permute.xlu0 %17763 }
 0xf93   : > { %20940 = vmatmul.mubr.f32.gmra.mrb[96].mxu0 %v19199_v4  ;;  %20999 = vmatmul.mubr.f32.gmra.mrb[98].mxu1 %v19185_v31 }
 0xf94   : > { %20942 = vmatprep.mubr.f32.mxu0 %v19200_v32  ;;  %21001 = vmatprep.mubr.f32.mxu1 %v19186_v22 }
 0xf97   : > { %20943 = vmatmul.mubr.f32.gmra.mrb[98].mxu0 %v19201_v36  ;;  %21002 = vmatmul.mubr.f32.gmra.mrb[100].mxu1 %v19187_v26 }
 0xf98   : > { %20945 = vmatprep.mubr.f32.mxu0 %v19202_v7  ;;  %21004 = vmatprep.mubr.f32.mxu1 %v19188_v41 }
 0xf9b   : > { %20946 = vmatmul.mubr.f32.gmra.mrb[100].mxu0 %v19203_v38  ;;  %21005 = vmatmul.mubr.f32.gmra.mrb[102].mxu1 %v19189_v11 }
 0xf9c   : > { %20948 = vmatprep.mubr.f32.mxu0 %v19204_v56  ;;  %21007 = vmatprep.mubr.f32.mxu1 %v19190_v34 }
 0xf9f   : > { %20949 = vmatmul.mubr.f32.gmra.mrb[102].mxu0 %v19205_v2  ;;  %21008 = vmatmul.mubr.f32.gmra.mrb[104].mxu1 %v19191_v23 }
 0xfa0   : > { %21010 = vmatprep.mubr.f32.mxu1 %v19192_v63  ;;  %v17679_v63 = vpop.permute.xlu1 %17678 }
 0xfa3   : > { %21011 = vmatmul.mubr.f32.gmra.mrb[106].mxu1 %v19193_v13 }
 0xfa4   : > { %21013 = vmatprep.mubr.f32.mxu1 %v19194_v50 }
 0xfa7   : > { %21014 = vmatmul.mubr.f32.gmra.mrb[108].mxu1 %v19195_v27  ;;  %v17684_v27 = vpop.permute.xlu0 %17683 }
 0xfa8   : > { %21016 = vmatprep.mubr.f32.mxu1 %v19196_v8 }
 0xfab   : > { %21017 = vmatmul.mubr.f32.gmra.mrb[110].mxu1 %v19197_v47 }
 0xfac   : > { %21019 = vmatprep.mubr.f32.mxu1 %v19198_v54 }
 0xfaf   : > { %21020 = vmatmul.mubr.f32.gmra.mrb[112].mxu1 %v19199_v4 }
 0xfb0   : > { %21022 = vmatprep.mubr.f32.mxu1 %v19200_v32 }
 0xfb3   : > { %21023 = vmatmul.mubr.f32.gmra.mrb[114].mxu1 %v19201_v36 }
 0xfb4   : > { %21025 = vmatprep.mubr.f32.mxu1 %v19202_v7 }
 0xfb7   : > { %21026 = vmatmul.mubr.f32.gmra.mrb[116].mxu1 %v19203_v38 }
 0xfb8   : > { %21028 = vmatprep.mubr.f32.mxu1 %v19204_v56  ;;  %v29368_v56 = vpop.permute.xlu1 %17768 }
 0xfbb   : > { %21029 = vmatmul.mubr.f32.gmra.mrb[118].mxu1 %v19205_v2 }
 0xfbc   : > { %21063 = vmatprep.mubr.msk.f32.mxu1 %vm23526_vm11, %v23501_v6 }
0x1036   : > { %v20905_v35 = vpop.f32.mrb[72].mxu0 }
0x1037   : > { %v29316_v46 = vadd.f32 %v20905_v35, %v17624_v48  ;;  %v17088_v53 = vpop.f32.mrb[73].mxu0  ;;  %v29372_v48 = vpop.permute.xlu0 %17773 }
0x1038   : > { %v29318_v20 = vadd.f32 %v17619_v3, %v17088_v53 }
0x1039   : > { %v17809_v16 = vmax.f32 %v29316_v46, 0.0 }
0x103a   : > { %v17808_v55 = vmax.f32 %v29318_v20, 0.0  ;;  %v20908_v62 = vpop.f32.mrb[74].mxu0 }
0x103b   : > { %v29322_v10 = vadd.f32 %v20908_v62, %v17634_v44  ;;  %v17098_v52 = vpop.f32.mrb[75].mxu0  ;;  %v17689_v62 = vpop.permute.xlu1 %17688 }
0x103c   : > { %v23342_v9 = vpack.i.bf16 %v17809_v16, %v17808_v55  ;;  %v29328_v60 = vadd.f32 %v17629_v19, %v17098_v52 }
0x103d   : > { %v17811_v25 = vmax.f32 %v29322_v10, 0.0 }
0x103e   : > { %v17810_v29 = vmax.f32 %v29328_v60, 0.0  ;;  %23343 = vrot.lane.b32.xlu0 %v23342_v9, %s30014_s25  ;;  %v20911_v21 = vpop.f32.mrb[76].mxu0 }
0x103f   : > { %v29337_v15 = vadd.f32 %v20911_v21, %v17644_v37  ;;  %v17108_v45 = vpop.f32.mrb[77].mxu0 }
0x1040   : > { %v23347_v31 = vpack.i.bf16 %v17811_v25, %v17810_v29  ;;  %v29343_v22 = vadd.f32 %v17639_v33, %v17108_v45 }
0x1041   : > { %v17813_v26 = vmax.f32 %v29337_v15, 0.0 }
0x1042   : > { %v17812_v41 = vmax.f32 %v29343_v22, 0.0  ;;  %23348 = vrot.lane.b32.xlu0 %v23347_v31, %s30014_s25  ;;  %v20914_v11 = vpop.f32.mrb[78].mxu0  ;;  %v23460_v31 = vld [vmem:[%s29984_s10 + $0x8] sm:$0xff] }
0x1043   : > { %v29348_v34 = vadd.f32 %v20914_v11, %v17654_v61  ;;  %v17118_v23 = vpop.f32.mrb[79].mxu0 }
0x1044   : > { %v23352_v13 = vpack.i.bf16 %v17813_v26, %v17812_v41  ;;  %v29354_v50 = vadd.f32 %v17649_v14, %v17118_v23 }
0x1045   : > { %v17815_v8 = vmax.f32 %v29348_v34, 0.0 }
0x1046   : > { %v17814_v47 = vmax.f32 %v29354_v50, 0.0  ;;  %23353 = vrot.lane.b32.xlu0 %v23352_v13, %s30014_s25  ;;  %v20917_v54 = vpop.f32.mrb[80].mxu0 }
0x1047   : > { %v29359_v4 = vadd.f32 %v20917_v54, %v17664_v57  ;;  %v17128_v32 = vpop.f32.mrb[81].mxu0 }
0x1048   : > { %v23357_v36 = vpack.i.bf16 %v17815_v8, %v17814_v47  ;;  %v29365_v7 = vadd.f32 %v17659_v58, %v17128_v32  ;;  %v23461_v32 = vld [vmem:[%s29984_s10] sm:$0xff] }
0x1049   : > { %v17817_v38 = vmax.f32 %v29359_v4, 0.0 }
0x104a   : > { %v17816_v2 = vmax.f32 %v29365_v7, 0.0  ;;  %23358 = vrot.lane.b32.xlu0 %v23357_v36, %s30014_s25  ;;  %v20920_v3 = vpop.f32.mrb[82].mxu0 }
0x104b   : > { %v29374_v19 = vadd.f32 %v20920_v3, %v17674_v5  ;;  %v17138_v44 = vpop.f32.mrb[83].mxu0 }
0x104c   : > { %v23362_v33 = vpack.i.bf16 %v17817_v38, %v17816_v2  ;;  %v29380_v37 = vadd.f32 %v17669_v43, %v17138_v44  ;;  %v17694_v43 = vpop.permute.xlu0 %17693 }
0x104d   : > { %v17819_v14 = vmax.f32 %v29374_v19, 0.0 }
0x104e   : > { %v17818_v61 = vmax.f32 %v29380_v37, 0.0  ;;  %23363 = vrot.lane.b32.xlu0 %v23362_v33, %s30014_s25  ;;  %v20923_v58 = vpop.f32.mrb[84].mxu0 }
0x104f   : > { %v29385_v57 = vadd.f32 %v20923_v58, %v17684_v27  ;;  %v17148_v35 = vpop.f32.mrb[85].mxu0 }
0x1050   : > { %v23367_v53 = vpack.i.bf16 %v17819_v14, %v17818_v61  ;;  %v29391_v5 = vadd.f32 %v17679_v63, %v17148_v35 }
0x1051   : > { %v17821_v52 = vmax.f32 %v29385_v57, 0.0 }
0x1052   : > { %v17820_v9 = vmax.f32 %v29391_v5, 0.0  ;;  %v20985_v21 = vpop.f32.mrb[88].mxu1  ;;  %23368 = vrot.lane.b32.xlu0 %v23367_v53, %s30014_s25  ;;  %v20926_v45 = vpop.f32.mrb[86].mxu0 }
0x1053   : > { %v17841_v11 = vadd.f32 %v23460_v31, %v20985_v21  ;;  %v29399_v23 = vadd.f32 %v20926_v45, %v17694_v43  ;;  %v17158_v13 = vpop.f32.mrb[87].mxu0  ;;  %v17393_v63 = vpop.f32.mrb[89].mxu1 }
0x1054   : > { %v23372_v27 = vpack.i.bf16 %v17821_v52, %v17820_v9  ;;  %v29405_v54 = vadd.f32 %v17689_v62, %v17158_v13  ;;  %v17840_v36 = vadd.f32 %v23461_v32, %v17393_v63  ;;  %v23462_v62 = vld [vmem:[%s29984_s10 + $0x18] sm:$0xff]  ;;  %v23463_v63 = vld [vmem:[%s29984_s10 + $0x10] sm:$0xff] }
0x1055   : > { %v17873_v3 = vmax.f32 %v17841_v11, 0.0  ;;  %v17823_v44 = vmax.f32 %v29399_v23, 0.0 }
0x1056   : > { %v17822_v33 = vmax.f32 %v29405_v54, 0.0  ;;  %v17872_v58 = vmax.f32 %v17840_v36, 0.0  ;;  %v20988_v35 = vpop.f32.mrb[90].mxu1  ;;  %23373 = vrot.lane.b32.xlu0 %v23372_v27, %s30014_s25  ;;  %v20929_v53 = vpop.f32.mrb[88].mxu0 }
0x1057   : > { %v29415_v43 = vmax.f32 %v17809_v16, %v17873_v3  ;;  %v17843_v21 = vadd.f32 %v23462_v62, %v20988_v35  ;;  %v29421_v45 = vadd.f32 %v20929_v53, %v29294_v49  ;;  %v17168_v31 = vpop.f32.mrb[89].mxu0  ;;  %v17403_v11 = vpop.f32.mrb[91].mxu1 }
0x1058   : > { %v23417_v13 = vpack.i.bf16 %v17823_v44, %v17822_v33  ;;  %v29429_v46 = vmax.f32 %v17808_v55, %v17872_v58  ;;  %v29432_v16 = vadd.f32 %v29292_v18, %v17168_v31  ;;  %v17842_v49 = vadd.f32 %v23463_v63, %v17403_v11  ;;  %v23464_v18 = vld [vmem:[%s29984_s10 + $0x28] sm:$0xff]  ;;  %v23465_v11 = vld [vmem:[%s29984_s10 + $0x20] sm:$0xff] }
0x1059   : > { %v17875_v27 = vmax.f32 %v17843_v21, 0.0  ;;  %v17825_v32 = vmax.f32 %v29421_v45, 0.0  ;;  %v23479_v45 = vld [vmem:[%s29984_s10 + $0x90] sm:$0xff] }
0x105a   : > { %v17824_v36 = vmax.f32 %v29432_v16, 0.0  ;;  %v17874_v3 = vmax.f32 %v17842_v49, 0.0  ;;  %v20991_v35 = vpop.f32.mrb[92].mxu1  ;;  %23418 = vrot.lane.b32.xlu0 %v23417_v13, %s30014_s25  ;;  %v20932_v20 = vpop.f32.mrb[90].mxu0  ;;  %v23480_v16 = vld [vmem:[%s29984_s10 + $0xa8] sm:$0xff] }
0x105b   : > { %v29442_v55 = vmax.f32 %v17811_v25, %v17875_v27  ;;  %v17845_v58 = vadd.f32 %v23464_v18, %v20991_v35  ;;  %v29448_v53 = vadd.f32 %v20932_v20, %v29298_v1  ;;  %v17178_v62 = vpop.f32.mrb[91].mxu0  ;;  %v17413_v21 = vpop.f32.mrb[93].mxu1 }
0x105c   : > { %v23377_v31 = vpack.i.bf16 %v17825_v32, %v17824_v36  ;;  %v29456_v10 = vmax.f32 %v17810_v29, %v17874_v3  ;;  %v29459_v25 = vadd.f32 %v29296_v12, %v17178_v62  ;;  %v17844_v1 = vadd.f32 %v23465_v11, %v17413_v21  ;;  %v23466_v12 = vld [vmem:[%s29984_s10 + $0x38] sm:$0xff]  ;;  %v23467_v21 = vld [vmem:[%s29984_s10 + $0x30] sm:$0xff] }
0x105d   : > { %v17877_v13 = vmax.f32 %v17845_v58, 0.0  ;;  %v17827_v63 = vmax.f32 %v29448_v53, 0.0 }
0x105e   : > { %v17826_v49 = vmax.f32 %v29459_v25, 0.0  ;;  %v17876_v27 = vmax.f32 %v17844_v1, 0.0  ;;  %v20994_v35 = vpop.f32.mrb[94].mxu1  ;;  %23378 = vrot.lane.b32.xlu1 %v23377_v31, %s30014_s25  ;;  %v20935_v60 = vpop.f32.mrb[92].mxu0 }
0x105f   : > { %v29469_v29 = vmax.f32 %v17813_v26, %v17877_v13  ;;  %v17847_v3 = vadd.f32 %v23466_v12, %v20994_v35  ;;  %v29475_v20 = vadd.f32 %v20935_v60, %v29302_v17  ;;  %v17188_v18 = vpop.f32.mrb[93].mxu0  ;;  %v17423_v58 = vpop.f32.mrb[95].mxu1 }
0x1060   : > { %v23382_v62 = vpack.i.bf16 %v17827_v63, %v17826_v49  ;;  %v29483_v15 = vmax.f32 %v17812_v41, %v17876_v27  ;;  %v29486_v26 = vadd.f32 %v29300_v30, %v17188_v18  ;;  %v17846_v17 = vadd.f32 %v23467_v21, %v17423_v58  ;;  %v23468_v30 = vld [vmem:[%s29984_s10 + $0x48] sm:$0xff]  ;;  %v23469_v58 = vld [vmem:[%s29984_s10 + $0x40] sm:$0xff] }
0x1061   : > { %v17879_v31 = vmax.f32 %v17847_v3, 0.0  ;;  %v17829_v11 = vmax.f32 %v29475_v20, 0.0 }
0x1062   : > { %v17828_v1 = vmax.f32 %v29486_v26, 0.0  ;;  %v17878_v13 = vmax.f32 %v17846_v17, 0.0  ;;  %v20997_v35 = vpop.f32.mrb[96].mxu1  ;;  %23383 = vrot.lane.b32.xlu1 %v23382_v62, %s30014_s25  ;;  %v20938_v22 = vpop.f32.mrb[94].mxu0 }
0x1063   : > { %v29496_v41 = vmax.f32 %v17815_v8, %v17879_v31  ;;  %v17849_v27 = vadd.f32 %v23468_v30, %v20997_v35  ;;  %v29502_v60 = vadd.f32 %v20938_v22, %v29306_v0  ;;  %v17198_v12 = vpop.f32.mrb[95].mxu0  ;;  %v17433_v3 = vpop.f32.mrb[97].mxu1 }
0x1064   : > { %v23387_v18 = vpack.i.bf16 %v17829_v11, %v17828_v1  ;;  %v29510_v34 = vmax.f32 %v17814_v47, %v17878_v13  ;;  %v29513_v8 = vadd.f32 %v29304_v39, %v17198_v12  ;;  %v17848_v0 = vadd.f32 %v23469_v58, %v17433_v3  ;;  %v23470_v39 = vld [vmem:[%s29984_s10 + $0x58] sm:$0xff]  ;;  %v23471_v3 = vld [vmem:[%s29984_s10 + $0x50] sm:$0xff] }
0x1065   : > { %v17881_v62 = vmax.f32 %v17849_v27, 0.0  ;;  %v17831_v21 = vmax.f32 %v29502_v60, 0.0 }
0x1066   : > { %v17830_v17 = vmax.f32 %v29513_v8, 0.0  ;;  %v17880_v31 = vmax.f32 %v17848_v0, 0.0  ;;  %v21000_v35 = vpop.f32.mrb[98].mxu1  ;;  %23388 = vrot.lane.b32.xlu1 %v23387_v18, %s30014_s25  ;;  %v20941_v50 = vpop.f32.mrb[96].mxu0 }
0x1067   : > { %v29523_v47 = vmax.f32 %v17817_v38, %v17881_v62  ;;  %v17851_v13 = vadd.f32 %v23470_v39, %v21000_v35  ;;  %v29529_v22 = vadd.f32 %v20941_v50, %v29310_v51  ;;  %v17208_v30 = vpop.f32.mrb[97].mxu0  ;;  %v17443_v27 = vpop.f32.mrb[99].mxu1 }
0x1068   : > { %v23392_v12 = vpack.i.bf16 %v17831_v21, %v17830_v17  ;;  %v29537_v4 = vmax.f32 %v17816_v2, %v17880_v31  ;;  %v29540_v38 = vadd.f32 %v29308_v24, %v17208_v30  ;;  %v17850_v51 = vadd.f32 %v23471_v3, %v17443_v27  ;;  %v23472_v24 = vld [vmem:[%s29984_s10 + $0x68] sm:$0xff]  ;;  %v23473_v27 = vld [vmem:[%s29984_s10 + $0x60] sm:$0xff] }
0x1069   : > { %v17883_v18 = vmax.f32 %v17851_v13, 0.0  ;;  %v17833_v58 = vmax.f32 %v29529_v22, 0.0 }
0x106a   : > { %v17832_v0 = vmax.f32 %v29540_v38, 0.0  ;;  %v17882_v62 = vmax.f32 %v17850_v51, 0.0  ;;  %v21003_v35 = vpop.f32.mrb[100].mxu1  ;;  %23393 = vrot.lane.b32.xlu1 %v23392_v12, %s30014_s25  ;;  %v20944_v7 = vpop.f32.mrb[98].mxu0 }
0x106b   : > { %v29550_v2 = vmax.f32 %v17819_v14, %v17883_v18  ;;  %v17853_v31 = vadd.f32 %v23472_v24, %v21003_v35  ;;  %v29556_v50 = vadd.f32 %v20944_v7, %v29314_v59  ;;  %v17218_v39 = vpop.f32.mrb[99].mxu0  ;;  %v17453_v13 = vpop.f32.mrb[101].mxu1 }
0x106c   : > { %v23397_v30 = vpack.i.bf16 %v17833_v58, %v17832_v0  ;;  %v29564_v19 = vmax.f32 %v17818_v61, %v17882_v62  ;;  %v29567_v14 = vadd.f32 %v29312_v40, %v17218_v39  ;;  %v17852_v59 = vadd.f32 %v23473_v27, %v17453_v13  ;;  %v23474_v40 = vld [vmem:[%s29984_s10 + $0x78] sm:$0xff]  ;;  %v23475_v13 = vld [vmem:[%s29984_s10 + $0x70] sm:$0xff] }
0x106d   : > { %v17885_v12 = vmax.f32 %v17853_v31, 0.0  ;;  %v17835_v3 = vmax.f32 %v29556_v50, 0.0 }
0x106e   : > { %v17834_v51 = vmax.f32 %v29567_v14, 0.0  ;;  %v17884_v18 = vmax.f32 %v17852_v59, 0.0  ;;  %v21006_v35 = vpop.f32.mrb[102].mxu1  ;;  %23398 = vrot.lane.b32.xlu1 %v23397_v30, %s30014_s25  ;;  %v20947_v37 = vpop.f32.mrb[100].mxu0 }
0x106f   : > { %v29577_v61 = vmax.f32 %v17821_v52, %v17885_v12  ;;  %v17855_v62 = vadd.f32 %v23474_v40, %v21006_v35  ;;  %v29583_v7 = vadd.f32 %v20947_v37, %v29335_v42  ;;  %v17228_v24 = vpop.f32.mrb[101].mxu0  ;;  %v17463_v31 = vpop.f32.mrb[103].mxu1 }
0x1070   : > { %v23402_v39 = vpack.i.bf16 %v17835_v3, %v17834_v51  ;;  %v29591_v57 = vmax.f32 %v17820_v9, %v17884_v18  ;;  %v29594_v52 = vadd.f32 %v29331_v28, %v17228_v24  ;;  %v17854_v42 = vadd.f32 %v23475_v13, %v17463_v31  ;;  %v23476_v28 = vld [vmem:[%s29984_s10 + $0x88] sm:$0xff]  ;;  %v23477_v31 = vld [vmem:[%s29984_s10 + $0x80] sm:$0xff] }
0x1071   : > { %v17887_v30 = vmax.f32 %v17855_v62, 0.0  ;;  %v17837_v27 = vmax.f32 %v29583_v7, 0.0 }
0x1072   : > { %v17836_v59 = vmax.f32 %v29594_v52, 0.0  ;;  %v17886_v12 = vmax.f32 %v17854_v42, 0.0  ;;  %v21009_v35 = vpop.f32.mrb[104].mxu1  ;;  %23403 = vrot.lane.b32.xlu1 %v23402_v39, %s30014_s25  ;;  %v20950_v5 = vpop.f32.mrb[102].mxu0  ;;  %v18113_v39 = vld [vmem:[%s29989_s15 + $0x8] sm:$0xff] }
0x1073   : > { %v29604_v9 = vmax.f32 %v17823_v44, %v17887_v30  ;;  %v17857_v18 = vadd.f32 %v23476_v28, %v21009_v35  ;;  %v29610_v37 = vadd.f32 %v20950_v5, %v29372_v48  ;;  %v17238_v40 = vpop.f32.mrb[103].mxu0  ;;  %v17473_v62 = vpop.f32.mrb[105].mxu1  ;;  %18208 = vmatprep.mubr.f32.mxu0 %v18113_v39 }
0x1074   : > { %v23407_v24 = vpack.i.bf16 %v17837_v27, %v17836_v59  ;;  %v29618_v23 = vmax.f32 %v17822_v33, %v17886_v12  ;;  %v29621_v44 = vadd.f32 %v29368_v56, %v17238_v40  ;;  %v17856_v48 = vadd.f32 %v23477_v31, %v17473_v62  ;;  %v23478_v12 = vld [vmem:[%s29984_s10 + $0x98] sm:$0xff] }
0x1075   : > { %v17889_v13 = vmax.f32 %v17857_v18, 0.0  ;;  %v17839_v42 = vmax.f32 %v29610_v37, 0.0 }
0x1076   : > { %v17838_v54 = vmax.f32 %v29621_v44, 0.0  ;;  %v17888_v33 = vmax.f32 %v17856_v48, 0.0  ;;  %v21012_v30 = vpop.f32.mrb[106].mxu1  ;;  %23408 = vrot.lane.b32.xlu1 %v23407_v24, %s30014_s25 }
0x1077   : > { %v29634_v56 = vmax.f32 %v17825_v32, %v17889_v13  ;;  %v17859_v35 = vadd.f32 %v23478_v12, %v21012_v30  ;;  %v17483_v5 = vpop.f32.mrb[107].mxu1  ;;  %v23481_v13 = vld [vmem:[%s29984_s10 + $0xa0] sm:$0xff] }
0x1078   : > { %v23412_v28 = vpack.i.bf16 %v17839_v42, %v17838_v54  ;;  %v29645_v18 = vmax.f32 %v17824_v36, %v17888_v33  ;;  %v17858_v32 = vadd.f32 %v23479_v45, %v17483_v5 }
0x1079   : > { %v17891_v40 = vmax.f32 %v17859_v35, 0.0  ;;  %v23482_v35 = vld [vmem:[%s29984_s10 + $0xb8] sm:$0xff] }
0x107a   : > { %v17890_v62 = vmax.f32 %v17858_v32, 0.0  ;;  %v21015_v24 = vpop.f32.mrb[108].mxu1  ;;  %23413 = vrot.lane.b32.xlu1 %v23412_v28, %s30014_s25  ;;  %v23483_v28 = vld [vmem:[%s29984_s10 + $0xb0] sm:$0xff] }
0x107b   : > { %v29653_v31 = vmax.f32 %v17827_v63, %v17891_v40  ;;  %v17861_v36 = vadd.f32 %v23480_v16, %v21015_v24  ;;  %v17493_v48 = vpop.f32.mrb[109].mxu1  ;;  %v23485_v16 = vld [vmem:[%s29984_s10 + $0xc0] sm:$0xff] }
0x107c   : > { %v29660_v39 = vmax.f32 %v17826_v49, %v17890_v62  ;;  %v17860_v33 = vadd.f32 %v23481_v13, %v17493_v48  ;;  %v23484_v62 = vld [vmem:[%s29984_s10 + $0xc8] sm:$0xff] }
0x107d   : > { %v17893_v30 = vmax.f32 %v17861_v36, 0.0 }
0x107e   : > { %v17892_v12 = vmax.f32 %v17860_v33, 0.0  ;;  %v21018_v53 = vpop.f32.mrb[110].mxu1  ;;  %v23486_v33 = vld [vmem:[%s29984_s10 + $0xd8] sm:$0xff] }
0x107f   : > { %v29667_v63 = vmax.f32 %v17829_v11, %v17893_v30  ;;  %v17863_v5 = vadd.f32 %v23482_v35, %v21018_v53  ;;  %v17503_v25 = vpop.f32.mrb[111].mxu1 }
0x1080   : > { %v29674_v49 = vmax.f32 %v17828_v1, %v17892_v12  ;;  %v17862_v45 = vadd.f32 %v23483_v28, %v17503_v25  ;;  %v23487_v12 = vld [vmem:[%s29984_s10 + $0xd0] sm:$0xff]  ;;  %v23488_v25 = vld [vmem:[%s29984_s10 + $0xe8] sm:$0xff] }
0x1081   : > { %v17895_v32 = vmax.f32 %v17863_v5, 0.0 }
0x1082   : > { %v17894_v40 = vmax.f32 %v17862_v45, 0.0  ;;  %v21021_v20 = vpop.f32.mrb[112].mxu1  ;;  %v23489_v45 = vld [vmem:[%s29984_s10 + $0xe0] sm:$0xff] }
0x1083   : > { %v29681_v11 = vmax.f32 %v17831_v21, %v17895_v32  ;;  %v17865_v24 = vadd.f32 %v23484_v62, %v21021_v20  ;;  %v17513_v26 = vpop.f32.mrb[113].mxu1  ;;  %v23490_v62 = vld [vmem:[%s29984_s10 + $0xf8] sm:$0xff] }
0x1084   : > { %v29688_v1 = vmax.f32 %v17830_v17, %v17894_v40  ;;  %v17864_v36 = vadd.f32 %v23485_v16, %v17513_v26  ;;  %v23491_v26 = vld [vmem:[%s29984_s10 + $0xf0] sm:$0xff] }
0x1085   : > { %v17897_v48 = vmax.f32 %v17865_v24, 0.0 }
0x1086   : > { %v17896_v13 = vmax.f32 %v17864_v36, 0.0  ;;  %v21024_v60 = vpop.f32.mrb[114].mxu1 }
0x1087   : > { %v29695_v21 = vmax.f32 %v17833_v58, %v17897_v48  ;;  %v17867_v30 = vadd.f32 %v23486_v33, %v21024_v60  ;;  %v17523_v8 = vpop.f32.mrb[115].mxu1 }
0x1088   : > { %v29702_v17 = vmax.f32 %v17832_v0, %v17896_v13  ;;  %v17866_v53 = vadd.f32 %v23487_v12, %v17523_v8 }
0x1089   : > { %v17899_v35 = vmax.f32 %v17867_v30, 0.0 }
0x108a   : > { %v17898_v5 = vmax.f32 %v17866_v53, 0.0  ;;  %v21027_v22 = vpop.f32.mrb[116].mxu1 }
0x108b   : > { %v29709_v58 = vmax.f32 %v17835_v3, %v17899_v35  ;;  %v17869_v28 = vadd.f32 %v23488_v25, %v21027_v22  ;;  %v17533_v38 = vpop.f32.mrb[117].mxu1 }
0x108c   : > { %v29716_v0 = vmax.f32 %v17834_v51, %v17898_v5  ;;  %v17868_v32 = vadd.f32 %v23489_v45, %v17533_v38 }
0x108d   : > { %v17901_v40 = vmax.f32 %v17869_v28, 0.0 }
0x108e   : > { %v17900_v20 = vmax.f32 %v17868_v32, 0.0  ;;  %v21030_v50 = vpop.f32.mrb[118].mxu1 }
0x108f   : > { %v29723_v3 = vmax.f32 %v17837_v27, %v17901_v40  ;;  %v17871_v24 = vadd.f32 %v23490_v62, %v21030_v50  ;;  %v17543_v14 = vpop.f32.mrb[119].mxu1 }
0x1090   : > { %v29730_v51 = vmax.f32 %v17836_v59, %v17900_v20  ;;  %v17870_v16 = vadd.f32 %v23491_v26, %v17543_v14 }
0x1091   : > { %v17903_v36 = vmax.f32 %v17871_v24, 0.0 }
0x1092   : > { %v17902_v48 = vmax.f32 %v17870_v16, 0.0 }
0x1093   : > { %v29737_v7 = vmax.f32 %v17839_v42, %v17903_v36 }
0x1094   : > { %v29741_v27 = vmax.f32 %v17838_v54, %v17902_v48 }
0x10b0   : > { %v23344_v13 = vpop.permute.xlu0 %23343 }
0x10b1   : > { %v23346_v60 = vunpack.i.h.bf16 %v23344_v13  ;;  %v23345_v52 = vunpack.i.l.bf16 %v23344_v13 }
0x10b3   : > { %v18065_v59 = vmax.f32 %v29415_v43, %v23346_v60  ;;  %v18064_v33 = vmax.f32 %v29429_v46, %v23345_v52 }
0x10b4   : > { %v23349_v30 = vpop.permute.xlu0 %23348 }
0x10b5   : > { %v22212_v8 = vpack.c.bf16 %v18065_v59, %v18064_v33  ;;  %v23351_v12 = vunpack.i.h.bf16 %v23349_v30  ;;  %v23350_v53 = vunpack.i.l.bf16 %v23349_v30 }
0x10b7   : > { %v18067_v35 = vmax.f32 %v29442_v55, %v23351_v12  ;;  %v18066_v37 = vmax.f32 %v29456_v10, %v23350_v53 }
0x10b8   : > { %v23354_v42 = vpop.permute.xlu0 %23353 }
0x10b9   : > { %v22216_v5 = vpack.c.bf16 %v18067_v35, %v18066_v37  ;;  %v23356_v44 = vunpack.i.h.bf16 %v23354_v42  ;;  %v23355_v54 = vunpack.i.l.bf16 %v23354_v42 }
0x10bb   : > { %v18069_v22 = vmax.f32 %v29469_v29, %v23356_v44  ;;  %v18068_v25 = vmax.f32 %v29483_v15, %v23355_v54 }
0x10bc   : > { %v23359_v28 = vpop.permute.xlu0 %23358 }
0x10bd   : > { %v22220_v43 = vpack.c.bf16 %v18069_v22, %v18068_v25  ;;  %v23361_v38 = vunpack.i.h.bf16 %v23359_v28  ;;  %v23360_v46 = vunpack.i.l.bf16 %v23359_v28 }
0x10bf   : > { %v29750_v45 = vmax.f32 %v29496_v41, %v23361_v38  ;;  %v18070_v32 = vmax.f32 %v29510_v34, %v23360_v46 }
0x10c0   : > { %v23364_v55 = vpop.permute.xlu0 %23363 }
0x10c1   : > { %v22224_v10 = vpack.c.bf16 %v29750_v45, %v18070_v32  ;;  %v23366_v40 = vunpack.i.h.bf16 %v23364_v55  ;;  %v23365_v20 = vunpack.i.l.bf16 %v23364_v55 }
0x10c3   : > { %v29755_v50 = vmax.f32 %v29523_v47, %v23366_v40  ;;  %v29758_v29 = vmax.f32 %v29537_v4, %v23365_v20 }
0x10c4   : > { %v23369_v15 = vpop.permute.xlu0 %23368 }
0x10c5   : > { %v22228_v62 = vpack.c.bf16 %v29755_v50, %v29758_v29  ;;  %v23371_v24 = vunpack.i.h.bf16 %v23369_v15  ;;  %v23370_v41 = vunpack.i.l.bf16 %v23369_v15 }
0x10c7   : > { %v29763_v14 = vmax.f32 %v29550_v2, %v23371_v24  ;;  %v29766_v34 = vmax.f32 %v29564_v19, %v23370_v41 }
0x10c8   : > { %v23374_v26 = vpop.permute.xlu0 %23373 }
0x10c9   : > { %v22232_v47 = vpack.c.bf16 %v29763_v14, %v29766_v34  ;;  %v23376_v16 = vunpack.i.h.bf16 %v23374_v26  ;;  %v23375_v36 = vunpack.i.l.bf16 %v23374_v26  ;;  %v18115_v14 = vld [vmem:[%s29989_s15 + $0x18] sm:$0xff]  ;;  %v18116_v34 = vld [vmem:[%s29989_s15 + $0x20] sm:$0xff] }
0x10cb   : > { %v29771_v4 = vmax.f32 %v29577_v61, %v23376_v16  ;;  %v29774_v48 = vmax.f32 %v29591_v57, %v23375_v36 }
0x10cc   : > { %v23419_v13 = vpop.permute.xlu0 %23418 }
0x10cd   : > { %v22236_v2 = vpack.c.bf16 %v29771_v4, %v29774_v48  ;;  %v23421_v60 = vunpack.i.h.bf16 %v23419_v13  ;;  %v23420_v52 = vunpack.i.l.bf16 %v23419_v13  ;;  %v18118_v4 = vld [vmem:[%s29989_s15 + $0x30] sm:$0xff]  ;;  %v18121_v48 = vld [vmem:[%s29989_s15 + $0x48] sm:$0xff]  ;;  %v18120_v13 = vld [vmem:[%s29989_s15 + $0x40] sm:$0xff] }
0x10cf   : > { %v29779_v19 = vmax.f32 %v29604_v9, %v23421_v60  ;;  %v29782_v59 = vmax.f32 %v29618_v23, %v23420_v52  ;;  %v18122_v60 = vld [vmem:[%s29989_s15 + $0x50] sm:$0xff]  ;;  %v18125_v52 = vld [vmem:[%s29989_s15 + $0x68] sm:$0xff] }
0x10d0   : > { %v23379_v33 = vpop.permute.xlu1 %23378 }
0x10d1   : > { %v22240_v61 = vpack.c.bf16 %v29779_v19, %v29782_v59  ;;  %v23381_v30 = vunpack.i.h.bf16 %v23379_v33  ;;  %v23380_v12 = vunpack.i.l.bf16 %v23379_v33  ;;  %v18124_v19 = vld [vmem:[%s29989_s15 + $0x60] sm:$0xff]  ;;  %v18127_v59 = vld [vmem:[%s29989_s15 + $0x78] sm:$0xff]  ;;  %v18126_v33 = vld [vmem:[%s29989_s15 + $0x70] sm:$0xff] }
0x10d3   : > { %v18081_v57 = vmax.f32 %v29634_v56, %v23381_v30  ;;  %v18080_v53 = vmax.f32 %v29645_v18, %v23380_v12  ;;  %v18128_v30 = vld [vmem:[%s29989_s15 + $0x80] sm:$0xff]  ;;  %v18131_v12 = vld [vmem:[%s29989_s15 + $0x98] sm:$0xff] }
0x10d4   : > { %v23384_v35 = vpop.permute.xlu1 %23383 }
0x10d5   : > { %v23386_v37 = vunpack.i.h.bf16 %v23384_v35  ;;  %v23385_v42 = vunpack.i.l.bf16 %v23384_v35  ;;  %v22210_v44 = vpack.c.bf16 %v18081_v57, %v18080_v53  ;;  %v18130_v57 = vld [vmem:[%s29989_s15 + $0x90] sm:$0xff]  ;;  %v18133_v53 = vld [vmem:[%s29989_s15 + $0xa8] sm:$0xff]  ;;  %v18132_v35 = vld [vmem:[%s29989_s15 + $0xa0] sm:$0xff] }
0x10d7   : > { %v18083_v9 = vmax.f32 %v29653_v31, %v23386_v37  ;;  %v18082_v54 = vmax.f32 %v29660_v39, %v23385_v42  ;;  %22211 = vmatprep.subr.bf16.mxu0 %v22210_v44  ;;  %v18135_v37 = vld [vmem:[%s29989_s15 + $0xb8] sm:$0xff]  ;;  %v18134_v42 = vld [vmem:[%s29989_s15 + $0xb0] sm:$0xff]  ;;  %v18137_v44 = vld [vmem:[%s29989_s15 + $0xc8] sm:$0xff] }
0x10d8   : > { %22213 = vmatpush3.bf16.msra.mxu0 %v22212_v8  ;;  %v23389_v23 = vpop.permute.xlu1 %23388 }
0x10d9   : > { %v23391_v22 = vunpack.i.h.bf16 %v23389_v23  ;;  %v23390_v25 = vunpack.i.l.bf16 %v23389_v23  ;;  %v22214_v28 = vpack.c.bf16 %v18083_v9, %v18082_v54  ;;  %v18136_v9 = vld [vmem:[%s29989_s15 + $0xc0] sm:$0xff]  ;;  %v18139_v54 = vld [vmem:[%s29989_s15 + $0xd8] sm:$0xff]  ;;  %v18138_v23 = vld [vmem:[%s29989_s15 + $0xd0] sm:$0xff] }
0x10db   : > { %v18085_v38 = vmax.f32 %v29667_v63, %v23391_v22  ;;  %v18084_v56 = vmax.f32 %v29674_v49, %v23390_v25  ;;  %22215 = vmatprep.subr.bf16.mxu0 %v22214_v28  ;;  %v18141_v22 = vld [vmem:[%s29989_s15 + $0xe8] sm:$0xff]  ;;  %v18140_v25 = vld [vmem:[%s29989_s15 + $0xe0] sm:$0xff]  ;;  %v18143_v28 = vld [vmem:[%s29989_s15 + $0xf8] sm:$0xff] }
0x10dc   : > { %22217 = vmatpush3.bf16.msra.mxu0 %v22216_v5  ;;  %v23394_v18 = vpop.permute.xlu1 %23393 }
0x10dd   : > { %v23396_v46 = vunpack.i.h.bf16 %v23394_v18  ;;  %v23395_v45 = vunpack.i.l.bf16 %v23394_v18  ;;  %v22218_v32 = vpack.c.bf16 %v18085_v38, %v18084_v56  ;;  %v18142_v38 = vld [vmem:[%s29989_s15 + $0xf0] sm:$0xff]  ;;  %v23525_v56 = vmov 0.0|0.0  }
0x10de   : > { %22242 = vmatprep.subr.bf16.mxu1 %v23525_v56 }
0x10df   : > { %v18087_v31 = vmax.f32 %v29681_v11, %v23396_v46  ;;  %v18086_v39 = vmax.f32 %v29688_v1, %v23395_v45  ;;  %22219 = vmatprep.subr.bf16.mxu0 %v22218_v32  ;;  %v18096_v32 = vld [vmem:[%s29990_s16] sm:$0xff] }
0x10e0   : > { %22221 = vmatpush3.bf16.msra.mxu0 %v22220_v43  ;;  %v23399_v8 = vpop.permute.xlu1 %23398 }
0x10e1   : > { %v23401_v55 = vunpack.i.h.bf16 %v23399_v8  ;;  %v23400_v40 = vunpack.i.l.bf16 %v23399_v8  ;;  %v22222_v20 = vpack.c.bf16 %v18087_v31, %v18086_v39  ;;  %v18097_v39 = vld [vmem:[%s29990_s16 + $0x8] sm:$0xff] }
0x10e3   : > { %v18089_v63 = vmax.f32 %v29695_v21, %v23401_v55  ;;  %v18088_v49 = vmax.f32 %v29702_v17, %v23400_v40  ;;  %22223 = vmatprep.subr.bf16.mxu0 %v22222_v20 }
0x10e4   : > { %22225 = vmatpush3.bf16.msra.mxu0 %v22224_v10  ;;  %v23404_v5 = vpop.permute.xlu1 %23403 }
0x10e5   : > { %v23406_v50 = vunpack.i.h.bf16 %v23404_v5  ;;  %v23405_v29 = vunpack.i.l.bf16 %v23404_v5  ;;  %v22226_v15 = vpack.c.bf16 %v18089_v63, %v18088_v49 }
0x10e7   : > { %v18091_v11 = vmax.f32 %v29709_v58, %v23406_v50  ;;  %v18090_v1 = vmax.f32 %v29716_v0, %v23405_v29  ;;  %22227 = vmatprep.subr.bf16.mxu0 %v22226_v15  ;;  %v18098_v29 = vld [vmem:[%s29990_s16 + $0x10] sm:$0xff] }
0x10e8   : > { %22229 = vmatpush3.bf16.msra.mxu0 %v22228_v62  ;;  %v23409_v43 = vpop.permute.xlu1 %23408 }
0x10e9   : > { %v23411_v24 = vunpack.i.h.bf16 %v23409_v43  ;;  %v23410_v41 = vunpack.i.l.bf16 %v23409_v43  ;;  %v22230_v26 = vpack.c.bf16 %v18091_v11, %v18090_v1  ;;  %v18099_v1 = vld [vmem:[%s29990_s16 + $0x18] sm:$0xff] }
0x10eb   : > { %v18093_v21 = vmax.f32 %v29723_v3, %v23411_v24  ;;  %v18092_v17 = vmax.f32 %v29730_v51, %v23410_v41  ;;  %22231 = vmatprep.subr.bf16.mxu0 %v22230_v26  ;;  %v18112_v51 = vld [vmem:[%s29989_s15] sm:$0xff] }
0x10ec   : > { %22233 = vmatpush3.bf16.msra.mxu0 %v22232_v47  ;;  %v23414_v10 = vpop.permute.xlu1 %23413  ;;  %v18119_v47 = vld [vmem:[%s29989_s15 + $0x38] sm:$0xff] }
0x10ed   : > { %v23416_v16 = vunpack.i.h.bf16 %v23414_v10  ;;  %v23415_v58 = vunpack.i.l.bf16 %v23414_v10  ;;  %v22234_v36 = vpack.c.bf16 %v18093_v21, %v18092_v17 }
0x10ef   : > { %v18095_v0 = vmax.f32 %v29737_v7, %v23416_v16  ;;  %v18094_v62 = vmax.f32 %v29741_v27, %v23415_v58  ;;  %22235 = vmatprep.subr.bf16.mxu0 %v22234_v36  ;;  %v18114_v7 = vld [vmem:[%s29989_s15 + $0x10] sm:$0xff]  ;;  %v18117_v27 = vld [vmem:[%s29989_s15 + $0x28] sm:$0xff]  ;;  %v18100_v36 = vld [vmem:[%s29990_s16 + $0x20] sm:$0xff] }
0x10f0   : > { %22237 = vmatpush3.bf16.msra.mxu0 %v22236_v2  ;;  %v18123_v2 = vld [vmem:[%s29989_s15 + $0x58] sm:$0xff] }
0x10f1   : > { %v22238_v3 = vpack.c.bf16 %v18095_v0, %v18094_v62 }
0x10f3   : > { %22239 = vmatprep.subr.bf16.mxu0 %v22238_v3  ;;  %v18101_v3 = vld [vmem:[%s29990_s16 + $0x28] sm:$0xff] }
0x10f4   : > { %22241 = vmatpush3.bf16.msra.mxu0 %v22240_v61  ;;  %v18129_v61 = vld [vmem:[%s29989_s15 + $0x88] sm:$0xff] }
0x10f7   : > { %18209 = vmatmul.mubr.f32.vlgmr.msra.gmra.mrb[104].mxu0 %v18112_v51 }
0x10f8   : > { %18213 = vmatprep.mubr.f32.mxu0 %v18115_v14 }
0x10fb   : > { %18214 = vmatmul.mubr.f32.gmra.mrb[106].mxu0 %v18114_v7 }
0x10fc   : > { %18218 = vmatprep.mubr.f32.mxu0 %v18117_v27 }
0x10ff   : > { %18219 = vmatmul.mubr.f32.gmra.mrb[108].mxu0 %v18116_v34 }
0x1100   : > { %18223 = vmatprep.mubr.f32.mxu0 %v18119_v47 }
0x1103   : > { %18224 = vmatmul.mubr.f32.gmra.mrb[110].mxu0 %v18118_v4 }
0x1104   : > { %18228 = vmatprep.mubr.f32.mxu0 %v18121_v48 }
0x1107   : > { %18229 = vmatmul.mubr.f32.gmra.mrb[112].mxu0 %v18120_v13 }
0x1108   : > { %18233 = vmatprep.mubr.f32.mxu0 %v18123_v2  ;;  %v18102_v2 = vld [vmem:[%s29990_s16 + $0x30] sm:$0xff] }
0x110b   : > { %18234 = vmatmul.mubr.f32.gmra.mrb[114].mxu0 %v18122_v60 }
0x110c   : > { %18238 = vmatprep.mubr.f32.mxu0 %v18125_v52 }
0x110f   : > { %18239 = vmatmul.mubr.f32.gmra.mrb[116].mxu0 %v18124_v19  ;;  %v18103_v19 = vld [vmem:[%s29990_s16 + $0x38] sm:$0xff] }
0x1110   : > { %18243 = vmatprep.mubr.f32.mxu0 %v18127_v59 }
0x1113   : > { %18244 = vmatmul.mubr.f32.gmra.mrb[118].mxu0 %v18126_v33 }
0x1114   : > { %18248 = vmatprep.mubr.f32.mxu0 %v18129_v61 }
0x1117   : > { %18249 = vmatmul.mubr.f32.gmra.mrb[120].mxu0 %v18128_v30 }
0x1118   : > { %18253 = vmatprep.mubr.f32.mxu0 %v18131_v12 }
0x111b   : > { %18254 = vmatmul.mubr.f32.gmra.mrb[122].mxu0 %v18130_v57 }
0x111c   : > { %18258 = vmatprep.mubr.f32.mxu0 %v18133_v53 }
0x111f   : > { %18259 = vmatmul.mubr.f32.gmra.mrb[124].mxu0 %v18132_v35 }
0x1120   : > { %18263 = vmatprep.mubr.f32.mxu0 %v18135_v37 }
0x1123   : > { %18264 = vmatmul.mubr.f32.gmra.mrb[126].mxu0 %v18134_v42  ;;  %v18104_v42 = vld [vmem:[%s29990_s16 + $0x40] sm:$0xff] }
0x1124   : > { %18268 = vmatprep.mubr.f32.mxu0 %v18137_v44 }
0x1127   : > { %18269 = vmatmul.mubr.f32.gmra.mrb[128].mxu0 %v18136_v9 }
0x1128   : > { %18273 = vmatprep.mubr.f32.mxu0 %v18139_v54  ;;  %v18105_v54 = vld [vmem:[%s29990_s16 + $0x48] sm:$0xff] }
0x112b   : > { %18274 = vmatmul.mubr.f32.gmra.mrb[130].mxu0 %v18138_v23 }
0x112c   : > { %18278 = vmatprep.mubr.f32.mxu0 %v18141_v22 }
0x112f   : > { %18279 = vmatmul.mubr.f32.gmra.mrb[132].mxu0 %v18140_v25 }
0x1130   : > { %18283 = vmatprep.mubr.f32.mxu0 %v18143_v28 }
0x1133   : > { %18284 = vmatmul.mubr.f32.gmra.mrb[134].mxu0 %v18142_v38 }
0x11ca   : > { %v19959_v18 = vpop.f32.mrb[104].mxu0 }
0x11cb   : > { %v19960_v46 = vpop.f32.mrb[105].mxu0 }
0x11cc   : > { %v19961_v45 = vadd.f32 %v19960_v46, %v19959_v18 }
0x11ce   : > { %v19962_v31 = vpop.f32.mrb[106].mxu0  ;;  %v18289_v55 = vadd.f32 %v19961_v45, %v18096_v32 }
0x11cf   : > { %v19963_v8 = vpop.f32.mrb[107].mxu0 }
0x11d0   : > { %v19964_v40 = vadd.f32 %v19963_v8, %v19962_v31  ;;  %v18305_v5 = vmax.f32 %v18289_v55, 0.0  ;;  %v18106_v31 = vld [vmem:[%s29990_s16 + $0x50] sm:$0xff]  ;;  %v18107_v55 = vld [vmem:[%s29990_s16 + $0x58] sm:$0xff] }
0x11d2   : > { %v18290_v20 = vadd.f32 %v19964_v40, %v18097_v39  ;;  %v19965_v63 = vpop.f32.mrb[108].mxu0 }
0x11d3   : > { %v19966_v49 = vpop.f32.mrb[109].mxu0 }
0x11d4   : > { %v18306_v6 = vmax.f32 %v18290_v20, 0.0  ;;  %v19967_v50 = vadd.f32 %v19966_v49, %v19965_v63 }
0x11d6   : > { %v22243_v15 = vpack.c.bf16 %v18306_v6, %v18305_v5  ;;  %v19968_v11 = vpop.f32.mrb[110].mxu0  ;;  %v18291_v24 = vadd.f32 %v19967_v50, %v18098_v29 }
0x11d7   : > { %v19969_v43 = vpop.f32.mrb[111].mxu0 }
0x11d8   : > { %v19970_v41 = vadd.f32 %v19969_v43, %v19968_v11  ;;  %22244 = vmatpush3.bf16.msra.mxu1 %v22243_v15  ;;  %v18307_v10 = vmax.f32 %v18291_v24, 0.0  ;;  %v18108_v11 = vld [vmem:[%s29990_s16 + $0x60] sm:$0xff]  ;;  %v18109_v24 = vld [vmem:[%s29990_s16 + $0x68] sm:$0xff] }
0x11d9   : > { %22245 = vmatprep.subr.bf16.mxu1 %v23525_v56 }
0x11da   : > { %v18292_v26 = vadd.f32 %v19970_v41, %v18099_v1  ;;  %v19971_v21 = vpop.f32.mrb[112].mxu0 }
0x11db   : > { %v19972_v17 = vpop.f32.mrb[113].mxu0 }
0x11dc   : > { %v18308_v16 = vmax.f32 %v18292_v26, 0.0  ;;  %v19973_v58 = vadd.f32 %v19972_v17, %v19971_v21 }
0x11de   : > { %v22246_v0 = vpack.c.bf16 %v18308_v16, %v18307_v10  ;;  %v19974_v62 = vpop.f32.mrb[114].mxu0  ;;  %v18293_v14 = vadd.f32 %v19973_v58, %v18100_v36 }
0x11df   : > { %v19975_v51 = vpop.f32.mrb[115].mxu0 }
0x11e0   : > { %v19976_v7 = vadd.f32 %v19975_v51, %v19974_v62  ;;  %22247 = vmatpush3.bf16.msra.mxu1 %v22246_v0  ;;  %v18309_v4 = vmax.f32 %v18293_v14, 0.0  ;;  %v18110_v62 = vld [vmem:[%s29990_s16 + $0x70] sm:$0xff]  ;;  %v18111_v14 = vld [vmem:[%s29990_s16 + $0x78] sm:$0xff] }
0x11e1   : > { %22248 = vmatprep.subr.bf16.mxu1 %v23525_v56 }
0x11e2   : > { %v18294_v27 = vadd.f32 %v19976_v7, %v18101_v3  ;;  %v19977_v34 = vpop.f32.mrb[116].mxu0 }
0x11e3   : > { %v19978_v47 = vpop.f32.mrb[117].mxu0 }
0x11e4   : > { %v18310_v48 = vmax.f32 %v18294_v27, 0.0  ;;  %v19979_v13 = vadd.f32 %v19978_v47, %v19977_v34 }
0x11e6   : > { %v22249_v60 = vpack.c.bf16 %v18310_v48, %v18309_v4  ;;  %v19980_v52 = vpop.f32.mrb[118].mxu0  ;;  %v18295_v33 = vadd.f32 %v19979_v13, %v18102_v2  ;;  %v18321_v2 = vld [vmem:[%s29991_s17] sm:$0x7f] }
0x11e7   : > { %v19981_v59 = vpop.f32.mrb[119].mxu0 }
0x11e8   : > { %v19982_v61 = vadd.f32 %v19981_v59, %v19980_v52  ;;  %22250 = vmatpush3.bf16.msra.mxu1 %v22249_v60  ;;  %v18311_v53 = vmax.f32 %v18295_v33, 0.0  ;;  %v18322_v60 = vld [vmem:[%s29992_s18] sm:$0x7f] }
0x11e9   : > { %22251 = vmatprep.subr.bf16.mxu1 %v23525_v56 }
0x11ea   : > { %v18296_v30 = vadd.f32 %v19982_v61, %v18103_v19  ;;  %v19983_v12 = vpop.f32.mrb[120].mxu0 }
0x11eb   : > { %v19984_v57 = vpop.f32.mrb[121].mxu0 }
0x11ec   : > { %v18312_v35 = vmax.f32 %v18296_v30, 0.0  ;;  %v19985_v37 = vadd.f32 %v19984_v57, %v19983_v12 }
0x11ee   : > { %v22252_v44 = vpack.c.bf16 %v18312_v35, %v18311_v53  ;;  %v19986_v9 = vpop.f32.mrb[122].mxu0  ;;  %v18297_v22 = vadd.f32 %v19985_v37, %v18104_v42 }
0x11ef   : > { %v19987_v23 = vpop.f32.mrb[123].mxu0 }
0x11f0   : > { %v19988_v25 = vadd.f32 %v19987_v23, %v19986_v9  ;;  %22253 = vmatpush3.bf16.msra.mxu1 %v22252_v44  ;;  %v18313_v46 = vmax.f32 %v18297_v22, 0.0 }
0x11f1   : > { %22254 = vmatprep.subr.bf16.mxu1 %v23525_v56 }
0x11f2   : > { %v18298_v28 = vadd.f32 %v19988_v25, %v18105_v54  ;;  %v19989_v38 = vpop.f32.mrb[124].mxu0 }
0x11f3   : > { %v19990_v18 = vpop.f32.mrb[125].mxu0 }
0x11f4   : > { %v18314_v45 = vmax.f32 %v18298_v28, 0.0  ;;  %v19991_v32 = vadd.f32 %v19990_v18, %v19989_v38 }
0x11f6   : > { %v22255_v39 = vpack.c.bf16 %v18314_v45, %v18313_v46  ;;  %v19992_v8 = vpop.f32.mrb[126].mxu0  ;;  %v18299_v20 = vadd.f32 %v19991_v32, %v18106_v31 }
0x11f7   : > { %v19993_v40 = vpop.f32.mrb[127].mxu0 }
0x11f8   : > { %v19994_v63 = vadd.f32 %v19993_v40, %v19992_v8  ;;  %22256 = vmatpush3.bf16.msra.mxu1 %v22255_v39  ;;  %v18315_v50 = vmax.f32 %v18299_v20, 0.0 }
0x11f9   : > { %22257 = vmatprep.subr.bf16.mxu1 %v23525_v56 }
0x11fa   : > { %v18300_v49 = vadd.f32 %v19994_v63, %v18107_v55  ;;  %v19995_v5 = vpop.f32.mrb[128].mxu0 }
0x11fb   : > { %v19996_v6 = vpop.f32.mrb[129].mxu0 }
0x11fc   : > { %v18316_v29 = vmax.f32 %v18300_v49, 0.0  ;;  %v19997_v15 = vadd.f32 %v19996_v6, %v19995_v5 }
0x11fe   : > { %v22258_v1 = vpack.c.bf16 %v18316_v29, %v18315_v50  ;;  %v19998_v43 = vpop.f32.mrb[130].mxu0  ;;  %v18301_v26 = vadd.f32 %v19997_v15, %v18108_v11 }
0x11ff   : > { %v19999_v41 = vpop.f32.mrb[131].mxu0 }
0x1200   : > { %v20000_v21 = vadd.f32 %v19999_v41, %v19998_v43  ;;  %22259 = vmatpush3.bf16.msra.mxu1 %v22258_v1  ;;  %v18317_v58 = vmax.f32 %v18301_v26, 0.0 }
0x1201   : > { %22260 = vmatprep.subr.bf16.mxu1 %v23525_v56 }
0x1202   : > { %v18302_v17 = vadd.f32 %v20000_v21, %v18109_v24  ;;  %v20001_v10 = vpop.f32.mrb[132].mxu0 }
0x1203   : > { %v20002_v16 = vpop.f32.mrb[133].mxu0 }
0x1204   : > { %v18318_v36 = vmax.f32 %v18302_v17, 0.0  ;;  %v20003_v0 = vadd.f32 %v20002_v16, %v20001_v10 }
0x1206   : > { %v22261_v3 = vpack.c.bf16 %v18318_v36, %v18317_v58  ;;  %v20004_v51 = vpop.f32.mrb[134].mxu0  ;;  %v18303_v27 = vadd.f32 %v20003_v0, %v18110_v62 }
0x1207   : > { %v20005_v7 = vpop.f32.mrb[135].mxu0 }
0x1208   : > { %v20006_v34 = vadd.f32 %v20005_v7, %v20004_v51  ;;  %22262 = vmatpush3.bf16.msra.mxu1 %v22261_v3  ;;  %v18319_v4 = vmax.f32 %v18303_v27, 0.0 }
0x1209   : > { %22263 = vmatprep.subr.bf16.mxu1 %v23525_v56 }
0x120a   : > { %v18304_v47 = vadd.f32 %v20006_v34, %v18111_v14 }
0x120c   : > { %v18320_v48 = vmax.f32 %v18304_v47, 0.0 }
0x120e   : > { %v22264_v13 = vpack.c.bf16 %v18320_v48, %v18319_v4 }
0x1210   : > { %22265 = vmatpush3.bf16.msra.mxu1 %v22264_v13 }
0x1213   : > { %21064 = vmatmul.mubr.f32.vlgmr.msra.gmra.mrb[120].mxu1 %v18321_v2 }
0x12e6   : > { %v18389_v52 = vpop.f32.mrb[120].mxu1 }
0x12e7   : > { %v18390_v19 = vadd.f32 %v18389_v52, %v18322_v60  ;;  %v21065_v59 = vpop.f32.mrb[121].mxu1 }
0x12e9   : > { %v18394_v56 = vsel %vm18393_vm12, %v18390_v19, -inf }
0x12ea   : > { %v18395_v33 = vrot.slane %v18394_v56, 4 }
0x12ec   : > { %v18396_v61 = vmax.f32 %v18394_v56, %v18395_v33 }
0x12ee   : > { %v18397_v30 = vrot.slane %v18396_v61, 2 }
0x12f0   : > { %v18398_v12 = vmax.f32 %v18396_v61, %v18397_v30 }
0x12f2   : > { %v18399_v57 = vrot.slane %v18398_v12, 1 }
0x12f4   : > { %v18400_v53 = vmax.f32 %v18398_v12, %v18399_v57 }
0x12f6   : > { %v18401_v35 = vsub.f32 %v18390_v19, %v18400_v53 }
0x12f8   : > { %v18402_v37 = vmul.f32 1.442695, %v18401_v35 }
0x12fa   : > { %23456 = vpow2.f32 %v18402_v37 }
0x1304   : > { %v23457_v42 = vpop.eup %23456 }
0x1305   : > { %v18404_v44 = vsel %vm18393_vm12, %v23457_v42, 0.0 }
0x1306   : > { %v18405_v9 = vrot.slane %v18404_v44, 4 }
0x1308   : > { %v18406_v54 = vadd.f32 %v18405_v9, %v18404_v44 }
0x130a   : > { %v18407_v23 = vrot.slane %v18406_v54, 2 }
0x130c   : > { %v18408_v22 = vadd.f32 %v18407_v23, %v18406_v54 }
0x130e   : > { %v18409_v25 = vrot.slane %v18408_v22, 1 }
0x1310   : > { %v18410_v28 = vadd.f32 %v18409_v25, %v18408_v22 }
0x1312   : > { %23458 = vrcp.f32 %v18410_v28 }
0x131c   : > { %v23459_v38 = vpop.eup %23458 }
0x131d   : > { %v18412_v18 = vmul.f32 %v23459_v38, %v23457_v42 }
0x131f   : > { %18413 = vst.msk [vmem:[%s600_s29] sm:$0x7f] %vm18393_vm12, %v18412_v18 }
0x1320 PF: > { %s29_s0 = sadd.s32 1, %s23498_s0  }
0x1321   : > { %p26_p4 = scmp.ge.s32.totalorder %s29_s0, 4  }
0x1323   :  { %28 = sbr.rel (!%p26_p4) target bundleno = 5 (0x5), region = 148 }

</bundles_post_ra>
